<compile_context>
chip_gen: v7x
topology: tpu7x:2x2x1
jax: 0.10.0
libtpu: 0.0.40
codegen_flags: <defaults>
</compile_context>

<pallas_src>
import functools

import numpy as np
import jax
import jax.numpy as jnp
from jax import lax
from jax.experimental import pallas as pl
from jax.experimental.pallas import tpu as pltpu


# ----------------------- constant matrices (numpy, trace time) -----------------------

def _adaptive_pool_matrix(in_size, out_size):
    # Exact PyTorch AdaptiveAvgPool window math.
    A = np.zeros((out_size, in_size), np.float32)
    for i in range(out_size):
        s = (i * in_size) // out_size
        e = -(-((i + 1) * in_size) // out_size)  # ceil
        A[i, s:e] = 1.0 / (e - s)
    return A


def _adaptive_pool2d_matrix(h, w, oh, ow):
    """(h*w, oh*ow): out[c, o*ow+p] = sum_{i,j} X[c, i*w+j] * Ah[o,i] * Aw[p,j]."""
    Ah = _adaptive_pool_matrix(h, oh)   # (oh, h)
    Aw = _adaptive_pool_matrix(w, ow)   # (ow, w)
    return np.einsum('oh,pw->hwop', Ah, Aw).reshape(h * w, oh * ow).astype(np.float32)


def _maxpool_select_concat(h, w):
    """(h*w, 4*(h//2)*(w//2)) 0/1 matrix; column d*n_out+q selects window elem d of out q."""
    ho, wo = h // 2, w // 2
    n_out = ho * wo
    S = np.zeros((h * w, 4 * n_out), np.float32)
    for d in range(4):
        di, dj = d // 2, d % 2
        for qi in range(ho):
            for qj in range(wo):
                S[(2 * qi + di) * w + (2 * qj + dj), d * n_out + qi * wo + qj] = 1.0
    return S


def _shift_mask(h, w):
    """(9, 1, h*w) validity masks of the 3x3 / padding=1 shifted windows."""
    M = np.zeros((9, 1, h * w), np.float32)
    for kh in range(3):
        for kw in range(3):
            tap = kh * 3 + kw
            dh, dw = kh - 1, kw - 1
            for i in range(h):
                for j in range(w):
                    if 0 <= i + dh < h and 0 <= j + dw < w:
                        M[tap, 0, i * w + j] = 1.0
    return M


def _lane_roll(x, delta, n):
    """out[:, s] = x[:, (s + delta) % n] via two static lane slices + concat (XLU)."""
    d = delta % n
    if d == 0:
        return x
    return jnp.concatenate([x[:, d:], x[:, :d]], axis=1)


# --------------------------------- Pallas kernels -------------------------------------

def cnn_fused_kernel(dims, x_ref, w1_ref, b1_ref, m1_ref, s1_ref,
                     w2_ref, b2_ref, m2_ref, s2_ref, mavg_ref, o_ref):
    """conv1->ReLU->pool1->conv2->ReLU->pool2->AdaptiveAvgPool for one batch element.

    x_ref  : (1, 1, H*W)    raw input, flat spatial in lanes
    w1_ref : (C1, 9)        b1_ref: (C1, 1)       m1_ref: (9, 1, H*W) tap masks
    s1_ref : (H*W, 4*n1)    pool1 selection       (n1 = (H/2)*(W/2))
    w2_ref : (C2, 9*C1)     b2_ref: (C2, 1)       m2_ref: (9, 1, n1) tap masks
    s2_ref : (n1, 4*n2)     pool2 selection       (n2 = (H/4)*(W/4))
    mavg_ref: (n2, OH*OW)   adaptive avg-pool matrix
    o_ref  : (1, C2, OH*OW) rows = channels, cols = flat (OH,OW) spatial (NCHW order)
    """
    H, W, H1, W1 = dims
    n0 = H * W
    n1 = H1 * W1
    n2 = (H1 // 2) * (W1 // 2)

    # conv1 (1->C1) + ReLU : im2col via masked lane rolls, accumulated as 9 broadcast
    # outer products on the VPU (single-channel input => no MXU needed here).
    x = x_ref[0]                                                     # (1, n0)
    y1 = None
    for kh in range(3):
        for kw in range(3):
            tap = kh * 3 + kw
            win = _lane_roll(x, (kh - 1) * W + (kw - 1), n0) * m1_ref[tap]   # (1, n0)
            contrib = w1_ref[:, tap:tap + 1] * win                           # (C1, n0)
            y1 = contrib if y1 is None else y1 + contrib
    y1 = jnp.maximum(y1 + b1_ref[...], 0.0)                          # (C1, n0)

    # maxpool1: ONE matmul against the lane-concatenated selection matrix, then a
    # 3-deep max tree over the four window copies (VPU/XLU, free next to the MXU chain).
    p = jnp.dot(y1, s1_ref[...], preferred_element_type=jnp.float32)         # (C1, 4*n1)
    pooled1 = jnp.maximum(jnp.maximum(p[:, 0:n1], p[:, n1:2 * n1]),
                          jnp.maximum(p[:, 2 * n1:3 * n1], p[:, 3 * n1:4 * n1]))

    # conv2 (C1->C2) + ReLU : in-kernel im2col (masked rolls, sublane concat -> (9*C1, n1)),
    # then ONE (C2, 9*C1)@(9*C1, n1) matmul.
    cols2 = []
    for kh in range(3):
        for kw in range(3):
            tap = kh * 3 + kw
            cols2.append(_lane_roll(pooled1, (kh - 1) * W1 + (kw - 1), n1) * m2_ref[tap])
    col2 = jnp.concatenate(cols2, axis=0)                            # (9*C1, n1)
    y2 = jnp.dot(w2_ref[...], col2, preferred_element_type=jnp.float32) + b2_ref[...]
    y2 = jnp.maximum(y2, 0.0)                                        # (C2, n1)

    # maxpool2: same single-matmul trick.
    q = jnp.dot(y2, s2_ref[...], preferred_element_type=jnp.float32)         # (C2, 4*n2)
    pooled2 = jnp.maximum(jnp.maximum(q[:, 0:n2], q[:, n2:2 * n2]),
                          jnp.maximum(q[:, 2 * n2:3 * n2], q[:, 3 * n2:4 * n2]))

    # adaptive avg pool -> lane-dense (C2, OH*OW) store in flat NCHW order.
    o_ref[0] = jnp.dot(pooled2, mavg_ref[...], preferred_element_type=jnp.float32)


def lstm_fc_kernel(dims, seq_ref, wx_ref, wrec_ref, badd_ref, wfc_ref, bfc_ref,
                   out_ref, gx_ref):
    """Fused 2-layer LSTM (skewed wavefront) + final Linear; emits last-step logits only.

    seq_ref : (T*Bp, Din)  time-major rows (row = t*Bp + b, batch zero-padded to Bp=8k)
    wx_ref  : (Din, 8H)    layer-0 x-projection in the layer-0 gate slots, zeros elsewhere
    wrec_ref: (2H, 8H)     fused recurrent weight: rows [h0; h1], interleaved gate slots
    badd_ref: (1, 8H)      [b0_i b1_i b0_f b1_f b0_g b1_g b0_o b1_o]
    wfc_ref : (H, C)       bfc_ref: (1, C)
    out_ref : (B, C)
    gx_ref  : (T*Bp, 8H)   VMEM scratch: hoisted static gate contributions, time-major.
    Gate slot order: [i0 i1 f0 f1 g0 g1 o0 o1], each H lanes wide (PyTorch i,f,g,o).
    """
    T, Bp, H, B = dims

    # Hoisted static part of BOTH layers' gates: ONE well-shaped matmul.  Layer-0 slots
    # get x_t @ Wih0 + b0, layer-1 slots get just b1 (their weight columns are zero).
    gx_ref[...] = (jnp.dot(seq_ref[...], wx_ref[...],
                           preferred_element_type=jnp.float32) + badd_ref[...])

    # ---- prologue: layer 0 at t=0 (h0=c0=0 => no recurrent matmul needed) ----
    g0 = gx_ref[pl.ds(0, Bp), :]
    c0 = jax.nn.sigmoid(g0[:, 0:H]) * jnp.tanh(g0[:, 4 * H:5 * H])
    h0 = jax.nn.sigmoid(g0[:, 6 * H:7 * H]) * jnp.tanh(c0)
    z = jnp.zeros_like(h0)
    hcat = jnp.concatenate([h0, z], axis=1)          # [h0_t, h1_{t-1}]
    ccat = jnp.concatenate([c0, z], axis=1)          # [c0_t, c1_{t-1}]

    # ---- skewed wavefront: iteration k does layer-0 @ t=k AND layer-1 @ t=k-1 with a
    #      SINGLE (Bp, 2H) @ (2H, 8H) matmul; activations on full blocks (few EUP pushes).
    def step(k, carry):
        hcat, ccat = carry
        row = pl.multiple_of(k * Bp, 8)
        gates = gx_ref[pl.ds(row, Bp), :] + jnp.dot(
            hcat, wrec_ref[...], preferred_element_type=jnp.float32)   # (Bp, 8H)
        sg = jax.nn.sigmoid(gates)
        gg = jnp.tanh(gates[:, 4 * H:6 * H])                           # [g0 | g1]
        ccat = sg[:, 2 * H:4 * H] * ccat + sg[:, 0:2 * H] * gg         # [c0 | c1]
        hcat = sg[:, 6 * H:8 * H] * jnp.tanh(ccat)                     # [h0 | h1]
        return hcat, ccat

    hcat, ccat = lax.fori_loop(1, T, step, (hcat, ccat), unroll=True)

    # ---- epilogue: layer 1 at t = T-1 ----
    ge = jnp.dot(hcat, wrec_ref[...], preferred_element_type=jnp.float32) + badd_ref[...]
    c1 = (jax.nn.sigmoid(ge[:, 3 * H:4 * H]) * ccat[:, H:2 * H]
          + jax.nn.sigmoid(ge[:, H:2 * H]) * jnp.tanh(ge[:, 5 * H:6 * H]))
    h1 = jax.nn.sigmoid(ge[:, 7 * H:8 * H]) * jnp.tanh(c1)

    logits = jnp.dot(h1, wfc_ref[...], preferred_element_type=jnp.float32) + bfc_ref[...]
    out_ref[...] = logits[:B]


# ----------------------------------- wrappers ------------------------------------------

def cnn_forward(x, conv1_w, conv1_b, conv2_w, conv2_b, out_hw=(16, 50)):
    """Full CNN head in one pallas_call, grid=(B,)."""
    Bsz, Cin, H, W = x.shape
    assert Cin == 1
    C1 = conv1_w.shape[0]                 # 16
    C2 = conv2_w.shape[0]                 # 32
    H1, W1 = H // 2, W // 2               # after pool1
    H2, W2 = H1 // 2, W1 // 2             # after pool2
    OH, OW = out_hw

    x3 = x.reshape(Bsz, 1, H * W)                                     # free bitcast
    w1 = conv1_w.reshape(C1, 9)
    b1 = conv1_b.reshape(C1, 1)
    w2r = jnp.transpose(conv2_w, (0, 2, 3, 1)).reshape(C2, 9 * C1)    # [o, tap*C1 + c]
    b2 = conv2_b.reshape(C2, 1)

    m1 = jnp.asarray(_shift_mask(H, W))                               # (9, 1, H*W)
    m2 = jnp.asarray(_shift_mask(H1, W1))                             # (9, 1, H1*W1)
    s1c = jnp.asarray(_maxpool_select_concat(H, W))                   # (H*W, 4*H1*W1)
    s2c = jnp.asarray(_maxpool_select_concat(H1, W1))                 # (H1*W1, 4*H2*W2)
    mavg = jnp.asarray(_adaptive_pool2d_matrix(H2, W2, OH, OW))       # (H2*W2, OH*OW)

    kernel = functools.partial(cnn_fused_kernel, (H, W, H1, W1))
    return pl.pallas_call(
        kernel,
        grid=(Bsz,),
        in_specs=[
            pl.BlockSpec((1, 1, H * W), lambda b: (b, 0, 0)),
            pl.BlockSpec((C1, 9), lambda b: (0, 0)),
            pl.BlockSpec((C1, 1), lambda b: (0, 0)),
            pl.BlockSpec((9, 1, H * W), lambda b: (0, 0, 0)),
            pl.BlockSpec((H * W, 4 * H1 * W1), lambda b: (0, 0)),
            pl.BlockSpec((C2, 9 * C1), lambda b: (0, 0)),
            pl.BlockSpec((C2, 1), lambda b: (0, 0)),
            pl.BlockSpec((9, 1, H1 * W1), lambda b: (0, 0, 0)),
            pl.BlockSpec((H1 * W1, 4 * H2 * W2), lambda b: (0, 0)),
            pl.BlockSpec((H2 * W2, OH * OW), lambda b: (0, 0)),
        ],
        out_specs=pl.BlockSpec((1, C2, OH * OW), lambda b: (b, 0, 0)),
        out_shape=jax.ShapeDtypeStruct((Bsz, C2, OH * OW), jnp.float32),
        compiler_params=pltpu.CompilerParams(dimension_semantics=("parallel",)),
    )(x3, w1, b1, m1, s1c, w2r, b2, m2, s2c, mavg)


def _gate_split(w, H):
    """PyTorch gate order i, f, g, o."""
    return w[0:H], w[H:2 * H], w[2 * H:3 * H], w[3 * H:4 * H]


def lstm_fc_forward(seq_flat, params, T, Bp, Bsz):
    """Fused 2-layer LSTM (skewed) + Linear in one grid-less pallas_call."""
    H = params['w_hh_l0'].shape[1]
    Din = params['w_ih_l0'].shape[1]
    ncls = params['fc_w'].shape[0]

    wih0 = _gate_split(params['w_ih_l0'], H)            # each (H, Din)
    whh0 = _gate_split(params['w_hh_l0'], H)            # each (H, H)
    wih1 = _gate_split(params['w_ih_l1'], H)
    whh1 = _gate_split(params['w_hh_l1'], H)
    b0 = _gate_split(params['b_ih_l0'] + params['b_hh_l0'], H)
    b1 = _gate_split(params['b_ih_l1'] + params['b_hh_l1'], H)

    zD = jnp.zeros((Din, H), jnp.float32)
    zH = jnp.zeros((H, H), jnp.float32)
    # fused gate slot layout: [i0 i1 f0 f1 g0 g1 o0 o1], each H columns.
    wx = jnp.concatenate([wih0[0].T, zD, wih0[1].T, zD,
                          wih0[2].T, zD, wih0[3].T, zD], axis=1)           # (Din, 8H)
    badd = jnp.concatenate([b0[0], b1[0], b0[1], b1[1],
                            b0[2], b1[2], b0[3], b1[3]]).reshape(1, 8 * H)
    top = jnp.concatenate([whh0[0].T, wih1[0].T, whh0[1].T, wih1[1].T,
                           whh0[2].T, wih1[2].T, whh0[3].T, wih1[3].T], axis=1)
    bot = jnp.concatenate([zH, whh1[0].T, zH, whh1[1].T,
                           zH, whh1[2].T, zH, whh1[3].T], axis=1)
    wrec = jnp.concatenate([top, bot], axis=0)                              # (2H, 8H)

    wfc = jnp.transpose(params['fc_w'])                                     # (H, C)
    bfc = params['fc_b'].reshape(1, ncls)

    kernel = functools.partial(lstm_fc_kernel, (T, Bp, H, Bsz))
    return pl.pallas_call(
        kernel,
        out_shape=jax.ShapeDtypeStruct((Bsz, ncls), jnp.float32),
        scratch_shapes=[pltpu.VMEM((T * Bp, 8 * H), jnp.float32)],
    )(seq_flat, wx, wrec, badd, wfc, bfc)


def cnn_lstm_forward(x, params, out_hw=(16, 50)):
    Bsz = x.shape[0]
    feat = cnn_forward(x, params['conv1_w'], params['conv1_b'],
                       params['conv2_w'], params['conv2_b'], out_hw)   # (B, 32, OH*OW)
    C2 = feat.shape[1]
    OH, OW = out_hw
    Din = C2 * OH                                                      # 512
    T = OW                                                             # 50
    # PyTorch: x.view(B, width, channels*height) on a contiguous NCHW tensor
    # == raw reshape of the flat NCHW buffer (no permute).  feat is already NCHW-flat.
    seq = feat.reshape(Bsz, T, Din)                                    # free bitcast
    seq_tm = jnp.transpose(seq, (1, 0, 2))                             # (T, B, Din)
    Bp = ((Bsz + 7) // 8) * 8                                          # sublane-pad batch
    if Bp != Bsz:
        seq_tm = jnp.pad(seq_tm, ((0, 0), (0, Bp - Bsz), (0, 0)))
    seq_flat = seq_tm.reshape(T * Bp, Din)                             # row = t*Bp + b
    return lstm_fc_forward(seq_flat, params, T, Bp, Bsz)               # (B, num_classes)


# ------------------------------------- main ---------------------------------------------

if __name__ == "__main__":
    HIDDEN = 32          # small hidden size for the test (module default is 128)
    NUM_CLASSES = 5
    LSTM_IN = 32 * 16    # fixed by the module's CNN head (channels * pooled height)

    key = jax.random.PRNGKey(0)
    keys = jax.random.split(key, 16)

    def rnd(k, shape, scale=0.05):
        return scale * jax.random.normal(k, shape, dtype=jnp.float32)

    params = {
        'conv1_w': rnd(keys[0], (16, 1, 3, 3)),
        'conv1_b': rnd(keys[1], (16,)),
        'conv2_w': rnd(keys[2], (32, 16, 3, 3)),
        'conv2_b': rnd(keys[3], (32,)),
        'w_ih_l0': rnd(keys[4], (4 * HIDDEN, LSTM_IN)),
        'w_hh_l0': rnd(keys[5], (4 * HIDDEN, HIDDEN)),
        'b_ih_l0': rnd(keys[6], (4 * HIDDEN,)),
        'b_hh_l0': rnd(keys[7], (4 * HIDDEN,)),
        'w_ih_l1': rnd(keys[8], (4 * HIDDEN, HIDDEN)),
        'w_hh_l1': rnd(keys[9], (4 * HIDDEN, HIDDEN)),
        'b_ih_l1': rnd(keys[10], (4 * HIDDEN,)),
        'b_hh_l1': rnd(keys[11], (4 * HIDDEN,)),
        'fc_w': rnd(keys[12], (NUM_CLASSES, HIDDEN)),
        'fc_b': rnd(keys[13], (NUM_CLASSES,)),
    }

    x = jax.random.normal(keys[14], (2, 1, 16, 16), dtype=jnp.float32)

    out = jax.jit(cnn_lstm_forward)(x, params)
    jax.block_until_ready(out)
    assert out.shape == (2, NUM_CLASSES)
    assert bool(jnp.all(jnp.isfinite(out)))
    print("KERNEL_OK")
</pallas_src>

<mosaic_0001>
module attributes {stable_mosaic.version = 11 : i64} {
  func.func @cnn_fused_kernel(%arg0: i32, %arg1: memref<1x1x256xf32, #tpu.memory_space<vmem>>, %arg2: memref<16x9xf32, #tpu.memory_space<vmem>>, %arg3: memref<16x1xf32, #tpu.memory_space<vmem>>, %arg4: memref<9x1x256xf32, #tpu.memory_space<vmem>>, %arg5: memref<256x256xf32, #tpu.memory_space<vmem>>, %arg6: memref<32x144xf32, #tpu.memory_space<vmem>>, %arg7: memref<32x1xf32, #tpu.memory_space<vmem>>, %arg8: memref<9x1x64xf32, #tpu.memory_space<vmem>>, %arg9: memref<64x64xf32, #tpu.memory_space<vmem>>, %arg10: memref<16x800xf32, #tpu.memory_space<vmem>>, %arg11: memref<1x32x800xf32, #tpu.memory_space<vmem>>) attributes {dimension_semantics = [#tpu.dimension_semantics<parallel>], iteration_bounds = array<i64: 2>, scalar_prefetch = 0 : i64, scratch_operands = 0 : i64, tpu.core_type = #tpu.core_type<tc>, window_params = [{transform_indices = @transform_0, window_bounds = array<i64: 1, 1, 256>}, {pipeline_mode = #tpu.pipeline_mode<synchronous>, transform_indices = @transform_1, window_bounds = array<i64: 16, 9>}, {pipeline_mode = #tpu.pipeline_mode<synchronous>, transform_indices = @transform_2, window_bounds = array<i64: 16, 1>}, {pipeline_mode = #tpu.pipeline_mode<synchronous>, transform_indices = @transform_3, window_bounds = array<i64: 9, 1, 256>}, {pipeline_mode = #tpu.pipeline_mode<synchronous>, transform_indices = @transform_4, window_bounds = array<i64: 256, 256>}, {pipeline_mode = #tpu.pipeline_mode<synchronous>, transform_indices = @transform_5, window_bounds = array<i64: 32, 144>}, {pipeline_mode = #tpu.pipeline_mode<synchronous>, transform_indices = @transform_6, window_bounds = array<i64: 32, 1>}, {pipeline_mode = #tpu.pipeline_mode<synchronous>, transform_indices = @transform_7, window_bounds = array<i64: 9, 1, 64>}, {pipeline_mode = #tpu.pipeline_mode<synchronous>, transform_indices = @transform_8, window_bounds = array<i64: 64, 64>}, {pipeline_mode = #tpu.pipeline_mode<synchronous>, transform_indices = @transform_9, window_bounds = array<i64: 16, 800>}, {transform_indices = @transform_10, window_bounds = array<i64: 1, 32, 800>}]} {
    %c0 = arith.constant 0 : index
    %c0_0 = arith.constant 0 : index
    %c0_1 = arith.constant 0 : index
    %0 = vector.load %arg1[%c0, %c0_0, %c0_1] : memref<1x1x256xf32, #tpu.memory_space<vmem>>, vector<1x1x256xf32>
    %1 = vector.shape_cast %0 : vector<1x1x256xf32> to vector<1x256xf32>
    %2 = vector.extract_strided_slice %1 {offsets = [0, 239], sizes = [1, 17], strides = [1, 1]} : vector<1x256xf32> to vector<1x17xf32>
    %3 = vector.extract_strided_slice %1 {offsets = [0, 0], sizes = [1, 239], strides = [1, 1]} : vector<1x256xf32> to vector<1x239xf32>
    %4 = tpu.concatenate %2, %3 in 1 : vector<1x17xf32>, vector<1x239xf32> -> vector<1x256xf32>
    %c0_2 = arith.constant 0 : index
    %c0_3 = arith.constant 0 : index
    %c0_4 = arith.constant 0 : index
    %5 = vector.load %arg4[%c0_2, %c0_3, %c0_4] : memref<9x1x256xf32, #tpu.memory_space<vmem>>, vector<1x1x256xf32>
    %6 = vector.shape_cast %5 : vector<1x1x256xf32> to vector<1x256xf32>
    %7 = arith.mulf %4, %6 : vector<1x256xf32>
    %c0_5 = arith.constant 0 : index
    %c0_6 = arith.constant 0 : index
    %8 = vector.load %arg2[%c0_5, %c0_6] : memref<16x9xf32, #tpu.memory_space<vmem>>, vector<16x1xf32>
    %9 = vector.broadcast %8 : vector<16x1xf32> to vector<16x256xf32>
    %10 = vector.broadcast %7 : vector<1x256xf32> to vector<16x256xf32>
    %11 = arith.mulf %9, %10 : vector<16x256xf32>
    %12 = vector.extract_strided_slice %1 {offsets = [0, 240], sizes = [1, 16], strides = [1, 1]} : vector<1x256xf32> to vector<1x16xf32>
    %13 = vector.extract_strided_slice %1 {offsets = [0, 0], sizes = [1, 240], strides = [1, 1]} : vector<1x256xf32> to vector<1x240xf32>
    %14 = tpu.concatenate %12, %13 in 1 : vector<1x16xf32>, vector<1x240xf32> -> vector<1x256xf32>
    %c1 = arith.constant 1 : index
    %c0_7 = arith.constant 0 : index
    %c0_8 = arith.constant 0 : index
    %15 = vector.load %arg4[%c1, %c0_7, %c0_8] : memref<9x1x256xf32, #tpu.memory_space<vmem>>, vector<1x1x256xf32>
    %16 = vector.shape_cast %15 : vector<1x1x256xf32> to vector<1x256xf32>
    %17 = arith.mulf %14, %16 : vector<1x256xf32>
    %c0_9 = arith.constant 0 : index
    %c1_10 = arith.constant 1 : index
    %18 = vector.load %arg2[%c0_9, %c1_10] : memref<16x9xf32, #tpu.memory_space<vmem>>, vector<16x1xf32>
    %19 = vector.broadcast %18 : vector<16x1xf32> to vector<16x256xf32>
    %20 = vector.broadcast %17 : vector<1x256xf32> to vector<16x256xf32>
    %21 = arith.mulf %19, %20 : vector<16x256xf32>
    %22 = arith.addf %11, %21 : vector<16x256xf32>
    %23 = vector.extract_strided_slice %1 {offsets = [0, 241], sizes = [1, 15], strides = [1, 1]} : vector<1x256xf32> to vector<1x15xf32>
    %24 = vector.extract_strided_slice %1 {offsets = [0, 0], sizes = [1, 241], strides = [1, 1]} : vector<1x256xf32> to vector<1x241xf32>
    %25 = tpu.concatenate %23, %24 in 1 : vector<1x15xf32>, vector<1x241xf32> -> vector<1x256xf32>
    %c2 = arith.constant 2 : index
    %c0_11 = arith.constant 0 : index
    %c0_12 = arith.constant 0 : index
    %26 = vector.load %arg4[%c2, %c0_11, %c0_12] : memref<9x1x256xf32, #tpu.memory_space<vmem>>, vector<1x1x256xf32>
    %27 = vector.shape_cast %26 : vector<1x1x256xf32> to vector<1x256xf32>
    %28 = arith.mulf %25, %27 : vector<1x256xf32>
    %c0_13 = arith.constant 0 : index
    %c2_14 = arith.constant 2 : index
    %29 = vector.load %arg2[%c0_13, %c2_14] : memref<16x9xf32, #tpu.memory_space<vmem>>, vector<16x1xf32>
    %30 = vector.broadcast %29 : vector<16x1xf32> to vector<16x256xf32>
    %31 = vector.broadcast %28 : vector<1x256xf32> to vector<16x256xf32>
    %32 = arith.mulf %30, %31 : vector<16x256xf32>
    %33 = arith.addf %22, %32 : vector<16x256xf32>
    %34 = vector.extract_strided_slice %1 {offsets = [0, 255], sizes = [1, 1], strides = [1, 1]} : vector<1x256xf32> to vector<1x1xf32>
    %35 = vector.extract_strided_slice %1 {offsets = [0, 0], sizes = [1, 255], strides = [1, 1]} : vector<1x256xf32> to vector<1x255xf32>
    %36 = tpu.concatenate %34, %35 in 1 : vector<1x1xf32>, vector<1x255xf32> -> vector<1x256xf32>
    %c3 = arith.constant 3 : index
    %c0_15 = arith.constant 0 : index
    %c0_16 = arith.constant 0 : index
    %37 = vector.load %arg4[%c3, %c0_15, %c0_16] : memref<9x1x256xf32, #tpu.memory_space<vmem>>, vector<1x1x256xf32>
    %38 = vector.shape_cast %37 : vector<1x1x256xf32> to vector<1x256xf32>
    %39 = arith.mulf %36, %38 : vector<1x256xf32>
    %c0_17 = arith.constant 0 : index
    %c3_18 = arith.constant 3 : index
    %40 = vector.load %arg2[%c0_17, %c3_18] : memref<16x9xf32, #tpu.memory_space<vmem>>, vector<16x1xf32>
    %41 = vector.broadcast %40 : vector<16x1xf32> to vector<16x256xf32>
    %42 = vector.broadcast %39 : vector<1x256xf32> to vector<16x256xf32>
    %43 = arith.mulf %41, %42 : vector<16x256xf32>
    %44 = arith.addf %33, %43 : vector<16x256xf32>
    %c4 = arith.constant 4 : index
    %c0_19 = arith.constant 0 : index
    %c0_20 = arith.constant 0 : index
    %45 = vector.load %arg4[%c4, %c0_19, %c0_20] : memref<9x1x256xf32, #tpu.memory_space<vmem>>, vector<1x1x256xf32>
    %46 = vector.shape_cast %45 : vector<1x1x256xf32> to vector<1x256xf32>
    %47 = arith.mulf %1, %46 : vector<1x256xf32>
    %c0_21 = arith.constant 0 : index
    %c4_22 = arith.constant 4 : index
    %48 = vector.load %arg2[%c0_21, %c4_22] : memref<16x9xf32, #tpu.memory_space<vmem>>, vector<16x1xf32>
    %49 = vector.broadcast %48 : vector<16x1xf32> to vector<16x256xf32>
    %50 = vector.broadcast %47 : vector<1x256xf32> to vector<16x256xf32>
    %51 = arith.mulf %49, %50 : vector<16x256xf32>
    %52 = arith.addf %44, %51 : vector<16x256xf32>
    %53 = vector.extract_strided_slice %1 {offsets = [0, 1], sizes = [1, 255], strides = [1, 1]} : vector<1x256xf32> to vector<1x255xf32>
    %54 = vector.extract_strided_slice %1 {offsets = [0, 0], sizes = [1, 1], strides = [1, 1]} : vector<1x256xf32> to vector<1x1xf32>
    %55 = tpu.concatenate %53, %54 in 1 : vector<1x255xf32>, vector<1x1xf32> -> vector<1x256xf32>
    %c5 = arith.constant 5 : index
    %c0_23 = arith.constant 0 : index
    %c0_24 = arith.constant 0 : index
    %56 = vector.load %arg4[%c5, %c0_23, %c0_24] : memref<9x1x256xf32, #tpu.memory_space<vmem>>, vector<1x1x256xf32>
    %57 = vector.shape_cast %56 : vector<1x1x256xf32> to vector<1x256xf32>
    %58 = arith.mulf %55, %57 : vector<1x256xf32>
    %c0_25 = arith.constant 0 : index
    %c5_26 = arith.constant 5 : index
    %59 = vector.load %arg2[%c0_25, %c5_26] : memref<16x9xf32, #tpu.memory_space<vmem>>, vector<16x1xf32>
    %60 = vector.broadcast %59 : vector<16x1xf32> to vector<16x256xf32>
    %61 = vector.broadcast %58 : vector<1x256xf32> to vector<16x256xf32>
    %62 = arith.mulf %60, %61 : vector<16x256xf32>
    %63 = arith.addf %52, %62 : vector<16x256xf32>
    %64 = vector.extract_strided_slice %1 {offsets = [0, 15], sizes = [1, 241], strides = [1, 1]} : vector<1x256xf32> to vector<1x241xf32>
    %65 = vector.extract_strided_slice %1 {offsets = [0, 0], sizes = [1, 15], strides = [1, 1]} : vector<1x256xf32> to vector<1x15xf32>
    %66 = tpu.concatenate %64, %65 in 1 : vector<1x241xf32>, vector<1x15xf32> -> vector<1x256xf32>
    %c6 = arith.constant 6 : index
    %c0_27 = arith.constant 0 : index
    %c0_28 = arith.constant 0 : index
    %67 = vector.load %arg4[%c6, %c0_27, %c0_28] : memref<9x1x256xf32, #tpu.memory_space<vmem>>, vector<1x1x256xf32>
    %68 = vector.shape_cast %67 : vector<1x1x256xf32> to vector<1x256xf32>
    %69 = arith.mulf %66, %68 : vector<1x256xf32>
    %c0_29 = arith.constant 0 : index
    %c6_30 = arith.constant 6 : index
    %70 = vector.load %arg2[%c0_29, %c6_30] : memref<16x9xf32, #tpu.memory_space<vmem>>, vector<16x1xf32>
    %71 = vector.broadcast %70 : vector<16x1xf32> to vector<16x256xf32>
    %72 = vector.broadcast %69 : vector<1x256xf32> to vector<16x256xf32>
    %73 = arith.mulf %71, %72 : vector<16x256xf32>
    %74 = arith.addf %63, %73 : vector<16x256xf32>
    %75 = vector.extract_strided_slice %1 {offsets = [0, 16], sizes = [1, 240], strides = [1, 1]} : vector<1x256xf32> to vector<1x240xf32>
    %76 = vector.extract_strided_slice %1 {offsets = [0, 0], sizes = [1, 16], strides = [1, 1]} : vector<1x256xf32> to vector<1x16xf32>
    %77 = tpu.concatenate %75, %76 in 1 : vector<1x240xf32>, vector<1x16xf32> -> vector<1x256xf32>
    %c7 = arith.constant 7 : index
    %c0_31 = arith.constant 0 : index
    %c0_32 = arith.constant 0 : index
    %78 = vector.load %arg4[%c7, %c0_31, %c0_32] : memref<9x1x256xf32, #tpu.memory_space<vmem>>, vector<1x1x256xf32>
    %79 = vector.shape_cast %78 : vector<1x1x256xf32> to vector<1x256xf32>
    %80 = arith.mulf %77, %79 : vector<1x256xf32>
    %c0_33 = arith.constant 0 : index
    %c7_34 = arith.constant 7 : index
    %81 = vector.load %arg2[%c0_33, %c7_34] : memref<16x9xf32, #tpu.memory_space<vmem>>, vector<16x1xf32>
    %82 = vector.broadcast %81 : vector<16x1xf32> to vector<16x256xf32>
    %83 = vector.broadcast %80 : vector<1x256xf32> to vector<16x256xf32>
    %84 = arith.mulf %82, %83 : vector<16x256xf32>
    %85 = arith.addf %74, %84 : vector<16x256xf32>
    %86 = vector.extract_strided_slice %1 {offsets = [0, 17], sizes = [1, 239], strides = [1, 1]} : vector<1x256xf32> to vector<1x239xf32>
    %87 = vector.extract_strided_slice %1 {offsets = [0, 0], sizes = [1, 17], strides = [1, 1]} : vector<1x256xf32> to vector<1x17xf32>
    %88 = tpu.concatenate %86, %87 in 1 : vector<1x239xf32>, vector<1x17xf32> -> vector<1x256xf32>
    %c8 = arith.constant 8 : index
    %c0_35 = arith.constant 0 : index
    %c0_36 = arith.constant 0 : index
    %89 = vector.load %arg4[%c8, %c0_35, %c0_36] : memref<9x1x256xf32, #tpu.memory_space<vmem>>, vector<1x1x256xf32>
    %90 = vector.shape_cast %89 : vector<1x1x256xf32> to vector<1x256xf32>
    %91 = arith.mulf %88, %90 : vector<1x256xf32>
    %c0_37 = arith.constant 0 : index
    %c8_38 = arith.constant 8 : index
    %92 = vector.load %arg2[%c0_37, %c8_38] : memref<16x9xf32, #tpu.memory_space<vmem>>, vector<16x1xf32>
    %93 = vector.broadcast %92 : vector<16x1xf32> to vector<16x256xf32>
    %94 = vector.broadcast %91 : vector<1x256xf32> to vector<16x256xf32>
    %95 = arith.mulf %93, %94 : vector<16x256xf32>
    %96 = arith.addf %85, %95 : vector<16x256xf32>
    %c0_39 = arith.constant 0 : index
    %c0_40 = arith.constant 0 : index
    %97 = vector.load %arg3[%c0_39, %c0_40] : memref<16x1xf32, #tpu.memory_space<vmem>>, vector<16x1xf32>
    %98 = vector.broadcast %97 : vector<16x1xf32> to vector<16x256xf32>
    %99 = arith.addf %96, %98 : vector<16x256xf32>
    %cst = arith.constant 0.000000e+00 : f32
    %100 = vector.broadcast %cst : f32 to vector<16x256xf32>
    %101 = arith.maximumf %99, %100 : vector<16x256xf32>
    %c0_41 = arith.constant 0 : index
    %c0_42 = arith.constant 0 : index
    %102 = vector.load %arg5[%c0_41, %c0_42] : memref<256x256xf32, #tpu.memory_space<vmem>>, vector<256x256xf32>
    %cst_43 = arith.constant dense<0.000000e+00> : vector<16x256xf32>
    %103 = tpu.matmul %101, %102, %cst_43 {dimension_numbers = #tpu.dot_dimension_numbers<[1], [0], [0], [1], [0, 0, 1, 1], [], []>} : vector<16x256xf32>, vector<256x256xf32>, vector<16x256xf32> -> vector<16x256xf32>
    %104 = vector.extract_strided_slice %103 {offsets = [0, 0], sizes = [16, 64], strides = [1, 1]} : vector<16x256xf32> to vector<16x64xf32>
    %105 = vector.extract_strided_slice %103 {offsets = [0, 64], sizes = [16, 64], strides = [1, 1]} : vector<16x256xf32> to vector<16x64xf32>
    %106 = arith.maximumf %104, %105 : vector<16x64xf32>
    %107 = vector.extract_strided_slice %103 {offsets = [0, 128], sizes = [16, 64], strides = [1, 1]} : vector<16x256xf32> to vector<16x64xf32>
    %108 = vector.extract_strided_slice %103 {offsets = [0, 192], sizes = [16, 64], strides = [1, 1]} : vector<16x256xf32> to vector<16x64xf32>
    %109 = arith.maximumf %107, %108 : vector<16x64xf32>
    %110 = arith.maximumf %106, %109 : vector<16x64xf32>
    %111 = vector.extract_strided_slice %110 {offsets = [0, 55], sizes = [16, 9], strides = [1, 1]} : vector<16x64xf32> to vector<16x9xf32>
    %112 = vector.extract_strided_slice %110 {offsets = [0, 0], sizes = [16, 55], strides = [1, 1]} : vector<16x64xf32> to vector<16x55xf32>
    %113 = tpu.concatenate %111, %112 in 1 : vector<16x9xf32>, vector<16x55xf32> -> vector<16x64xf32>
    %c0_44 = arith.constant 0 : index
    %c0_45 = arith.constant 0 : index
    %c0_46 = arith.constant 0 : index
    %114 = vector.load %arg8[%c0_44, %c0_45, %c0_46] : memref<9x1x64xf32, #tpu.memory_space<vmem>>, vector<1x1x64xf32>
    %115 = vector.shape_cast %114 : vector<1x1x64xf32> to vector<1x64xf32>
    %116 = vector.broadcast %115 : vector<1x64xf32> to vector<16x64xf32>
    %117 = arith.mulf %113, %116 : vector<16x64xf32>
    %118 = vector.extract_strided_slice %110 {offsets = [0, 56], sizes = [16, 8], strides = [1, 1]} : vector<16x64xf32> to vector<16x8xf32>
    %119 = vector.extract_strided_slice %110 {offsets = [0, 0], sizes = [16, 56], strides = [1, 1]} : vector<16x64xf32> to vector<16x56xf32>
    %120 = tpu.concatenate %118, %119 in 1 : vector<16x8xf32>, vector<16x56xf32> -> vector<16x64xf32>
    %c1_47 = arith.constant 1 : index
    %c0_48 = arith.constant 0 : index
    %c0_49 = arith.constant 0 : index
    %121 = vector.load %arg8[%c1_47, %c0_48, %c0_49] : memref<9x1x64xf32, #tpu.memory_space<vmem>>, vector<1x1x64xf32>
    %122 = vector.shape_cast %121 : vector<1x1x64xf32> to vector<1x64xf32>
    %123 = vector.broadcast %122 : vector<1x64xf32> to vector<16x64xf32>
    %124 = arith.mulf %120, %123 : vector<16x64xf32>
    %125 = vector.extract_strided_slice %110 {offsets = [0, 57], sizes = [16, 7], strides = [1, 1]} : vector<16x64xf32> to vector<16x7xf32>
    %126 = vector.extract_strided_slice %110 {offsets = [0, 0], sizes = [16, 57], strides = [1, 1]} : vector<16x64xf32> to vector<16x57xf32>
    %127 = tpu.concatenate %125, %126 in 1 : vector<16x7xf32>, vector<16x57xf32> -> vector<16x64xf32>
    %c2_50 = arith.constant 2 : index
    %c0_51 = arith.constant 0 : index
    %c0_52 = arith.constant 0 : index
    %128 = vector.load %arg8[%c2_50, %c0_51, %c0_52] : memref<9x1x64xf32, #tpu.memory_space<vmem>>, vector<1x1x64xf32>
    %129 = vector.shape_cast %128 : vector<1x1x64xf32> to vector<1x64xf32>
    %130 = vector.broadcast %129 : vector<1x64xf32> to vector<16x64xf32>
    %131 = arith.mulf %127, %130 : vector<16x64xf32>
    %132 = vector.extract_strided_slice %110 {offsets = [0, 63], sizes = [16, 1], strides = [1, 1]} : vector<16x64xf32> to vector<16x1xf32>
    %133 = vector.extract_strided_slice %110 {offsets = [0, 0], sizes = [16, 63], strides = [1, 1]} : vector<16x64xf32> to vector<16x63xf32>
    %134 = tpu.concatenate %132, %133 in 1 : vector<16x1xf32>, vector<16x63xf32> -> vector<16x64xf32>
    %c3_53 = arith.constant 3 : index
    %c0_54 = arith.constant 0 : index
    %c0_55 = arith.constant 0 : index
    %135 = vector.load %arg8[%c3_53, %c0_54, %c0_55] : memref<9x1x64xf32, #tpu.memory_space<vmem>>, vector<1x1x64xf32>
    %136 = vector.shape_cast %135 : vector<1x1x64xf32> to vector<1x64xf32>
    %137 = vector.broadcast %136 : vector<1x64xf32> to vector<16x64xf32>
    %138 = arith.mulf %134, %137 : vector<16x64xf32>
    %c4_56 = arith.constant 4 : index
    %c0_57 = arith.constant 0 : index
    %c0_58 = arith.constant 0 : index
    %139 = vector.load %arg8[%c4_56, %c0_57, %c0_58] : memref<9x1x64xf32, #tpu.memory_space<vmem>>, vector<1x1x64xf32>
    %140 = vector.shape_cast %139 : vector<1x1x64xf32> to vector<1x64xf32>
    %141 = vector.broadcast %140 : vector<1x64xf32> to vector<16x64xf32>
    %142 = arith.mulf %110, %141 : vector<16x64xf32>
    %143 = vector.extract_strided_slice %110 {offsets = [0, 1], sizes = [16, 63], strides = [1, 1]} : vector<16x64xf32> to vector<16x63xf32>
    %144 = vector.extract_strided_slice %110 {offsets = [0, 0], sizes = [16, 1], strides = [1, 1]} : vector<16x64xf32> to vector<16x1xf32>
    %145 = tpu.concatenate %143, %144 in 1 : vector<16x63xf32>, vector<16x1xf32> -> vector<16x64xf32>
    %c5_59 = arith.constant 5 : index
    %c0_60 = arith.constant 0 : index
    %c0_61 = arith.constant 0 : index
    %146 = vector.load %arg8[%c5_59, %c0_60, %c0_61] : memref<9x1x64xf32, #tpu.memory_space<vmem>>, vector<1x1x64xf32>
    %147 = vector.shape_cast %146 : vector<1x1x64xf32> to vector<1x64xf32>
    %148 = vector.broadcast %147 : vector<1x64xf32> to vector<16x64xf32>
    %149 = arith.mulf %145, %148 : vector<16x64xf32>
    %150 = vector.extract_strided_slice %110 {offsets = [0, 7], sizes = [16, 57], strides = [1, 1]} : vector<16x64xf32> to vector<16x57xf32>
    %151 = vector.extract_strided_slice %110 {offsets = [0, 0], sizes = [16, 7], strides = [1, 1]} : vector<16x64xf32> to vector<16x7xf32>
    %152 = tpu.concatenate %150, %151 in 1 : vector<16x57xf32>, vector<16x7xf32> -> vector<16x64xf32>
    %c6_62 = arith.constant 6 : index
    %c0_63 = arith.constant 0 : index
    %c0_64 = arith.constant 0 : index
    %153 = vector.load %arg8[%c6_62, %c0_63, %c0_64] : memref<9x1x64xf32, #tpu.memory_space<vmem>>, vector<1x1x64xf32>
    %154 = vector.shape_cast %153 : vector<1x1x64xf32> to vector<1x64xf32>
    %155 = vector.broadcast %154 : vector<1x64xf32> to vector<16x64xf32>
    %156 = arith.mulf %152, %155 : vector<16x64xf32>
    %157 = vector.extract_strided_slice %110 {offsets = [0, 8], sizes = [16, 56], strides = [1, 1]} : vector<16x64xf32> to vector<16x56xf32>
    %158 = vector.extract_strided_slice %110 {offsets = [0, 0], sizes = [16, 8], strides = [1, 1]} : vector<16x64xf32> to vector<16x8xf32>
    %159 = tpu.concatenate %157, %158 in 1 : vector<16x56xf32>, vector<16x8xf32> -> vector<16x64xf32>
    %c7_65 = arith.constant 7 : index
    %c0_66 = arith.constant 0 : index
    %c0_67 = arith.constant 0 : index
    %160 = vector.load %arg8[%c7_65, %c0_66, %c0_67] : memref<9x1x64xf32, #tpu.memory_space<vmem>>, vector<1x1x64xf32>
    %161 = vector.shape_cast %160 : vector<1x1x64xf32> to vector<1x64xf32>
    %162 = vector.broadcast %161 : vector<1x64xf32> to vector<16x64xf32>
    %163 = arith.mulf %159, %162 : vector<16x64xf32>
    %164 = vector.extract_strided_slice %110 {offsets = [0, 9], sizes = [16, 55], strides = [1, 1]} : vector<16x64xf32> to vector<16x55xf32>
    %165 = vector.extract_strided_slice %110 {offsets = [0, 0], sizes = [16, 9], strides = [1, 1]} : vector<16x64xf32> to vector<16x9xf32>
    %166 = tpu.concatenate %164, %165 in 1 : vector<16x55xf32>, vector<16x9xf32> -> vector<16x64xf32>
    %c8_68 = arith.constant 8 : index
    %c0_69 = arith.constant 0 : index
    %c0_70 = arith.constant 0 : index
    %167 = vector.load %arg8[%c8_68, %c0_69, %c0_70] : memref<9x1x64xf32, #tpu.memory_space<vmem>>, vector<1x1x64xf32>
    %168 = vector.shape_cast %167 : vector<1x1x64xf32> to vector<1x64xf32>
    %169 = vector.broadcast %168 : vector<1x64xf32> to vector<16x64xf32>
    %170 = arith.mulf %166, %169 : vector<16x64xf32>
    %171 = tpu.concatenate %117, %124, %131, %138, %142, %149, %156, %163, %170 in 0 : vector<16x64xf32>, vector<16x64xf32>, vector<16x64xf32>, vector<16x64xf32>, vector<16x64xf32>, vector<16x64xf32>, vector<16x64xf32>, vector<16x64xf32>, vector<16x64xf32> -> vector<144x64xf32>
    %c0_71 = arith.constant 0 : index
    %c0_72 = arith.constant 0 : index
    %172 = vector.load %arg6[%c0_71, %c0_72] : memref<32x144xf32, #tpu.memory_space<vmem>>, vector<32x144xf32>
    %cst_73 = arith.constant dense<0.000000e+00> : vector<32x64xf32>
    %173 = tpu.matmul %172, %171, %cst_73 {dimension_numbers = #tpu.dot_dimension_numbers<[1], [0], [0], [1], [0, 0, 1, 1], [], []>} : vector<32x144xf32>, vector<144x64xf32>, vector<32x64xf32> -> vector<32x64xf32>
    %c0_74 = arith.constant 0 : index
    %c0_75 = arith.constant 0 : index
    %174 = vector.load %arg7[%c0_74, %c0_75] : memref<32x1xf32, #tpu.memory_space<vmem>>, vector<32x1xf32>
    %175 = vector.broadcast %174 : vector<32x1xf32> to vector<32x64xf32>
    %176 = arith.addf %173, %175 : vector<32x64xf32>
    %cst_76 = arith.constant 0.000000e+00 : f32
    %177 = vector.broadcast %cst_76 : f32 to vector<32x64xf32>
    %178 = arith.maximumf %176, %177 : vector<32x64xf32>
    %c0_77 = arith.constant 0 : index
    %c0_78 = arith.constant 0 : index
    %179 = vector.load %arg9[%c0_77, %c0_78] : memref<64x64xf32, #tpu.memory_space<vmem>>, vector<64x64xf32>
    %cst_79 = arith.constant dense<0.000000e+00> : vector<32x64xf32>
    %180 = tpu.matmul %178, %179, %cst_79 {dimension_numbers = #tpu.dot_dimension_numbers<[1], [0], [0], [1], [0, 0, 1, 1], [], []>} : vector<32x64xf32>, vector<64x64xf32>, vector<32x64xf32> -> vector<32x64xf32>
    %181 = vector.extract_strided_slice %180 {offsets = [0, 0], sizes = [32, 16], strides = [1, 1]} : vector<32x64xf32> to vector<32x16xf32>
    %182 = vector.extract_strided_slice %180 {offsets = [0, 16], sizes = [32, 16], strides = [1, 1]} : vector<32x64xf32> to vector<32x16xf32>
    %183 = arith.maximumf %181, %182 : vector<32x16xf32>
    %184 = vector.extract_strided_slice %180 {offsets = [0, 32], sizes = [32, 16], strides = [1, 1]} : vector<32x64xf32> to vector<32x16xf32>
    %185 = vector.extract_strided_slice %180 {offsets = [0, 48], sizes = [32, 16], strides = [1, 1]} : vector<32x64xf32> to vector<32x16xf32>
    %186 = arith.maximumf %184, %185 : vector<32x16xf32>
    %187 = arith.maximumf %183, %186 : vector<32x16xf32>
    %c0_80 = arith.constant 0 : index
    %c0_81 = arith.constant 0 : index
    %188 = vector.load %arg10[%c0_80, %c0_81] : memref<16x800xf32, #tpu.memory_space<vmem>>, vector<16x800xf32>
    %cst_82 = arith.constant dense<0.000000e+00> : vector<32x800xf32>
    %189 = tpu.matmul %187, %188, %cst_82 {dimension_numbers = #tpu.dot_dimension_numbers<[1], [0], [0], [1], [0, 0, 1, 1], [], []>} : vector<32x16xf32>, vector<16x800xf32>, vector<32x800xf32> -> vector<32x800xf32>
    %c0_83 = arith.constant 0 : index
    %c0_84 = arith.constant 0 : index
    %c0_85 = arith.constant 0 : index
    %190 = vector.load %arg11[%c0_83, %c0_84, %c0_85] : memref<1x32x800xf32, #tpu.memory_space<vmem>>, vector<1x32x800xf32>
    %191 = vector.shape_cast %190 : vector<1x32x800xf32> to vector<32x800xf32>
    %192 = vector.shape_cast %189 : vector<32x800xf32> to vector<1x32x800xf32>
    tpu.vector_store %arg11[%c0_83, %c0_84, %c0_85], %192 {strides = array<i32>} : memref<1x32x800xf32, #tpu.memory_space<vmem>>, vector<1x32x800xf32>,
    return
  }
  func.func @transform_0(%arg0: i32) -> (i32, i32, i32) {
    %c0_i32 = arith.constant 0 : i32
    %c0_i32_0 = arith.constant 0 : i32
    %c0_i32_1 = arith.constant 0 : i32
    return %arg0, %c0_i32, %c0_i32_0 : i32, i32, i32
  }
  func.func @transform_1(%arg0: i32) -> (i32, i32) {
    %c0_i32 = arith.constant 0 : i32
    %c0_i32_0 = arith.constant 0 : i32
    %c0_i32_1 = arith.constant 0 : i32
    return %c0_i32, %c0_i32_0 : i32, i32
  }
  func.func @transform_2(%arg0: i32) -> (i32, i32) {
    %c0_i32 = arith.constant 0 : i32
    %c0_i32_0 = arith.constant 0 : i32
    %c0_i32_1 = arith.constant 0 : i32
    return %c0_i32, %c0_i32_0 : i32, i32
  }
  func.func @transform_3(%arg0: i32) -> (i32, i32, i32) {
    %c0_i32 = arith.constant 0 : i32
    %c0_i32_0 = arith.constant 0 : i32
    %c0_i32_1 = arith.constant 0 : i32
    %c0_i32_2 = arith.constant 0 : i32
    return %c0_i32, %c0_i32_0, %c0_i32_1 : i32, i32, i32
  }
  func.func @transform_4(%arg0: i32) -> (i32, i32) {
    %c0_i32 = arith.constant 0 : i32
    %c0_i32_0 = arith.constant 0 : i32
    %c0_i32_1 = arith.constant 0 : i32
    return %c0_i32, %c0_i32_0 : i32, i32
  }
  func.func @transform_5(%arg0: i32) -> (i32, i32) {
    %c0_i32 = arith.constant 0 : i32
    %c0_i32_0 = arith.constant 0 : i32
    %c0_i32_1 = arith.constant 0 : i32
    return %c0_i32, %c0_i32_0 : i32, i32
  }
  func.func @transform_6(%arg0: i32) -> (i32, i32) {
    %c0_i32 = arith.constant 0 : i32
    %c0_i32_0 = arith.constant 0 : i32
    %c0_i32_1 = arith.constant 0 : i32
    return %c0_i32, %c0_i32_0 : i32, i32
  }
  func.func @transform_7(%arg0: i32) -> (i32, i32, i32) {
    %c0_i32 = arith.constant 0 : i32
    %c0_i32_0 = arith.constant 0 : i32
    %c0_i32_1 = arith.constant 0 : i32
    %c0_i32_2 = arith.constant 0 : i32
    return %c0_i32, %c0_i32_0, %c0_i32_1 : i32, i32, i32
  }
  func.func @transform_8(%arg0: i32) -> (i32, i32) {
    %c0_i32 = arith.constant 0 : i32
    %c0_i32_0 = arith.constant 0 : i32
    %c0_i32_1 = arith.constant 0 : i32
    return %c0_i32, %c0_i32_0 : i32, i32
  }
  func.func @transform_9(%arg0: i32) -> (i32, i32) {
    %c0_i32 = arith.constant 0 : i32
    %c0_i32_0 = arith.constant 0 : i32
    %c0_i32_1 = arith.constant 0 : i32
    return %c0_i32, %c0_i32_0 : i32, i32
  }
  func.func @transform_10(%arg0: i32) -> (i32, i32, i32) {
    %c0_i32 = arith.constant 0 : i32
    %c0_i32_0 = arith.constant 0 : i32
    %c0_i32_1 = arith.constant 0 : i32
    return %arg0, %c0_i32, %c0_i32_0 : i32, i32, i32
  }
}

module attributes {stable_mosaic.version = 11 : i64} {
  func.func @lstm_fc_kernel(%arg0: memref<400x512xf32, #tpu.memory_space<vmem>>, %arg1: memref<512x256xf32, #tpu.memory_space<vmem>>, %arg2: memref<64x256xf32, #tpu.memory_space<vmem>>, %arg3: memref<1x256xf32, #tpu.memory_space<vmem>>, %arg4: memref<32x5xf32, #tpu.memory_space<vmem>>, %arg5: memref<1x5xf32, #tpu.memory_space<vmem>>, %arg6: memref<2x5xf32, #tpu.memory_space<vmem>>, %arg7: memref<400x256xf32, #tpu.memory_space<vmem>>) attributes {dimension_semantics = [], scalar_prefetch = 0 : i64, scratch_operands = 1 : i64, tpu.core_type = #tpu.core_type<tc>} {
    %c0 = arith.constant 0 : index
    %c0_0 = arith.constant 0 : index
    %0 = vector.load %arg0[%c0, %c0_0] : memref<400x512xf32, #tpu.memory_space<vmem>>, vector<400x512xf32>
    %c0_1 = arith.constant 0 : index
    %c0_2 = arith.constant 0 : index
    %1 = vector.load %arg1[%c0_1, %c0_2] : memref<512x256xf32, #tpu.memory_space<vmem>>, vector<512x256xf32>
    %cst = arith.constant dense<0.000000e+00> : vector<400x256xf32>
    %2 = tpu.matmul %0, %1, %cst {dimension_numbers = #tpu.dot_dimension_numbers<[1], [0], [0], [1], [0, 0, 1, 1], [], []>} : vector<400x512xf32>, vector<512x256xf32>, vector<400x256xf32> -> vector<400x256xf32>
    %c0_3 = arith.constant 0 : index
    %c0_4 = arith.constant 0 : index
    %3 = vector.load %arg3[%c0_3, %c0_4] : memref<1x256xf32, #tpu.memory_space<vmem>>, vector<1x256xf32>
    %4 = vector.broadcast %3 : vector<1x256xf32> to vector<400x256xf32>
    %5 = arith.addf %2, %4 : vector<400x256xf32>
    %c0_5 = arith.constant 0 : index
    %c0_6 = arith.constant 0 : index
    %6 = vector.load %arg7[%c0_5, %c0_6] : memref<400x256xf32, #tpu.memory_space<vmem>>, vector<400x256xf32>
    tpu.vector_store %arg7[%c0_5, %c0_6], %5 {strides = array<i32>} : memref<400x256xf32, #tpu.memory_space<vmem>>, vector<400x256xf32>,
    %c0_7 = arith.constant 0 : index
    %c0_8 = arith.constant 0 : index
    %7 = vector.load %arg7[%c0_7, %c0_8] : memref<400x256xf32, #tpu.memory_space<vmem>>, vector<8x256xf32>
    %8 = vector.extract_strided_slice %7 {offsets = [0, 0], sizes = [8, 32], strides = [1, 1]} : vector<8x256xf32> to vector<8x32xf32>
    %9 = arith.negf %8 : vector<8x32xf32>
    %10 = math.exp %9 : vector<8x32xf32>
    %cst_9 = arith.constant 1.000000e+00 : f32
    %11 = vector.broadcast %cst_9 : f32 to vector<8x32xf32>
    %12 = arith.addf %11, %10 : vector<8x32xf32>
    %13 = arith.divf %11, %12 : vector<8x32xf32>
    %14 = vector.extract_strided_slice %7 {offsets = [0, 128], sizes = [8, 32], strides = [1, 1]} : vector<8x256xf32> to vector<8x32xf32>
    %15 = math.tanh %14 : vector<8x32xf32>
    %16 = arith.mulf %13, %15 : vector<8x32xf32>
    %17 = vector.extract_strided_slice %7 {offsets = [0, 192], sizes = [8, 32], strides = [1, 1]} : vector<8x256xf32> to vector<8x32xf32>
    %18 = arith.negf %17 : vector<8x32xf32>
    %19 = math.exp %18 : vector<8x32xf32>
    %cst_10 = arith.constant 1.000000e+00 : f32
    %20 = vector.broadcast %cst_10 : f32 to vector<8x32xf32>
    %21 = arith.addf %20, %19 : vector<8x32xf32>
    %22 = arith.divf %20, %21 : vector<8x32xf32>
    %23 = math.tanh %16 : vector<8x32xf32>
    %24 = arith.mulf %22, %23 : vector<8x32xf32>
    %cst_11 = arith.constant 0.000000e+00 : f32
    %25 = vector.broadcast %cst_11 : f32 to vector<8x32xf32>
    %26 = tpu.concatenate %24, %25 in 1 : vector<8x32xf32>, vector<8x32xf32> -> vector<8x64xf32>
    %27 = tpu.concatenate %16, %25 in 1 : vector<8x32xf32>, vector<8x32xf32> -> vector<8x64xf32>
    %c1_i32 = arith.constant 1 : i32
    %c8_i32 = arith.constant 8 : i32
    %28 = arith.muli %c1_i32, %c8_i32 : i32
    %29 = tpu.assume_multiple %28, 8 : i32
    %30 = arith.index_cast %29 : i32 to index
    %c0_12 = arith.constant 0 : index
    %31 = vector.load %arg7[%30, %c0_12] : memref<400x256xf32, #tpu.memory_space<vmem>>, vector<8x256xf32>
    %c0_13 = arith.constant 0 : index
    %c0_14 = arith.constant 0 : index
    %32 = vector.load %arg2[%c0_13, %c0_14] : memref<64x256xf32, #tpu.memory_space<vmem>>, vector<64x256xf32>
    %cst_15 = arith.constant dense<0.000000e+00> : vector<8x256xf32>
    %33 = tpu.matmul %26, %32, %cst_15 {dimension_numbers = #tpu.dot_dimension_numbers<[1], [0], [0], [1], [0, 0, 1, 1], [], []>} : vector<8x64xf32>, vector<64x256xf32>, vector<8x256xf32> -> vector<8x256xf32>
    %34 = arith.addf %31, %33 : vector<8x256xf32>
    %35 = arith.negf %34 : vector<8x256xf32>
    %36 = math.exp %35 : vector<8x256xf32>
    %cst_16 = arith.constant 1.000000e+00 : f32
    %37 = vector.broadcast %cst_16 : f32 to vector<8x256xf32>
    %38 = arith.addf %37, %36 : vector<8x256xf32>
    %39 = arith.divf %37, %38 : vector<8x256xf32>
    %40 = vector.extract_strided_slice %34 {offsets = [0, 128], sizes = [8, 64], strides = [1, 1]} : vector<8x256xf32> to vector<8x64xf32>
    %41 = math.tanh %40 : vector<8x64xf32>
    %42 = vector.extract_strided_slice %39 {offsets = [0, 64], sizes = [8, 64], strides = [1, 1]} : vector<8x256xf32> to vector<8x64xf32>
    %43 = arith.mulf %42, %27 : vector<8x64xf32>
    %44 = vector.extract_strided_slice %39 {offsets = [0, 0], sizes = [8, 64], strides = [1, 1]} : vector<8x256xf32> to vector<8x64xf32>
    %45 = arith.mulf %44, %41 : vector<8x64xf32>
    %46 = arith.addf %43, %45 : vector<8x64xf32>
    %47 = vector.extract_strided_slice %39 {offsets = [0, 192], sizes = [8, 64], strides = [1, 1]} : vector<8x256xf32> to vector<8x64xf32>
    %48 = math.tanh %46 : vector<8x64xf32>
    %49 = arith.mulf %47, %48 : vector<8x64xf32>
    %c2_i32 = arith.constant 2 : i32
    %c8_i32_17 = arith.constant 8 : i32
    %50 = arith.muli %c2_i32, %c8_i32_17 : i32
    %51 = tpu.assume_multiple %50, 8 : i32
    %52 = arith.index_cast %51 : i32 to index
    %c0_18 = arith.constant 0 : index
    %53 = vector.load %arg7[%52, %c0_18] : memref<400x256xf32, #tpu.memory_space<vmem>>, vector<8x256xf32>
    %c0_19 = arith.constant 0 : index
    %c0_20 = arith.constant 0 : index
    %54 = vector.load %arg2[%c0_19, %c0_20] : memref<64x256xf32, #tpu.memory_space<vmem>>, vector<64x256xf32>
    %cst_21 = arith.constant dense<0.000000e+00> : vector<8x256xf32>
    %55 = tpu.matmul %49, %54, %cst_21 {dimension_numbers = #tpu.dot_dimension_numbers<[1], [0], [0], [1], [0, 0, 1, 1], [], []>} : vector<8x64xf32>, vector<64x256xf32>, vector<8x256xf32> -> vector<8x256xf32>
    %56 = arith.addf %53, %55 : vector<8x256xf32>
    %57 = arith.negf %56 : vector<8x256xf32>
    %58 = math.exp %57 : vector<8x256xf32>
    %cst_22 = arith.constant 1.000000e+00 : f32
    %59 = vector.broadcast %cst_22 : f32 to vector<8x256xf32>
    %60 = arith.addf %59, %58 : vector<8x256xf32>
    %61 = arith.divf %59, %60 : vector<8x256xf32>
    %62 = vector.extract_strided_slice %56 {offsets = [0, 128], sizes = [8, 64], strides = [1, 1]} : vector<8x256xf32> to vector<8x64xf32>
    %63 = math.tanh %62 : vector<8x64xf32>
    %64 = vector.extract_strided_slice %61 {offsets = [0, 64], sizes = [8, 64], strides = [1, 1]} : vector<8x256xf32> to vector<8x64xf32>
    %65 = arith.mulf %64, %46 : vector<8x64xf32>
    %66 = vector.extract_strided_slice %61 {offsets = [0, 0], sizes = [8, 64], strides = [1, 1]} : vector<8x256xf32> to vector<8x64xf32>
    %67 = arith.mulf %66, %63 : vector<8x64xf32>
    %68 = arith.addf %65, %67 : vector<8x64xf32>
    %69 = vector.extract_strided_slice %61 {offsets = [0, 192], sizes = [8, 64], strides = [1, 1]} : vector<8x256xf32> to vector<8x64xf32>
    %70 = math.tanh %68 : vector<8x64xf32>
    %71 = arith.mulf %69, %70 : vector<8x64xf32>
    %c3_i32 = arith.constant 3 : i32
    %c8_i32_23 = arith.constant 8 : i32
    %72 = arith.muli %c3_i32, %c8_i32_23 : i32
    %73 = tpu.assume_multiple %72, 8 : i32
    %74 = arith.index_cast %73 : i32 to index
    %c0_24 = arith.constant 0 : index
    %75 = vector.load %arg7[%74, %c0_24] : memref<400x256xf32, #tpu.memory_space<vmem>>, vector<8x256xf32>
    %c0_25 = arith.constant 0 : index
    %c0_26 = arith.constant 0 : index
    %76 = vector.load %arg2[%c0_25, %c0_26] : memref<64x256xf32, #tpu.memory_space<vmem>>, vector<64x256xf32>
    %cst_27 = arith.constant dense<0.000000e+00> : vector<8x256xf32>
    %77 = tpu.matmul %71, %76, %cst_27 {dimension_numbers = #tpu.dot_dimension_numbers<[1], [0], [0], [1], [0, 0, 1, 1], [], []>} : vector<8x64xf32>, vector<64x256xf32>, vector<8x256xf32> -> vector<8x256xf32>
    %78 = arith.addf %75, %77 : vector<8x256xf32>
    %79 = arith.negf %78 : vector<8x256xf32>
    %80 = math.exp %79 : vector<8x256xf32>
    %cst_28 = arith.constant 1.000000e+00 : f32
    %81 = vector.broadcast %cst_28 : f32 to vector<8x256xf32>
    %82 = arith.addf %81, %80 : vector<8x256xf32>
    %83 = arith.divf %81, %82 : vector<8x256xf32>
    %84 = vector.extract_strided_slice %78 {offsets = [0, 128], sizes = [8, 64], strides = [1, 1]} : vector<8x256xf32> to vector<8x64xf32>
    %85 = math.tanh %84 : vector<8x64xf32>
    %86 = vector.extract_strided_slice %83 {offsets = [0, 64], sizes = [8, 64], strides = [1, 1]} : vector<8x256xf32> to vector<8x64xf32>
    %87 = arith.mulf %86, %68 : vector<8x64xf32>
    %88 = vector.extract_strided_slice %83 {offsets = [0, 0], sizes = [8, 64], strides = [1, 1]} : vector<8x256xf32> to vector<8x64xf32>
    %89 = arith.mulf %88, %85 : vector<8x64xf32>
    %90 = arith.addf %87, %89 : vector<8x64xf32>
    %91 = vector.extract_strided_slice %83 {offsets = [0, 192], sizes = [8, 64], strides = [1, 1]} : vector<8x256xf32> to vector<8x64xf32>
    %92 = math.tanh %90 : vector<8x64xf32>
    %93 = arith.mulf %91, %92 : vector<8x64xf32>
    %c4_i32 = arith.constant 4 : i32
    %c8_i32_29 = arith.constant 8 : i32
    %94 = arith.muli %c4_i32, %c8_i32_29 : i32
    %95 = tpu.assume_multiple %94, 8 : i32
    %96 = arith.index_cast %95 : i32 to index
    %c0_30 = arith.constant 0 : index
    %97 = vector.load %arg7[%96, %c0_30] : memref<400x256xf32, #tpu.memory_space<vmem>>, vector<8x256xf32>
    %c0_31 = arith.constant 0 : index
    %c0_32 = arith.constant 0 : index
    %98 = vector.load %arg2[%c0_31, %c0_32] : memref<64x256xf32, #tpu.memory_space<vmem>>, vector<64x256xf32>
    %cst_33 = arith.constant dense<0.000000e+00> : vector<8x256xf32>
    %99 = tpu.matmul %93, %98, %cst_33 {dimension_numbers = #tpu.dot_dimension_numbers<[1], [0], [0], [1], [0, 0, 1, 1], [], []>} : vector<8x64xf32>, vector<64x256xf32>, vector<8x256xf32> -> vector<8x256xf32>
    %100 = arith.addf %97, %99 : vector<8x256xf32>
    %101 = arith.negf %100 : vector<8x256xf32>
    %102 = math.exp %101 : vector<8x256xf32>
    %cst_34 = arith.constant 1.000000e+00 : f32
    %103 = vector.broadcast %cst_34 : f32 to vector<8x256xf32>
    %104 = arith.addf %103, %102 : vector<8x256xf32>
    %105 = arith.divf %103, %104 : vector<8x256xf32>
    %106 = vector.extract_strided_slice %100 {offsets = [0, 128], sizes = [8, 64], strides = [1, 1]} : vector<8x256xf32> to vector<8x64xf32>
    %107 = math.tanh %106 : vector<8x64xf32>
    %108 = vector.extract_strided_slice %105 {offsets = [0, 64], sizes = [8, 64], strides = [1, 1]} : vector<8x256xf32> to vector<8x64xf32>
    %109 = arith.mulf %108, %90 : vector<8x64xf32>
    %110 = vector.extract_strided_slice %105 {offsets = [0, 0], sizes = [8, 64], strides = [1, 1]} : vector<8x256xf32> to vector<8x64xf32>
    %111 = arith.mulf %110, %107 : vector<8x64xf32>
    %112 = arith.addf %109, %111 : vector<8x64xf32>
    %113 = vector.extract_strided_slice %105 {offsets = [0, 192], sizes = [8, 64], strides = [1, 1]} : vector<8x256xf32> to vector<8x64xf32>
    %114 = math.tanh %112 : vector<8x64xf32>
    %115 = arith.mulf %113, %114 : vector<8x64xf32>
    %c5_i32 = arith.constant 5 : i32
    %c8_i32_35 = arith.constant 8 : i32
    %116 = arith.muli %c5_i32, %c8_i32_35 : i32
    %117 = tpu.assume_multiple %116, 8 : i32
    %118 = arith.index_cast %117 : i32 to index
    %c0_36 = arith.constant 0 : index
    %119 = vector.load %arg7[%118, %c0_36] : memref<400x256xf32, #tpu.memory_space<vmem>>, vector<8x256xf32>
    %c0_37 = arith.constant 0 : index
    %c0_38 = arith.constant 0 : index
    %120 = vector.load %arg2[%c0_37, %c0_38] : memref<64x256xf32, #tpu.memory_space<vmem>>, vector<64x256xf32>
    %cst_39 = arith.constant dense<0.000000e+00> : vector<8x256xf32>
    %121 = tpu.matmul %115, %120, %cst_39 {dimension_numbers = #tpu.dot_dimension_numbers<[1], [0], [0], [1], [0, 0, 1, 1], [], []>} : vector<8x64xf32>, vector<64x256xf32>, vector<8x256xf32> -> vector<8x256xf32>
    %122 = arith.addf %119, %121 : vector<8x256xf32>
    %123 = arith.negf %122 : vector<8x256xf32>
    %124 = math.exp %123 : vector<8x256xf32>
    %cst_40 = arith.constant 1.000000e+00 : f32
    %125 = vector.broadcast %cst_40 : f32 to vector<8x256xf32>
    %126 = arith.addf %125, %124 : vector<8x256xf32>
    %127 = arith.divf %125, %126 : vector<8x256xf32>
    %128 = vector.extract_strided_slice %122 {offsets = [0, 128], sizes = [8, 64], strides = [1, 1]} : vector<8x256xf32> to vector<8x64xf32>
    %129 = math.tanh %128 : vector<8x64xf32>
    %130 = vector.extract_strided_slice %127 {offsets = [0, 64], sizes = [8, 64], strides = [1, 1]} : vector<8x256xf32> to vector<8x64xf32>
    %131 = arith.mulf %130, %112 : vector<8x64xf32>
    %132 = vector.extract_strided_slice %127 {offsets = [0, 0], sizes = [8, 64], strides = [1, 1]} : vector<8x256xf32> to vector<8x64xf32>
    %133 = arith.mulf %132, %129 : vector<8x64xf32>
    %134 = arith.addf %131, %133 : vector<8x64xf32>
    %135 = vector.extract_strided_slice %127 {offsets = [0, 192], sizes = [8, 64], strides = [1, 1]} : vector<8x256xf32> to vector<8x64xf32>
    %136 = math.tanh %134 : vector<8x64xf32>
    %137 = arith.mulf %135, %136 : vector<8x64xf32>
    %c6_i32 = arith.constant 6 : i32
    %c8_i32_41 = arith.constant 8 : i32
    %138 = arith.muli %c6_i32, %c8_i32_41 : i32
    %139 = tpu.assume_multiple %138, 8 : i32
    %140 = arith.index_cast %139 : i32 to index
    %c0_42 = arith.constant 0 : index
    %141 = vector.load %arg7[%140, %c0_42] : memref<400x256xf32, #tpu.memory_space<vmem>>, vector<8x256xf32>
    %c0_43 = arith.constant 0 : index
    %c0_44 = arith.constant 0 : index
    %142 = vector.load %arg2[%c0_43, %c0_44] : memref<64x256xf32, #tpu.memory_space<vmem>>, vector<64x256xf32>
    %cst_45 = arith.constant dense<0.000000e+00> : vector<8x256xf32>
    %143 = tpu.matmul %137, %142, %cst_45 {dimension_numbers = #tpu.dot_dimension_numbers<[1], [0], [0], [1], [0, 0, 1, 1], [], []>} : vector<8x64xf32>, vector<64x256xf32>, vector<8x256xf32> -> vector<8x256xf32>
    %144 = arith.addf %141, %143 : vector<8x256xf32>
    %145 = arith.negf %144 : vector<8x256xf32>
    %146 = math.exp %145 : vector<8x256xf32>
    %cst_46 = arith.constant 1.000000e+00 : f32
    %147 = vector.broadcast %cst_46 : f32 to vector<8x256xf32>
    %148 = arith.addf %147, %146 : vector<8x256xf32>
    %149 = arith.divf %147, %148 : vector<8x256xf32>
    %150 = vector.extract_strided_slice %144 {offsets = [0, 128], sizes = [8, 64], strides = [1, 1]} : vector<8x256xf32> to vector<8x64xf32>
    %151 = math.tanh %150 : vector<8x64xf32>
    %152 = vector.extract_strided_slice %149 {offsets = [0, 64], sizes = [8, 64], strides = [1, 1]} : vector<8x256xf32> to vector<8x64xf32>
    %153 = arith.mulf %152, %134 : vector<8x64xf32>
    %154 = vector.extract_strided_slice %149 {offsets = [0, 0], sizes = [8, 64], strides = [1, 1]} : vector<8x256xf32> to vector<8x64xf32>
    %155 = arith.mulf %154, %151 : vector<8x64xf32>
    %156 = arith.addf %153, %155 : vector<8x64xf32>
    %157 = vector.extract_strided_slice %149 {offsets = [0, 192], sizes = [8, 64], strides = [1, 1]} : vector<8x256xf32> to vector<8x64xf32>
    %158 = math.tanh %156 : vector<8x64xf32>
    %159 = arith.mulf %157, %158 : vector<8x64xf32>
    %c7_i32 = arith.constant 7 : i32
    %c8_i32_47 = arith.constant 8 : i32
    %160 = arith.muli %c7_i32, %c8_i32_47 : i32
    %161 = tpu.assume_multiple %160, 8 : i32
    %162 = arith.index_cast %161 : i32 to index
    %c0_48 = arith.constant 0 : index
    %163 = vector.load %arg7[%162, %c0_48] : memref<400x256xf32, #tpu.memory_space<vmem>>, vector<8x256xf32>
    %c0_49 = arith.constant 0 : index
    %c0_50 = arith.constant 0 : index
    %164 = vector.load %arg2[%c0_49, %c0_50] : memref<64x256xf32, #tpu.memory_space<vmem>>, vector<64x256xf32>
    %cst_51 = arith.constant dense<0.000000e+00> : vector<8x256xf32>
    %165 = tpu.matmul %159, %164, %cst_51 {dimension_numbers = #tpu.dot_dimension_numbers<[1], [0], [0], [1], [0, 0, 1, 1], [], []>} : vector<8x64xf32>, vector<64x256xf32>, vector<8x256xf32> -> vector<8x256xf32>
    %166 = arith.addf %163, %165 : vector<8x256xf32>
    %167 = arith.negf %166 : vector<8x256xf32>
    %168 = math.exp %167 : vector<8x256xf32>
    %cst_52 = arith.constant 1.000000e+00 : f32
    %169 = vector.broadcast %cst_52 : f32 to vector<8x256xf32>
    %170 = arith.addf %169, %168 : vector<8x256xf32>
    %171 = arith.divf %169, %170 : vector<8x256xf32>
    %172 = vector.extract_strided_slice %166 {offsets = [0, 128], sizes = [8, 64], strides = [1, 1]} : vector<8x256xf32> to vector<8x64xf32>
    %173 = math.tanh %172 : vector<8x64xf32>
    %174 = vector.extract_strided_slice %171 {offsets = [0, 64], sizes = [8, 64], strides = [1, 1]} : vector<8x256xf32> to vector<8x64xf32>
    %175 = arith.mulf %174, %156 : vector<8x64xf32>
    %176 = vector.extract_strided_slice %171 {offsets = [0, 0], sizes = [8, 64], strides = [1, 1]} : vector<8x256xf32> to vector<8x64xf32>
    %177 = arith.mulf %176, %173 : vector<8x64xf32>
    %178 = arith.addf %175, %177 : vector<8x64xf32>
    %179 = vector.extract_strided_slice %171 {offsets = [0, 192], sizes = [8, 64], strides = [1, 1]} : vector<8x256xf32> to vector<8x64xf32>
    %180 = math.tanh %178 : vector<8x64xf32>
    %181 = arith.mulf %179, %180 : vector<8x64xf32>
    %c8_i32_53 = arith.constant 8 : i32
    %c8_i32_54 = arith.constant 8 : i32
    %182 = arith.muli %c8_i32_53, %c8_i32_54 : i32
    %183 = tpu.assume_multiple %182, 8 : i32
    %184 = arith.index_cast %183 : i32 to index
    %c0_55 = arith.constant 0 : index
    %185 = vector.load %arg7[%184, %c0_55] : memref<400x256xf32, #tpu.memory_space<vmem>>, vector<8x256xf32>
    %c0_56 = arith.constant 0 : index
    %c0_57 = arith.constant 0 : index
    %186 = vector.load %arg2[%c0_56, %c0_57] : memref<64x256xf32, #tpu.memory_space<vmem>>, vector<64x256xf32>
    %cst_58 = arith.constant dense<0.000000e+00> : vector<8x256xf32>
    %187 = tpu.matmul %181, %186, %cst_58 {dimension_numbers = #tpu.dot_dimension_numbers<[1], [0], [0], [1], [0, 0, 1, 1], [], []>} : vector<8x64xf32>, vector<64x256xf32>, vector<8x256xf32> -> vector<8x256xf32>
    %188 = arith.addf %185, %187 : vector<8x256xf32>
    %189 = arith.negf %188 : vector<8x256xf32>
    %190 = math.exp %189 : vector<8x256xf32>
    %cst_59 = arith.constant 1.000000e+00 : f32
    %191 = vector.broadcast %cst_59 : f32 to vector<8x256xf32>
    %192 = arith.addf %191, %190 : vector<8x256xf32>
    %193 = arith.divf %191, %192 : vector<8x256xf32>
    %194 = vector.extract_strided_slice %188 {offsets = [0, 128], sizes = [8, 64], strides = [1, 1]} : vector<8x256xf32> to vector<8x64xf32>
    %195 = math.tanh %194 : vector<8x64xf32>
    %196 = vector.extract_strided_slice %193 {offsets = [0, 64], sizes = [8, 64], strides = [1, 1]} : vector<8x256xf32> to vector<8x64xf32>
    %197 = arith.mulf %196, %178 : vector<8x64xf32>
    %198 = vector.extract_strided_slice %193 {offsets = [0, 0], sizes = [8, 64], strides = [1, 1]} : vector<8x256xf32> to vector<8x64xf32>
    %199 = arith.mulf %198, %195 : vector<8x64xf32>
    %200 = arith.addf %197, %199 : vector<8x64xf32>
    %201 = vector.extract_strided_slice %193 {offsets = [0, 192], sizes = [8, 64], strides = [1, 1]} : vector<8x256xf32> to vector<8x64xf32>
    %202 = math.tanh %200 : vector<8x64xf32>
    %203 = arith.mulf %201, %202 : vector<8x64xf32>
    %c9_i32 = arith.constant 9 : i32
    %c8_i32_60 = arith.constant 8 : i32
    %204 = arith.muli %c9_i32, %c8_i32_60 : i32
    %205 = tpu.assume_multiple %204, 8 : i32
    %206 = arith.index_cast %205 : i32 to index
    %c0_61 = arith.constant 0 : index
    %207 = vector.load %arg7[%206, %c0_61] : memref<400x256xf32, #tpu.memory_space<vmem>>, vector<8x256xf32>
    %c0_62 = arith.constant 0 : index
    %c0_63 = arith.constant 0 : index
    %208 = vector.load %arg2[%c0_62, %c0_63] : memref<64x256xf32, #tpu.memory_space<vmem>>, vector<64x256xf32>
    %cst_64 = arith.constant dense<0.000000e+00> : vector<8x256xf32>
    %209 = tpu.matmul %203, %208, %cst_64 {dimension_numbers = #tpu.dot_dimension_numbers<[1], [0], [0], [1], [0, 0, 1, 1], [], []>} : vector<8x64xf32>, vector<64x256xf32>, vector<8x256xf32> -> vector<8x256xf32>
    %210 = arith.addf %207, %209 : vector<8x256xf32>
    %211 = arith.negf %210 : vector<8x256xf32>
    %212 = math.exp %211 : vector<8x256xf32>
    %cst_65 = arith.constant 1.000000e+00 : f32
    %213 = vector.broadcast %cst_65 : f32 to vector<8x256xf32>
    %214 = arith.addf %213, %212 : vector<8x256xf32>
    %215 = arith.divf %213, %214 : vector<8x256xf32>
    %216 = vector.extract_strided_slice %210 {offsets = [0, 128], sizes = [8, 64], strides = [1, 1]} : vector<8x256xf32> to vector<8x64xf32>
    %217 = math.tanh %216 : vector<8x64xf32>
    %218 = vector.extract_strided_slice %215 {offsets = [0, 64], sizes = [8, 64], strides = [1, 1]} : vector<8x256xf32> to vector<8x64xf32>
    %219 = arith.mulf %218, %200 : vector<8x64xf32>
    %220 = vector.extract_strided_slice %215 {offsets = [0, 0], sizes = [8, 64], strides = [1, 1]} : vector<8x256xf32> to vector<8x64xf32>
    %221 = arith.mulf %220, %217 : vector<8x64xf32>
    %222 = arith.addf %219, %221 : vector<8x64xf32>
    %223 = vector.extract_strided_slice %215 {offsets = [0, 192], sizes = [8, 64], strides = [1, 1]} : vector<8x256xf32> to vector<8x64xf32>
    %224 = math.tanh %222 : vector<8x64xf32>
    %225 = arith.mulf %223, %224 : vector<8x64xf32>
    %c10_i32 = arith.constant 10 : i32
    %c8_i32_66 = arith.constant 8 : i32
    %226 = arith.muli %c10_i32, %c8_i32_66 : i32
    %227 = tpu.assume_multiple %226, 8 : i32
    %228 = arith.index_cast %227 : i32 to index
    %c0_67 = arith.constant 0 : index
    %229 = vector.load %arg7[%228, %c0_67] : memref<400x256xf32, #tpu.memory_space<vmem>>, vector<8x256xf32>
    %c0_68 = arith.constant 0 : index
    %c0_69 = arith.constant 0 : index
    %230 = vector.load %arg2[%c0_68, %c0_69] : memref<64x256xf32, #tpu.memory_space<vmem>>, vector<64x256xf32>
    %cst_70 = arith.constant dense<0.000000e+00> : vector<8x256xf32>
    %231 = tpu.matmul %225, %230, %cst_70 {dimension_numbers = #tpu.dot_dimension_numbers<[1], [0], [0], [1], [0, 0, 1, 1], [], []>} : vector<8x64xf32>, vector<64x256xf32>, vector<8x256xf32> -> vector<8x256xf32>
    %232 = arith.addf %229, %231 : vector<8x256xf32>
    %233 = arith.negf %232 : vector<8x256xf32>
    %234 = math.exp %233 : vector<8x256xf32>
    %cst_71 = arith.constant 1.000000e+00 : f32
    %235 = vector.broadcast %cst_71 : f32 to vector<8x256xf32>
    %236 = arith.addf %235, %234 : vector<8x256xf32>
    %237 = arith.divf %235, %236 : vector<8x256xf32>
    %238 = vector.extract_strided_slice %232 {offsets = [0, 128], sizes = [8, 64], strides = [1, 1]} : vector<8x256xf32> to vector<8x64xf32>
    %239 = math.tanh %238 : vector<8x64xf32>
    %240 = vector.extract_strided_slice %237 {offsets = [0, 64], sizes = [8, 64], strides = [1, 1]} : vector<8x256xf32> to vector<8x64xf32>
    %241 = arith.mulf %240, %222 : vector<8x64xf32>
    %242 = vector.extract_strided_slice %237 {offsets = [0, 0], sizes = [8, 64], strides = [1, 1]} : vector<8x256xf32> to vector<8x64xf32>
    %243 = arith.mulf %242, %239 : vector<8x64xf32>
    %244 = arith.addf %241, %243 : vector<8x64xf32>
    %245 = vector.extract_strided_slice %237 {offsets = [0, 192], sizes = [8, 64], strides = [1, 1]} : vector<8x256xf32> to vector<8x64xf32>
    %246 = math.tanh %244 : vector<8x64xf32>
    %247 = arith.mulf %245, %246 : vector<8x64xf32>
    %c11_i32 = arith.constant 11 : i32
    %c8_i32_72 = arith.constant 8 : i32
    %248 = arith.muli %c11_i32, %c8_i32_72 : i32
    %249 = tpu.assume_multiple %248, 8 : i32
    %250 = arith.index_cast %249 : i32 to index
    %c0_73 = arith.constant 0 : index
    %251 = vector.load %arg7[%250, %c0_73] : memref<400x256xf32, #tpu.memory_space<vmem>>, vector<8x256xf32>
    %c0_74 = arith.constant 0 : index
    %c0_75 = arith.constant 0 : index
    %252 = vector.load %arg2[%c0_74, %c0_75] : memref<64x256xf32, #tpu.memory_space<vmem>>, vector<64x256xf32>
    %cst_76 = arith.constant dense<0.000000e+00> : vector<8x256xf32>
    %253 = tpu.matmul %247, %252, %cst_76 {dimension_numbers = #tpu.dot_dimension_numbers<[1], [0], [0], [1], [0, 0, 1, 1], [], []>} : vector<8x64xf32>, vector<64x256xf32>, vector<8x256xf32> -> vector<8x256xf32>
    %254 = arith.addf %251, %253 : vector<8x256xf32>
    %255 = arith.negf %254 : vector<8x256xf32>
    %256 = math.exp %255 : vector<8x256xf32>
    %cst_77 = arith.constant 1.000000e+00 : f32
    %257 = vector.broadcast %cst_77 : f32 to vector<8x256xf32>
    %258 = arith.addf %257, %256 : vector<8x256xf32>
    %259 = arith.divf %257, %258 : vector<8x256xf32>
    %260 = vector.extract_strided_slice %254 {offsets = [0, 128], sizes = [8, 64], strides = [1, 1]} : vector<8x256xf32> to vector<8x64xf32>
    %261 = math.tanh %260 : vector<8x64xf32>
    %262 = vector.extract_strided_slice %259 {offsets = [0, 64], sizes = [8, 64], strides = [1, 1]} : vector<8x256xf32> to vector<8x64xf32>
    %263 = arith.mulf %262, %244 : vector<8x64xf32>
    %264 = vector.extract_strided_slice %259 {offsets = [0, 0], sizes = [8, 64], strides = [1, 1]} : vector<8x256xf32> to vector<8x64xf32>
    %265 = arith.mulf %264, %261 : vector<8x64xf32>
    %266 = arith.addf %263, %265 : vector<8x64xf32>
    %267 = vector.extract_strided_slice %259 {offsets = [0, 192], sizes = [8, 64], strides = [1, 1]} : vector<8x256xf32> to vector<8x64xf32>
    %268 = math.tanh %266 : vector<8x64xf32>
    %269 = arith.mulf %267, %268 : vector<8x64xf32>
    %c12_i32 = arith.constant 12 : i32
    %c8_i32_78 = arith.constant 8 : i32
    %270 = arith.muli %c12_i32, %c8_i32_78 : i32
    %271 = tpu.assume_multiple %270, 8 : i32
    %272 = arith.index_cast %271 : i32 to index
    %c0_79 = arith.constant 0 : index
    %273 = vector.load %arg7[%272, %c0_79] : memref<400x256xf32, #tpu.memory_space<vmem>>, vector<8x256xf32>
    %c0_80 = arith.constant 0 : index
    %c0_81 = arith.constant 0 : index
    %274 = vector.load %arg2[%c0_80, %c0_81] : memref<64x256xf32, #tpu.memory_space<vmem>>, vector<64x256xf32>
    %cst_82 = arith.constant dense<0.000000e+00> : vector<8x256xf32>
    %275 = tpu.matmul %269, %274, %cst_82 {dimension_numbers = #tpu.dot_dimension_numbers<[1], [0], [0], [1], [0, 0, 1, 1], [], []>} : vector<8x64xf32>, vector<64x256xf32>, vector<8x256xf32> -> vector<8x256xf32>
    %276 = arith.addf %273, %275 : vector<8x256xf32>
    %277 = arith.negf %276 : vector<8x256xf32>
    %278 = math.exp %277 : vector<8x256xf32>
    %cst_83 = arith.constant 1.000000e+00 : f32
    %279 = vector.broadcast %cst_83 : f32 to vector<8x256xf32>
    %280 = arith.addf %279, %278 : vector<8x256xf32>
    %281 = arith.divf %279, %280 : vector<8x256xf32>
    %282 = vector.extract_strided_slice %276 {offsets = [0, 128], sizes = [8, 64], strides = [1, 1]} : vector<8x256xf32> to vector<8x64xf32>
    %283 = math.tanh %282 : vector<8x64xf32>
    %284 = vector.extract_strided_slice %281 {offsets = [0, 64], sizes = [8, 64], strides = [1, 1]} : vector<8x256xf32> to vector<8x64xf32>
    %285 = arith.mulf %284, %266 : vector<8x64xf32>
    %286 = vector.extract_strided_slice %281 {offsets = [0, 0], sizes = [8, 64], strides = [1, 1]} : vector<8x256xf32> to vector<8x64xf32>
    %287 = arith.mulf %286, %283 : vector<8x64xf32>
    %288 = arith.addf %285, %287 : vector<8x64xf32>
    %289 = vector.extract_strided_slice %281 {offsets = [0, 192], sizes = [8, 64], strides = [1, 1]} : vector<8x256xf32> to vector<8x64xf32>
    %290 = math.tanh %288 : vector<8x64xf32>
    %291 = arith.mulf %289, %290 : vector<8x64xf32>
    %c13_i32 = arith.constant 13 : i32
    %c8_i32_84 = arith.constant 8 : i32
    %292 = arith.muli %c13_i32, %c8_i32_84 : i32
    %293 = tpu.assume_multiple %292, 8 : i32
    %294 = arith.index_cast %293 : i32 to index
    %c0_85 = arith.constant 0 : index
    %295 = vector.load %arg7[%294, %c0_85] : memref<400x256xf32, #tpu.memory_space<vmem>>, vector<8x256xf32>
    %c0_86 = arith.constant 0 : index
    %c0_87 = arith.constant 0 : index
    %296 = vector.load %arg2[%c0_86, %c0_87] : memref<64x256xf32, #tpu.memory_space<vmem>>, vector<64x256xf32>
    %cst_88 = arith.constant dense<0.000000e+00> : vector<8x256xf32>
    %297 = tpu.matmul %291, %296, %cst_88 {dimension_numbers = #tpu.dot_dimension_numbers<[1], [0], [0], [1], [0, 0, 1, 1], [], []>} : vector<8x64xf32>, vector<64x256xf32>, vector<8x256xf32> -> vector<8x256xf32>
    %298 = arith.addf %295, %297 : vector<8x256xf32>
    %299 = arith.negf %298 : vector<8x256xf32>
    %300 = math.exp %299 : vector<8x256xf32>
    %cst_89 = arith.constant 1.000000e+00 : f32
    %301 = vector.broadcast %cst_89 : f32 to vector<8x256xf32>
    %302 = arith.addf %301, %300 : vector<8x256xf32>
    %303 = arith.divf %301, %302 : vector<8x256xf32>
    %304 = vector.extract_strided_slice %298 {offsets = [0, 128], sizes = [8, 64], strides = [1, 1]} : vector<8x256xf32> to vector<8x64xf32>
    %305 = math.tanh %304 : vector<8x64xf32>
    %306 = vector.extract_strided_slice %303 {offsets = [0, 64], sizes = [8, 64], strides = [1, 1]} : vector<8x256xf32> to vector<8x64xf32>
    %307 = arith.mulf %306, %288 : vector<8x64xf32>
    %308 = vector.extract_strided_slice %303 {offsets = [0, 0], sizes = [8, 64], strides = [1, 1]} : vector<8x256xf32> to vector<8x64xf32>
    %309 = arith.mulf %308, %305 : vector<8x64xf32>
    %310 = arith.addf %307, %309 : vector<8x64xf32>
    %311 = vector.extract_strided_slice %303 {offsets = [0, 192], sizes = [8, 64], strides = [1, 1]} : vector<8x256xf32> to vector<8x64xf32>
    %312 = math.tanh %310 : vector<8x64xf32>
    %313 = arith.mulf %311, %312 : vector<8x64xf32>
    %c14_i32 = arith.constant 14 : i32
    %c8_i32_90 = arith.constant 8 : i32
    %314 = arith.muli %c14_i32, %c8_i32_90 : i32
    %315 = tpu.assume_multiple %314, 8 : i32
    %316 = arith.index_cast %315 : i32 to index
    %c0_91 = arith.constant 0 : index
    %317 = vector.load %arg7[%316, %c0_91] : memref<400x256xf32, #tpu.memory_space<vmem>>, vector<8x256xf32>
    %c0_92 = arith.constant 0 : index
    %c0_93 = arith.constant 0 : index
    %318 = vector.load %arg2[%c0_92, %c0_93] : memref<64x256xf32, #tpu.memory_space<vmem>>, vector<64x256xf32>
    %cst_94 = arith.constant dense<0.000000e+00> : vector<8x256xf32>
    %319 = tpu.matmul %313, %318, %cst_94 {dimension_numbers = #tpu.dot_dimension_numbers<[1], [0], [0], [1], [0, 0, 1, 1], [], []>} : vector<8x64xf32>, vector<64x256xf32>, vector<8x256xf32> -> vector<8x256xf32>
    %320 = arith.addf %317, %319 : vector<8x256xf32>
    %321 = arith.negf %320 : vector<8x256xf32>
    %322 = math.exp %321 : vector<8x256xf32>
    %cst_95 = arith.constant 1.000000e+00 : f32
    %323 = vector.broadcast %cst_95 : f32 to vector<8x256xf32>
    %324 = arith.addf %323, %322 : vector<8x256xf32>
    %325 = arith.divf %323, %324 : vector<8x256xf32>
    %326 = vector.extract_strided_slice %320 {offsets = [0, 128], sizes = [8, 64], strides = [1, 1]} : vector<8x256xf32> to vector<8x64xf32>
    %327 = math.tanh %326 : vector<8x64xf32>
    %328 = vector.extract_strided_slice %325 {offsets = [0, 64], sizes = [8, 64], strides = [1, 1]} : vector<8x256xf32> to vector<8x64xf32>
    %329 = arith.mulf %328, %310 : vector<8x64xf32>
    %330 = vector.extract_strided_slice %325 {offsets = [0, 0], sizes = [8, 64], strides = [1, 1]} : vector<8x256xf32> to vector<8x64xf32>
    %331 = arith.mulf %330, %327 : vector<8x64xf32>
    %332 = arith.addf %329, %331 : vector<8x64xf32>
    %333 = vector.extract_strided_slice %325 {offsets = [0, 192], sizes = [8, 64], strides = [1, 1]} : vector<8x256xf32> to vector<8x64xf32>
    %334 = math.tanh %332 : vector<8x64xf32>
    %335 = arith.mulf %333, %334 : vector<8x64xf32>
    %c15_i32 = arith.constant 15 : i32
    %c8_i32_96 = arith.constant 8 : i32
    %336 = arith.muli %c15_i32, %c8_i32_96 : i32
    %337 = tpu.assume_multiple %336, 8 : i32
    %338 = arith.index_cast %337 : i32 to index
    %c0_97 = arith.constant 0 : index
    %339 = vector.load %arg7[%338, %c0_97] : memref<400x256xf32, #tpu.memory_space<vmem>>, vector<8x256xf32>
    %c0_98 = arith.constant 0 : index
    %c0_99 = arith.constant 0 : index
    %340 = vector.load %arg2[%c0_98, %c0_99] : memref<64x256xf32, #tpu.memory_space<vmem>>, vector<64x256xf32>
    %cst_100 = arith.constant dense<0.000000e+00> : vector<8x256xf32>
    %341 = tpu.matmul %335, %340, %cst_100 {dimension_numbers = #tpu.dot_dimension_numbers<[1], [0], [0], [1], [0, 0, 1, 1], [], []>} : vector<8x64xf32>, vector<64x256xf32>, vector<8x256xf32> -> vector<8x256xf32>
    %342 = arith.addf %339, %341 : vector<8x256xf32>
    %343 = arith.negf %342 : vector<8x256xf32>
    %344 = math.exp %343 : vector<8x256xf32>
    %cst_101 = arith.constant 1.000000e+00 : f32
    %345 = vector.broadcast %cst_101 : f32 to vector<8x256xf32>
    %346 = arith.addf %345, %344 : vector<8x256xf32>
    %347 = arith.divf %345, %346 : vector<8x256xf32>
    %348 = vector.extract_strided_slice %342 {offsets = [0, 128], sizes = [8, 64], strides = [1, 1]} : vector<8x256xf32> to vector<8x64xf32>
    %349 = math.tanh %348 : vector<8x64xf32>
    %350 = vector.extract_strided_slice %347 {offsets = [0, 64], sizes = [8, 64], strides = [1, 1]} : vector<8x256xf32> to vector<8x64xf32>
    %351 = arith.mulf %350, %332 : vector<8x64xf32>
    %352 = vector.extract_strided_slice %347 {offsets = [0, 0], sizes = [8, 64], strides = [1, 1]} : vector<8x256xf32> to vector<8x64xf32>
    %353 = arith.mulf %352, %349 : vector<8x64xf32>
    %354 = arith.addf %351, %353 : vector<8x64xf32>
    %355 = vector.extract_strided_slice %347 {offsets = [0, 192], sizes = [8, 64], strides = [1, 1]} : vector<8x256xf32> to vector<8x64xf32>
    %356 = math.tanh %354 : vector<8x64xf32>
    %357 = arith.mulf %355, %356 : vector<8x64xf32>
    %c16_i32 = arith.constant 16 : i32
    %c8_i32_102 = arith.constant 8 : i32
    %358 = arith.muli %c16_i32, %c8_i32_102 : i32
    %359 = tpu.assume_multiple %358, 8 : i32
    %360 = arith.index_cast %359 : i32 to index
    %c0_103 = arith.constant 0 : index
    %361 = vector.load %arg7[%360, %c0_103] : memref<400x256xf32, #tpu.memory_space<vmem>>, vector<8x256xf32>
    %c0_104 = arith.constant 0 : index
    %c0_105 = arith.constant 0 : index
    %362 = vector.load %arg2[%c0_104, %c0_105] : memref<64x256xf32, #tpu.memory_space<vmem>>, vector<64x256xf32>
    %cst_106 = arith.constant dense<0.000000e+00> : vector<8x256xf32>
    %363 = tpu.matmul %357, %362, %cst_106 {dimension_numbers = #tpu.dot_dimension_numbers<[1], [0], [0], [1], [0, 0, 1, 1], [], []>} : vector<8x64xf32>, vector<64x256xf32>, vector<8x256xf32> -> vector<8x256xf32>
    %364 = arith.addf %361, %363 : vector<8x256xf32>
    %365 = arith.negf %364 : vector<8x256xf32>
    %366 = math.exp %365 : vector<8x256xf32>
    %cst_107 = arith.constant 1.000000e+00 : f32
    %367 = vector.broadcast %cst_107 : f32 to vector<8x256xf32>
    %368 = arith.addf %367, %366 : vector<8x256xf32>
    %369 = arith.divf %367, %368 : vector<8x256xf32>
    %370 = vector.extract_strided_slice %364 {offsets = [0, 128], sizes = [8, 64], strides = [1, 1]} : vector<8x256xf32> to vector<8x64xf32>
    %371 = math.tanh %370 : vector<8x64xf32>
    %372 = vector.extract_strided_slice %369 {offsets = [0, 64], sizes = [8, 64], strides = [1, 1]} : vector<8x256xf32> to vector<8x64xf32>
    %373 = arith.mulf %372, %354 : vector<8x64xf32>
    %374 = vector.extract_strided_slice %369 {offsets = [0, 0], sizes = [8, 64], strides = [1, 1]} : vector<8x256xf32> to vector<8x64xf32>
    %375 = arith.mulf %374, %371 : vector<8x64xf32>
    %376 = arith.addf %373, %375 : vector<8x64xf32>
    %377 = vector.extract_strided_slice %369 {offsets = [0, 192], sizes = [8, 64], strides = [1, 1]} : vector<8x256xf32> to vector<8x64xf32>
    %378 = math.tanh %376 : vector<8x64xf32>
    %379 = arith.mulf %377, %378 : vector<8x64xf32>
    %c17_i32 = arith.constant 17 : i32
    %c8_i32_108 = arith.constant 8 : i32
    %380 = arith.muli %c17_i32, %c8_i32_108 : i32
    %381 = tpu.assume_multiple %380, 8 : i32
    %382 = arith.index_cast %381 : i32 to index
    %c0_109 = arith.constant 0 : index
    %383 = vector.load %arg7[%382, %c0_109] : memref<400x256xf32, #tpu.memory_space<vmem>>, vector<8x256xf32>
    %c0_110 = arith.constant 0 : index
    %c0_111 = arith.constant 0 : index
    %384 = vector.load %arg2[%c0_110, %c0_111] : memref<64x256xf32, #tpu.memory_space<vmem>>, vector<64x256xf32>
    %cst_112 = arith.constant dense<0.000000e+00> : vector<8x256xf32>
    %385 = tpu.matmul %379, %384, %cst_112 {dimension_numbers = #tpu.dot_dimension_numbers<[1], [0], [0], [1], [0, 0, 1, 1], [], []>} : vector<8x64xf32>, vector<64x256xf32>, vector<8x256xf32> -> vector<8x256xf32>
    %386 = arith.addf %383, %385 : vector<8x256xf32>
    %387 = arith.negf %386 : vector<8x256xf32>
    %388 = math.exp %387 : vector<8x256xf32>
    %cst_113 = arith.constant 1.000000e+00 : f32
    %389 = vector.broadcast %cst_113 : f32 to vector<8x256xf32>
    %390 = arith.addf %389, %388 : vector<8x256xf32>
    %391 = arith.divf %389, %390 : vector<8x256xf32>
    %392 = vector.extract_strided_slice %386 {offsets = [0, 128], sizes = [8, 64], strides = [1, 1]} : vector<8x256xf32> to vector<8x64xf32>
    %393 = math.tanh %392 : vector<8x64xf32>
    %394 = vector.extract_strided_slice %391 {offsets = [0, 64], sizes = [8, 64], strides = [1, 1]} : vector<8x256xf32> to vector<8x64xf32>
    %395 = arith.mulf %394, %376 : vector<8x64xf32>
    %396 = vector.extract_strided_slice %391 {offsets = [0, 0], sizes = [8, 64], strides = [1, 1]} : vector<8x256xf32> to vector<8x64xf32>
    %397 = arith.mulf %396, %393 : vector<8x64xf32>
    %398 = arith.addf %395, %397 : vector<8x64xf32>
    %399 = vector.extract_strided_slice %391 {offsets = [0, 192], sizes = [8, 64], strides = [1, 1]} : vector<8x256xf32> to vector<8x64xf32>
    %400 = math.tanh %398 : vector<8x64xf32>
    %401 = arith.mulf %399, %400 : vector<8x64xf32>
    %c18_i32 = arith.constant 18 : i32
    %c8_i32_114 = arith.constant 8 : i32
    %402 = arith.muli %c18_i32, %c8_i32_114 : i32
    %403 = tpu.assume_multiple %402, 8 : i32
    %404 = arith.index_cast %403 : i32 to index
    %c0_115 = arith.constant 0 : index
    %405 = vector.load %arg7[%404, %c0_115] : memref<400x256xf32, #tpu.memory_space<vmem>>, vector<8x256xf32>
    %c0_116 = arith.constant 0 : index
    %c0_117 = arith.constant 0 : index
    %406 = vector.load %arg2[%c0_116, %c0_117] : memref<64x256xf32, #tpu.memory_space<vmem>>, vector<64x256xf32>
    %cst_118 = arith.constant dense<0.000000e+00> : vector<8x256xf32>
    %407 = tpu.matmul %401, %406, %cst_118 {dimension_numbers = #tpu.dot_dimension_numbers<[1], [0], [0], [1], [0, 0, 1, 1], [], []>} : vector<8x64xf32>, vector<64x256xf32>, vector<8x256xf32> -> vector<8x256xf32>
    %408 = arith.addf %405, %407 : vector<8x256xf32>
    %409 = arith.negf %408 : vector<8x256xf32>
    %410 = math.exp %409 : vector<8x256xf32>
    %cst_119 = arith.constant 1.000000e+00 : f32
    %411 = vector.broadcast %cst_119 : f32 to vector<8x256xf32>
    %412 = arith.addf %411, %410 : vector<8x256xf32>
    %413 = arith.divf %411, %412 : vector<8x256xf32>
    %414 = vector.extract_strided_slice %408 {offsets = [0, 128], sizes = [8, 64], strides = [1, 1]} : vector<8x256xf32> to vector<8x64xf32>
    %415 = math.tanh %414 : vector<8x64xf32>
    %416 = vector.extract_strided_slice %413 {offsets = [0, 64], sizes = [8, 64], strides = [1, 1]} : vector<8x256xf32> to vector<8x64xf32>
    %417 = arith.mulf %416, %398 : vector<8x64xf32>
    %418 = vector.extract_strided_slice %413 {offsets = [0, 0], sizes = [8, 64], strides = [1, 1]} : vector<8x256xf32> to vector<8x64xf32>
    %419 = arith.mulf %418, %415 : vector<8x64xf32>
    %420 = arith.addf %417, %419 : vector<8x64xf32>
    %421 = vector.extract_strided_slice %413 {offsets = [0, 192], sizes = [8, 64], strides = [1, 1]} : vector<8x256xf32> to vector<8x64xf32>
    %422 = math.tanh %420 : vector<8x64xf32>
    %423 = arith.mulf %421, %422 : vector<8x64xf32>
    %c19_i32 = arith.constant 19 : i32
    %c8_i32_120 = arith.constant 8 : i32
    %424 = arith.muli %c19_i32, %c8_i32_120 : i32
    %425 = tpu.assume_multiple %424, 8 : i32
    %426 = arith.index_cast %425 : i32 to index
    %c0_121 = arith.constant 0 : index
    %427 = vector.load %arg7[%426, %c0_121] : memref<400x256xf32, #tpu.memory_space<vmem>>, vector<8x256xf32>
    %c0_122 = arith.constant 0 : index
    %c0_123 = arith.constant 0 : index
    %428 = vector.load %arg2[%c0_122, %c0_123] : memref<64x256xf32, #tpu.memory_space<vmem>>, vector<64x256xf32>
    %cst_124 = arith.constant dense<0.000000e+00> : vector<8x256xf32>
    %429 = tpu.matmul %423, %428, %cst_124 {dimension_numbers = #tpu.dot_dimension_numbers<[1], [0], [0], [1], [0, 0, 1, 1], [], []>} : vector<8x64xf32>, vector<64x256xf32>, vector<8x256xf32> -> vector<8x256xf32>
    %430 = arith.addf %427, %429 : vector<8x256xf32>
    %431 = arith.negf %430 : vector<8x256xf32>
    %432 = math.exp %431 : vector<8x256xf32>
    %cst_125 = arith.constant 1.000000e+00 : f32
    %433 = vector.broadcast %cst_125 : f32 to vector<8x256xf32>
    %434 = arith.addf %433, %432 : vector<8x256xf32>
    %435 = arith.divf %433, %434 : vector<8x256xf32>
    %436 = vector.extract_strided_slice %430 {offsets = [0, 128], sizes = [8, 64], strides = [1, 1]} : vector<8x256xf32> to vector<8x64xf32>
    %437 = math.tanh %436 : vector<8x64xf32>
    %438 = vector.extract_strided_slice %435 {offsets = [0, 64], sizes = [8, 64], strides = [1, 1]} : vector<8x256xf32> to vector<8x64xf32>
    %439 = arith.mulf %438, %420 : vector<8x64xf32>
    %440 = vector.extract_strided_slice %435 {offsets = [0, 0], sizes = [8, 64], strides = [1, 1]} : vector<8x256xf32> to vector<8x64xf32>
    %441 = arith.mulf %440, %437 : vector<8x64xf32>
    %442 = arith.addf %439, %441 : vector<8x64xf32>
    %443 = vector.extract_strided_slice %435 {offsets = [0, 192], sizes = [8, 64], strides = [1, 1]} : vector<8x256xf32> to vector<8x64xf32>
    %444 = math.tanh %442 : vector<8x64xf32>
    %445 = arith.mulf %443, %444 : vector<8x64xf32>
    %c20_i32 = arith.constant 20 : i32
    %c8_i32_126 = arith.constant 8 : i32
    %446 = arith.muli %c20_i32, %c8_i32_126 : i32
    %447 = tpu.assume_multiple %446, 8 : i32
    %448 = arith.index_cast %447 : i32 to index
    %c0_127 = arith.constant 0 : index
    %449 = vector.load %arg7[%448, %c0_127] : memref<400x256xf32, #tpu.memory_space<vmem>>, vector<8x256xf32>
    %c0_128 = arith.constant 0 : index
    %c0_129 = arith.constant 0 : index
    %450 = vector.load %arg2[%c0_128, %c0_129] : memref<64x256xf32, #tpu.memory_space<vmem>>, vector<64x256xf32>
    %cst_130 = arith.constant dense<0.000000e+00> : vector<8x256xf32>
    %451 = tpu.matmul %445, %450, %cst_130 {dimension_numbers = #tpu.dot_dimension_numbers<[1], [0], [0], [1], [0, 0, 1, 1], [], []>} : vector<8x64xf32>, vector<64x256xf32>, vector<8x256xf32> -> vector<8x256xf32>
    %452 = arith.addf %449, %451 : vector<8x256xf32>
    %453 = arith.negf %452 : vector<8x256xf32>
    %454 = math.exp %453 : vector<8x256xf32>
    %cst_131 = arith.constant 1.000000e+00 : f32
    %455 = vector.broadcast %cst_131 : f32 to vector<8x256xf32>
    %456 = arith.addf %455, %454 : vector<8x256xf32>
    %457 = arith.divf %455, %456 : vector<8x256xf32>
    %458 = vector.extract_strided_slice %452 {offsets = [0, 128], sizes = [8, 64], strides = [1, 1]} : vector<8x256xf32> to vector<8x64xf32>
    %459 = math.tanh %458 : vector<8x64xf32>
    %460 = vector.extract_strided_slice %457 {offsets = [0, 64], sizes = [8, 64], strides = [1, 1]} : vector<8x256xf32> to vector<8x64xf32>
    %461 = arith.mulf %460, %442 : vector<8x64xf32>
    %462 = vector.extract_strided_slice %457 {offsets = [0, 0], sizes = [8, 64], strides = [1, 1]} : vector<8x256xf32> to vector<8x64xf32>
    %463 = arith.mulf %462, %459 : vector<8x64xf32>
    %464 = arith.addf %461, %463 : vector<8x64xf32>
    %465 = vector.extract_strided_slice %457 {offsets = [0, 192], sizes = [8, 64], strides = [1, 1]} : vector<8x256xf32> to vector<8x64xf32>
    %466 = math.tanh %464 : vector<8x64xf32>
    %467 = arith.mulf %465, %466 : vector<8x64xf32>
    %c21_i32 = arith.constant 21 : i32
    %c8_i32_132 = arith.constant 8 : i32
    %468 = arith.muli %c21_i32, %c8_i32_132 : i32
    %469 = tpu.assume_multiple %468, 8 : i32
    %470 = arith.index_cast %469 : i32 to index
    %c0_133 = arith.constant 0 : index
    %471 = vector.load %arg7[%470, %c0_133] : memref<400x256xf32, #tpu.memory_space<vmem>>, vector<8x256xf32>
    %c0_134 = arith.constant 0 : index
    %c0_135 = arith.constant 0 : index
    %472 = vector.load %arg2[%c0_134, %c0_135] : memref<64x256xf32, #tpu.memory_space<vmem>>, vector<64x256xf32>
    %cst_136 = arith.constant dense<0.000000e+00> : vector<8x256xf32>
    %473 = tpu.matmul %467, %472, %cst_136 {dimension_numbers = #tpu.dot_dimension_numbers<[1], [0], [0], [1], [0, 0, 1, 1], [], []>} : vector<8x64xf32>, vector<64x256xf32>, vector<8x256xf32> -> vector<8x256xf32>
    %474 = arith.addf %471, %473 : vector<8x256xf32>
    %475 = arith.negf %474 : vector<8x256xf32>
    %476 = math.exp %475 : vector<8x256xf32>
    %cst_137 = arith.constant 1.000000e+00 : f32
    %477 = vector.broadcast %cst_137 : f32 to vector<8x256xf32>
    %478 = arith.addf %477, %476 : vector<8x256xf32>
    %479 = arith.divf %477, %478 : vector<8x256xf32>
    %480 = vector.extract_strided_slice %474 {offsets = [0, 128], sizes = [8, 64], strides = [1, 1]} : vector<8x256xf32> to vector<8x64xf32>
    %481 = math.tanh %480 : vector<8x64xf32>
    %482 = vector.extract_strided_slice %479 {offsets = [0, 64], sizes = [8, 64], strides = [1, 1]} : vector<8x256xf32> to vector<8x64xf32>
    %483 = arith.mulf %482, %464 : vector<8x64xf32>
    %484 = vector.extract_strided_slice %479 {offsets = [0, 0], sizes = [8, 64], strides = [1, 1]} : vector<8x256xf32> to vector<8x64xf32>
    %485 = arith.mulf %484, %481 : vector<8x64xf32>
    %486 = arith.addf %483, %485 : vector<8x64xf32>
    %487 = vector.extract_strided_slice %479 {offsets = [0, 192], sizes = [8, 64], strides = [1, 1]} : vector<8x256xf32> to vector<8x64xf32>
    %488 = math.tanh %486 : vector<8x64xf32>
    %489 = arith.mulf %487, %488 : vector<8x64xf32>
    %c22_i32 = arith.constant 22 : i32
    %c8_i32_138 = arith.constant 8 : i32
    %490 = arith.muli %c22_i32, %c8_i32_138 : i32
    %491 = tpu.assume_multiple %490, 8 : i32
    %492 = arith.index_cast %491 : i32 to index
    %c0_139 = arith.constant 0 : index
    %493 = vector.load %arg7[%492, %c0_139] : memref<400x256xf32, #tpu.memory_space<vmem>>, vector<8x256xf32>
    %c0_140 = arith.constant 0 : index
    %c0_141 = arith.constant 0 : index
    %494 = vector.load %arg2[%c0_140, %c0_141] : memref<64x256xf32, #tpu.memory_space<vmem>>, vector<64x256xf32>
    %cst_142 = arith.constant dense<0.000000e+00> : vector<8x256xf32>
    %495 = tpu.matmul %489, %494, %cst_142 {dimension_numbers = #tpu.dot_dimension_numbers<[1], [0], [0], [1], [0, 0, 1, 1], [], []>} : vector<8x64xf32>, vector<64x256xf32>, vector<8x256xf32> -> vector<8x256xf32>
    %496 = arith.addf %493, %495 : vector<8x256xf32>
    %497 = arith.negf %496 : vector<8x256xf32>
    %498 = math.exp %497 : vector<8x256xf32>
    %cst_143 = arith.constant 1.000000e+00 : f32
    %499 = vector.broadcast %cst_143 : f32 to vector<8x256xf32>
    %500 = arith.addf %499, %498 : vector<8x256xf32>
    %501 = arith.divf %499, %500 : vector<8x256xf32>
    %502 = vector.extract_strided_slice %496 {offsets = [0, 128], sizes = [8, 64], strides = [1, 1]} : vector<8x256xf32> to vector<8x64xf32>
    %503 = math.tanh %502 : vector<8x64xf32>
    %504 = vector.extract_strided_slice %501 {offsets = [0, 64], sizes = [8, 64], strides = [1, 1]} : vector<8x256xf32> to vector<8x64xf32>
    %505 = arith.mulf %504, %486 : vector<8x64xf32>
    %506 = vector.extract_strided_slice %501 {offsets = [0, 0], sizes = [8, 64], strides = [1, 1]} : vector<8x256xf32> to vector<8x64xf32>
    %507 = arith.mulf %506, %503 : vector<8x64xf32>
    %508 = arith.addf %505, %507 : vector<8x64xf32>
    %509 = vector.extract_strided_slice %501 {offsets = [0, 192], sizes = [8, 64], strides = [1, 1]} : vector<8x256xf32> to vector<8x64xf32>
    %510 = math.tanh %508 : vector<8x64xf32>
    %511 = arith.mulf %509, %510 : vector<8x64xf32>
    %c23_i32 = arith.constant 23 : i32
    %c8_i32_144 = arith.constant 8 : i32
    %512 = arith.muli %c23_i32, %c8_i32_144 : i32
    %513 = tpu.assume_multiple %512, 8 : i32
    %514 = arith.index_cast %513 : i32 to index
    %c0_145 = arith.constant 0 : index
    %515 = vector.load %arg7[%514, %c0_145] : memref<400x256xf32, #tpu.memory_space<vmem>>, vector<8x256xf32>
    %c0_146 = arith.constant 0 : index
    %c0_147 = arith.constant 0 : index
    %516 = vector.load %arg2[%c0_146, %c0_147] : memref<64x256xf32, #tpu.memory_space<vmem>>, vector<64x256xf32>
    %cst_148 = arith.constant dense<0.000000e+00> : vector<8x256xf32>
    %517 = tpu.matmul %511, %516, %cst_148 {dimension_numbers = #tpu.dot_dimension_numbers<[1], [0], [0], [1], [0, 0, 1, 1], [], []>} : vector<8x64xf32>, vector<64x256xf32>, vector<8x256xf32> -> vector<8x256xf32>
    %518 = arith.addf %515, %517 : vector<8x256xf32>
    %519 = arith.negf %518 : vector<8x256xf32>
    %520 = math.exp %519 : vector<8x256xf32>
    %cst_149 = arith.constant 1.000000e+00 : f32
    %521 = vector.broadcast %cst_149 : f32 to vector<8x256xf32>
    %522 = arith.addf %521, %520 : vector<8x256xf32>
    %523 = arith.divf %521, %522 : vector<8x256xf32>
    %524 = vector.extract_strided_slice %518 {offsets = [0, 128], sizes = [8, 64], strides = [1, 1]} : vector<8x256xf32> to vector<8x64xf32>
    %525 = math.tanh %524 : vector<8x64xf32>
    %526 = vector.extract_strided_slice %523 {offsets = [0, 64], sizes = [8, 64], strides = [1, 1]} : vector<8x256xf32> to vector<8x64xf32>
    %527 = arith.mulf %526, %508 : vector<8x64xf32>
    %528 = vector.extract_strided_slice %523 {offsets = [0, 0], sizes = [8, 64], strides = [1, 1]} : vector<8x256xf32> to vector<8x64xf32>
    %529 = arith.mulf %528, %525 : vector<8x64xf32>
    %530 = arith.addf %527, %529 : vector<8x64xf32>
    %531 = vector.extract_strided_slice %523 {offsets = [0, 192], sizes = [8, 64], strides = [1, 1]} : vector<8x256xf32> to vector<8x64xf32>
    %532 = math.tanh %530 : vector<8x64xf32>
    %533 = arith.mulf %531, %532 : vector<8x64xf32>
    %c24_i32 = arith.constant 24 : i32
    %c8_i32_150 = arith.constant 8 : i32
    %534 = arith.muli %c24_i32, %c8_i32_150 : i32
    %535 = tpu.assume_multiple %534, 8 : i32
    %536 = arith.index_cast %535 : i32 to index
    %c0_151 = arith.constant 0 : index
    %537 = vector.load %arg7[%536, %c0_151] : memref<400x256xf32, #tpu.memory_space<vmem>>, vector<8x256xf32>
    %c0_152 = arith.constant 0 : index
    %c0_153 = arith.constant 0 : index
    %538 = vector.load %arg2[%c0_152, %c0_153] : memref<64x256xf32, #tpu.memory_space<vmem>>, vector<64x256xf32>
    %cst_154 = arith.constant dense<0.000000e+00> : vector<8x256xf32>
    %539 = tpu.matmul %533, %538, %cst_154 {dimension_numbers = #tpu.dot_dimension_numbers<[1], [0], [0], [1], [0, 0, 1, 1], [], []>} : vector<8x64xf32>, vector<64x256xf32>, vector<8x256xf32> -> vector<8x256xf32>
    %540 = arith.addf %537, %539 : vector<8x256xf32>
    %541 = arith.negf %540 : vector<8x256xf32>
    %542 = math.exp %541 : vector<8x256xf32>
    %cst_155 = arith.constant 1.000000e+00 : f32
    %543 = vector.broadcast %cst_155 : f32 to vector<8x256xf32>
    %544 = arith.addf %543, %542 : vector<8x256xf32>
    %545 = arith.divf %543, %544 : vector<8x256xf32>
    %546 = vector.extract_strided_slice %540 {offsets = [0, 128], sizes = [8, 64], strides = [1, 1]} : vector<8x256xf32> to vector<8x64xf32>
    %547 = math.tanh %546 : vector<8x64xf32>
    %548 = vector.extract_strided_slice %545 {offsets = [0, 64], sizes = [8, 64], strides = [1, 1]} : vector<8x256xf32> to vector<8x64xf32>
    %549 = arith.mulf %548, %530 : vector<8x64xf32>
    %550 = vector.extract_strided_slice %545 {offsets = [0, 0], sizes = [8, 64], strides = [1, 1]} : vector<8x256xf32> to vector<8x64xf32>
    %551 = arith.mulf %550, %547 : vector<8x64xf32>
    %552 = arith.addf %549, %551 : vector<8x64xf32>
    %553 = vector.extract_strided_slice %545 {offsets = [0, 192], sizes = [8, 64], strides = [1, 1]} : vector<8x256xf32> to vector<8x64xf32>
    %554 = math.tanh %552 : vector<8x64xf32>
    %555 = arith.mulf %553, %554 : vector<8x64xf32>
    %c25_i32 = arith.constant 25 : i32
    %c8_i32_156 = arith.constant 8 : i32
    %556 = arith.muli %c25_i32, %c8_i32_156 : i32
    %557 = tpu.assume_multiple %556, 8 : i32
    %558 = arith.index_cast %557 : i32 to index
    %c0_157 = arith.constant 0 : index
    %559 = vector.load %arg7[%558, %c0_157] : memref<400x256xf32, #tpu.memory_space<vmem>>, vector<8x256xf32>
    %c0_158 = arith.constant 0 : index
    %c0_159 = arith.constant 0 : index
    %560 = vector.load %arg2[%c0_158, %c0_159] : memref<64x256xf32, #tpu.memory_space<vmem>>, vector<64x256xf32>
    %cst_160 = arith.constant dense<0.000000e+00> : vector<8x256xf32>
    %561 = tpu.matmul %555, %560, %cst_160 {dimension_numbers = #tpu.dot_dimension_numbers<[1], [0], [0], [1], [0, 0, 1, 1], [], []>} : vector<8x64xf32>, vector<64x256xf32>, vector<8x256xf32> -> vector<8x256xf32>
    %562 = arith.addf %559, %561 : vector<8x256xf32>
    %563 = arith.negf %562 : vector<8x256xf32>
    %564 = math.exp %563 : vector<8x256xf32>
    %cst_161 = arith.constant 1.000000e+00 : f32
    %565 = vector.broadcast %cst_161 : f32 to vector<8x256xf32>
    %566 = arith.addf %565, %564 : vector<8x256xf32>
    %567 = arith.divf %565, %566 : vector<8x256xf32>
    %568 = vector.extract_strided_slice %562 {offsets = [0, 128], sizes = [8, 64], strides = [1, 1]} : vector<8x256xf32> to vector<8x64xf32>
    %569 = math.tanh %568 : vector<8x64xf32>
    %570 = vector.extract_strided_slice %567 {offsets = [0, 64], sizes = [8, 64], strides = [1, 1]} : vector<8x256xf32> to vector<8x64xf32>
    %571 = arith.mulf %570, %552 : vector<8x64xf32>
    %572 = vector.extract_strided_slice %567 {offsets = [0, 0], sizes = [8, 64], strides = [1, 1]} : vector<8x256xf32> to vector<8x64xf32>
    %573 = arith.mulf %572, %569 : vector<8x64xf32>
    %574 = arith.addf %571, %573 : vector<8x64xf32>
    %575 = vector.extract_strided_slice %567 {offsets = [0, 192], sizes = [8, 64], strides = [1, 1]} : vector<8x256xf32> to vector<8x64xf32>
    %576 = math.tanh %574 : vector<8x64xf32>
    %577 = arith.mulf %575, %576 : vector<8x64xf32>
    %c26_i32 = arith.constant 26 : i32
    %c8_i32_162 = arith.constant 8 : i32
    %578 = arith.muli %c26_i32, %c8_i32_162 : i32
    %579 = tpu.assume_multiple %578, 8 : i32
    %580 = arith.index_cast %579 : i32 to index
    %c0_163 = arith.constant 0 : index
    %581 = vector.load %arg7[%580, %c0_163] : memref<400x256xf32, #tpu.memory_space<vmem>>, vector<8x256xf32>
    %c0_164 = arith.constant 0 : index
    %c0_165 = arith.constant 0 : index
    %582 = vector.load %arg2[%c0_164, %c0_165] : memref<64x256xf32, #tpu.memory_space<vmem>>, vector<64x256xf32>
    %cst_166 = arith.constant dense<0.000000e+00> : vector<8x256xf32>
    %583 = tpu.matmul %577, %582, %cst_166 {dimension_numbers = #tpu.dot_dimension_numbers<[1], [0], [0], [1], [0, 0, 1, 1], [], []>} : vector<8x64xf32>, vector<64x256xf32>, vector<8x256xf32> -> vector<8x256xf32>
    %584 = arith.addf %581, %583 : vector<8x256xf32>
    %585 = arith.negf %584 : vector<8x256xf32>
    %586 = math.exp %585 : vector<8x256xf32>
    %cst_167 = arith.constant 1.000000e+00 : f32
    %587 = vector.broadcast %cst_167 : f32 to vector<8x256xf32>
    %588 = arith.addf %587, %586 : vector<8x256xf32>
    %589 = arith.divf %587, %588 : vector<8x256xf32>
    %590 = vector.extract_strided_slice %584 {offsets = [0, 128], sizes = [8, 64], strides = [1, 1]} : vector<8x256xf32> to vector<8x64xf32>
    %591 = math.tanh %590 : vector<8x64xf32>
    %592 = vector.extract_strided_slice %589 {offsets = [0, 64], sizes = [8, 64], strides = [1, 1]} : vector<8x256xf32> to vector<8x64xf32>
    %593 = arith.mulf %592, %574 : vector<8x64xf32>
    %594 = vector.extract_strided_slice %589 {offsets = [0, 0], sizes = [8, 64], strides = [1, 1]} : vector<8x256xf32> to vector<8x64xf32>
    %595 = arith.mulf %594, %591 : vector<8x64xf32>
    %596 = arith.addf %593, %595 : vector<8x64xf32>
    %597 = vector.extract_strided_slice %589 {offsets = [0, 192], sizes = [8, 64], strides = [1, 1]} : vector<8x256xf32> to vector<8x64xf32>
    %598 = math.tanh %596 : vector<8x64xf32>
    %599 = arith.mulf %597, %598 : vector<8x64xf32>
    %c27_i32 = arith.constant 27 : i32
    %c8_i32_168 = arith.constant 8 : i32
    %600 = arith.muli %c27_i32, %c8_i32_168 : i32
    %601 = tpu.assume_multiple %600, 8 : i32
    %602 = arith.index_cast %601 : i32 to index
    %c0_169 = arith.constant 0 : index
    %603 = vector.load %arg7[%602, %c0_169] : memref<400x256xf32, #tpu.memory_space<vmem>>, vector<8x256xf32>
    %c0_170 = arith.constant 0 : index
    %c0_171 = arith.constant 0 : index
    %604 = vector.load %arg2[%c0_170, %c0_171] : memref<64x256xf32, #tpu.memory_space<vmem>>, vector<64x256xf32>
    %cst_172 = arith.constant dense<0.000000e+00> : vector<8x256xf32>
    %605 = tpu.matmul %599, %604, %cst_172 {dimension_numbers = #tpu.dot_dimension_numbers<[1], [0], [0], [1], [0, 0, 1, 1], [], []>} : vector<8x64xf32>, vector<64x256xf32>, vector<8x256xf32> -> vector<8x256xf32>
    %606 = arith.addf %603, %605 : vector<8x256xf32>
    %607 = arith.negf %606 : vector<8x256xf32>
    %608 = math.exp %607 : vector<8x256xf32>
    %cst_173 = arith.constant 1.000000e+00 : f32
    %609 = vector.broadcast %cst_173 : f32 to vector<8x256xf32>
    %610 = arith.addf %609, %608 : vector<8x256xf32>
    %611 = arith.divf %609, %610 : vector<8x256xf32>
    %612 = vector.extract_strided_slice %606 {offsets = [0, 128], sizes = [8, 64], strides = [1, 1]} : vector<8x256xf32> to vector<8x64xf32>
    %613 = math.tanh %612 : vector<8x64xf32>
    %614 = vector.extract_strided_slice %611 {offsets = [0, 64], sizes = [8, 64], strides = [1, 1]} : vector<8x256xf32> to vector<8x64xf32>
    %615 = arith.mulf %614, %596 : vector<8x64xf32>
    %616 = vector.extract_strided_slice %611 {offsets = [0, 0], sizes = [8, 64], strides = [1, 1]} : vector<8x256xf32> to vector<8x64xf32>
    %617 = arith.mulf %616, %613 : vector<8x64xf32>
    %618 = arith.addf %615, %617 : vector<8x64xf32>
    %619 = vector.extract_strided_slice %611 {offsets = [0, 192], sizes = [8, 64], strides = [1, 1]} : vector<8x256xf32> to vector<8x64xf32>
    %620 = math.tanh %618 : vector<8x64xf32>
    %621 = arith.mulf %619, %620 : vector<8x64xf32>
    %c28_i32 = arith.constant 28 : i32
    %c8_i32_174 = arith.constant 8 : i32
    %622 = arith.muli %c28_i32, %c8_i32_174 : i32
    %623 = tpu.assume_multiple %622, 8 : i32
    %624 = arith.index_cast %623 : i32 to index
    %c0_175 = arith.constant 0 : index
    %625 = vector.load %arg7[%624, %c0_175] : memref<400x256xf32, #tpu.memory_space<vmem>>, vector<8x256xf32>
    %c0_176 = arith.constant 0 : index
    %c0_177 = arith.constant 0 : index
    %626 = vector.load %arg2[%c0_176, %c0_177] : memref<64x256xf32, #tpu.memory_space<vmem>>, vector<64x256xf32>
    %cst_178 = arith.constant dense<0.000000e+00> : vector<8x256xf32>
    %627 = tpu.matmul %621, %626, %cst_178 {dimension_numbers = #tpu.dot_dimension_numbers<[1], [0], [0], [1], [0, 0, 1, 1], [], []>} : vector<8x64xf32>, vector<64x256xf32>, vector<8x256xf32> -> vector<8x256xf32>
    %628 = arith.addf %625, %627 : vector<8x256xf32>
    %629 = arith.negf %628 : vector<8x256xf32>
    %630 = math.exp %629 : vector<8x256xf32>
    %cst_179 = arith.constant 1.000000e+00 : f32
    %631 = vector.broadcast %cst_179 : f32 to vector<8x256xf32>
    %632 = arith.addf %631, %630 : vector<8x256xf32>
    %633 = arith.divf %631, %632 : vector<8x256xf32>
    %634 = vector.extract_strided_slice %628 {offsets = [0, 128], sizes = [8, 64], strides = [1, 1]} : vector<8x256xf32> to vector<8x64xf32>
    %635 = math.tanh %634 : vector<8x64xf32>
    %636 = vector.extract_strided_slice %633 {offsets = [0, 64], sizes = [8, 64], strides = [1, 1]} : vector<8x256xf32> to vector<8x64xf32>
    %637 = arith.mulf %636, %618 : vector<8x64xf32>
    %638 = vector.extract_strided_slice %633 {offsets = [0, 0], sizes = [8, 64], strides = [1, 1]} : vector<8x256xf32> to vector<8x64xf32>
    %639 = arith.mulf %638, %635 : vector<8x64xf32>
    %640 = arith.addf %637, %639 : vector<8x64xf32>
    %641 = vector.extract_strided_slice %633 {offsets = [0, 192], sizes = [8, 64], strides = [1, 1]} : vector<8x256xf32> to vector<8x64xf32>
    %642 = math.tanh %640 : vector<8x64xf32>
    %643 = arith.mulf %641, %642 : vector<8x64xf32>
    %c29_i32 = arith.constant 29 : i32
    %c8_i32_180 = arith.constant 8 : i32
    %644 = arith.muli %c29_i32, %c8_i32_180 : i32
    %645 = tpu.assume_multiple %644, 8 : i32
    %646 = arith.index_cast %645 : i32 to index
    %c0_181 = arith.constant 0 : index
    %647 = vector.load %arg7[%646, %c0_181] : memref<400x256xf32, #tpu.memory_space<vmem>>, vector<8x256xf32>
    %c0_182 = arith.constant 0 : index
    %c0_183 = arith.constant 0 : index
    %648 = vector.load %arg2[%c0_182, %c0_183] : memref<64x256xf32, #tpu.memory_space<vmem>>, vector<64x256xf32>
    %cst_184 = arith.constant dense<0.000000e+00> : vector<8x256xf32>
    %649 = tpu.matmul %643, %648, %cst_184 {dimension_numbers = #tpu.dot_dimension_numbers<[1], [0], [0], [1], [0, 0, 1, 1], [], []>} : vector<8x64xf32>, vector<64x256xf32>, vector<8x256xf32> -> vector<8x256xf32>
    %650 = arith.addf %647, %649 : vector<8x256xf32>
    %651 = arith.negf %650 : vector<8x256xf32>
    %652 = math.exp %651 : vector<8x256xf32>
    %cst_185 = arith.constant 1.000000e+00 : f32
    %653 = vector.broadcast %cst_185 : f32 to vector<8x256xf32>
    %654 = arith.addf %653, %652 : vector<8x256xf32>
    %655 = arith.divf %653, %654 : vector<8x256xf32>
    %656 = vector.extract_strided_slice %650 {offsets = [0, 128], sizes = [8, 64], strides = [1, 1]} : vector<8x256xf32> to vector<8x64xf32>
    %657 = math.tanh %656 : vector<8x64xf32>
    %658 = vector.extract_strided_slice %655 {offsets = [0, 64], sizes = [8, 64], strides = [1, 1]} : vector<8x256xf32> to vector<8x64xf32>
    %659 = arith.mulf %658, %640 : vector<8x64xf32>
    %660 = vector.extract_strided_slice %655 {offsets = [0, 0], sizes = [8, 64], strides = [1, 1]} : vector<8x256xf32> to vector<8x64xf32>
    %661 = arith.mulf %660, %657 : vector<8x64xf32>
    %662 = arith.addf %659, %661 : vector<8x64xf32>
    %663 = vector.extract_strided_slice %655 {offsets = [0, 192], sizes = [8, 64], strides = [1, 1]} : vector<8x256xf32> to vector<8x64xf32>
    %664 = math.tanh %662 : vector<8x64xf32>
    %665 = arith.mulf %663, %664 : vector<8x64xf32>
    %c30_i32 = arith.constant 30 : i32
    %c8_i32_186 = arith.constant 8 : i32
    %666 = arith.muli %c30_i32, %c8_i32_186 : i32
    %667 = tpu.assume_multiple %666, 8 : i32
    %668 = arith.index_cast %667 : i32 to index
    %c0_187 = arith.constant 0 : index
    %669 = vector.load %arg7[%668, %c0_187] : memref<400x256xf32, #tpu.memory_space<vmem>>, vector<8x256xf32>
    %c0_188 = arith.constant 0 : index
    %c0_189 = arith.constant 0 : index
    %670 = vector.load %arg2[%c0_188, %c0_189] : memref<64x256xf32, #tpu.memory_space<vmem>>, vector<64x256xf32>
    %cst_190 = arith.constant dense<0.000000e+00> : vector<8x256xf32>
    %671 = tpu.matmul %665, %670, %cst_190 {dimension_numbers = #tpu.dot_dimension_numbers<[1], [0], [0], [1], [0, 0, 1, 1], [], []>} : vector<8x64xf32>, vector<64x256xf32>, vector<8x256xf32> -> vector<8x256xf32>
    %672 = arith.addf %669, %671 : vector<8x256xf32>
    %673 = arith.negf %672 : vector<8x256xf32>
    %674 = math.exp %673 : vector<8x256xf32>
    %cst_191 = arith.constant 1.000000e+00 : f32
    %675 = vector.broadcast %cst_191 : f32 to vector<8x256xf32>
    %676 = arith.addf %675, %674 : vector<8x256xf32>
    %677 = arith.divf %675, %676 : vector<8x256xf32>
    %678 = vector.extract_strided_slice %672 {offsets = [0, 128], sizes = [8, 64], strides = [1, 1]} : vector<8x256xf32> to vector<8x64xf32>
    %679 = math.tanh %678 : vector<8x64xf32>
    %680 = vector.extract_strided_slice %677 {offsets = [0, 64], sizes = [8, 64], strides = [1, 1]} : vector<8x256xf32> to vector<8x64xf32>
    %681 = arith.mulf %680, %662 : vector<8x64xf32>
    %682 = vector.extract_strided_slice %677 {offsets = [0, 0], sizes = [8, 64], strides = [1, 1]} : vector<8x256xf32> to vector<8x64xf32>
    %683 = arith.mulf %682, %679 : vector<8x64xf32>
    %684 = arith.addf %681, %683 : vector<8x64xf32>
    %685 = vector.extract_strided_slice %677 {offsets = [0, 192], sizes = [8, 64], strides = [1, 1]} : vector<8x256xf32> to vector<8x64xf32>
    %686 = math.tanh %684 : vector<8x64xf32>
    %687 = arith.mulf %685, %686 : vector<8x64xf32>
    %c31_i32 = arith.constant 31 : i32
    %c8_i32_192 = arith.constant 8 : i32
    %688 = arith.muli %c31_i32, %c8_i32_192 : i32
    %689 = tpu.assume_multiple %688, 8 : i32
    %690 = arith.index_cast %689 : i32 to index
    %c0_193 = arith.constant 0 : index
    %691 = vector.load %arg7[%690, %c0_193] : memref<400x256xf32, #tpu.memory_space<vmem>>, vector<8x256xf32>
    %c0_194 = arith.constant 0 : index
    %c0_195 = arith.constant 0 : index
    %692 = vector.load %arg2[%c0_194, %c0_195] : memref<64x256xf32, #tpu.memory_space<vmem>>, vector<64x256xf32>
    %cst_196 = arith.constant dense<0.000000e+00> : vector<8x256xf32>
    %693 = tpu.matmul %687, %692, %cst_196 {dimension_numbers = #tpu.dot_dimension_numbers<[1], [0], [0], [1], [0, 0, 1, 1], [], []>} : vector<8x64xf32>, vector<64x256xf32>, vector<8x256xf32> -> vector<8x256xf32>
    %694 = arith.addf %691, %693 : vector<8x256xf32>
    %695 = arith.negf %694 : vector<8x256xf32>
    %696 = math.exp %695 : vector<8x256xf32>
    %cst_197 = arith.constant 1.000000e+00 : f32
    %697 = vector.broadcast %cst_197 : f32 to vector<8x256xf32>
    %698 = arith.addf %697, %696 : vector<8x256xf32>
    %699 = arith.divf %697, %698 : vector<8x256xf32>
    %700 = vector.extract_strided_slice %694 {offsets = [0, 128], sizes = [8, 64], strides = [1, 1]} : vector<8x256xf32> to vector<8x64xf32>
    %701 = math.tanh %700 : vector<8x64xf32>
    %702 = vector.extract_strided_slice %699 {offsets = [0, 64], sizes = [8, 64], strides = [1, 1]} : vector<8x256xf32> to vector<8x64xf32>
    %703 = arith.mulf %702, %684 : vector<8x64xf32>
    %704 = vector.extract_strided_slice %699 {offsets = [0, 0], sizes = [8, 64], strides = [1, 1]} : vector<8x256xf32> to vector<8x64xf32>
    %705 = arith.mulf %704, %701 : vector<8x64xf32>
    %706 = arith.addf %703, %705 : vector<8x64xf32>
    %707 = vector.extract_strided_slice %699 {offsets = [0, 192], sizes = [8, 64], strides = [1, 1]} : vector<8x256xf32> to vector<8x64xf32>
    %708 = math.tanh %706 : vector<8x64xf32>
    %709 = arith.mulf %707, %708 : vector<8x64xf32>
    %c32_i32 = arith.constant 32 : i32
    %c8_i32_198 = arith.constant 8 : i32
    %710 = arith.muli %c32_i32, %c8_i32_198 : i32
    %711 = tpu.assume_multiple %710, 8 : i32
    %712 = arith.index_cast %711 : i32 to index
    %c0_199 = arith.constant 0 : index
    %713 = vector.load %arg7[%712, %c0_199] : memref<400x256xf32, #tpu.memory_space<vmem>>, vector<8x256xf32>
    %c0_200 = arith.constant 0 : index
    %c0_201 = arith.constant 0 : index
    %714 = vector.load %arg2[%c0_200, %c0_201] : memref<64x256xf32, #tpu.memory_space<vmem>>, vector<64x256xf32>
    %cst_202 = arith.constant dense<0.000000e+00> : vector<8x256xf32>
    %715 = tpu.matmul %709, %714, %cst_202 {dimension_numbers = #tpu.dot_dimension_numbers<[1], [0], [0], [1], [0, 0, 1, 1], [], []>} : vector<8x64xf32>, vector<64x256xf32>, vector<8x256xf32> -> vector<8x256xf32>
    %716 = arith.addf %713, %715 : vector<8x256xf32>
    %717 = arith.negf %716 : vector<8x256xf32>
    %718 = math.exp %717 : vector<8x256xf32>
    %cst_203 = arith.constant 1.000000e+00 : f32
    %719 = vector.broadcast %cst_203 : f32 to vector<8x256xf32>
    %720 = arith.addf %719, %718 : vector<8x256xf32>
    %721 = arith.divf %719, %720 : vector<8x256xf32>
    %722 = vector.extract_strided_slice %716 {offsets = [0, 128], sizes = [8, 64], strides = [1, 1]} : vector<8x256xf32> to vector<8x64xf32>
    %723 = math.tanh %722 : vector<8x64xf32>
    %724 = vector.extract_strided_slice %721 {offsets = [0, 64], sizes = [8, 64], strides = [1, 1]} : vector<8x256xf32> to vector<8x64xf32>
    %725 = arith.mulf %724, %706 : vector<8x64xf32>
    %726 = vector.extract_strided_slice %721 {offsets = [0, 0], sizes = [8, 64], strides = [1, 1]} : vector<8x256xf32> to vector<8x64xf32>
    %727 = arith.mulf %726, %723 : vector<8x64xf32>
    %728 = arith.addf %725, %727 : vector<8x64xf32>
    %729 = vector.extract_strided_slice %721 {offsets = [0, 192], sizes = [8, 64], strides = [1, 1]} : vector<8x256xf32> to vector<8x64xf32>
    %730 = math.tanh %728 : vector<8x64xf32>
    %731 = arith.mulf %729, %730 : vector<8x64xf32>
    %c33_i32 = arith.constant 33 : i32
    %c8_i32_204 = arith.constant 8 : i32
    %732 = arith.muli %c33_i32, %c8_i32_204 : i32
    %733 = tpu.assume_multiple %732, 8 : i32
    %734 = arith.index_cast %733 : i32 to index
    %c0_205 = arith.constant 0 : index
    %735 = vector.load %arg7[%734, %c0_205] : memref<400x256xf32, #tpu.memory_space<vmem>>, vector<8x256xf32>
    %c0_206 = arith.constant 0 : index
    %c0_207 = arith.constant 0 : index
    %736 = vector.load %arg2[%c0_206, %c0_207] : memref<64x256xf32, #tpu.memory_space<vmem>>, vector<64x256xf32>
    %cst_208 = arith.constant dense<0.000000e+00> : vector<8x256xf32>
    %737 = tpu.matmul %731, %736, %cst_208 {dimension_numbers = #tpu.dot_dimension_numbers<[1], [0], [0], [1], [0, 0, 1, 1], [], []>} : vector<8x64xf32>, vector<64x256xf32>, vector<8x256xf32> -> vector<8x256xf32>
    %738 = arith.addf %735, %737 : vector<8x256xf32>
    %739 = arith.negf %738 : vector<8x256xf32>
    %740 = math.exp %739 : vector<8x256xf32>
    %cst_209 = arith.constant 1.000000e+00 : f32
    %741 = vector.broadcast %cst_209 : f32 to vector<8x256xf32>
    %742 = arith.addf %741, %740 : vector<8x256xf32>
    %743 = arith.divf %741, %742 : vector<8x256xf32>
    %744 = vector.extract_strided_slice %738 {offsets = [0, 128], sizes = [8, 64], strides = [1, 1]} : vector<8x256xf32> to vector<8x64xf32>
    %745 = math.tanh %744 : vector<8x64xf32>
    %746 = vector.extract_strided_slice %743 {offsets = [0, 64], sizes = [8, 64], strides = [1, 1]} : vector<8x256xf32> to vector<8x64xf32>
    %747 = arith.mulf %746, %728 : vector<8x64xf32>
    %748 = vector.extract_strided_slice %743 {offsets = [0, 0], sizes = [8, 64], strides = [1, 1]} : vector<8x256xf32> to vector<8x64xf32>
    %749 = arith.mulf %748, %745 : vector<8x64xf32>
    %750 = arith.addf %747, %749 : vector<8x64xf32>
    %751 = vector.extract_strided_slice %743 {offsets = [0, 192], sizes = [8, 64], strides = [1, 1]} : vector<8x256xf32> to vector<8x64xf32>
    %752 = math.tanh %750 : vector<8x64xf32>
    %753 = arith.mulf %751, %752 : vector<8x64xf32>
    %c34_i32 = arith.constant 34 : i32
    %c8_i32_210 = arith.constant 8 : i32
    %754 = arith.muli %c34_i32, %c8_i32_210 : i32
    %755 = tpu.assume_multiple %754, 8 : i32
    %756 = arith.index_cast %755 : i32 to index
    %c0_211 = arith.constant 0 : index
    %757 = vector.load %arg7[%756, %c0_211] : memref<400x256xf32, #tpu.memory_space<vmem>>, vector<8x256xf32>
    %c0_212 = arith.constant 0 : index
    %c0_213 = arith.constant 0 : index
    %758 = vector.load %arg2[%c0_212, %c0_213] : memref<64x256xf32, #tpu.memory_space<vmem>>, vector<64x256xf32>
    %cst_214 = arith.constant dense<0.000000e+00> : vector<8x256xf32>
    %759 = tpu.matmul %753, %758, %cst_214 {dimension_numbers = #tpu.dot_dimension_numbers<[1], [0], [0], [1], [0, 0, 1, 1], [], []>} : vector<8x64xf32>, vector<64x256xf32>, vector<8x256xf32> -> vector<8x256xf32>
    %760 = arith.addf %757, %759 : vector<8x256xf32>
    %761 = arith.negf %760 : vector<8x256xf32>
    %762 = math.exp %761 : vector<8x256xf32>
    %cst_215 = arith.constant 1.000000e+00 : f32
    %763 = vector.broadcast %cst_215 : f32 to vector<8x256xf32>
    %764 = arith.addf %763, %762 : vector<8x256xf32>
    %765 = arith.divf %763, %764 : vector<8x256xf32>
    %766 = vector.extract_strided_slice %760 {offsets = [0, 128], sizes = [8, 64], strides = [1, 1]} : vector<8x256xf32> to vector<8x64xf32>
    %767 = math.tanh %766 : vector<8x64xf32>
    %768 = vector.extract_strided_slice %765 {offsets = [0, 64], sizes = [8, 64], strides = [1, 1]} : vector<8x256xf32> to vector<8x64xf32>
    %769 = arith.mulf %768, %750 : vector<8x64xf32>
    %770 = vector.extract_strided_slice %765 {offsets = [0, 0], sizes = [8, 64], strides = [1, 1]} : vector<8x256xf32> to vector<8x64xf32>
    %771 = arith.mulf %770, %767 : vector<8x64xf32>
    %772 = arith.addf %769, %771 : vector<8x64xf32>
    %773 = vector.extract_strided_slice %765 {offsets = [0, 192], sizes = [8, 64], strides = [1, 1]} : vector<8x256xf32> to vector<8x64xf32>
    %774 = math.tanh %772 : vector<8x64xf32>
    %775 = arith.mulf %773, %774 : vector<8x64xf32>
    %c35_i32 = arith.constant 35 : i32
    %c8_i32_216 = arith.constant 8 : i32
    %776 = arith.muli %c35_i32, %c8_i32_216 : i32
    %777 = tpu.assume_multiple %776, 8 : i32
    %778 = arith.index_cast %777 : i32 to index
    %c0_217 = arith.constant 0 : index
    %779 = vector.load %arg7[%778, %c0_217] : memref<400x256xf32, #tpu.memory_space<vmem>>, vector<8x256xf32>
    %c0_218 = arith.constant 0 : index
    %c0_219 = arith.constant 0 : index
    %780 = vector.load %arg2[%c0_218, %c0_219] : memref<64x256xf32, #tpu.memory_space<vmem>>, vector<64x256xf32>
    %cst_220 = arith.constant dense<0.000000e+00> : vector<8x256xf32>
    %781 = tpu.matmul %775, %780, %cst_220 {dimension_numbers = #tpu.dot_dimension_numbers<[1], [0], [0], [1], [0, 0, 1, 1], [], []>} : vector<8x64xf32>, vector<64x256xf32>, vector<8x256xf32> -> vector<8x256xf32>
    %782 = arith.addf %779, %781 : vector<8x256xf32>
    %783 = arith.negf %782 : vector<8x256xf32>
    %784 = math.exp %783 : vector<8x256xf32>
    %cst_221 = arith.constant 1.000000e+00 : f32
    %785 = vector.broadcast %cst_221 : f32 to vector<8x256xf32>
    %786 = arith.addf %785, %784 : vector<8x256xf32>
    %787 = arith.divf %785, %786 : vector<8x256xf32>
    %788 = vector.extract_strided_slice %782 {offsets = [0, 128], sizes = [8, 64], strides = [1, 1]} : vector<8x256xf32> to vector<8x64xf32>
    %789 = math.tanh %788 : vector<8x64xf32>
    %790 = vector.extract_strided_slice %787 {offsets = [0, 64], sizes = [8, 64], strides = [1, 1]} : vector<8x256xf32> to vector<8x64xf32>
    %791 = arith.mulf %790, %772 : vector<8x64xf32>
    %792 = vector.extract_strided_slice %787 {offsets = [0, 0], sizes = [8, 64], strides = [1, 1]} : vector<8x256xf32> to vector<8x64xf32>
    %793 = arith.mulf %792, %789 : vector<8x64xf32>
    %794 = arith.addf %791, %793 : vector<8x64xf32>
    %795 = vector.extract_strided_slice %787 {offsets = [0, 192], sizes = [8, 64], strides = [1, 1]} : vector<8x256xf32> to vector<8x64xf32>
    %796 = math.tanh %794 : vector<8x64xf32>
    %797 = arith.mulf %795, %796 : vector<8x64xf32>
    %c36_i32 = arith.constant 36 : i32
    %c8_i32_222 = arith.constant 8 : i32
    %798 = arith.muli %c36_i32, %c8_i32_222 : i32
    %799 = tpu.assume_multiple %798, 8 : i32
    %800 = arith.index_cast %799 : i32 to index
    %c0_223 = arith.constant 0 : index
    %801 = vector.load %arg7[%800, %c0_223] : memref<400x256xf32, #tpu.memory_space<vmem>>, vector<8x256xf32>
    %c0_224 = arith.constant 0 : index
    %c0_225 = arith.constant 0 : index
    %802 = vector.load %arg2[%c0_224, %c0_225] : memref<64x256xf32, #tpu.memory_space<vmem>>, vector<64x256xf32>
    %cst_226 = arith.constant dense<0.000000e+00> : vector<8x256xf32>
    %803 = tpu.matmul %797, %802, %cst_226 {dimension_numbers = #tpu.dot_dimension_numbers<[1], [0], [0], [1], [0, 0, 1, 1], [], []>} : vector<8x64xf32>, vector<64x256xf32>, vector<8x256xf32> -> vector<8x256xf32>
    %804 = arith.addf %801, %803 : vector<8x256xf32>
    %805 = arith.negf %804 : vector<8x256xf32>
    %806 = math.exp %805 : vector<8x256xf32>
    %cst_227 = arith.constant 1.000000e+00 : f32
    %807 = vector.broadcast %cst_227 : f32 to vector<8x256xf32>
    %808 = arith.addf %807, %806 : vector<8x256xf32>
    %809 = arith.divf %807, %808 : vector<8x256xf32>
    %810 = vector.extract_strided_slice %804 {offsets = [0, 128], sizes = [8, 64], strides = [1, 1]} : vector<8x256xf32> to vector<8x64xf32>
    %811 = math.tanh %810 : vector<8x64xf32>
    %812 = vector.extract_strided_slice %809 {offsets = [0, 64], sizes = [8, 64], strides = [1, 1]} : vector<8x256xf32> to vector<8x64xf32>
    %813 = arith.mulf %812, %794 : vector<8x64xf32>
    %814 = vector.extract_strided_slice %809 {offsets = [0, 0], sizes = [8, 64], strides = [1, 1]} : vector<8x256xf32> to vector<8x64xf32>
    %815 = arith.mulf %814, %811 : vector<8x64xf32>
    %816 = arith.addf %813, %815 : vector<8x64xf32>
    %817 = vector.extract_strided_slice %809 {offsets = [0, 192], sizes = [8, 64], strides = [1, 1]} : vector<8x256xf32> to vector<8x64xf32>
    %818 = math.tanh %816 : vector<8x64xf32>
    %819 = arith.mulf %817, %818 : vector<8x64xf32>
    %c37_i32 = arith.constant 37 : i32
    %c8_i32_228 = arith.constant 8 : i32
    %820 = arith.muli %c37_i32, %c8_i32_228 : i32
    %821 = tpu.assume_multiple %820, 8 : i32
    %822 = arith.index_cast %821 : i32 to index
    %c0_229 = arith.constant 0 : index
    %823 = vector.load %arg7[%822, %c0_229] : memref<400x256xf32, #tpu.memory_space<vmem>>, vector<8x256xf32>
    %c0_230 = arith.constant 0 : index
    %c0_231 = arith.constant 0 : index
    %824 = vector.load %arg2[%c0_230, %c0_231] : memref<64x256xf32, #tpu.memory_space<vmem>>, vector<64x256xf32>
    %cst_232 = arith.constant dense<0.000000e+00> : vector<8x256xf32>
    %825 = tpu.matmul %819, %824, %cst_232 {dimension_numbers = #tpu.dot_dimension_numbers<[1], [0], [0], [1], [0, 0, 1, 1], [], []>} : vector<8x64xf32>, vector<64x256xf32>, vector<8x256xf32> -> vector<8x256xf32>
    %826 = arith.addf %823, %825 : vector<8x256xf32>
    %827 = arith.negf %826 : vector<8x256xf32>
    %828 = math.exp %827 : vector<8x256xf32>
    %cst_233 = arith.constant 1.000000e+00 : f32
    %829 = vector.broadcast %cst_233 : f32 to vector<8x256xf32>
    %830 = arith.addf %829, %828 : vector<8x256xf32>
    %831 = arith.divf %829, %830 : vector<8x256xf32>
    %832 = vector.extract_strided_slice %826 {offsets = [0, 128], sizes = [8, 64], strides = [1, 1]} : vector<8x256xf32> to vector<8x64xf32>
    %833 = math.tanh %832 : vector<8x64xf32>
    %834 = vector.extract_strided_slice %831 {offsets = [0, 64], sizes = [8, 64], strides = [1, 1]} : vector<8x256xf32> to vector<8x64xf32>
    %835 = arith.mulf %834, %816 : vector<8x64xf32>
    %836 = vector.extract_strided_slice %831 {offsets = [0, 0], sizes = [8, 64], strides = [1, 1]} : vector<8x256xf32> to vector<8x64xf32>
    %837 = arith.mulf %836, %833 : vector<8x64xf32>
    %838 = arith.addf %835, %837 : vector<8x64xf32>
    %839 = vector.extract_strided_slice %831 {offsets = [0, 192], sizes = [8, 64], strides = [1, 1]} : vector<8x256xf32> to vector<8x64xf32>
    %840 = math.tanh %838 : vector<8x64xf32>
    %841 = arith.mulf %839, %840 : vector<8x64xf32>
    %c38_i32 = arith.constant 38 : i32
    %c8_i32_234 = arith.constant 8 : i32
    %842 = arith.muli %c38_i32, %c8_i32_234 : i32
    %843 = tpu.assume_multiple %842, 8 : i32
    %844 = arith.index_cast %843 : i32 to index
    %c0_235 = arith.constant 0 : index
    %845 = vector.load %arg7[%844, %c0_235] : memref<400x256xf32, #tpu.memory_space<vmem>>, vector<8x256xf32>
    %c0_236 = arith.constant 0 : index
    %c0_237 = arith.constant 0 : index
    %846 = vector.load %arg2[%c0_236, %c0_237] : memref<64x256xf32, #tpu.memory_space<vmem>>, vector<64x256xf32>
    %cst_238 = arith.constant dense<0.000000e+00> : vector<8x256xf32>
    %847 = tpu.matmul %841, %846, %cst_238 {dimension_numbers = #tpu.dot_dimension_numbers<[1], [0], [0], [1], [0, 0, 1, 1], [], []>} : vector<8x64xf32>, vector<64x256xf32>, vector<8x256xf32> -> vector<8x256xf32>
    %848 = arith.addf %845, %847 : vector<8x256xf32>
    %849 = arith.negf %848 : vector<8x256xf32>
    %850 = math.exp %849 : vector<8x256xf32>
    %cst_239 = arith.constant 1.000000e+00 : f32
    %851 = vector.broadcast %cst_239 : f32 to vector<8x256xf32>
    %852 = arith.addf %851, %850 : vector<8x256xf32>
    %853 = arith.divf %851, %852 : vector<8x256xf32>
    %854 = vector.extract_strided_slice %848 {offsets = [0, 128], sizes = [8, 64], strides = [1, 1]} : vector<8x256xf32> to vector<8x64xf32>
    %855 = math.tanh %854 : vector<8x64xf32>
    %856 = vector.extract_strided_slice %853 {offsets = [0, 64], sizes = [8, 64], strides = [1, 1]} : vector<8x256xf32> to vector<8x64xf32>
    %857 = arith.mulf %856, %838 : vector<8x64xf32>
    %858 = vector.extract_strided_slice %853 {offsets = [0, 0], sizes = [8, 64], strides = [1, 1]} : vector<8x256xf32> to vector<8x64xf32>
    %859 = arith.mulf %858, %855 : vector<8x64xf32>
    %860 = arith.addf %857, %859 : vector<8x64xf32>
    %861 = vector.extract_strided_slice %853 {offsets = [0, 192], sizes = [8, 64], strides = [1, 1]} : vector<8x256xf32> to vector<8x64xf32>
    %862 = math.tanh %860 : vector<8x64xf32>
    %863 = arith.mulf %861, %862 : vector<8x64xf32>
    %c39_i32 = arith.constant 39 : i32
    %c8_i32_240 = arith.constant 8 : i32
    %864 = arith.muli %c39_i32, %c8_i32_240 : i32
    %865 = tpu.assume_multiple %864, 8 : i32
    %866 = arith.index_cast %865 : i32 to index
    %c0_241 = arith.constant 0 : index
    %867 = vector.load %arg7[%866, %c0_241] : memref<400x256xf32, #tpu.memory_space<vmem>>, vector<8x256xf32>
    %c0_242 = arith.constant 0 : index
    %c0_243 = arith.constant 0 : index
    %868 = vector.load %arg2[%c0_242, %c0_243] : memref<64x256xf32, #tpu.memory_space<vmem>>, vector<64x256xf32>
    %cst_244 = arith.constant dense<0.000000e+00> : vector<8x256xf32>
    %869 = tpu.matmul %863, %868, %cst_244 {dimension_numbers = #tpu.dot_dimension_numbers<[1], [0], [0], [1], [0, 0, 1, 1], [], []>} : vector<8x64xf32>, vector<64x256xf32>, vector<8x256xf32> -> vector<8x256xf32>
    %870 = arith.addf %867, %869 : vector<8x256xf32>
    %871 = arith.negf %870 : vector<8x256xf32>
    %872 = math.exp %871 : vector<8x256xf32>
    %cst_245 = arith.constant 1.000000e+00 : f32
    %873 = vector.broadcast %cst_245 : f32 to vector<8x256xf32>
    %874 = arith.addf %873, %872 : vector<8x256xf32>
    %875 = arith.divf %873, %874 : vector<8x256xf32>
    %876 = vector.extract_strided_slice %870 {offsets = [0, 128], sizes = [8, 64], strides = [1, 1]} : vector<8x256xf32> to vector<8x64xf32>
    %877 = math.tanh %876 : vector<8x64xf32>
    %878 = vector.extract_strided_slice %875 {offsets = [0, 64], sizes = [8, 64], strides = [1, 1]} : vector<8x256xf32> to vector<8x64xf32>
    %879 = arith.mulf %878, %860 : vector<8x64xf32>
    %880 = vector.extract_strided_slice %875 {offsets = [0, 0], sizes = [8, 64], strides = [1, 1]} : vector<8x256xf32> to vector<8x64xf32>
    %881 = arith.mulf %880, %877 : vector<8x64xf32>
    %882 = arith.addf %879, %881 : vector<8x64xf32>
    %883 = vector.extract_strided_slice %875 {offsets = [0, 192], sizes = [8, 64], strides = [1, 1]} : vector<8x256xf32> to vector<8x64xf32>
    %884 = math.tanh %882 : vector<8x64xf32>
    %885 = arith.mulf %883, %884 : vector<8x64xf32>
    %c40_i32 = arith.constant 40 : i32
    %c8_i32_246 = arith.constant 8 : i32
    %886 = arith.muli %c40_i32, %c8_i32_246 : i32
    %887 = tpu.assume_multiple %886, 8 : i32
    %888 = arith.index_cast %887 : i32 to index
    %c0_247 = arith.constant 0 : index
    %889 = vector.load %arg7[%888, %c0_247] : memref<400x256xf32, #tpu.memory_space<vmem>>, vector<8x256xf32>
    %c0_248 = arith.constant 0 : index
    %c0_249 = arith.constant 0 : index
    %890 = vector.load %arg2[%c0_248, %c0_249] : memref<64x256xf32, #tpu.memory_space<vmem>>, vector<64x256xf32>
    %cst_250 = arith.constant dense<0.000000e+00> : vector<8x256xf32>
    %891 = tpu.matmul %885, %890, %cst_250 {dimension_numbers = #tpu.dot_dimension_numbers<[1], [0], [0], [1], [0, 0, 1, 1], [], []>} : vector<8x64xf32>, vector<64x256xf32>, vector<8x256xf32> -> vector<8x256xf32>
    %892 = arith.addf %889, %891 : vector<8x256xf32>
    %893 = arith.negf %892 : vector<8x256xf32>
    %894 = math.exp %893 : vector<8x256xf32>
    %cst_251 = arith.constant 1.000000e+00 : f32
    %895 = vector.broadcast %cst_251 : f32 to vector<8x256xf32>
    %896 = arith.addf %895, %894 : vector<8x256xf32>
    %897 = arith.divf %895, %896 : vector<8x256xf32>
    %898 = vector.extract_strided_slice %892 {offsets = [0, 128], sizes = [8, 64], strides = [1, 1]} : vector<8x256xf32> to vector<8x64xf32>
    %899 = math.tanh %898 : vector<8x64xf32>
    %900 = vector.extract_strided_slice %897 {offsets = [0, 64], sizes = [8, 64], strides = [1, 1]} : vector<8x256xf32> to vector<8x64xf32>
    %901 = arith.mulf %900, %882 : vector<8x64xf32>
    %902 = vector.extract_strided_slice %897 {offsets = [0, 0], sizes = [8, 64], strides = [1, 1]} : vector<8x256xf32> to vector<8x64xf32>
    %903 = arith.mulf %902, %899 : vector<8x64xf32>
    %904 = arith.addf %901, %903 : vector<8x64xf32>
    %905 = vector.extract_strided_slice %897 {offsets = [0, 192], sizes = [8, 64], strides = [1, 1]} : vector<8x256xf32> to vector<8x64xf32>
    %906 = math.tanh %904 : vector<8x64xf32>
    %907 = arith.mulf %905, %906 : vector<8x64xf32>
    %c41_i32 = arith.constant 41 : i32
    %c8_i32_252 = arith.constant 8 : i32
    %908 = arith.muli %c41_i32, %c8_i32_252 : i32
    %909 = tpu.assume_multiple %908, 8 : i32
    %910 = arith.index_cast %909 : i32 to index
    %c0_253 = arith.constant 0 : index
    %911 = vector.load %arg7[%910, %c0_253] : memref<400x256xf32, #tpu.memory_space<vmem>>, vector<8x256xf32>
    %c0_254 = arith.constant 0 : index
    %c0_255 = arith.constant 0 : index
    %912 = vector.load %arg2[%c0_254, %c0_255] : memref<64x256xf32, #tpu.memory_space<vmem>>, vector<64x256xf32>
    %cst_256 = arith.constant dense<0.000000e+00> : vector<8x256xf32>
    %913 = tpu.matmul %907, %912, %cst_256 {dimension_numbers = #tpu.dot_dimension_numbers<[1], [0], [0], [1], [0, 0, 1, 1], [], []>} : vector<8x64xf32>, vector<64x256xf32>, vector<8x256xf32> -> vector<8x256xf32>
    %914 = arith.addf %911, %913 : vector<8x256xf32>
    %915 = arith.negf %914 : vector<8x256xf32>
    %916 = math.exp %915 : vector<8x256xf32>
    %cst_257 = arith.constant 1.000000e+00 : f32
    %917 = vector.broadcast %cst_257 : f32 to vector<8x256xf32>
    %918 = arith.addf %917, %916 : vector<8x256xf32>
    %919 = arith.divf %917, %918 : vector<8x256xf32>
    %920 = vector.extract_strided_slice %914 {offsets = [0, 128], sizes = [8, 64], strides = [1, 1]} : vector<8x256xf32> to vector<8x64xf32>
    %921 = math.tanh %920 : vector<8x64xf32>
    %922 = vector.extract_strided_slice %919 {offsets = [0, 64], sizes = [8, 64], strides = [1, 1]} : vector<8x256xf32> to vector<8x64xf32>
    %923 = arith.mulf %922, %904 : vector<8x64xf32>
    %924 = vector.extract_strided_slice %919 {offsets = [0, 0], sizes = [8, 64], strides = [1, 1]} : vector<8x256xf32> to vector<8x64xf32>
    %925 = arith.mulf %924, %921 : vector<8x64xf32>
    %926 = arith.addf %923, %925 : vector<8x64xf32>
    %927 = vector.extract_strided_slice %919 {offsets = [0, 192], sizes = [8, 64], strides = [1, 1]} : vector<8x256xf32> to vector<8x64xf32>
    %928 = math.tanh %926 : vector<8x64xf32>
    %929 = arith.mulf %927, %928 : vector<8x64xf32>
    %c42_i32 = arith.constant 42 : i32
    %c8_i32_258 = arith.constant 8 : i32
    %930 = arith.muli %c42_i32, %c8_i32_258 : i32
    %931 = tpu.assume_multiple %930, 8 : i32
    %932 = arith.index_cast %931 : i32 to index
    %c0_259 = arith.constant 0 : index
    %933 = vector.load %arg7[%932, %c0_259] : memref<400x256xf32, #tpu.memory_space<vmem>>, vector<8x256xf32>
    %c0_260 = arith.constant 0 : index
    %c0_261 = arith.constant 0 : index
    %934 = vector.load %arg2[%c0_260, %c0_261] : memref<64x256xf32, #tpu.memory_space<vmem>>, vector<64x256xf32>
    %cst_262 = arith.constant dense<0.000000e+00> : vector<8x256xf32>
    %935 = tpu.matmul %929, %934, %cst_262 {dimension_numbers = #tpu.dot_dimension_numbers<[1], [0], [0], [1], [0, 0, 1, 1], [], []>} : vector<8x64xf32>, vector<64x256xf32>, vector<8x256xf32> -> vector<8x256xf32>
    %936 = arith.addf %933, %935 : vector<8x256xf32>
    %937 = arith.negf %936 : vector<8x256xf32>
    %938 = math.exp %937 : vector<8x256xf32>
    %cst_263 = arith.constant 1.000000e+00 : f32
    %939 = vector.broadcast %cst_263 : f32 to vector<8x256xf32>
    %940 = arith.addf %939, %938 : vector<8x256xf32>
    %941 = arith.divf %939, %940 : vector<8x256xf32>
    %942 = vector.extract_strided_slice %936 {offsets = [0, 128], sizes = [8, 64], strides = [1, 1]} : vector<8x256xf32> to vector<8x64xf32>
    %943 = math.tanh %942 : vector<8x64xf32>
    %944 = vector.extract_strided_slice %941 {offsets = [0, 64], sizes = [8, 64], strides = [1, 1]} : vector<8x256xf32> to vector<8x64xf32>
    %945 = arith.mulf %944, %926 : vector<8x64xf32>
    %946 = vector.extract_strided_slice %941 {offsets = [0, 0], sizes = [8, 64], strides = [1, 1]} : vector<8x256xf32> to vector<8x64xf32>
    %947 = arith.mulf %946, %943 : vector<8x64xf32>
    %948 = arith.addf %945, %947 : vector<8x64xf32>
    %949 = vector.extract_strided_slice %941 {offsets = [0, 192], sizes = [8, 64], strides = [1, 1]} : vector<8x256xf32> to vector<8x64xf32>
    %950 = math.tanh %948 : vector<8x64xf32>
    %951 = arith.mulf %949, %950 : vector<8x64xf32>
    %c43_i32 = arith.constant 43 : i32
    %c8_i32_264 = arith.constant 8 : i32
    %952 = arith.muli %c43_i32, %c8_i32_264 : i32
    %953 = tpu.assume_multiple %952, 8 : i32
    %954 = arith.index_cast %953 : i32 to index
    %c0_265 = arith.constant 0 : index
    %955 = vector.load %arg7[%954, %c0_265] : memref<400x256xf32, #tpu.memory_space<vmem>>, vector<8x256xf32>
    %c0_266 = arith.constant 0 : index
    %c0_267 = arith.constant 0 : index
    %956 = vector.load %arg2[%c0_266, %c0_267] : memref<64x256xf32, #tpu.memory_space<vmem>>, vector<64x256xf32>
    %cst_268 = arith.constant dense<0.000000e+00> : vector<8x256xf32>
    %957 = tpu.matmul %951, %956, %cst_268 {dimension_numbers = #tpu.dot_dimension_numbers<[1], [0], [0], [1], [0, 0, 1, 1], [], []>} : vector<8x64xf32>, vector<64x256xf32>, vector<8x256xf32> -> vector<8x256xf32>
    %958 = arith.addf %955, %957 : vector<8x256xf32>
    %959 = arith.negf %958 : vector<8x256xf32>
    %960 = math.exp %959 : vector<8x256xf32>
    %cst_269 = arith.constant 1.000000e+00 : f32
    %961 = vector.broadcast %cst_269 : f32 to vector<8x256xf32>
    %962 = arith.addf %961, %960 : vector<8x256xf32>
    %963 = arith.divf %961, %962 : vector<8x256xf32>
    %964 = vector.extract_strided_slice %958 {offsets = [0, 128], sizes = [8, 64], strides = [1, 1]} : vector<8x256xf32> to vector<8x64xf32>
    %965 = math.tanh %964 : vector<8x64xf32>
    %966 = vector.extract_strided_slice %963 {offsets = [0, 64], sizes = [8, 64], strides = [1, 1]} : vector<8x256xf32> to vector<8x64xf32>
    %967 = arith.mulf %966, %948 : vector<8x64xf32>
    %968 = vector.extract_strided_slice %963 {offsets = [0, 0], sizes = [8, 64], strides = [1, 1]} : vector<8x256xf32> to vector<8x64xf32>
    %969 = arith.mulf %968, %965 : vector<8x64xf32>
    %970 = arith.addf %967, %969 : vector<8x64xf32>
    %971 = vector.extract_strided_slice %963 {offsets = [0, 192], sizes = [8, 64], strides = [1, 1]} : vector<8x256xf32> to vector<8x64xf32>
    %972 = math.tanh %970 : vector<8x64xf32>
    %973 = arith.mulf %971, %972 : vector<8x64xf32>
    %c44_i32 = arith.constant 44 : i32
    %c8_i32_270 = arith.constant 8 : i32
    %974 = arith.muli %c44_i32, %c8_i32_270 : i32
    %975 = tpu.assume_multiple %974, 8 : i32
    %976 = arith.index_cast %975 : i32 to index
    %c0_271 = arith.constant 0 : index
    %977 = vector.load %arg7[%976, %c0_271] : memref<400x256xf32, #tpu.memory_space<vmem>>, vector<8x256xf32>
    %c0_272 = arith.constant 0 : index
    %c0_273 = arith.constant 0 : index
    %978 = vector.load %arg2[%c0_272, %c0_273] : memref<64x256xf32, #tpu.memory_space<vmem>>, vector<64x256xf32>
    %cst_274 = arith.constant dense<0.000000e+00> : vector<8x256xf32>
    %979 = tpu.matmul %973, %978, %cst_274 {dimension_numbers = #tpu.dot_dimension_numbers<[1], [0], [0], [1], [0, 0, 1, 1], [], []>} : vector<8x64xf32>, vector<64x256xf32>, vector<8x256xf32> -> vector<8x256xf32>
    %980 = arith.addf %977, %979 : vector<8x256xf32>
    %981 = arith.negf %980 : vector<8x256xf32>
    %982 = math.exp %981 : vector<8x256xf32>
    %cst_275 = arith.constant 1.000000e+00 : f32
    %983 = vector.broadcast %cst_275 : f32 to vector<8x256xf32>
    %984 = arith.addf %983, %982 : vector<8x256xf32>
    %985 = arith.divf %983, %984 : vector<8x256xf32>
    %986 = vector.extract_strided_slice %980 {offsets = [0, 128], sizes = [8, 64], strides = [1, 1]} : vector<8x256xf32> to vector<8x64xf32>
    %987 = math.tanh %986 : vector<8x64xf32>
    %988 = vector.extract_strided_slice %985 {offsets = [0, 64], sizes = [8, 64], strides = [1, 1]} : vector<8x256xf32> to vector<8x64xf32>
    %989 = arith.mulf %988, %970 : vector<8x64xf32>
    %990 = vector.extract_strided_slice %985 {offsets = [0, 0], sizes = [8, 64], strides = [1, 1]} : vector<8x256xf32> to vector<8x64xf32>
    %991 = arith.mulf %990, %987 : vector<8x64xf32>
    %992 = arith.addf %989, %991 : vector<8x64xf32>
    %993 = vector.extract_strided_slice %985 {offsets = [0, 192], sizes = [8, 64], strides = [1, 1]} : vector<8x256xf32> to vector<8x64xf32>
    %994 = math.tanh %992 : vector<8x64xf32>
    %995 = arith.mulf %993, %994 : vector<8x64xf32>
    %c45_i32 = arith.constant 45 : i32
    %c8_i32_276 = arith.constant 8 : i32
    %996 = arith.muli %c45_i32, %c8_i32_276 : i32
    %997 = tpu.assume_multiple %996, 8 : i32
    %998 = arith.index_cast %997 : i32 to index
    %c0_277 = arith.constant 0 : index
    %999 = vector.load %arg7[%998, %c0_277] : memref<400x256xf32, #tpu.memory_space<vmem>>, vector<8x256xf32>
    %c0_278 = arith.constant 0 : index
    %c0_279 = arith.constant 0 : index
    %1000 = vector.load %arg2[%c0_278, %c0_279] : memref<64x256xf32, #tpu.memory_space<vmem>>, vector<64x256xf32>
    %cst_280 = arith.constant dense<0.000000e+00> : vector<8x256xf32>
    %1001 = tpu.matmul %995, %1000, %cst_280 {dimension_numbers = #tpu.dot_dimension_numbers<[1], [0], [0], [1], [0, 0, 1, 1], [], []>} : vector<8x64xf32>, vector<64x256xf32>, vector<8x256xf32> -> vector<8x256xf32>
    %1002 = arith.addf %999, %1001 : vector<8x256xf32>
    %1003 = arith.negf %1002 : vector<8x256xf32>
    %1004 = math.exp %1003 : vector<8x256xf32>
    %cst_281 = arith.constant 1.000000e+00 : f32
    %1005 = vector.broadcast %cst_281 : f32 to vector<8x256xf32>
    %1006 = arith.addf %1005, %1004 : vector<8x256xf32>
    %1007 = arith.divf %1005, %1006 : vector<8x256xf32>
    %1008 = vector.extract_strided_slice %1002 {offsets = [0, 128], sizes = [8, 64], strides = [1, 1]} : vector<8x256xf32> to vector<8x64xf32>
    %1009 = math.tanh %1008 : vector<8x64xf32>
    %1010 = vector.extract_strided_slice %1007 {offsets = [0, 64], sizes = [8, 64], strides = [1, 1]} : vector<8x256xf32> to vector<8x64xf32>
    %1011 = arith.mulf %1010, %992 : vector<8x64xf32>
    %1012 = vector.extract_strided_slice %1007 {offsets = [0, 0], sizes = [8, 64], strides = [1, 1]} : vector<8x256xf32> to vector<8x64xf32>
    %1013 = arith.mulf %1012, %1009 : vector<8x64xf32>
    %1014 = arith.addf %1011, %1013 : vector<8x64xf32>
    %1015 = vector.extract_strided_slice %1007 {offsets = [0, 192], sizes = [8, 64], strides = [1, 1]} : vector<8x256xf32> to vector<8x64xf32>
    %1016 = math.tanh %1014 : vector<8x64xf32>
    %1017 = arith.mulf %1015, %1016 : vector<8x64xf32>
    %c46_i32 = arith.constant 46 : i32
    %c8_i32_282 = arith.constant 8 : i32
    %1018 = arith.muli %c46_i32, %c8_i32_282 : i32
    %1019 = tpu.assume_multiple %1018, 8 : i32
    %1020 = arith.index_cast %1019 : i32 to index
    %c0_283 = arith.constant 0 : index
    %1021 = vector.load %arg7[%1020, %c0_283] : memref<400x256xf32, #tpu.memory_space<vmem>>, vector<8x256xf32>
    %c0_284 = arith.constant 0 : index
    %c0_285 = arith.constant 0 : index
    %1022 = vector.load %arg2[%c0_284, %c0_285] : memref<64x256xf32, #tpu.memory_space<vmem>>, vector<64x256xf32>
    %cst_286 = arith.constant dense<0.000000e+00> : vector<8x256xf32>
    %1023 = tpu.matmul %1017, %1022, %cst_286 {dimension_numbers = #tpu.dot_dimension_numbers<[1], [0], [0], [1], [0, 0, 1, 1], [], []>} : vector<8x64xf32>, vector<64x256xf32>, vector<8x256xf32> -> vector<8x256xf32>
    %1024 = arith.addf %1021, %1023 : vector<8x256xf32>
    %1025 = arith.negf %1024 : vector<8x256xf32>
    %1026 = math.exp %1025 : vector<8x256xf32>
    %cst_287 = arith.constant 1.000000e+00 : f32
    %1027 = vector.broadcast %cst_287 : f32 to vector<8x256xf32>
    %1028 = arith.addf %1027, %1026 : vector<8x256xf32>
    %1029 = arith.divf %1027, %1028 : vector<8x256xf32>
    %1030 = vector.extract_strided_slice %1024 {offsets = [0, 128], sizes = [8, 64], strides = [1, 1]} : vector<8x256xf32> to vector<8x64xf32>
    %1031 = math.tanh %1030 : vector<8x64xf32>
    %1032 = vector.extract_strided_slice %1029 {offsets = [0, 64], sizes = [8, 64], strides = [1, 1]} : vector<8x256xf32> to vector<8x64xf32>
    %1033 = arith.mulf %1032, %1014 : vector<8x64xf32>
    %1034 = vector.extract_strided_slice %1029 {offsets = [0, 0], sizes = [8, 64], strides = [1, 1]} : vector<8x256xf32> to vector<8x64xf32>
    %1035 = arith.mulf %1034, %1031 : vector<8x64xf32>
    %1036 = arith.addf %1033, %1035 : vector<8x64xf32>
    %1037 = vector.extract_strided_slice %1029 {offsets = [0, 192], sizes = [8, 64], strides = [1, 1]} : vector<8x256xf32> to vector<8x64xf32>
    %1038 = math.tanh %1036 : vector<8x64xf32>
    %1039 = arith.mulf %1037, %1038 : vector<8x64xf32>
    %c47_i32 = arith.constant 47 : i32
    %c8_i32_288 = arith.constant 8 : i32
    %1040 = arith.muli %c47_i32, %c8_i32_288 : i32
    %1041 = tpu.assume_multiple %1040, 8 : i32
    %1042 = arith.index_cast %1041 : i32 to index
    %c0_289 = arith.constant 0 : index
    %1043 = vector.load %arg7[%1042, %c0_289] : memref<400x256xf32, #tpu.memory_space<vmem>>, vector<8x256xf32>
    %c0_290 = arith.constant 0 : index
    %c0_291 = arith.constant 0 : index
    %1044 = vector.load %arg2[%c0_290, %c0_291] : memref<64x256xf32, #tpu.memory_space<vmem>>, vector<64x256xf32>
    %cst_292 = arith.constant dense<0.000000e+00> : vector<8x256xf32>
    %1045 = tpu.matmul %1039, %1044, %cst_292 {dimension_numbers = #tpu.dot_dimension_numbers<[1], [0], [0], [1], [0, 0, 1, 1], [], []>} : vector<8x64xf32>, vector<64x256xf32>, vector<8x256xf32> -> vector<8x256xf32>
    %1046 = arith.addf %1043, %1045 : vector<8x256xf32>
    %1047 = arith.negf %1046 : vector<8x256xf32>
    %1048 = math.exp %1047 : vector<8x256xf32>
    %cst_293 = arith.constant 1.000000e+00 : f32
    %1049 = vector.broadcast %cst_293 : f32 to vector<8x256xf32>
    %1050 = arith.addf %1049, %1048 : vector<8x256xf32>
    %1051 = arith.divf %1049, %1050 : vector<8x256xf32>
    %1052 = vector.extract_strided_slice %1046 {offsets = [0, 128], sizes = [8, 64], strides = [1, 1]} : vector<8x256xf32> to vector<8x64xf32>
    %1053 = math.tanh %1052 : vector<8x64xf32>
    %1054 = vector.extract_strided_slice %1051 {offsets = [0, 64], sizes = [8, 64], strides = [1, 1]} : vector<8x256xf32> to vector<8x64xf32>
    %1055 = arith.mulf %1054, %1036 : vector<8x64xf32>
    %1056 = vector.extract_strided_slice %1051 {offsets = [0, 0], sizes = [8, 64], strides = [1, 1]} : vector<8x256xf32> to vector<8x64xf32>
    %1057 = arith.mulf %1056, %1053 : vector<8x64xf32>
    %1058 = arith.addf %1055, %1057 : vector<8x64xf32>
    %1059 = vector.extract_strided_slice %1051 {offsets = [0, 192], sizes = [8, 64], strides = [1, 1]} : vector<8x256xf32> to vector<8x64xf32>
    %1060 = math.tanh %1058 : vector<8x64xf32>
    %1061 = arith.mulf %1059, %1060 : vector<8x64xf32>
    %c48_i32 = arith.constant 48 : i32
    %c8_i32_294 = arith.constant 8 : i32
    %1062 = arith.muli %c48_i32, %c8_i32_294 : i32
    %1063 = tpu.assume_multiple %1062, 8 : i32
    %1064 = arith.index_cast %1063 : i32 to index
    %c0_295 = arith.constant 0 : index
    %1065 = vector.load %arg7[%1064, %c0_295] : memref<400x256xf32, #tpu.memory_space<vmem>>, vector<8x256xf32>
    %c0_296 = arith.constant 0 : index
    %c0_297 = arith.constant 0 : index
    %1066 = vector.load %arg2[%c0_296, %c0_297] : memref<64x256xf32, #tpu.memory_space<vmem>>, vector<64x256xf32>
    %cst_298 = arith.constant dense<0.000000e+00> : vector<8x256xf32>
    %1067 = tpu.matmul %1061, %1066, %cst_298 {dimension_numbers = #tpu.dot_dimension_numbers<[1], [0], [0], [1], [0, 0, 1, 1], [], []>} : vector<8x64xf32>, vector<64x256xf32>, vector<8x256xf32> -> vector<8x256xf32>
    %1068 = arith.addf %1065, %1067 : vector<8x256xf32>
    %1069 = arith.negf %1068 : vector<8x256xf32>
    %1070 = math.exp %1069 : vector<8x256xf32>
    %cst_299 = arith.constant 1.000000e+00 : f32
    %1071 = vector.broadcast %cst_299 : f32 to vector<8x256xf32>
    %1072 = arith.addf %1071, %1070 : vector<8x256xf32>
    %1073 = arith.divf %1071, %1072 : vector<8x256xf32>
    %1074 = vector.extract_strided_slice %1068 {offsets = [0, 128], sizes = [8, 64], strides = [1, 1]} : vector<8x256xf32> to vector<8x64xf32>
    %1075 = math.tanh %1074 : vector<8x64xf32>
    %1076 = vector.extract_strided_slice %1073 {offsets = [0, 64], sizes = [8, 64], strides = [1, 1]} : vector<8x256xf32> to vector<8x64xf32>
    %1077 = arith.mulf %1076, %1058 : vector<8x64xf32>
    %1078 = vector.extract_strided_slice %1073 {offsets = [0, 0], sizes = [8, 64], strides = [1, 1]} : vector<8x256xf32> to vector<8x64xf32>
    %1079 = arith.mulf %1078, %1075 : vector<8x64xf32>
    %1080 = arith.addf %1077, %1079 : vector<8x64xf32>
    %1081 = vector.extract_strided_slice %1073 {offsets = [0, 192], sizes = [8, 64], strides = [1, 1]} : vector<8x256xf32> to vector<8x64xf32>
    %1082 = math.tanh %1080 : vector<8x64xf32>
    %1083 = arith.mulf %1081, %1082 : vector<8x64xf32>
    %c49_i32 = arith.constant 49 : i32
    %c8_i32_300 = arith.constant 8 : i32
    %1084 = arith.muli %c49_i32, %c8_i32_300 : i32
    %1085 = tpu.assume_multiple %1084, 8 : i32
    %1086 = arith.index_cast %1085 : i32 to index
    %c0_301 = arith.constant 0 : index
    %1087 = vector.load %arg7[%1086, %c0_301] : memref<400x256xf32, #tpu.memory_space<vmem>>, vector<8x256xf32>
    %c0_302 = arith.constant 0 : index
    %c0_303 = arith.constant 0 : index
    %1088 = vector.load %arg2[%c0_302, %c0_303] : memref<64x256xf32, #tpu.memory_space<vmem>>, vector<64x256xf32>
    %cst_304 = arith.constant dense<0.000000e+00> : vector<8x256xf32>
    %1089 = tpu.matmul %1083, %1088, %cst_304 {dimension_numbers = #tpu.dot_dimension_numbers<[1], [0], [0], [1], [0, 0, 1, 1], [], []>} : vector<8x64xf32>, vector<64x256xf32>, vector<8x256xf32> -> vector<8x256xf32>
    %1090 = arith.addf %1087, %1089 : vector<8x256xf32>
    %1091 = arith.negf %1090 : vector<8x256xf32>
    %1092 = math.exp %1091 : vector<8x256xf32>
    %cst_305 = arith.constant 1.000000e+00 : f32
    %1093 = vector.broadcast %cst_305 : f32 to vector<8x256xf32>
    %1094 = arith.addf %1093, %1092 : vector<8x256xf32>
    %1095 = arith.divf %1093, %1094 : vector<8x256xf32>
    %1096 = vector.extract_strided_slice %1090 {offsets = [0, 128], sizes = [8, 64], strides = [1, 1]} : vector<8x256xf32> to vector<8x64xf32>
    %1097 = math.tanh %1096 : vector<8x64xf32>
    %1098 = vector.extract_strided_slice %1095 {offsets = [0, 64], sizes = [8, 64], strides = [1, 1]} : vector<8x256xf32> to vector<8x64xf32>
    %1099 = arith.mulf %1098, %1080 : vector<8x64xf32>
    %1100 = vector.extract_strided_slice %1095 {offsets = [0, 0], sizes = [8, 64], strides = [1, 1]} : vector<8x256xf32> to vector<8x64xf32>
    %1101 = arith.mulf %1100, %1097 : vector<8x64xf32>
    %1102 = arith.addf %1099, %1101 : vector<8x64xf32>
    %1103 = vector.extract_strided_slice %1095 {offsets = [0, 192], sizes = [8, 64], strides = [1, 1]} : vector<8x256xf32> to vector<8x64xf32>
    %1104 = math.tanh %1102 : vector<8x64xf32>
    %1105 = arith.mulf %1103, %1104 : vector<8x64xf32>
    %c49_i32_306 = arith.constant 49 : i32
    %c0_307 = arith.constant 0 : index
    %c0_308 = arith.constant 0 : index
    %1106 = vector.load %arg2[%c0_307, %c0_308] : memref<64x256xf32, #tpu.memory_space<vmem>>, vector<64x256xf32>
    %cst_309 = arith.constant dense<0.000000e+00> : vector<8x256xf32>
    %1107 = tpu.matmul %1105, %1106, %cst_309 {dimension_numbers = #tpu.dot_dimension_numbers<[1], [0], [0], [1], [0, 0, 1, 1], [], []>} : vector<8x64xf32>, vector<64x256xf32>, vector<8x256xf32> -> vector<8x256xf32>
    %c0_310 = arith.constant 0 : index
    %c0_311 = arith.constant 0 : index
    %1108 = vector.load %arg3[%c0_310, %c0_311] : memref<1x256xf32, #tpu.memory_space<vmem>>, vector<1x256xf32>
    %1109 = vector.broadcast %1108 : vector<1x256xf32> to vector<8x256xf32>
    %1110 = arith.addf %1107, %1109 : vector<8x256xf32>
    %1111 = vector.extract_strided_slice %1110 {offsets = [0, 96], sizes = [8, 32], strides = [1, 1]} : vector<8x256xf32> to vector<8x32xf32>
    %1112 = arith.negf %1111 : vector<8x32xf32>
    %1113 = math.exp %1112 : vector<8x32xf32>
    %cst_312 = arith.constant 1.000000e+00 : f32
    %1114 = vector.broadcast %cst_312 : f32 to vector<8x32xf32>
    %1115 = arith.addf %1114, %1113 : vector<8x32xf32>
    %1116 = arith.divf %1114, %1115 : vector<8x32xf32>
    %1117 = vector.extract_strided_slice %1102 {offsets = [0, 32], sizes = [8, 32], strides = [1, 1]} : vector<8x64xf32> to vector<8x32xf32>
    %1118 = arith.mulf %1116, %1117 : vector<8x32xf32>
    %1119 = vector.extract_strided_slice %1110 {offsets = [0, 32], sizes = [8, 32], strides = [1, 1]} : vector<8x256xf32> to vector<8x32xf32>
    %1120 = arith.negf %1119 : vector<8x32xf32>
    %1121 = math.exp %1120 : vector<8x32xf32>
    %cst_313 = arith.constant 1.000000e+00 : f32
    %1122 = vector.broadcast %cst_313 : f32 to vector<8x32xf32>
    %1123 = arith.addf %1122, %1121 : vector<8x32xf32>
    %1124 = arith.divf %1122, %1123 : vector<8x32xf32>
    %1125 = vector.extract_strided_slice %1110 {offsets = [0, 160], sizes = [8, 32], strides = [1, 1]} : vector<8x256xf32> to vector<8x32xf32>
    %1126 = math.tanh %1125 : vector<8x32xf32>
    %1127 = arith.mulf %1124, %1126 : vector<8x32xf32>
    %1128 = arith.addf %1118, %1127 : vector<8x32xf32>
    %1129 = vector.extract_strided_slice %1110 {offsets = [0, 224], sizes = [8, 32], strides = [1, 1]} : vector<8x256xf32> to vector<8x32xf32>
    %1130 = arith.negf %1129 : vector<8x32xf32>
    %1131 = math.exp %1130 : vector<8x32xf32>
    %cst_314 = arith.constant 1.000000e+00 : f32
    %1132 = vector.broadcast %cst_314 : f32 to vector<8x32xf32>
    %1133 = arith.addf %1132, %1131 : vector<8x32xf32>
    %1134 = arith.divf %1132, %1133 : vector<8x32xf32>
    %1135 = math.tanh %1128 : vector<8x32xf32>
    %1136 = arith.mulf %1134, %1135 : vector<8x32xf32>
    %c0_315 = arith.constant 0 : index
    %c0_316 = arith.constant 0 : index
    %1137 = vector.load %arg4[%c0_315, %c0_316] : memref<32x5xf32, #tpu.memory_space<vmem>>, vector<32x5xf32>
    %cst_317 = arith.constant dense<0.000000e+00> : vector<8x5xf32>
    %1138 = tpu.matmul %1136, %1137, %cst_317 {dimension_numbers = #tpu.dot_dimension_numbers<[1], [0], [0], [1], [0, 0, 1, 1], [], []>} : vector<8x32xf32>, vector<32x5xf32>, vector<8x5xf32> -> vector<8x5xf32>
    %c0_318 = arith.constant 0 : index
    %c0_319 = arith.constant 0 : index
    %1139 = vector.load %arg5[%c0_318, %c0_319] : memref<1x5xf32, #tpu.memory_space<vmem>>, vector<1x5xf32>
    %1140 = vector.broadcast %1139 : vector<1x5xf32> to vector<8x5xf32>
    %1141 = arith.addf %1138, %1140 : vector<8x5xf32>
    %1142 = vector.extract_strided_slice %1141 {offsets = [0, 0], sizes = [2, 5], strides = [1, 1]} : vector<8x5xf32> to vector<2x5xf32>
    %c0_320 = arith.constant 0 : index
    %c0_321 = arith.constant 0 : index
    %1143 = vector.load %arg6[%c0_320, %c0_321] : memref<2x5xf32, #tpu.memory_space<vmem>>, vector<2x5xf32>
    tpu.vector_store %arg6[%c0_320, %c0_321], %1142 {strides = array<i32>} : memref<2x5xf32, #tpu.memory_space<vmem>>, vector<2x5xf32>,
    return
  }
}

</mosaic_0001>

<bundles_post_ra>
// kernel: cnn_lstm_forward.2
= control target key start
LH: loop header
LB: loop body
LE: loop exit
PB: predicated region body
PF: predicated region fallthrough
CT: control target
= control target key end

     0   :  { %s2309_s13 = smov 0   ;;  %s2950_s0 = inlined_call_operand.vmem [shape: f32[2,1,256], index: 0, kind: input, shape index: {}]   ;;  %s2951_s1 = inlined_call_operand.vmem [shape: f32[16,9], index: 1, kind: input, shape index: {}]   ;;  %s2952_s2 = inlined_call_operand.vmem [shape: f32[16,1], index: 2, kind: input, shape index: {}]   ;;  %s2953_s3 = inlined_call_operand.vmem [shape: f32[9,1,256], index: 3, kind: input, shape index: {}]   ;;  %s2954_s4 = inlined_call_operand.vmem [shape: f32[256,256], index: 4, kind: input, shape index: {}]   ;;  %s2955_s5 = inlined_call_operand.vmem [shape: f32[32,144], index: 5, kind: input, shape index: {}]   ;;  %s2956_s6 = inlined_call_operand.vmem [shape: f32[32,1], index: 6, kind: input, shape index: {}]   ;;  %s2957_s7 = inlined_call_operand.vmem [shape: f32[9,1,64], index: 7, kind: input, shape index: {}]   ;;  %s2958_s8 = inlined_call_operand.vmem [shape: f32[64,64], index: 8, kind: input, shape index: {}]   ;;  %s2959_s9 = inlined_call_operand.vmem [shape: f32[16,800], index: 9, kind: input, shape index: {}]   ;;  %s2960_s10 = inlined_call_operand.vmem [shape: f32[2,32,800], index: 10, kind: output, shape index: {}]  }
   0x1 LB: > { %s1922_s14 = sadd.s32 4294967295, %s2217_s13   ;;  %p1926_p0 = scmp.ge.s32.totalorder %s2217_s13, 1  ;;  %s2217_s13 = sphi %s2309_s13, %s20_s13  }
   0x2   : > { %p311_p1 = scmp.lt.s32.totalorder %s2217_s13, 3 }
   0x4   : > { %p312_p2 = pnand %p1926_p0, %p311_p1 }
   0x5   : > { %v2320_v0 = vld [vmem:[%s2951_s1] sm:$0xff] (!%p312_p2)  ;;  %p348_p3 = scmp.lt.s32.totalorder (!%p312_p2), %s1922_s14, 1  ;;  %v359_v1 = vlaneseq (!%p312_p2)  ;;  %v2219_v2 = vmov (!%p312_p2), 1   ;;  %v2220_v4 = vmov (!%p312_p2), 2   ;;  %v2221_v7 = vmov (!%p312_p2), 0   ;;  %s2222_s21 = smov (!%p312_p2), 17  }
   0x6   : > { %315 = sbr.rel (%p312_p2) target bundleno = 1666 (0x682), region = 60  ;;  %2197 = vset.pattern.permute.xlu0 (!%p312_p2), %v2219_v2  ;;  %2199 = vset.pattern.permute.xlu1 (!%p312_p2), %v2220_v4  ;;  %s2223_s22 = smov (!%p312_p2), 16   ;;  %v2350_v11 = vld [vmem:[%s2951_s1 + $0x8] sm:$0xff] (!%p312_p2)  ;;  %v2225_v12 = vmov (!%p312_p2), 4   ;;  %v811_v14 = vld [vmem:[%s2954_s4 + $0x18] sm:$0xff] (!%p312_p2)  ;;  %v2226_v15 = vmov (!%p312_p2), 3  }
   0x7   : > { %441 = vperm.xlu0 (!%p312_p2), %2197, %v2320_v0   ;;  %v360_v3 = vshrl.u32 (!%p312_p2), %v359_v1, 7  ;;  %s2224_s25 = smov (!%p312_p2), 15   ;;  %v809_v13 = vld [vmem:[%s2954_s4 + $0x8] sm:$0xff] (!%p312_p2)  ;;  %v808_v17 = vld [vmem:[%s2954_s4] sm:$0xff] (!%p312_p2)  ;;  %v810_v18 = vld [vmem:[%s2954_s4 + $0x10] sm:$0xff] (!%p312_p2)  ;;  %s2227_s24 = smov (!%p312_p2), 127  }
   0x8   : > { %v2030_v16 = vpack.c.bf16 (!%p312_p2), %v811_v14, %v809_v13  ;;  %v2032_v19 = vpack.c.bf16 (!%p312_p2), %v810_v18, %v808_v17  ;;  %v813_v20 = vld [vmem:[%s2954_s4 + $0x28] sm:$0xff] (!%p312_p2)  ;;  %v815_v21 = vld [vmem:[%s2954_s4 + $0x38] sm:$0xff] (!%p312_p2)  ;;  %v812_v23 = vld [vmem:[%s2954_s4 + $0x20] sm:$0xff] (!%p312_p2)  ;;  %v2228_v26 = vmov (!%p312_p2), 5   ;;  %s2229_s29 = smov (!%p312_p2), 1   ;;  %v2230_v38 = vmov (!%p312_p2), 7  }
   0x9   : > { %v2326_v5 = vsub.s32 (!%p312_p2), 1, %v360_v3  ;;  %v2328_v6 = vsub.s32 (!%p312_p2), 0, %v360_v3  ;;  %v2034_v22 = vpack.c.bf16 (!%p312_p2), %v815_v21, %v813_v20  ;;  %v814_v24 = vld [vmem:[%s2954_s4 + $0x30] sm:$0xff] (!%p312_p2)  ;;  %v817_v27 = vld [vmem:[%s2954_s4 + $0x48] sm:$0xff] (!%p312_p2)  ;;  %v819_v28 = vld [vmem:[%s2954_s4 + $0x58] sm:$0xff] (!%p312_p2)  ;;  %s2231_s16 = smov (!%p312_p2), 112  }
   0xa   : > { %2031 = vmatprep.subr.bf16.mxu0 (!%p312_p2), %v2030_v16  ;;  %v2036_v25 = vpack.c.bf16 (!%p312_p2), %v814_v24, %v812_v23  ;;  %v2038_v29 = vpack.c.bf16 (!%p312_p2), %v819_v28, %v817_v27  ;;  %v816_v30 = vld [vmem:[%s2954_s4 + $0x40] sm:$0xff] (!%p312_p2)  ;;  %v818_v31 = vld [vmem:[%s2954_s4 + $0x50] sm:$0xff] (!%p312_p2)  ;;  %v821_v33 = vld [vmem:[%s2954_s4 + $0x68] sm:$0xff] (!%p312_p2)  ;;  %v2232_v57 = vmov (!%p312_p2), 6   ;;  %s2233_s18 = smov (!%p312_p2), 111   ;;  %vm420_vm0 = vcmask (!%p312_p2), 130048  }
   0xb   : > { %2198 = vset.pattern.permute.xlu0 (!%p312_p2), %v2221_v7  ;;  %2033 = vmatpush1.bf16.msra.mxu0 (!%p312_p2), %v2032_v19  ;;  %v2040_v32 = vpack.c.bf16 (!%p312_p2), %v818_v31, %v816_v30  ;;  %v823_v34 = vld [vmem:[%s2954_s4 + $0x78] sm:$0xff] (!%p312_p2)  ;;  %v820_v36 = vld [vmem:[%s2954_s4 + $0x60] sm:$0xff] (!%p312_p2)  ;;  %v822_v37 = vld [vmem:[%s2954_s4 + $0x70] sm:$0xff] (!%p312_p2)  ;;  %vm372_vm1 = vcmask (!%p312_p2), 138240   ;;  %vm469_vm2 = vcmask (!%p312_p2), 121856   ;;  %vm518_vm3 = vcmask (!%p312_p2), 7168  }
   0xc   : > { %395 = vperm.xlu0 (!%p312_p2), %2198, %v2320_v0   ;;  %2035 = vmatprep.subr.bf16.mxu0 (!%p312_p2), %v2034_v22  ;;  %v2042_v35 = vpack.c.bf16 (!%p312_p2), %v823_v34, %v821_v33  ;;  %v2044_v39 = vpack.c.bf16 (!%p312_p2), %v822_v37, %v820_v36  ;;  %v825_v40 = vld [vmem:[%s2954_s4 + $0x88] sm:$0xff] (!%p312_p2)  ;;  %v827_v41 = vld [vmem:[%s2954_s4 + $0x98] sm:$0xff] (!%p312_p2)  ;;  %v824_v43 = vld [vmem:[%s2954_s4 + $0x80] sm:$0xff] (!%p312_p2)  ;;  %vm596_vm4 = vcmask (!%p312_p2), 1039360   ;;  %vm645_vm5 = vcmask (!%p312_p2), 924672   ;;  %s2236_s28 = smov (!%p312_p2), 64  }
   0xd   : > { %s2962_s14 = smov (!%p348_p3, %s1922_s14), 1  ;;  %v2046_v42 = vpack.c.bf16 %v827_v41, %v825_v40  ;;  %v826_v44 = vld [vmem:[%s2954_s4 + $0x90] sm:$0xff]  ;;  %v829_v46 = vld [vmem:[%s2954_s4 + $0xa8] sm:$0xff]  ;;  %v831_v47 = vld [vmem:[%s2954_s4 + $0xb8] sm:$0xff]  ;;  %vm694_vm6 = vcmask 916480   ;;  %vm743_vm7 = vcmask 908288  }
   0xe   : > { %s1927_s17 = sshll.u32 %s2962_s14, 1  ;;  %v2048_v45 = vpack.c.bf16 %v826_v44, %v824_v43  ;;  %v2050_v48 = vpack.c.bf16 %v831_v47, %v829_v46  ;;  %v828_v49 = vld [vmem:[%s2954_s4 + $0xa0] sm:$0xff]  ;;  %v830_v50 = vld [vmem:[%s2954_s4 + $0xb0] sm:$0xff]  ;;  %v833_v52 = vld [vmem:[%s2954_s4 + $0xc8] sm:$0xff]  ;;  %s2238_s30 = smov 73   ;;  %vm985_vm8 = vcmask 72704  }
   0xf   : > { %s351_s20 = scalar_lea.vmem %s2950_s0, %s1927_s17  ;;  %2037 = vmatpush1.bf16.msra.mxu0 %v2036_v25  ;;  %v2052_v51 = vpack.c.bf16 %v830_v50, %v828_v49  ;;  %v835_v53 = vld [vmem:[%s2954_s4 + $0xd8] sm:$0xff]  ;;  %v832_v55 = vld [vmem:[%s2954_s4 + $0xc0] sm:$0xff]  ;;  %v834_v56 = vld [vmem:[%s2954_s4 + $0xd0] sm:$0xff]  ;;  %s2239_s15 = smov 9   ;;  %vm1009_vm9 = vcmask 64512   ;;  %vm1034_vm10 = vcmask 56320  }
  0x10   : > { %v2334_v8 = vld [vmem:[%s351_s20] sm:$0x3]  ;;  %2039 = vmatprep.subr.bf16.mxu0 %v2038_v29  ;;  %v2054_v54 = vpack.c.bf16 %v835_v53, %v833_v52  ;;  %v2056_v58 = vpack.c.bf16 %v834_v56, %v832_v55  ;;  %v837_v60 = vld [vmem:[%s2954_s4 + $0xe8] sm:$0xff]  ;;  %v839_v61 = vld [vmem:[%s2954_s4 + $0xf8] sm:$0xff]  ;;  %s2240_s17 = smov 72   ;;  %s2241_s19 = smov 8  }
  0x11   : > { %v2339_v9 = vrot.slane %v2334_v8, %v2326_v5  ;;  %v2343_v10 = vrot.slane %v2334_v8, %v2328_v6  ;;  %v788_v59 = vld [vmem:[%s2952_s2] sm:$0xff]  ;;  %v2058_v62 = vpack.c.bf16 %v839_v61, %v837_v60  ;;  %v838_v1 = vld [vmem:[%s2954_s4 + $0xf0] sm:$0xff]  ;;  %v841_v3 = vld [vmem:[%s2954_s4 + $0x108] sm:$0xff]  ;;  %s2242_s20 = smov 71   ;;  %s2245_s23 = smov 63   ;;  %vm1093_vm11 = vcmask 515072  }
  0x12   : > { %v836_v63 = vld [vmem:[%s2954_s4 + $0xe0] sm:$0xff]  ;;  %v842_v14 = vld [vmem:[%s2954_s4 + $0x110] sm:$0xff]  ;;  %v845_v16 = vld [vmem:[%s2954_s4 + $0x128] sm:$0xff]  ;;  %s2247_s26 = smov 57   ;;  %s2249_s27 = smov 56   ;;  %vm1118_vm12 = vcmask 465920  }
  0x13   : > { %363 = vrot.lane.b32.xlu1 %v2339_v9, %s2222_s21  ;;  %418 = vrot.lane.b32.xlu0 %v2343_v10, %s2223_s22  ;;  %v847_v17 = vld [vmem:[%s2954_s4 + $0x138] sm:$0xff]  ;;  %v844_v19 = vld [vmem:[%s2954_s4 + $0x120] sm:$0xff]  ;;  %vm1143_vm13 = vcmask 457728   ;;  %vm1168_vm14 = vcmask 449536   ;;  %vm1322_vm15 = vcmask 523264  }
  0x14   : > { %2041 = vmatpush1.bf16.msra.mxu0 %v2040_v32  ;;  %v2066_v18 = vpack.c.bf16 %v847_v17, %v845_v16  ;;  %v846_v20 = vld [vmem:[%s2954_s4 + $0x130] sm:$0xff]  ;;  %v849_v22 = vld [vmem:[%s2954_s4 + $0x148] sm:$0xff]  ;;  %v848_v24 = vld [vmem:[%s2954_s4 + $0x140] sm:$0xff]  ;;  %v2235_v32 = vmov 8  }
  0x15   : > { %2043 = vmatprep.subr.bf16.mxu0 %v2042_v35  ;;  %v2068_v21 = vpack.c.bf16 %v846_v20, %v844_v19  ;;  %v850_v25 = vld [vmem:[%s2954_s4 + $0x150] sm:$0xff]  ;;  %v853_v27 = vld [vmem:[%s2954_s4 + $0x168] sm:$0xff]  ;;  %v855_v28 = vld [vmem:[%s2954_s4 + $0x178] sm:$0xff] }
  0x16   : > { %v2074_v29 = vpack.c.bf16 %v855_v28, %v853_v27  ;;  %v852_v30 = vld [vmem:[%s2954_s4 + $0x160] sm:$0xff]  ;;  %v854_v31 = vld [vmem:[%s2954_s4 + $0x170] sm:$0xff]  ;;  %v857_v34 = vld [vmem:[%s2954_s4 + $0x188] sm:$0xff] }
  0x17   : > { %370 = vrot.lane.b32.xlu1 %v2343_v10, %s2222_s21  ;;  %400 = vperm.xlu0 %2198, %v2350_v11   ;;  %s2234_s21 = smov 113   ;;  %v2076_v33 = vpack.c.bf16 %v854_v31, %v852_v30  ;;  %v859_v35 = vld [vmem:[%s2954_s4 + $0x198] sm:$0xff]  ;;  %v856_v37 = vld [vmem:[%s2954_s4 + $0x180] sm:$0xff]  ;;  %v861_v40 = vld [vmem:[%s2954_s4 + $0x1a8] sm:$0xff] }
  0x18   : > { %2045 = vmatpush1.bf16.msra.mxu0 %v2044_v39  ;;  %v2078_v36 = vpack.c.bf16 %v859_v35, %v857_v34  ;;  %v862_v43 = vld [vmem:[%s2954_s4 + $0x1b0] sm:$0xff]  ;;  %v864_v47 = vld [vmem:[%s2954_s4 + $0x1c0] sm:$0xff]  ;;  %v789_v50 = vld [vmem:[%s2952_s2 + $0x8] sm:$0xff] }
  0x19   : > { %2047 = vmatprep.subr.bf16.mxu0 %v2046_v42  ;;  %v860_v42 = vld [vmem:[%s2954_s4 + $0x1a0] sm:$0xff] }
  0x1a   : > { %v2084_v44 = vpack.c.bf16 %v862_v43, %v860_v42  ;;  %v868_v53 = vld [vmem:[%s2954_s4 + $0x1e0] sm:$0xff] }
  0x1b   : > { %415 = vrot.lane.b32.xlu1 %v2339_v9, %s2223_s22  ;;  %467 = vrot.lane.b32.xlu0 %v2343_v10, %s2224_s25  ;;  %v1929_v16 = vld [vmem:[%s2953_s3 + $0x2] sm:$0x3]  ;;  %v377_v20 = vld [vmem:[%s2953_s3] sm:$0x3]  ;;  %s2243_s22 = smov 7  }
  0x1c   : > { %2202 = vset.pattern.permute.xlu0 %v2220_v4  ;;  %2049 = vmatpush1.bf16.msra.mxu0 %v2048_v45  ;;  %v843_v4 = vld [vmem:[%s2954_s4 + $0x118] sm:$0xff]  ;;  %v865_v45 = vld [vmem:[%s2954_s4 + $0x1c8] sm:$0xff]  ;;  %v431_v19 = vrot.slane %v1929_v16, %v2328_v6  ;;  %v382_v27 = vrot.slane %v377_v20, %v2328_v6  ;;  %v386_v28 = vrot.slane %v377_v20, %v2326_v5  ;;  %v1931_v31 = vld [vmem:[%s2953_s3 + $0x6] sm:$0x3] }
  0x1d   : > { %2051 = vmatprep.subr.bf16.mxu0 %v2050_v48  ;;  %v2062_v13 = vpack.c.bf16 %v843_v4, %v841_v3  ;;  %v866_v48 = vld [vmem:[%s2954_s4 + $0x1d0] sm:$0xff] }
  0x1e   : > { %v2088_v49 = vpack.c.bf16 %v866_v48, %v864_v47 }
  0x1f   : > { %490 = vperm.xlu1 %2199, %v2320_v0   ;;  %494 = vperm.xlu0 %2202, %v2350_v11  }
  0x20   : > { %2053 = vmatpush1.bf16.msra.mxu0 %v2052_v51  ;;  %v871_v51 = vld [vmem:[%s2954_s4 + $0x1f8] sm:$0xff] }
  0x21   : > { %2055 = vmatprep.subr.bf16.mxu0 %v2054_v54  ;;  %v870_v54 = vld [vmem:[%s2954_s4 + $0x1f0] sm:$0xff] }
  0x22   : > { %v2092_v55 = vpack.c.bf16 %v870_v54, %v868_v53 }
  0x23   : > { %2200 = vset.pattern.permute.xlu1 %v2219_v2  ;;  %2203 = vset.pattern.permute.xlu0 %v2225_v12  ;;  %v2060_v2 = vpack.c.bf16 %v838_v1, %v836_v63  ;;  %v840_v12 = vld [vmem:[%s2954_s4 + $0x100] sm:$0xff] }
  0x24   : > { %445 = vperm.xlu1 %2200, %v2350_v11   ;;  %566 = vperm.xlu0 %2203, %v2320_v0  }
  0x25   : > { %2057 = vmatpush1.bf16.msra.mxu0 %v2056_v58 }
  0x26   : > { %2059 = vmatprep.subr.bf16.mxu0 %v2058_v62 }
  0x28   : > { %464 = vrot.lane.b32.xlu1 %v2339_v9, %s2224_s25  ;;  %570 = vperm.xlu0 %2203, %v2350_v11   ;;  %s2246_s25 = smov 121  }
  0x29   : > { %2201 = vset.pattern.permute.xlu1 %v2226_v15  ;;  %2061 = vmatpush1.bf16.msra.mxu0 %v2060_v2  ;;  %v2064_v15 = vpack.c.bf16 %v842_v14, %v840_v12 }
  0x2a   : > { %2063 = vmatprep.subr.bf16.mxu0 %v2062_v13 }
  0x2c   : > { %539 = vperm.xlu1 %2201, %v2320_v0   ;;  %594 = vrot.lane.b32.xlu0 %v2339_v9, %s2227_s24 }
  0x2d   : > { %2206 = vset.pattern.permute.xlu0 %v2228_v26  ;;  %2065 = vmatpush1.bf16.msra.mxu0 %v2064_v15 }
  0x2e   : > { %2067 = vmatprep.subr.bf16.mxu0 %v2066_v18 }
  0x30   : > { %513 = vrot.lane.b32.xlu1 %v2339_v9, %s2229_s29  ;;  %622 = vperm.xlu0 %2206, %v2350_v11  }
  0x31   : > { %2069 = vmatpush1.bf16.msra.mxu0 %v2068_v21  ;;  %v435_v21 = vrot.slane %v1929_v16, %v2326_v5 }
  0x34   : > { %516 = vrot.lane.b32.xlu1 %v2343_v10, %s2229_s29  ;;  %2207 = vset.pattern.permute.xlu0 %v2230_v38  ;;  %v858_v38 = vld [vmem:[%s2954_s4 + $0x190] sm:$0xff] }
  0x35   : > { %716 = vperm.xlu0 %2207, %v2320_v0   ;;  %v2080_v39 = vpack.c.bf16 %v858_v38, %v856_v37 }
  0x38   : > { %543 = vperm.xlu1 %2201, %v2350_v11  }
  0x39   : > { %692 = vrot.lane.b32.xlu0 %v2339_v9, %s2231_s16 }
  0x3c   : > { %2204 = vset.pattern.permute.xlu1 %v2228_v26  ;;  %v2072_v26 = vpack.c.bf16 %v850_v25, %v848_v24  ;;  %v1930_v24 = vld [vmem:[%s2953_s3 + $0x4] sm:$0x3] }
  0x3d   : > { %618 = vperm.xlu1 %2204, %v2320_v0   ;;  %720 = vperm.xlu0 %2207, %v2350_v11   ;;  %v480_v35 = vrot.slane %v1930_v24, %v2328_v6 }
  0x41   : > { %592 = vrot.lane.b32.xlu1 %v2343_v10, %s2227_s24  ;;  %741 = vrot.lane.b32.xlu0 %v2339_v9, %s2233_s18 }
  0x42   : > { %2205 = vset.pattern.permute.xlu1 %v2232_v57  ;;  %2209 = vset.pattern.permute.xlu0 %v2221_v7 }
  0x45   : > { %667 = vperm.xlu1 %2205, %v2320_v0   ;;  %792 = vperm.xlu0 %2209, %v788_v59  }
  0x49   : > { %641 = vrot.lane.b32.xlu1 %v2343_v10, %s2234_s21 }
  0x4d   : > { %643 = vrot.lane.b32.xlu1 %v2339_v9, %s2234_s21  ;;  %v851_v9 = vld [vmem:[%s2954_s4 + $0x158] sm:$0xff]  ;;  %s2244_s21 = smov 65  }
  0x4e   : > { %v2070_v23 = vpack.c.bf16 %v851_v9, %v849_v22  ;;  %v1932_v9 = vld [vmem:[%s2953_s3 + $0x8] sm:$0x3] }
  0x4f   : > { %v564_v30 = vmul.f32 %v1932_v9, %v2334_v8  ;;  %v1933_v8 = vld [vmem:[%s2953_s3 + $0xa] sm:$0x3] }
  0x50   : > { %2071 = vmatprep.subr.bf16.mxu0 %v2070_v23 }
  0x51   : > { %671 = vperm.xlu1 %2205, %v2350_v11   ;;  %2073 = vmatpush1.bf16.msra.mxu0 %v2072_v26 }
  0x52   : > { %2075 = vmatprep.subr.bf16.mxu0 %v2074_v29 }
  0x55   : > { %690 = vrot.lane.b32.xlu1 %v2343_v10, %s2231_s16  ;;  %2077 = vmatpush1.bf16.msra.mxu0 %v2076_v33 }
  0x56   : > { %2208 = vset.pattern.permute.xlu1 %v2235_v32  ;;  %2079 = vmatprep.subr.bf16.mxu0 %v2078_v36  ;;  %v484_v36 = vrot.slane %v1930_v24, %v2326_v5 }
  0x59   : > { %765 = vperm.xlu1 %2208, %v2320_v0   ;;  %2081 = vmatpush1.bf16.msra.mxu0 %v2080_v39  ;;  %v863_v0 = vld [vmem:[%s2954_s4 + $0x1b8] sm:$0xff]  ;;  %v529_v39 = vrot.slane %v1931_v31, %v2328_v6 }
  0x5a   : > { %v2082_v41 = vpack.c.bf16 %v863_v0, %v861_v40  ;;  %v533_v40 = vrot.slane %v1931_v31, %v2326_v5 }
  0x5c   : > { %2083 = vmatprep.subr.bf16.mxu0 %v2082_v41 }
  0x5d   : > { %739 = vrot.lane.b32.xlu1 %v2343_v10, %s2233_s18  ;;  %2085 = vmatpush1.bf16.msra.mxu0 %v2084_v44  ;;  %v867_v10 = vld [vmem:[%s2954_s4 + $0x1d8] sm:$0xff]  ;;  %v577_v44 = vrot.slane %v564_v30, %v2328_v6  ;;  %s2248_s18 = smov 120  }
  0x5e   : > { %v2086_v46 = vpack.c.bf16 %v867_v10, %v865_v45  ;;  %v2648_v45 = vld [vmem:[%s2953_s3 + $0xc] sm:$0x3] }
  0x5f   : > { %v657_v54 = vrot.slane %v2648_v45, %v2328_v6 }
  0x60   : > { %2087 = vmatprep.subr.bf16.mxu0 %v2086_v46 }
  0x61   : > { %769 = vperm.xlu1 %2208, %v2350_v11   ;;  %2089 = vmatpush1.bf16.msra.mxu0 %v2088_v49  ;;  %v869_v11 = vld [vmem:[%s2954_s4 + $0x1e8] sm:$0xff] }
  0x62   : > { %v2090_v52 = vpack.c.bf16 %v871_v51, %v869_v11  ;;  %v581_v11 = vrot.slane %v564_v30, %v2326_v5  ;;  %v608_v51 = vrot.slane %v1933_v8, %v2328_v6 }
  0x64   : > { %2091 = vmatprep.subr.bf16.mxu0 %v2090_v52  ;;  %v612_v52 = vrot.slane %v1933_v8, %v2326_v5 }
  0x65   : > { %2210 = vset.pattern.permute.xlu1 %v2221_v7  ;;  %2093 = vmatpush1.bf16.msra.mxu0 %v2092_v55  ;;  %v661_v55 = vrot.slane %v2648_v45, %v2326_v5 }
  0x66   : > { %797 = vperm.xlu1 %2210, %v789_v50  }
  0x85   : > { %v364_v56 = vpop.permute.xlu1 %363 }
  0x86   : > { %v2590_v58 = vpop.permute.xlu0 %441 }
  0x89   : > { %v371_v57 = vpop.permute.xlu1 %370 }
  0x8a   : > { %v373_v32 = vsel %vm372_vm1, %v371_v57, %v364_v56  ;;  %v376_v33 = vsel %vm372_vm1, %v364_v56, %v371_v57  ;;  %v2665_v56 = vld [vmem:[%s2953_s3 + $0xe] sm:$0x3] }
  0x8b   : > { %v2592_v60 = vpop.permute.xlu0 %395  ;;  %v389_v41 = vmul.f32 %v382_v27, %v376_v33  ;;  %v390_v42 = vmul.f32 %v386_v28, %v373_v32 }
  0x8d   : > { %v416_v59 = vpop.permute.xlu1 %415  ;;  %v406_v57 = vrot.slane %v389_v41, %v2328_v6 }
  0x8f   : > { %v419_v61 = vpop.permute.xlu0 %418  ;;  %v411_v9 = vmul.f32 %v406_v57, %v2592_v60 }
  0x90   : > { %v424_v22 = vsel %vm420_vm0, %v416_v59, %v419_v61  ;;  %v421_v23 = vsel %vm420_vm0, %v419_v61, %v416_v59  ;;  %v410_v59 = vrot.slane %v390_v42, %v2328_v6 }
  0x91   : > { %v438_v29 = vmul.f32 %v431_v19, %v424_v22  ;;  %v439_v34 = vmul.f32 %v435_v21, %v421_v23  ;;  %v706_v21 = vrot.slane %v2665_v56, %v2328_v6  ;;  %v710_v22 = vrot.slane %v2665_v56, %v2326_v5 }
  0x92   : > { %v412_v23 = vmul.f32 %v410_v59, %v2592_v60 }
  0x93   : > { %v451_v43 = vrot.slane %v438_v29, %v2328_v6  ;;  %v455_v10 = vrot.slane %v439_v34, %v2328_v6 }
  0x96   : > { %v2598_v63 = vpop.permute.xlu0 %400 }
  0x9a   : > { %v468_v2 = vpop.permute.xlu0 %467 }
  0x9e   : > { %v2594_v7 = vpop.permute.xlu1 %490  ;;  %v2602_v12 = vpop.permute.xlu0 %494 }
  0xa3   : > { %v2596_v62 = vpop.permute.xlu1 %445  ;;  %v2604_v14 = vpop.permute.xlu0 %566 }
  0xa4   : > { %v459_v19 = vmul.f32 %v455_v10, %v2596_v62 }
  0xa7   : > { %v465_v1 = vpop.permute.xlu1 %464  ;;  %v2611_v17 = vpop.permute.xlu0 %570 }
  0xa8   : > { %v473_v37 = vsel %vm469_vm2, %v465_v1, %v468_v2  ;;  %v470_v38 = vsel %vm469_vm2, %v468_v2, %v465_v1  ;;  %v456_v2 = vmul.f32 %v451_v43, %v2590_v58  ;;  %v586_v45 = vmul.f32 %v577_v44, %v2611_v17 }
  0xa9   : > { %v487_v46 = vmul.f32 %v480_v35, %v473_v37  ;;  %v488_v50 = vmul.f32 %v484_v36, %v470_v38 }
  0xaa   : > { %v460_v32 = vadd.f32 %v456_v2, %v411_v9 }
  0xab   : > { %v2600_v3 = vpop.permute.xlu1 %539  ;;  %v595_v25 = vpop.permute.xlu0 %594  ;;  %v500_v16 = vrot.slane %v487_v46, %v2328_v6  ;;  %v504_v20 = vrot.slane %v488_v50, %v2328_v6 }
  0xad   : > { %v505_v60 = vmul.f32 %v500_v16, %v2594_v7  ;;  %v506_v36 = vmul.f32 %v504_v20, %v2594_v7  ;;  %v507_v37 = vmul.f32 %v500_v16, %v2602_v12 }
  0xaf   : > { %v514_v4 = vpop.permute.xlu1 %513  ;;  %v2653_v49 = vpop.permute.xlu0 %622  ;;  %v509_v7 = vadd.f32 %v505_v60, %v460_v32 }
  0xb3   : > { %v517_v13 = vpop.permute.xlu1 %516 }
  0xb4   : > { %v519_v47 = vsel %vm518_vm3, %v517_v13, %v514_v4  ;;  %v522_v48 = vsel %vm518_vm3, %v514_v4, %v517_v13  ;;  %v457_v4 = vmul.f32 %v455_v10, %v2590_v58  ;;  %v458_v13 = vmul.f32 %v451_v43, %v2596_v62  ;;  %v2683_v27 = vpop.permute.xlu0 %716 }
  0xb5   : > { %v536_v61 = vmul.f32 %v529_v39, %v522_v48  ;;  %v537_v1 = vmul.f32 %v533_v40, %v519_v47  ;;  %v413_v58 = vmul.f32 %v406_v57, %v2598_v63  ;;  %v414_v62 = vmul.f32 %v410_v59, %v2598_v63 }
  0xb6   : > { %v461_v33 = vadd.f32 %v457_v4, %v412_v23  ;;  %v508_v39 = vmul.f32 %v504_v20, %v2602_v12 }
  0xb7   : > { %v2606_v15 = vpop.permute.xlu1 %543  ;;  %v549_v29 = vrot.slane %v536_v61, %v2328_v6  ;;  %v553_v30 = vrot.slane %v537_v1, %v2328_v6  ;;  %v462_v34 = vadd.f32 %v458_v13, %v413_v58  ;;  %v463_v35 = vadd.f32 %v459_v19, %v414_v62 }
  0xb8   : > { %v693_v46 = vpop.permute.xlu0 %692  ;;  %v510_v47 = vadd.f32 %v506_v36, %v461_v33 }
  0xb9   : > { %v554_v42 = vmul.f32 %v549_v29, %v2600_v3  ;;  %v555_v43 = vmul.f32 %v553_v30, %v2600_v3  ;;  %v556_v10 = vmul.f32 %v549_v29, %v2606_v15  ;;  %v557_v12 = vmul.f32 %v553_v30, %v2606_v15 }
  0xbb   : > { %v558_v57 = vadd.f32 %v554_v42, %v509_v7  ;;  %v559_v59 = vadd.f32 %v555_v43, %v510_v47 }
  0xbc   : > { %v2613_v18 = vpop.permute.xlu1 %618  ;;  %v721_v2 = vpop.permute.xlu0 %720 }
  0xc0   : > { %v593_v26 = vpop.permute.xlu1 %592  ;;  %v742_v60 = vpop.permute.xlu0 %741 }
  0xc1   : > { %v597_v24 = vsel %vm596_vm4, %v593_v26, %v595_v25  ;;  %v601_v31 = vsel %vm596_vm4, %v595_v25, %v593_v26  ;;  %v584_v25 = vmul.f32 %v577_v44, %v2604_v14  ;;  %v585_v26 = vmul.f32 %v581_v11, %v2604_v14 }
  0xc2   : > { %v615_v38 = vmul.f32 %v608_v51, %v597_v24  ;;  %v616_v63 = vmul.f32 %v612_v52, %v601_v31  ;;  %v511_v52 = vadd.f32 %v507_v37, %v462_v34  ;;  %v587_v14 = vmul.f32 %v581_v11, %v2611_v17 }
  0xc3   : > { %v589_v24 = vadd.f32 %v585_v26, %v559_v59 }
  0xc4   : > { %v2641_v0 = vpop.permute.xlu1 %667  ;;  %v628_v48 = vrot.slane %v615_v38, %v2328_v6  ;;  %v632_v56 = vrot.slane %v616_v63, %v2328_v6  ;;  %v560_v15 = vadd.f32 %v556_v10, %v511_v52 }
  0xc6   : > { %v633_v17 = vmul.f32 %v628_v48, %v2613_v18  ;;  %v634_v16 = vmul.f32 %v632_v56, %v2613_v18  ;;  %v636_v19 = vmul.f32 %v632_v56, %v2653_v49  ;;  %v635_v29 = vmul.f32 %v628_v48, %v2653_v49 }
  0xc8   : > { %v642_v53 = vpop.permute.xlu1 %641  ;;  %v638_v37 = vadd.f32 %v634_v16, %v589_v24 }
  0xcc   : > { %v644_v28 = vpop.permute.xlu1 %643 }
  0xcd   : > { %v646_v40 = vsel %vm645_vm5, %v642_v53, %v644_v28  ;;  %v650_v8 = vsel %vm645_vm5, %v644_v28, %v642_v53  ;;  %v512_v53 = vadd.f32 %v508_v39, %v463_v35  ;;  %v590_v28 = vadd.f32 %v586_v45, %v560_v15 }
  0xce   : > { %v664_v50 = vmul.f32 %v657_v54, %v646_v40  ;;  %v665_v51 = vmul.f32 %v661_v55, %v650_v8  ;;  %v1936_v54 = vld [vmem:[%s2953_s3 + $0x10] sm:$0x3] }
  0xcf   : > { %v561_v1 = vadd.f32 %v557_v12, %v512_v53  ;;  %v755_v23 = vrot.slane %v1936_v54, %v2328_v6  ;;  %v759_v58 = vrot.slane %v1936_v54, %v2326_v5  ;;  %v639_v63 = vadd.f32 %v635_v29, %v590_v28  ;;  %v1945_v28 = vld [vmem:[%s2957_s7 + $0x4] ss:$0 sm:$0xff] }
  0xd0   : > { %v672_v41 = vpop.permute.xlu1 %671  ;;  %v677_v11 = vrot.slane %v664_v50, %v2328_v6  ;;  %v681_v55 = vrot.slane %v665_v51, %v2328_v6  ;;  %v793_v51 = vpop.permute.xlu0 %792 }
  0xd1   : > { %v591_v62 = vadd.f32 %v587_v14, %v561_v1 }
  0xd2   : > { %v682_v18 = vmul.f32 %v677_v11, %v2641_v0  ;;  %v683_v31 = vmul.f32 %v681_v55, %v2641_v0  ;;  %v685_v32 = vmul.f32 %v681_v55, %v672_v41  ;;  %v684_v34 = vmul.f32 %v677_v11, %v672_v41 }
  0xd3   : > { %v640_v33 = vadd.f32 %v636_v19, %v591_v62 }
  0xd4   : > { %v691_v3 = vpop.permute.xlu1 %690  ;;  %v687_v42 = vadd.f32 %v683_v31, %v638_v37  ;;  %v688_v45 = vadd.f32 %v684_v34, %v639_v63  ;;  %v1182_v31 = vld [vmem:[%s2955_s5 + $0x8] sm:$0xff]  ;;  %v1191_v34 = vld [vmem:[%s2956_s6 + $0x10] sm:$0xff] }
  0xd5   : > { %v695_v44 = vsel %vm694_vm6, %v691_v3, %v693_v46  ;;  %v699_v61 = vsel %vm694_vm6, %v693_v46, %v691_v3  ;;  %1954 = vmatprep.mubr.msk.f32.mxu1 %vm420_vm0, %v1182_v31 }
  0xd6   : > { %v713_v4 = vmul.f32 %v706_v21, %v695_v44  ;;  %v714_v13 = vmul.f32 %v710_v22, %v699_v61  ;;  %v588_v21 = vadd.f32 %v584_v25, %v558_v57  ;;  %v689_v25 = vadd.f32 %v685_v32, %v640_v33  ;;  %v1189_v32 = vld [vmem:[%s2956_s6] sm:$0xff]  ;;  %v1190_v33 = vld [vmem:[%s2956_s6 + $0x8] sm:$0xff] }
  0xd8   : > { %v726_v20 = vrot.slane %v713_v4, %v2328_v6  ;;  %v766_v9 = vpop.permute.xlu1 %765  ;;  %v730_v22 = vrot.slane %v714_v13, %v2328_v6  ;;  %v637_v30 = vadd.f32 %v633_v17, %v588_v21 }
  0xda   : > { %v731_v35 = vmul.f32 %v726_v20, %v2683_v27  ;;  %v734_v38 = vmul.f32 %v730_v22, %v721_v2  ;;  %v732_v49 = vmul.f32 %v730_v22, %v2683_v27  ;;  %v733_v0 = vmul.f32 %v726_v20, %v721_v2 }
  0xdb   : > { %v686_v26 = vadd.f32 %v682_v18, %v637_v30 }
  0xdc   : > { %v740_v36 = vpop.permute.xlu1 %739  ;;  %v738_v12 = vadd.f32 %v734_v38, %v689_v25  ;;  %v736_v46 = vadd.f32 %v732_v49, %v687_v42  ;;  %v737_v52 = vadd.f32 %v733_v0, %v688_v45  ;;  %v1937_v38 = vld [vmem:[%s2957_s7] ss:$0 sm:$0xff]  ;;  %v1939_v42 = vld [vmem:[%s2957_s7 + $0x1] ss:$0 sm:$0xff] }
  0xdd   : > { %v744_v5 = vsel %vm743_vm7, %v740_v36, %v742_v60  ;;  %v748_v39 = vsel %vm743_vm7, %v742_v60, %v740_v36  ;;  %v735_v10 = vadd.f32 %v731_v35, %v686_v26  ;;  %v1192_v60 = vld [vmem:[%s2956_s6 + $0x18] sm:$0xff] }
  0xde   : > { %v762_v40 = vmul.f32 %v755_v23, %v744_v5  ;;  %v763_v8 = vmul.f32 %v759_v58, %v748_v39  ;;  %v2237_v23 = vmov 0.0|0.0  }
  0xdf   : > { %2094 = vmatprep.subr.bf16.mxu1 %v2237_v23 }
  0xe0   : > { %v775_v41 = vrot.slane %v762_v40, %v2328_v6  ;;  %v779_v43 = vrot.slane %v763_v8, %v2328_v6  ;;  %v770_v7 = vpop.permute.xlu1 %769 }
  0xe2   : > { %v782_v47 = vmul.f32 %v775_v41, %v770_v7  ;;  %v783_v48 = vmul.f32 %v779_v43, %v770_v7  ;;  %v780_v50 = vmul.f32 %v775_v41, %v766_v9  ;;  %v781_v27 = vmul.f32 %v779_v43, %v766_v9 }
  0xe4   : > { %v784_v53 = vadd.f32 %v780_v50, %v735_v10  ;;  %v787_v14 = vadd.f32 %v783_v48, %v738_v12  ;;  %v785_v56 = vadd.f32 %v781_v27, %v736_v46  ;;  %v786_v3 = vadd.f32 %v782_v47, %v737_v52  ;;  %v1941_v50 = vld [vmem:[%s2957_s7 + $0x2] ss:$0 sm:$0xff] }
  0xe5   : > { %v798_v57 = vpop.permute.xlu1 %797 }
  0xe6   : > { %v800_v59 = vadd.f32 %v793_v51, %v784_v53  ;;  %v803_v44 = vadd.f32 %v798_v57, %v787_v14  ;;  %v801_v61 = vadd.f32 %v793_v51, %v785_v56  ;;  %v802_v1 = vadd.f32 %v798_v57, %v786_v3 }
  0xe8   : > { %v804_v6 = vmax.f32 %v800_v59, 0.0  ;;  %v805_v15 = vmax.f32 %v801_v61, 0.0  ;;  %v807_v2 = vmax.f32 %v803_v44, 0.0  ;;  %v806_v4 = vmax.f32 %v802_v1, 0.0  ;;  %v1943_v44 = vld [vmem:[%s2957_s7 + $0x3] ss:$0 sm:$0xff] }
  0xea   : > { %936 = vmatprep.mubr.f32.mxu0 %v805_v15 }
  0xeb   : > { %937 = vmatmul.mubr.f32.vlgmr.msra.gmra.mrb[0].mxu0 %v804_v6 }
  0xec   : > { %942 = vmatprep.mubr.f32.mxu0 %v807_v2 }
  0xef   : > { %943 = vmatmul.mubr.f32.gmra.mrb[2].mxu0 %v806_v4 }
 0x1be   : > { %v938_v13 = vpop.f32.mrb[0].mxu0 }
 0x1bf   : > { %951 = vrot.lane.b32.xlu1 %v938_v13, %s2236_s28  ;;  %v940_v54 = vpop.f32.mrb[1].mxu0 }
 0x1c2   : > { %v944_v17 = vpop.f32.mrb[2].mxu0 }
 0x1c3   : > { %961 = vrot.lane.b32.xlu1 %v940_v54, %s2236_s28  ;;  %953 = vrot.lane.b32.xlu0 %v944_v17, %s2236_s28  ;;  %v946_v11 = vpop.f32.mrb[3].mxu0 }
 0x1c7   : > { %963 = vrot.lane.b32.xlu0 %v946_v11, %s2236_s28  ;;  %s2153_s28 = smul.u32 224, %s2962_s14 }
 0x1c9   : > { %s2913_s11 = scalar_lea.vmem %s2960_s10, %s2153_s28 }
 0x231   : > { %v952_v55 = vpop.permute.xlu1 %951 }
 0x232   : > { %v957_v20 = vmax.f32 %v938_v13, %v952_v55 }
 0x235   : > { %v954_v16 = vpop.permute.xlu0 %953  ;;  %v962_v19 = vpop.permute.xlu1 %961 }
 0x236   : > { %v967_v9 = vmax.f32 %v940_v54, %v962_v19  ;;  %v958_v58 = vmax.f32 %v944_v17, %v954_v16 }
 0x238   : > { %v969_v21 = vmax.f32 %v957_v20, %v967_v9 }
 0x239   : > { %v964_v22 = vpop.permute.xlu0 %963 }
 0x23a   : > { %v968_v24 = vmax.f32 %v946_v11, %v964_v22  ;;  %973 = vrot.lane.b32.xlu1 %v969_v21, %s2238_s30  ;;  %v2732_v29 = vmul.f32 %v1945_v28, %v969_v21  ;;  %v1947_v11 = vld [vmem:[%s2957_s7 + $0x5] ss:$0 sm:$0xff] }
 0x23c   : > { %v970_v62 = vmax.f32 %v958_v58, %v968_v24 }
 0x23e   : > { %975 = vrot.lane.b32.xlu0 %v970_v62, %s2238_s30  ;;  %979 = vrot.lane.b32.xlu1 %v969_v21, %s2239_s15  ;;  %v2734_v30 = vmul.f32 %v1945_v28, %v970_v62  ;;  %v1949_v28 = vld [vmem:[%s2957_s7 + $0x6] ss:$0 sm:$0xff] }
 0x240   : > { %v2107_v18 = vpack.c.bf16 %v2734_v30, %v2732_v29 }
 0x242   : > { %981 = vrot.lane.b32.xlu0 %v970_v62, %s2239_s15  ;;  %997 = vrot.lane.b32.xlu1 %v969_v21, %s2240_s17 }
 0x246   : > { %999 = vrot.lane.b32.xlu0 %v970_v62, %s2240_s17  ;;  %1003 = vrot.lane.b32.xlu1 %v969_v21, %s2241_s19 }
 0x24a   : > { %1005 = vrot.lane.b32.xlu0 %v970_v62, %s2241_s19  ;;  %1022 = vrot.lane.b32.xlu1 %v969_v21, %s2242_s20 }
 0x24e   : > { %1024 = vrot.lane.b32.xlu0 %v970_v62, %s2242_s20  ;;  %1028 = vrot.lane.b32.xlu1 %v969_v21, %s2243_s22 }
 0x252   : > { %1030 = vrot.lane.b32.xlu0 %v970_v62, %s2243_s22  ;;  %1047 = vrot.lane.b32.xlu1 %v969_v21, %s2244_s21 }
 0x256   : > { %1049 = vrot.lane.b32.xlu0 %v970_v62, %s2244_s21  ;;  %1053 = vrot.lane.b32.xlu1 %v969_v21, %s2229_s29 }
 0x25a   : > { %1055 = vrot.lane.b32.xlu0 %v970_v62, %s2229_s29  ;;  %1081 = vrot.lane.b32.xlu1 %v969_v21, %s2227_s24  ;;  %s2250_s29 = smov 119  }
 0x25e   : > { %1083 = vrot.lane.b32.xlu0 %v970_v62, %s2227_s24  ;;  %1087 = vrot.lane.b32.xlu1 %v969_v21, %s2245_s23  ;;  %s2251_s24 = smov 55  }
 0x262   : > { %1089 = vrot.lane.b32.xlu0 %v970_v62, %s2245_s23  ;;  %1106 = vrot.lane.b32.xlu1 %v969_v21, %s2246_s25 }
 0x266   : > { %1108 = vrot.lane.b32.xlu0 %v970_v62, %s2246_s25  ;;  %1112 = vrot.lane.b32.xlu1 %v969_v21, %s2247_s26  ;;  %s2253_s25 = smov 96  }
 0x26a   : > { %1114 = vrot.lane.b32.xlu0 %v970_v62, %s2247_s26  ;;  %1131 = vrot.lane.b32.xlu1 %v969_v21, %s2248_s18 }
 0x26e   : > { %1133 = vrot.lane.b32.xlu0 %v970_v62, %s2248_s18  ;;  %1137 = vrot.lane.b32.xlu1 %v969_v21, %s2249_s27 }
 0x272   : > { %1139 = vrot.lane.b32.xlu0 %v970_v62, %s2249_s27  ;;  %1156 = vrot.lane.b32.xlu1 %v969_v21, %s2250_s29 }
 0x276   : > { %1158 = vrot.lane.b32.xlu0 %v970_v62, %s2250_s29  ;;  %1162 = vrot.lane.b32.xlu1 %v969_v21, %s2251_s24 }
 0x27a   : > { %1164 = vrot.lane.b32.xlu0 %v970_v62, %s2251_s24  ;;  %1195 = vperm.xlu1 %2210, %v1189_v32  }
 0x27e   : > { %1200 = vperm.xlu0 %2209, %v1190_v33   ;;  %1205 = vperm.xlu1 %2210, %v1191_v34  }
 0x282   : > { %1210 = vperm.xlu0 %2209, %v1192_v60  }
 0x2ac   : > { %v974_v35 = vpop.permute.xlu1 %973 }
 0x2b0   : > { %v976_v36 = vpop.permute.xlu0 %975  ;;  %v980_v37 = vpop.permute.xlu1 %979 }
 0x2b1   : > { %v986_v5 = vsel %vm985_vm8, %v974_v35, %v980_v37  ;;  %v1951_v35 = vld [vmem:[%s2957_s7 + $0x7] ss:$0 sm:$0xff] }
 0x2b2   : > { %v995_v40 = vmul.f32 %v1937_v38, %v986_v5 }
 0x2b4   : > { %v982_v39 = vpop.permute.xlu0 %981  ;;  %v998_v49 = vpop.permute.xlu1 %997 }
 0x2b5   : > { %v987_v63 = vsel %vm985_vm8, %v976_v36, %v982_v39 }
 0x2b6   : > { %v996_v8 = vmul.f32 %v1937_v38, %v987_v63 }
 0x2b8   : > { %v1000_v25 = vpop.permute.xlu0 %999  ;;  %v1004_v0 = vpop.permute.xlu1 %1003  ;;  %v2095_v26 = vpack.c.bf16 %v996_v8, %v995_v40 }
 0x2b9   : > { %v1010_v41 = vsel %vm1009_vm9, %v998_v49, %v1004_v0 }
 0x2ba   : > { %2096 = vmatpush1.bf16.msra.mxu1 %v2095_v26  ;;  %v1020_v10 = vmul.f32 %v1939_v42, %v1010_v41  ;;  %v1315_v41 = vld [vmem:[%s2958_s8 + $0x8] sm:$0xff] }
 0x2bb   : > { %2097 = vmatprep.subr.bf16.mxu1 %v2237_v23 }
 0x2bc   : > { %v1006_v43 = vpop.permute.xlu0 %1005  ;;  %v1023_v7 = vpop.permute.xlu1 %1022 }
 0x2bd   : > { %v1011_v45 = vsel %vm1009_vm9, %v1000_v25, %v1006_v43  ;;  %v1953_v25 = vld [vmem:[%s2957_s7 + $0x8] ss:$0 sm:$0xff] }
 0x2be   : > { %v1021_v12 = vmul.f32 %v1939_v42, %v1011_v45  ;;  %v1314_v42 = vld [vmem:[%s2958_s8] sm:$0xff] }
 0x2c0   : > { %v1025_v46 = vpop.permute.xlu0 %1024  ;;  %v1029_v47 = vpop.permute.xlu1 %1028  ;;  %v2098_v48 = vpack.c.bf16 %v1021_v12, %v1020_v10  ;;  %v2121_v10 = vpack.c.bf16 %v1315_v41, %v1314_v42  ;;  %v1473_v42 = vld [vmem:[%s2959_s9 + $0x68] sm:$0xff] }
 0x2c1   : > { %v1035_v27 = vsel %vm1034_vm10, %v1023_v7, %v1029_v47  ;;  %v1181_v47 = vld [vmem:[%s2955_s5] sm:$0xff] }
 0x2c2   : > { %2099 = vmatpush1.bf16.msra.mxu1 %v2098_v48  ;;  %v1045_v14 = vmul.f32 %v1941_v50, %v1035_v27  ;;  %v1184_v48 = vld [vmem:[%s2955_s5 + $0x18] sm:$0xff]  ;;  %v1183_v27 = vld [vmem:[%s2955_s5 + $0x10] sm:$0xff] }
 0x2c3   : > { %2100 = vmatprep.subr.bf16.mxu1 %v2237_v23 }
 0x2c4   : > { %v1031_v51 = vpop.permute.xlu0 %1030  ;;  %v1048_v52 = vpop.permute.xlu1 %1047 }
 0x2c5   : > { %v1036_v53 = vsel %vm1034_vm10, %v1025_v46, %v1031_v51  ;;  %v1316_v46 = vld [vmem:[%s2958_s8 + $0x10] sm:$0xff]  ;;  %v1186_v51 = vld [vmem:[%s2955_s5 + $0x28] sm:$0xff] }
 0x2c6   : > { %v1046_v56 = vmul.f32 %v1941_v50, %v1036_v53  ;;  %v1188_v53 = vld [vmem:[%s2955_s5 + $0x38] sm:$0xff] }
 0x2c8   : > { %v1050_v3 = vpop.permute.xlu0 %1049  ;;  %v1054_v57 = vpop.permute.xlu1 %1053  ;;  %v2101_v59 = vpack.c.bf16 %v1046_v56, %v1045_v14  ;;  %v1187_v14 = vld [vmem:[%s2955_s5 + $0x30] sm:$0xff]  ;;  %v1318_v56 = vld [vmem:[%s2958_s8 + $0x20] sm:$0xff] }
 0x2c9   : > { %v1059_v61 = vsel %vm518_vm3, %v1048_v52, %v1054_v57  ;;  %v1185_v52 = vld [vmem:[%s2955_s5 + $0x20] sm:$0xff] }
 0x2ca   : > { %2102 = vmatpush1.bf16.msra.mxu1 %v2101_v59  ;;  %v1069_v2 = vmul.f32 %v1943_v44, %v1059_v61  ;;  %v1320_v59 = vld [vmem:[%s2958_s8 + $0x30] sm:$0xff] }
 0x2cb   : > { %2103 = vmatprep.subr.bf16.mxu1 %v2237_v23 }
 0x2cc   : > { %v1056_v6 = vpop.permute.xlu0 %1055  ;;  %v1082_v15 = vpop.permute.xlu1 %1081 }
 0x2cd   : > { %v1060_v1 = vsel %vm518_vm3, %v1050_v3, %v1056_v6  ;;  %v1319_v3 = vld [vmem:[%s2958_s8 + $0x28] sm:$0xff] }
 0x2ce   : > { %v1070_v4 = vmul.f32 %v1943_v44, %v1060_v1  ;;  %v2129_v57 = vpack.c.bf16 %v1319_v3, %v1318_v56  ;;  %v1321_v44 = vld [vmem:[%s2958_s8 + $0x38] sm:$0xff] }
 0x2cf   : > { %v2133_v61 = vpack.c.bf16 %v1321_v44, %v1320_v59 }
 0x2d0   : > { %v1084_v13 = vpop.permute.xlu0 %1083  ;;  %v1088_v54 = vpop.permute.xlu1 %1087  ;;  %v2104_v17 = vpack.c.bf16 %v1070_v4, %v1069_v2 }
 0x2d1   : > { %v1094_v55 = vsel %vm1093_vm11, %v1082_v15, %v1088_v54 }
 0x2d2   : > { %2105 = vmatpush1.bf16.msra.mxu1 %v2104_v17  ;;  %v1104_v9 = vmul.f32 %v1947_v11, %v1094_v55 }
 0x2d3   : > { %2106 = vmatprep.subr.bf16.mxu1 %v2237_v23 }
 0x2d4   : > { %v1090_v16 = vpop.permute.xlu0 %1089  ;;  %v1107_v19 = vpop.permute.xlu1 %1106 }
 0x2d5   : > { %v1095_v20 = vsel %vm1093_vm11, %v1084_v13, %v1090_v16 }
 0x2d6   : > { %v1105_v21 = vmul.f32 %v1947_v11, %v1095_v20  ;;  %2108 = vmatpush1.bf16.msra.mxu1 %v2107_v18 }
 0x2d7   : > { %2109 = vmatprep.subr.bf16.mxu1 %v2237_v23 }
 0x2d8   : > { %v1109_v22 = vpop.permute.xlu0 %1108  ;;  %v1113_v58 = vpop.permute.xlu1 %1112  ;;  %v2110_v24 = vpack.c.bf16 %v1105_v21, %v1104_v9 }
 0x2d9   : > { %v1119_v62 = vsel %vm1118_vm12, %v1107_v19, %v1113_v58 }
 0x2da   : > { %2111 = vmatpush1.bf16.msra.mxu1 %v2110_v24  ;;  %v1129_v34 = vmul.f32 %v1949_v28, %v1119_v62 }
 0x2db   : > { %2112 = vmatprep.subr.bf16.mxu1 %v2237_v23 }
 0x2dc   : > { %v1115_v31 = vpop.permute.xlu0 %1114  ;;  %v1132_v32 = vpop.permute.xlu1 %1131 }
 0x2dd   : > { %v1120_v33 = vsel %vm1118_vm12, %v1109_v22, %v1115_v31  ;;  %v1461_v31 = vld [vmem:[%s2959_s9 + $0x8] sm:$0xff] }
 0x2de   : > { %v1130_v29 = vmul.f32 %v1949_v28, %v1120_v33  ;;  %v1460_v33 = vld [vmem:[%s2959_s9] sm:$0xff] }
 0x2e0   : > { %v1134_v30 = vpop.permute.xlu0 %1133  ;;  %v1138_v18 = vpop.permute.xlu1 %1137  ;;  %v2113_v60 = vpack.c.bf16 %v1130_v29, %v1129_v34 }
 0x2e1   : > { %v1144_v36 = vsel %vm1143_vm13, %v1132_v32, %v1138_v18  ;;  %v1468_v32 = vld [vmem:[%s2959_s9 + $0x40] sm:$0xff]  ;;  %v1463_v18 = vld [vmem:[%s2959_s9 + $0x18] sm:$0xff] }
 0x2e2   : > { %2114 = vmatpush1.bf16.msra.mxu1 %v2113_v60  ;;  %v1154_v39 = vmul.f32 %v1951_v35, %v1144_v36  ;;  %v2137_v29 = vpack.c.bf16 %v1468_v32, %v1461_v31  ;;  %v1470_v60 = vld [vmem:[%s2959_s9 + $0x50] sm:$0xff] }
 0x2e3   : > { %2115 = vmatprep.subr.bf16.mxu1 %v2237_v23 }
 0x2e4   : > { %v1140_v37 = vpop.permute.xlu0 %1139  ;;  %v1157_v38 = vpop.permute.xlu1 %1156 }
 0x2e5   : > { %v1145_v5 = vsel %vm1143_vm13, %v1134_v30, %v1140_v37  ;;  %v1467_v30 = vld [vmem:[%s2959_s9 + $0x38] sm:$0xff]  ;;  %v2141_v37 = vpack.c.bf16 %v1470_v60, %v1463_v18 }
 0x2e6   : > { %v1155_v49 = vmul.f32 %v1951_v35, %v1145_v5  ;;  %v2139_v36 = vpack.c.bf16 %v1467_v30, %v1460_v33 }
 0x2e7   : > { %2142 = vmatprep.subr.bf16.mxu0 %v2141_v37 }
 0x2e8   : > { %v1159_v63 = vpop.permute.xlu0 %1158  ;;  %v1163_v40 = vpop.permute.xlu1 %1162  ;;  %v2116_v8 = vpack.c.bf16 %v1155_v49, %v1154_v39  ;;  %v1462_v39 = vld [vmem:[%s2959_s9 + $0x10] sm:$0xff]  ;;  %v1469_v49 = vld [vmem:[%s2959_s9 + $0x48] sm:$0xff] }
 0x2e9   : > { %v1169_v0 = vsel %vm1168_vm14, %v1157_v38, %v1163_v40  ;;  %v1465_v40 = vld [vmem:[%s2959_s9 + $0x28] sm:$0xff] }
 0x2ea   : > { %2117 = vmatpush1.bf16.msra.mxu1 %v2116_v8  ;;  %v1179_v7 = vmul.f32 %v1953_v25, %v1169_v0  ;;  %v1472_v8 = vld [vmem:[%s2959_s9 + $0x60] sm:$0xff] }
 0x2eb   : > { %2118 = vmatprep.subr.bf16.mxu1 %v2237_v23  ;;  %v1317_v23 = vld [vmem:[%s2958_s8 + $0x18] sm:$0xff]  ;;  %v2145_v0 = vpack.c.bf16 %v1472_v8, %v1465_v40 }
 0x2ec   : > { %v1165_v26 = vpop.permute.xlu0 %1164  ;;  %v2125_v50 = vpack.c.bf16 %v1317_v23, %v1316_v46 }
 0x2ed   : > { %v1170_v43 = vsel %vm1168_vm14, %v1159_v63, %v1165_v26  ;;  %v2143_v63 = vpack.c.bf16 %v1469_v49, %v1462_v39  ;;  %v1466_v26 = vld [vmem:[%s2959_s9 + $0x30] sm:$0xff] }
 0x2ee   : > { %v1180_v45 = vmul.f32 %v1953_v25, %v1170_v43  ;;  %v2252_v25 = vmov 0.0   ;;  %v2149_v43 = vpack.c.bf16 %v1473_v42, %v1466_v26 }
 0x2ef   : > { %2144 = vmatpush1.bf16.msra.mxu0 %v2143_v63  ;;  %1639 = vmatprep.mubr.f32.mxu0 %v2252_v25 }
 0x2f0   : > { %v2119_v12 = vpack.c.bf16 %v1180_v45, %v1179_v7  ;;  %2150 = vmatprep.subr.bf16.mxu0 %v2149_v43 }
 0x2f2   : > { %2120 = vmatpush1.bf16.msra.mxu1 %v2119_v12 }
 0x2f3   : > { %2122 = vmatprep.subr.bf16.mxu1 %v2121_v10 }
 0x2f5   : > { %1290 = vmatmul.mubr.f32.vlgmr.msra.gmra.mrb[0].mxu1 %v1181_v47 }
 0x2f6   : > { %1955 = vmatprep.mubr.msk.f32.mxu1 %vm420_vm0, %v1184_v48  ;;  %2124 = vmatpush3.bf16.msra.mxu1 %v2121_v10  ;;  %v1464_v48 = vld [vmem:[%s2959_s9 + $0x20] sm:$0xff] }
 0x2f7   : > { %2126 = vmatprep.subr.bf16.mxu1 %v2125_v50 }
 0x2f9   : > { %1295 = vmatmul.mubr.f32.gmra.mrb[2].mxu1 %v1183_v27  ;;  %v1196_v6 = vpop.permute.xlu1 %1195 }
 0x2fa   : > { %1956 = vmatprep.mubr.msk.f32.mxu1 %vm420_vm0, %v1186_v51  ;;  %2128 = vmatpush3.bf16.msra.mxu1 %v2125_v50  ;;  %v1471_v50 = vld [vmem:[%s2959_s9 + $0x58] sm:$0xff] }
 0x2fb   : > { %2130 = vmatprep.subr.bf16.mxu1 %v2129_v57  ;;  %v2147_v51 = vpack.c.bf16 %v1471_v50, %v1464_v48 }
 0x2fd   : > { %1300 = vmatmul.mubr.f32.gmra.mrb[4].mxu1 %v1185_v52  ;;  %v1201_v13 = vpop.permute.xlu0 %1200  ;;  %v1206_v16 = vpop.permute.xlu1 %1205 }
 0x2fe   : > { %1957 = vmatprep.mubr.msk.f32.mxu1 %vm420_vm0, %v1188_v53  ;;  %2132 = vmatpush3.bf16.msra.mxu1 %v2129_v57 }
 0x2ff   : > { %2134 = vmatprep.subr.bf16.mxu1 %v2133_v61 }
 0x301   : > { %1305 = vmatmul.mubr.f32.gmra.mrb[6].mxu1 %v1187_v14  ;;  %v1211_v22 = vpop.permute.xlu0 %1210 }
 0x302   : > { %2136 = vmatpush3.bf16.msra.mxu1 %v2133_v61 }
 0x303   : > { %2138 = vmatprep.subr.bf16.mxu1 %v2137_v29 }
 0x3c8   : > { %v1291_v15 = vpop.f32.mrb[0].mxu1 }
 0x3c9   : > { %v1292_v1 = vadd.f32 %v1291_v15, %v1196_v6  ;;  %v1293_v2 = vpop.f32.mrb[1].mxu1 }
 0x3cb   : > { %v1310_v4 = vmax.f32 %v1292_v1, 0.0 }
 0x3cc   : > { %v1296_v54 = vpop.f32.mrb[2].mxu1 }
 0x3cd   : > { %v1297_v17 = vadd.f32 %v1296_v54, %v1201_v13  ;;  %v1298_v11 = vpop.f32.mrb[3].mxu1  ;;  %2014 = vmatprep.mubr.msk.f32.mxu1 %vm1322_vm15, %v1310_v4 }
 0x3cf   : > { %v1311_v55 = vmax.f32 %v1297_v17, 0.0 }
 0x3d0   : > { %v1301_v19 = vpop.f32.mrb[4].mxu1 }
 0x3d1   : > { %v1302_v20 = vadd.f32 %v1301_v19, %v1206_v16  ;;  %v1303_v9 = vpop.f32.mrb[5].mxu1  ;;  %2015 = vmatmul.mubr.msk.f32.vlgmr.msra.gmra.mrb[8].mxu1 %vm1322_vm15, %v1311_v55 }
 0x3d2   : > { %2140 = vmatpush1.bf16.msra.mxu1 %v2139_v36 }
 0x3d3   : > { %v1312_v21 = vmax.f32 %v1302_v20, 0.0  ;;  %2146 = vmatprep.subr.bf16.mxu1 %v2145_v0 }
 0x3d4   : > { %v1306_v58 = vpop.f32.mrb[6].mxu1 }
 0x3d5   : > { %v1307_v24 = vadd.f32 %v1306_v58, %v1211_v22  ;;  %v1308_v28 = vpop.f32.mrb[7].mxu1  ;;  %2017 = vmatprep.mubr.msk.f32.mxu1 %vm1322_vm15, %v1312_v21 }
 0x3d7   : > { %v1313_v62 = vmax.f32 %v1307_v24, 0.0 }
 0x3d9   : > { %2018 = vmatmul.mubr.msk.f32.gmra.mrb[10].mxu1 %vm1322_vm15, %v1313_v62 }
 0x3da   : > { %1550 = vmatprep.mubr.f32.mxu1 %v2252_v25 }
 0x4a4   : > { %v2016_v34 = vpop.f32.mrb[8].mxu1 }
 0x4a5   : > { %1426 = vrot.lane.b32.xlu0 %v2016_v34, %s2231_s16  ;;  %v1401_v35 = vpop.f32.mrb[9].mxu1 }
 0x4a6   : > { %1424 = vrot.lane.b32.xlu1 %v1401_v35, %s2231_s16 }
 0x4ac   : > { %v2019_v38 = vpop.f32.mrb[10].mxu1 }
 0x4ad   : > { %1430 = vrot.lane.b32.xlu0 %v2019_v38, %s2231_s16  ;;  %v1411_v5 = vpop.f32.mrb[11].mxu1 }
 0x4ae   : > { %1428 = vrot.lane.b32.xlu1 %v1411_v5, %s2231_s16 }
 0x517   : > { %v1427_v41 = vpop.permute.xlu0 %1426 }
 0x518   : > { %v1437_v7 = vmax.f32 %v2016_v34, %v1427_v41  ;;  %v1425_v45 = vpop.permute.xlu1 %1424 }
 0x519   : > { %v1436_v10 = vmax.f32 %v1401_v35, %v1425_v45 }
 0x51a   : > { %1446 = vrot.lane.b32.xlu0 %v1437_v7, %s2253_s25 }
 0x51b   : > { %1444 = vrot.lane.b32.xlu1 %v1436_v10, %s2253_s25 }
 0x51f   : > { %v1431_v12 = vpop.permute.xlu0 %1430 }
 0x520   : > { %v1439_v46 = vmax.f32 %v2019_v38, %v1431_v12  ;;  %v1429_v23 = vpop.permute.xlu1 %1428 }
 0x521   : > { %v1438_v47 = vmax.f32 %v1411_v5, %v1429_v23 }
 0x522   : > { %1450 = vrot.lane.b32.xlu0 %v1439_v46, %s2253_s25 }
 0x523   : > { %1448 = vrot.lane.b32.xlu1 %v1438_v47, %s2253_s25 }
 0x58c   : > { %v1447_v53 = vpop.permute.xlu0 %1446 }
 0x58d   : > { %v1445_v27 = vpop.permute.xlu1 %1444  ;;  %v1457_v14 = vmax.f32 %v1437_v7, %v1447_v53 }
 0x58e   : > { %v1456_v52 = vmax.f32 %v1436_v10, %v1445_v27 }
 0x590   : > { %1962 = vmatmul.mubr.msk.f32.vlgmr.msra.gmra.mrb[12].mxu1 %vm420_vm0, %v1456_v52  ;;  %1966 = vmatmul.mubr.msk.f32.vlgmr.msra.gmra.mrb[4].mxu0 %vm420_vm0, %v1456_v52 }
 0x591   : > { %2148 = vmatpush1.bf16.msra.mxu1 %v2147_v51  ;;  %1556 = vmatprep.mubr.f32.mxu1 %v2252_v25 }
 0x592   : > { %1645 = vmatprep.mubr.f32.mxu0 %v2252_v25  ;;  %2152 = vmatpush3.bf16.msra.mxu0 %v2149_v43 }
 0x594   : > { %1963 = vmatmul.mubr.msk.f32.gmra.mrb[14].mxu1 %vm420_vm0, %v1457_v14  ;;  %1967 = vmatmul.mubr.msk.f32.gmra.mrb[6].mxu0 %vm420_vm0, %v1457_v14  ;;  %v1451_v57 = vpop.permute.xlu0 %1450 }
 0x595   : > { %v1449_v56 = vpop.permute.xlu1 %1448  ;;  %1562 = vmatprep.mubr.f32.mxu1 %v2252_v25  ;;  %1651 = vmatprep.mubr.f32.mxu0 %v2252_v25  ;;  %v1459_v59 = vmax.f32 %v1439_v46, %v1451_v57 }
 0x596   : > { %v1458_v3 = vmax.f32 %v1438_v47, %v1449_v56 }
 0x598   : > { %1964 = vmatmul.mubr.msk.f32.gmra.mrb[16].mxu1 %vm420_vm0, %v1458_v3  ;;  %1968 = vmatmul.mubr.msk.f32.gmra.mrb[8].mxu0 %vm420_vm0, %v1458_v3 }
 0x599   : > { %1568 = vmatprep.mubr.f32.mxu1 %v2252_v25  ;;  %1657 = vmatprep.mubr.f32.mxu0 %v2252_v25 }
 0x59c   : > { %1965 = vmatmul.mubr.msk.f32.gmra.mrb[18].mxu1 %vm420_vm0, %v1459_v59  ;;  %1969 = vmatmul.mubr.msk.f32.gmra.mrb[10].mxu0 %vm420_vm0, %v1459_v59 }
 0x59d   : > { %2024 = vmatprep.mubr.msk.f32.mxu0 %vm420_vm0, %v1456_v52  ;;  %1728 = vmatprep.mubr.f32.mxu1 %v2252_v25 }
 0x5a0   : > { %1970 = vmatmul.mubr.msk.f32.vlgmr.msra.gmra.mrb[20].mxu1 %vm420_vm0, %v1456_v52  ;;  %2025 = vmatmul.mubr.msk.f32.vlgmr.msra.gmra.mrb[12].mxu0 %vm420_vm0, %v1457_v14 }
 0x5a1   : > { %2027 = vmatprep.mubr.msk.f32.mxu0 %vm420_vm0, %v1458_v3  ;;  %1734 = vmatprep.mubr.f32.mxu1 %v2252_v25 }
 0x5a4   : > { %1971 = vmatmul.mubr.msk.f32.gmra.mrb[22].mxu1 %vm420_vm0, %v1457_v14  ;;  %2028 = vmatmul.mubr.msk.f32.gmra.mrb[14].mxu0 %vm420_vm0, %v1459_v59 }
 0x5a5   : > { %1740 = vmatprep.mubr.f32.mxu1 %v2252_v25 }
 0x5a8   : > { %1972 = vmatmul.mubr.msk.f32.gmra.mrb[24].mxu1 %vm420_vm0, %v1458_v3 }
 0x5a9   : > { %1746 = vmatprep.mubr.f32.mxu1 %v2252_v25 }
 0x5ac   : > { %1973 = vmatmul.mubr.msk.f32.gmra.mrb[26].mxu1 %vm420_vm0, %v1459_v59  ;;  %vm1844_vm0 = vcmask 261120  }
 0x663   : > { %v1552_v44 = vpop.f32.mrb[12].mxu1  ;;  %v1641_v61 = vpop.f32.mrb[4].mxu0 }
 0x664   : > { %1838 = vst [vmem:[%s2913_s11] sm:$0xff] %v1552_v44  ;;  %1840 = vst [vmem:[%s2913_s11 + $0x10] sm:$0xff] %v1641_v61  ;;  %v1554_v6 = vpop.f32.mrb[13].mxu1  ;;  %v1643_v15 = vpop.f32.mrb[5].mxu0 }
 0x665   : > { %1839 = vst [vmem:[%s2913_s11 + $0x8] sm:$0xff] %v1554_v6  ;;  %1841 = vst [vmem:[%s2913_s11 + $0x18] sm:$0xff] %v1643_v15 }
 0x667   : > { %v1558_v1 = vpop.f32.mrb[14].mxu1  ;;  %v1647_v2 = vpop.f32.mrb[6].mxu0 }
 0x668   : > { %1846 = vst [vmem:[%s2913_s11 + $0x38] sm:$0xff] %v1558_v1  ;;  %1848 = vst [vmem:[%s2913_s11 + $0x48] sm:$0xff] %v1647_v2  ;;  %v1560_v4 = vpop.f32.mrb[15].mxu1  ;;  %v1649_v13 = vpop.f32.mrb[7].mxu0 }
 0x669   : > { %1847 = vst [vmem:[%s2913_s11 + $0x40] sm:$0xff] %v1560_v4  ;;  %1849 = vst [vmem:[%s2913_s11 + $0x50] sm:$0xff] %v1649_v13 }
 0x66b   : > { %v1564_v54 = vpop.f32.mrb[16].mxu1  ;;  %v1653_v17 = vpop.f32.mrb[8].mxu0 }
 0x66c   : > { %1853 = vst [vmem:[%s2913_s11 + $0x70] sm:$0xff] %v1564_v54  ;;  %1855 = vst [vmem:[%s2913_s11 + $0x80] sm:$0xff] %v1653_v17  ;;  %v1566_v11 = vpop.f32.mrb[17].mxu1  ;;  %v1655_v55 = vpop.f32.mrb[9].mxu0 }
 0x66d   : > { %1854 = vst [vmem:[%s2913_s11 + $0x78] sm:$0xff] %v1566_v11  ;;  %1856 = vst [vmem:[%s2913_s11 + $0x88] sm:$0xff] %v1655_v55 }
 0x66f   : > { %v1570_v16 = vpop.f32.mrb[18].mxu1  ;;  %v1659_v19 = vpop.f32.mrb[10].mxu0 }
 0x670   : > { %1860 = vst [vmem:[%s2913_s11 + $0xa8] sm:$0xff] %v1570_v16  ;;  %1862 = vst [vmem:[%s2913_s11 + $0xb8] sm:$0xff] %v1659_v19  ;;  %v1572_v20 = vpop.f32.mrb[19].mxu1  ;;  %v1661_v9 = vpop.f32.mrb[11].mxu0 }
 0x671   : > { %1861 = vst [vmem:[%s2913_s11 + $0xb0] sm:$0xff] %v1572_v20  ;;  %1863 = vst [vmem:[%s2913_s11 + $0xc0] sm:$0xff] %v1661_v9 }
 0x673   : > { %v1730_v21 = vpop.f32.mrb[20].mxu1  ;;  %v2026_v22 = vpop.f32.mrb[12].mxu0 }
 0x674   : > { %1842 = vst [vmem:[%s2913_s11 + $0x20] sm:$0xff] %v1730_v21  ;;  %1852 = vst.msk [vmem:[%s2913_s11 + $0x68] sm:$0xff] %vm1844_vm0, %v2026_v22  ;;  %v1732_v58 = vpop.f32.mrb[21].mxu1  ;;  %v1819_v24 = vpop.f32.mrb[13].mxu0 }
 0x675   : > { %1843 = vst [vmem:[%s2913_s11 + $0x28] sm:$0xff] %v1732_v58  ;;  %1845 = vst.msk [vmem:[%s2913_s11 + $0x30] sm:$0xff] %vm1844_vm0, %v1819_v24 }
 0x677   : > { %v1736_v28 = vpop.f32.mrb[22].mxu1  ;;  %v2029_v62 = vpop.f32.mrb[14].mxu0 }
 0x678   : > { %1850 = vst [vmem:[%s2913_s11 + $0x58] sm:$0xff] %v1736_v28  ;;  %1866 = vst.msk [vmem:[%s2913_s11 + $0xd8] sm:$0xff] %vm1844_vm0, %v2029_v62  ;;  %v1738_v31 = vpop.f32.mrb[23].mxu1  ;;  %v1829_v32 = vpop.f32.mrb[15].mxu0 }
 0x679   : > { %1851 = vst [vmem:[%s2913_s11 + $0x60] sm:$0xff] %v1738_v31  ;;  %1859 = vst.msk [vmem:[%s2913_s11 + $0xa0] sm:$0xff] %vm1844_vm0, %v1829_v32 }
 0x67b   : > { %v1742_v33 = vpop.f32.mrb[24].mxu1 }
 0x67c   : > { %1857 = vst [vmem:[%s2913_s11 + $0x90] sm:$0xff] %v1742_v33  ;;  %v1744_v34 = vpop.f32.mrb[25].mxu1 }
 0x67d   : > { %1858 = vst [vmem:[%s2913_s11 + $0x98] sm:$0xff] %v1744_v34 }
 0x67f   : > { %v1748_v29 = vpop.f32.mrb[26].mxu1 }
 0x680   : > { %1864 = vst [vmem:[%s2913_s11 + $0xc8] sm:$0xff] %v1748_v29  ;;  %v1750_v30 = vpop.f32.mrb[27].mxu1 }
 0x681   : > { %1865 = vst [vmem:[%s2913_s11 + $0xd0] sm:$0xff] %v1750_v30 }
 0x682 PF: > { %s20_s13 = sadd.s32 1, %s2217_s13  }
 0x683   : > { %p17_p4 = scmp.ge.s32.totalorder %s20_s13, 4  }
 0x685   :  { %19 = sbr.rel (!%p17_p4) target bundleno = 1 (0x1), region = 106 }

// kernel: cnn_lstm_forward.3
= control target key start
LH: loop header
LB: loop body
LE: loop exit
PB: predicated region body
PF: predicated region fallthrough
CT: control target
= control target key end

     0   :  { %s10774_s0 = inlined_call_operand.vmem [shape: f32[400,512], index: 0, kind: input, shape index: {}]   ;;  %s10775_s1 = inlined_call_operand.vmem [shape: f32[512,256], index: 1, kind: input, shape index: {}]   ;;  %s10776_s2 = inlined_call_operand.vmem [shape: f32[64,256], index: 2, kind: input, shape index: {}]   ;;  %s10777_s3 = inlined_call_operand.vmem [shape: f32[1,256], index: 3, kind: input, shape index: {}]   ;;  %s10778_s4 = inlined_call_operand.vmem [shape: f32[32,5], index: 4, kind: input, shape index: {}]   ;;  %s10779_s5 = inlined_call_operand.vmem [shape: f32[1,5], index: 5, kind: input, shape index: {}]   ;;  %s10780_s6 = inlined_call_operand.hbm [shape: f32[2,5], index: 6, kind: output, shape index: {}]  }
   0x1   :  { %v225_v0 = vld [vmem:[%s10775_s1 + $0x8] sm:$0xff]  ;;  %v227_v1 = vld [vmem:[%s10775_s1 + $0x18] sm:$0xff]  ;;  %v224_v2 = vld [vmem:[%s10775_s1] sm:$0xff] }
   0x2   :  { %v6818_v3 = vpack.c.bf16 %v227_v1, %v225_v0  ;;  %v226_v4 = vld [vmem:[%s10775_s1 + $0x10] sm:$0xff]  ;;  %v229_v5 = vld [vmem:[%s10775_s1 + $0x28] sm:$0xff]  ;;  %v231_v6 = vld [vmem:[%s10775_s1 + $0x38] sm:$0xff] }
   0x3   :  { %v6820_v7 = vpack.c.bf16 %v226_v4, %v224_v2  ;;  %v6822_v8 = vpack.c.bf16 %v231_v6, %v229_v5  ;;  %v228_v9 = vld [vmem:[%s10775_s1 + $0x20] sm:$0xff]  ;;  %v230_v10 = vld [vmem:[%s10775_s1 + $0x30] sm:$0xff]  ;;  %v233_v11 = vld [vmem:[%s10775_s1 + $0x48] sm:$0xff] }
   0x4   :  { %6819 = vmatprep.subr.bf16.mxu1 %v6818_v3  ;;  %v235_v12 = vld [vmem:[%s10775_s1 + $0x58] sm:$0xff]  ;;  %v6824_v13 = vpack.c.bf16 %v230_v10, %v228_v9  ;;  %v232_v15 = vld [vmem:[%s10775_s1 + $0x40] sm:$0xff]  ;;  %v234_v16 = vld [vmem:[%s10775_s1 + $0x50] sm:$0xff] }
   0x5   :  { %6821 = vmatpush1.bf16.msra.mxu1 %v6820_v7  ;;  %v6826_v14 = vpack.c.bf16 %v235_v12, %v233_v11  ;;  %v237_v17 = vld [vmem:[%s10775_s1 + $0x68] sm:$0xff]  ;;  %v239_v18 = vld [vmem:[%s10775_s1 + $0x78] sm:$0xff]  ;;  %v6828_v19 = vpack.c.bf16 %v234_v16, %v232_v15  ;;  %v236_v21 = vld [vmem:[%s10775_s1 + $0x60] sm:$0xff] }
   0x6   :  { %6823 = vmatprep.subr.bf16.mxu1 %v6822_v8  ;;  %v6830_v20 = vpack.c.bf16 %v239_v18, %v237_v17  ;;  %v238_v22 = vld [vmem:[%s10775_s1 + $0x70] sm:$0xff]  ;;  %v241_v23 = vld [vmem:[%s10775_s1 + $0x88] sm:$0xff]  ;;  %v243_v24 = vld [vmem:[%s10775_s1 + $0x98] sm:$0xff] }
   0x7   :  { %v6832_v25 = vpack.c.bf16 %v238_v22, %v236_v21  ;;  %v6834_v26 = vpack.c.bf16 %v243_v24, %v241_v23  ;;  %v240_v27 = vld [vmem:[%s10775_s1 + $0x80] sm:$0xff]  ;;  %v242_v28 = vld [vmem:[%s10775_s1 + $0x90] sm:$0xff]  ;;  %v245_v29 = vld [vmem:[%s10775_s1 + $0xa8] sm:$0xff] }
   0x8   :  { %v247_v30 = vld [vmem:[%s10775_s1 + $0xb8] sm:$0xff]  ;;  %v6836_v31 = vpack.c.bf16 %v242_v28, %v240_v27  ;;  %v244_v33 = vld [vmem:[%s10775_s1 + $0xa0] sm:$0xff]  ;;  %v246_v34 = vld [vmem:[%s10775_s1 + $0xb0] sm:$0xff] }
   0x9   :  { %6825 = vmatpush1.bf16.msra.mxu1 %v6824_v13  ;;  %v6838_v32 = vpack.c.bf16 %v247_v30, %v245_v29  ;;  %v249_v35 = vld [vmem:[%s10775_s1 + $0xc8] sm:$0xff]  ;;  %v251_v36 = vld [vmem:[%s10775_s1 + $0xd8] sm:$0xff]  ;;  %v6840_v37 = vpack.c.bf16 %v246_v34, %v244_v33  ;;  %v248_v39 = vld [vmem:[%s10775_s1 + $0xc0] sm:$0xff] }
   0xa   :  { %6827 = vmatprep.subr.bf16.mxu1 %v6826_v14  ;;  %v6842_v38 = vpack.c.bf16 %v251_v36, %v249_v35  ;;  %v250_v40 = vld [vmem:[%s10775_s1 + $0xd0] sm:$0xff]  ;;  %v25_v41 = vld [vmem:[%s10774_s0 + $0x8] sm:$0xff]  ;;  %v255_v43 = vld [vmem:[%s10775_s1 + $0xf8] sm:$0xff] }
   0xb   :  { %v253_v42 = vld [vmem:[%s10775_s1 + $0xe8] sm:$0xff]  ;;  %428 = vmatprep.mubr.f32.mxu1 %v25_v41  ;;  %v6844_v44 = vpack.c.bf16 %v250_v40, %v248_v39  ;;  %v252_v46 = vld [vmem:[%s10775_s1 + $0xe0] sm:$0xff]  ;;  %v254_v47 = vld [vmem:[%s10775_s1 + $0xf0] sm:$0xff] }
   0xc   :  { %v6846_v45 = vpack.c.bf16 %v255_v43, %v253_v42  ;;  %v257_v48 = vld [vmem:[%s10775_s1 + $0x108] sm:$0xff]  ;;  %v259_v49 = vld [vmem:[%s10775_s1 + $0x118] sm:$0xff]  ;;  %v6848_v50 = vpack.c.bf16 %v254_v47, %v252_v46  ;;  %v256_v52 = vld [vmem:[%s10775_s1 + $0x100] sm:$0xff] }
   0xd   :  { %6829 = vmatpush1.bf16.msra.mxu1 %v6828_v19  ;;  %v6850_v51 = vpack.c.bf16 %v259_v49, %v257_v48  ;;  %v258_v53 = vld [vmem:[%s10775_s1 + $0x110] sm:$0xff]  ;;  %v261_v54 = vld [vmem:[%s10775_s1 + $0x128] sm:$0xff]  ;;  %v263_v55 = vld [vmem:[%s10775_s1 + $0x138] sm:$0xff] }
   0xe   :  { %6831 = vmatprep.subr.bf16.mxu1 %v6830_v20  ;;  %v6852_v56 = vpack.c.bf16 %v258_v53, %v256_v52  ;;  %v6854_v57 = vpack.c.bf16 %v263_v55, %v261_v54  ;;  %v260_v58 = vld [vmem:[%s10775_s1 + $0x120] sm:$0xff]  ;;  %v262_v59 = vld [vmem:[%s10775_s1 + $0x130] sm:$0xff]  ;;  %v265_v60 = vld [vmem:[%s10775_s1 + $0x148] sm:$0xff] }
   0xf   :  { %v267_v61 = vld [vmem:[%s10775_s1 + $0x158] sm:$0xff]  ;;  %v6856_v62 = vpack.c.bf16 %v262_v59, %v260_v58  ;;  %v264_v0 = vld [vmem:[%s10775_s1 + $0x140] sm:$0xff]  ;;  %v266_v1 = vld [vmem:[%s10775_s1 + $0x150] sm:$0xff] }
  0x10   :  { %v6858_v63 = vpack.c.bf16 %v267_v61, %v265_v60  ;;  %v269_v2 = vld [vmem:[%s10775_s1 + $0x168] sm:$0xff]  ;;  %v271_v3 = vld [vmem:[%s10775_s1 + $0x178] sm:$0xff]  ;;  %v6860_v4 = vpack.c.bf16 %v266_v1, %v264_v0  ;;  %v268_v6 = vld [vmem:[%s10775_s1 + $0x160] sm:$0xff] }
  0x11   :  { %6833 = vmatpush1.bf16.msra.mxu1 %v6832_v25  ;;  %v6862_v5 = vpack.c.bf16 %v271_v3, %v269_v2  ;;  %v270_v7 = vld [vmem:[%s10775_s1 + $0x170] sm:$0xff]  ;;  %v273_v8 = vld [vmem:[%s10775_s1 + $0x188] sm:$0xff]  ;;  %v275_v9 = vld [vmem:[%s10775_s1 + $0x198] sm:$0xff] }
  0x12   :  { %6835 = vmatprep.subr.bf16.mxu1 %v6834_v26  ;;  %v6864_v10 = vpack.c.bf16 %v270_v7, %v268_v6  ;;  %v6866_v11 = vpack.c.bf16 %v275_v9, %v273_v8  ;;  %v272_v12 = vld [vmem:[%s10775_s1 + $0x180] sm:$0xff]  ;;  %v274_v13 = vld [vmem:[%s10775_s1 + $0x190] sm:$0xff]  ;;  %v277_v14 = vld [vmem:[%s10775_s1 + $0x1a8] sm:$0xff] }
  0x13   :  { %v279_v15 = vld [vmem:[%s10775_s1 + $0x1b8] sm:$0xff]  ;;  %v6868_v16 = vpack.c.bf16 %v274_v13, %v272_v12  ;;  %v276_v18 = vld [vmem:[%s10775_s1 + $0x1a0] sm:$0xff]  ;;  %v278_v19 = vld [vmem:[%s10775_s1 + $0x1b0] sm:$0xff] }
  0x14   :  { %v6870_v17 = vpack.c.bf16 %v279_v15, %v277_v14  ;;  %v281_v20 = vld [vmem:[%s10775_s1 + $0x1c8] sm:$0xff]  ;;  %v283_v21 = vld [vmem:[%s10775_s1 + $0x1d8] sm:$0xff]  ;;  %v6872_v22 = vpack.c.bf16 %v278_v19, %v276_v18  ;;  %v280_v24 = vld [vmem:[%s10775_s1 + $0x1c0] sm:$0xff] }
  0x15   :  { %6837 = vmatpush1.bf16.msra.mxu1 %v6836_v31  ;;  %v6874_v23 = vpack.c.bf16 %v283_v21, %v281_v20  ;;  %v282_v25 = vld [vmem:[%s10775_s1 + $0x1d0] sm:$0xff]  ;;  %v285_v26 = vld [vmem:[%s10775_s1 + $0x1e8] sm:$0xff]  ;;  %v287_v27 = vld [vmem:[%s10775_s1 + $0x1f8] sm:$0xff] }
  0x16   :  { %6839 = vmatprep.subr.bf16.mxu1 %v6838_v32 }
  0x19   :  { %6841 = vmatpush1.bf16.msra.mxu1 %v6840_v37 }
  0x1a   :  { %6843 = vmatprep.subr.bf16.mxu1 %v6842_v38 }
  0x1d   :  { %6845 = vmatpush1.bf16.msra.mxu1 %v6844_v44 }
  0x1e   :  { %6847 = vmatprep.subr.bf16.mxu1 %v6846_v45 }
  0x21   :  { %6849 = vmatpush1.bf16.msra.mxu1 %v6848_v50 }
  0x22   :  { %6851 = vmatprep.subr.bf16.mxu1 %v6850_v51 }
  0x25   :  { %6853 = vmatpush1.bf16.msra.mxu1 %v6852_v56 }
  0x26   :  { %6855 = vmatprep.subr.bf16.mxu1 %v6854_v57 }
  0x29   :  { %6857 = vmatpush1.bf16.msra.mxu1 %v6856_v62 }
  0x2a   :  { %6859 = vmatprep.subr.bf16.mxu1 %v6858_v63 }
  0x2d   :  { %6861 = vmatpush1.bf16.msra.mxu1 %v6860_v4 }
  0x2e   :  { %6863 = vmatprep.subr.bf16.mxu1 %v6862_v5 }
  0x31   :  { %6865 = vmatpush1.bf16.msra.mxu1 %v6864_v10 }
  0x32   :  { %6867 = vmatprep.subr.bf16.mxu1 %v6866_v11 }
  0x35   :  { %6869 = vmatpush1.bf16.msra.mxu1 %v6868_v16 }
  0x36   :  { %6871 = vmatprep.subr.bf16.mxu1 %v6870_v17 }
  0x37   :  { %11 = vsyncpa [#allocation4], 0  ;;  %v6876_v28 = vpack.c.bf16 %v282_v25, %v280_v24  ;;  %v6878_v29 = vpack.c.bf16 %v287_v27, %v285_v26  ;;  %v284_v30 = vld [vmem:[%s10775_s1 + $0x1e0] sm:$0xff]  ;;  %v286_v31 = vld [vmem:[%s10775_s1 + $0x1f0] sm:$0xff]  ;;  %vm1220_vm0 = vcmask 261120   ;;  %s8692_s8 = smov 64  }
  0x38   :  { %v289_v32 = vld [vmem:[%s10775_s1 + $0x208] sm:$0xff]  ;;  %v291_v33 = vld [vmem:[%s10775_s1 + $0x218] sm:$0xff]  ;;  %v6880_v34 = vpack.c.bf16 %v286_v31, %v284_v30  ;;  %v288_v36 = vld [vmem:[%s10775_s1 + $0x200] sm:$0xff]  ;;  %vm1244_vm1 = vcmask 523264   ;;  %vm8695_vm2 = vmmov 0   ;;  %s8697_s9 = smov [#allocation3]  }
  0x39   :  { %6873 = vmatpush1.bf16.msra.mxu1 %v6872_v22  ;;  %v6882_v35 = vpack.c.bf16 %v291_v33, %v289_v32  ;;  %v290_v37 = vld [vmem:[%s10775_s1 + $0x210] sm:$0xff]  ;;  %v293_v38 = vld [vmem:[%s10775_s1 + $0x228] sm:$0xff]  ;;  %v295_v39 = vld [vmem:[%s10775_s1 + $0x238] sm:$0xff]  ;;  %s6591_s10 = sshll.u32 %s8697_s9, 4  ;;  %vm6583_vm3 = vcmask 33792   ;;  %s6592_s10 = int_to_ptr.vmem [resolvable:$true] %s6591_s10 }
  0x3a   :  { %6875 = vmatprep.subr.bf16.mxu1 %v6874_v23  ;;  %v24_v40 = vld [vmem:[%s10774_s0] sm:$0xff]  ;;  %v6884_v41 = vpack.c.bf16 %v290_v37, %v288_v36  ;;  %v29_v42 = vld [vmem:[%s10774_s0 + $0x28] sm:$0xff]  ;;  %v6886_v43 = vpack.c.bf16 %v295_v39, %v293_v38  ;;  %v294_v45 = vld [vmem:[%s10775_s1 + $0x230] sm:$0xff]  ;;  %s8668_s11 = scalar_lea.vmem %s6592_s10, 32  ;;  %p8673_p1 = scmp.lt.s32.totalorder %s6592_s10, %s6592_s10 }
  0x3b   :  { %v292_v44 = vld [vmem:[%s10775_s1 + $0x220] sm:$0xff]  ;;  %v297_v46 = vld [vmem:[%s10775_s1 + $0x248] sm:$0xff]  ;;  %v299_v47 = vld [vmem:[%s10775_s1 + $0x258] sm:$0xff]  ;;  %p8669_p0 = scmp.ne.s32.totalorder %s6592_s10, %s8668_s11  ;;  %p8674_p2 = scmp.lt.s32.totalorder %s8668_s11, %s8668_s11 }
  0x3c   :  { %v28_v48 = vld [vmem:[%s10774_s0 + $0x20] sm:$0xff]  ;;  %v6888_v49 = vpack.c.bf16 %v294_v45, %v292_v44  ;;  %v33_v50 = vld [vmem:[%s10774_s0 + $0x48] sm:$0xff]  ;;  %v6890_v51 = vpack.c.bf16 %v299_v47, %v297_v46  ;;  %v298_v53 = vld [vmem:[%s10775_s1 + $0x250] sm:$0xff] }
  0x3d   :  { %6877 = vmatpush1.bf16.msra.mxu1 %v6876_v28  ;;  %v296_v52 = vld [vmem:[%s10775_s1 + $0x240] sm:$0xff]  ;;  %v301_v54 = vld [vmem:[%s10775_s1 + $0x268] sm:$0xff]  ;;  %v303_v55 = vld [vmem:[%s10775_s1 + $0x278] sm:$0xff]  ;;  %p8675_p3 = por %p8674_p2, %p8673_p1 }
  0x3e   :  { %6879 = vmatprep.subr.bf16.mxu1 %v6878_v29  ;;  %v32_v56 = vld [vmem:[%s10774_s0 + $0x40] sm:$0xff]  ;;  %v6892_v57 = vpack.c.bf16 %v298_v53, %v296_v52  ;;  %v37_v58 = vld [vmem:[%s10774_s0 + $0x68] sm:$0xff]  ;;  %v6894_v59 = vpack.c.bf16 %v303_v55, %v301_v54  ;;  %v302_v61 = vld [vmem:[%s10775_s1 + $0x270] sm:$0xff] }
  0x3f   :  { %v300_v60 = vld [vmem:[%s10775_s1 + $0x260] sm:$0xff]  ;;  %v305_v62 = vld [vmem:[%s10775_s1 + $0x288] sm:$0xff]  ;;  %v307_v63 = vld [vmem:[%s10775_s1 + $0x298] sm:$0xff]  ;;  %p8676_p4 = pnand %p8675_p3, %p8669_p0 }
  0x40   :  { %v36_v0 = vld [vmem:[%s10774_s0 + $0x60] sm:$0xff]  ;;  %v6896_v1 = vpack.c.bf16 %v302_v61, %v300_v60  ;;  %v41_v2 = vld [vmem:[%s10774_s0 + $0x88] sm:$0xff]  ;;  %v6898_v3 = vpack.c.bf16 %v307_v63, %v305_v62  ;;  %v306_v5 = vld [vmem:[%s10775_s1 + $0x290] sm:$0xff] }
  0x41   :  { %6881 = vmatpush1.bf16.msra.mxu1 %v6880_v34  ;;  %v304_v4 = vld [vmem:[%s10775_s1 + $0x280] sm:$0xff]  ;;  %v309_v6 = vld [vmem:[%s10775_s1 + $0x2a8] sm:$0xff]  ;;  %v311_v7 = vld [vmem:[%s10775_s1 + $0x2b8] sm:$0xff] }
  0x42   :  { %6883 = vmatprep.subr.bf16.mxu1 %v6882_v35  ;;  %v40_v8 = vld [vmem:[%s10774_s0 + $0x80] sm:$0xff]  ;;  %v6900_v9 = vpack.c.bf16 %v306_v5, %v304_v4  ;;  %v45_v10 = vld [vmem:[%s10774_s0 + $0xa8] sm:$0xff]  ;;  %v6902_v11 = vpack.c.bf16 %v311_v7, %v309_v6  ;;  %v310_v13 = vld [vmem:[%s10775_s1 + $0x2b0] sm:$0xff] }
  0x43   :  { %v308_v12 = vld [vmem:[%s10775_s1 + $0x2a0] sm:$0xff]  ;;  %v313_v14 = vld [vmem:[%s10775_s1 + $0x2c8] sm:$0xff]  ;;  %v315_v15 = vld [vmem:[%s10775_s1 + $0x2d8] sm:$0xff] }
  0x44   :  { %429 = vmatmul.mubr.f32.vlgmr.msra.gmra.mrb[0].mxu1 %v24_v40  ;;  %v44_v16 = vld [vmem:[%s10774_s0 + $0xa0] sm:$0xff]  ;;  %v6904_v17 = vpack.c.bf16 %v310_v13, %v308_v12  ;;  %v49_v18 = vld [vmem:[%s10774_s0 + $0xc8] sm:$0xff]  ;;  %v6906_v19 = vpack.c.bf16 %v315_v15, %v313_v14  ;;  %v314_v21 = vld [vmem:[%s10775_s1 + $0x2d0] sm:$0xff] }
  0x45   :  { %6885 = vmatpush1.bf16.msra.mxu1 %v6884_v41  ;;  %434 = vmatprep.mubr.f32.mxu1 %v29_v42  ;;  %v312_v20 = vld [vmem:[%s10775_s1 + $0x2c0] sm:$0xff]  ;;  %v317_v22 = vld [vmem:[%s10775_s1 + $0x2e8] sm:$0xff]  ;;  %v319_v23 = vld [vmem:[%s10775_s1 + $0x2f8] sm:$0xff] }
  0x46   :  { %6887 = vmatprep.subr.bf16.mxu1 %v6886_v43  ;;  %v48_v24 = vld [vmem:[%s10774_s0 + $0xc0] sm:$0xff]  ;;  %v6908_v25 = vpack.c.bf16 %v314_v21, %v312_v20  ;;  %v53_v26 = vld [vmem:[%s10774_s0 + $0xe8] sm:$0xff]  ;;  %v6910_v27 = vpack.c.bf16 %v319_v23, %v317_v22  ;;  %v318_v29 = vld [vmem:[%s10775_s1 + $0x2f0] sm:$0xff] }
  0x47   :  { %v316_v28 = vld [vmem:[%s10775_s1 + $0x2e0] sm:$0xff]  ;;  %v321_v30 = vld [vmem:[%s10775_s1 + $0x308] sm:$0xff]  ;;  %v323_v31 = vld [vmem:[%s10775_s1 + $0x318] sm:$0xff] }
  0x48   :  { %435 = vmatmul.mubr.f32.gmra.mrb[2].mxu1 %v28_v48  ;;  %v52_v32 = vld [vmem:[%s10774_s0 + $0xe0] sm:$0xff]  ;;  %v6912_v33 = vpack.c.bf16 %v318_v29, %v316_v28  ;;  %v57_v34 = vld [vmem:[%s10774_s0 + $0x108] sm:$0xff]  ;;  %v6914_v35 = vpack.c.bf16 %v323_v31, %v321_v30  ;;  %v322_v37 = vld [vmem:[%s10775_s1 + $0x310] sm:$0xff] }
  0x49   :  { %440 = vmatprep.mubr.f32.mxu1 %v33_v50  ;;  %6889 = vmatpush1.bf16.msra.mxu1 %v6888_v49  ;;  %v320_v36 = vld [vmem:[%s10775_s1 + $0x300] sm:$0xff]  ;;  %v325_v38 = vld [vmem:[%s10775_s1 + $0x328] sm:$0xff]  ;;  %v327_v39 = vld [vmem:[%s10775_s1 + $0x338] sm:$0xff] }
  0x4a   :  { %6891 = vmatprep.subr.bf16.mxu1 %v6890_v51  ;;  %v56_v40 = vld [vmem:[%s10774_s0 + $0x100] sm:$0xff]  ;;  %v6916_v41 = vpack.c.bf16 %v322_v37, %v320_v36  ;;  %v61_v42 = vld [vmem:[%s10774_s0 + $0x128] sm:$0xff]  ;;  %v6918_v43 = vpack.c.bf16 %v327_v39, %v325_v38  ;;  %v326_v45 = vld [vmem:[%s10775_s1 + $0x330] sm:$0xff] }
  0x4b   :  { %v324_v44 = vld [vmem:[%s10775_s1 + $0x320] sm:$0xff]  ;;  %v329_v46 = vld [vmem:[%s10775_s1 + $0x348] sm:$0xff]  ;;  %v331_v47 = vld [vmem:[%s10775_s1 + $0x358] sm:$0xff] }
  0x4c   :  { %441 = vmatmul.mubr.f32.gmra.mrb[4].mxu1 %v32_v56  ;;  %v60_v48 = vld [vmem:[%s10774_s0 + $0x120] sm:$0xff]  ;;  %v6920_v49 = vpack.c.bf16 %v326_v45, %v324_v44  ;;  %v65_v50 = vld [vmem:[%s10774_s0 + $0x148] sm:$0xff]  ;;  %v6922_v51 = vpack.c.bf16 %v331_v47, %v329_v46  ;;  %v330_v53 = vld [vmem:[%s10775_s1 + $0x350] sm:$0xff] }
  0x4d   :  { %446 = vmatprep.mubr.f32.mxu1 %v37_v58  ;;  %6893 = vmatpush1.bf16.msra.mxu1 %v6892_v57  ;;  %v328_v52 = vld [vmem:[%s10775_s1 + $0x340] sm:$0xff]  ;;  %v333_v54 = vld [vmem:[%s10775_s1 + $0x368] sm:$0xff]  ;;  %v335_v55 = vld [vmem:[%s10775_s1 + $0x378] sm:$0xff] }
  0x4e   :  { %6895 = vmatprep.subr.bf16.mxu1 %v6894_v59  ;;  %v64_v56 = vld [vmem:[%s10774_s0 + $0x140] sm:$0xff]  ;;  %v6924_v57 = vpack.c.bf16 %v330_v53, %v328_v52  ;;  %v69_v58 = vld [vmem:[%s10774_s0 + $0x168] sm:$0xff]  ;;  %v6926_v59 = vpack.c.bf16 %v335_v55, %v333_v54  ;;  %v334_v61 = vld [vmem:[%s10775_s1 + $0x370] sm:$0xff] }
  0x4f   :  { %v332_v60 = vld [vmem:[%s10775_s1 + $0x360] sm:$0xff]  ;;  %v337_v62 = vld [vmem:[%s10775_s1 + $0x388] sm:$0xff]  ;;  %v339_v63 = vld [vmem:[%s10775_s1 + $0x398] sm:$0xff] }
  0x50   :  { %447 = vmatmul.mubr.f32.gmra.mrb[6].mxu1 %v36_v0  ;;  %v68_v0 = vld [vmem:[%s10774_s0 + $0x160] sm:$0xff]  ;;  %v338_v5 = vld [vmem:[%s10775_s1 + $0x390] sm:$0xff]  ;;  %v341_v6 = vld [vmem:[%s10775_s1 + $0x3a8] sm:$0xff] }
  0x51   :  { %452 = vmatprep.mubr.f32.mxu1 %v41_v2  ;;  %6897 = vmatpush1.bf16.msra.mxu1 %v6896_v1  ;;  %v6928_v1 = vpack.c.bf16 %v334_v61, %v332_v60  ;;  %v73_v2 = vld [vmem:[%s10774_s0 + $0x188] sm:$0xff]  ;;  %v336_v4 = vld [vmem:[%s10775_s1 + $0x380] sm:$0xff]  ;;  %v343_v7 = vld [vmem:[%s10775_s1 + $0x3b8] sm:$0xff] }
  0x52   :  { %6899 = vmatprep.subr.bf16.mxu1 %v6898_v3  ;;  %v6930_v3 = vpack.c.bf16 %v339_v63, %v337_v62  ;;  %v340_v12 = vld [vmem:[%s10775_s1 + $0x3a0] sm:$0xff]  ;;  %v342_v13 = vld [vmem:[%s10775_s1 + $0x3b0] sm:$0xff]  ;;  %v345_v14 = vld [vmem:[%s10775_s1 + $0x3c8] sm:$0xff] }
  0x53   :  { %v347_v15 = vld [vmem:[%s10775_s1 + $0x3d8] sm:$0xff]  ;;  %v344_v20 = vld [vmem:[%s10775_s1 + $0x3c0] sm:$0xff]  ;;  %v346_v21 = vld [vmem:[%s10775_s1 + $0x3d0] sm:$0xff] }
  0x54   :  { %453 = vmatmul.mubr.f32.gmra.mrb[8].mxu1 %v40_v8  ;;  %v72_v8 = vld [vmem:[%s10774_s0 + $0x180] sm:$0xff]  ;;  %v6940_v23 = vpack.c.bf16 %v346_v21, %v344_v20  ;;  %v351_v28 = vld [vmem:[%s10775_s1 + $0x3f8] sm:$0xff]  ;;  %v97_v36 = vld [vmem:[%s10774_s0 + $0x248] sm:$0xff] }
  0x55   :  { %458 = vmatprep.mubr.f32.mxu1 %v45_v10  ;;  %6901 = vmatpush1.bf16.msra.mxu1 %v6900_v9  ;;  %v6932_v9 = vpack.c.bf16 %v338_v5, %v336_v4  ;;  %v77_v10 = vld [vmem:[%s10774_s0 + $0x1a8] sm:$0xff]  ;;  %v80_v22 = vld [vmem:[%s10774_s0 + $0x1c0] sm:$0xff] }
  0x56   :  { %6903 = vmatprep.subr.bf16.mxu1 %v6902_v11  ;;  %v6934_v11 = vpack.c.bf16 %v343_v7, %v341_v6  ;;  %v348_v29 = vld [vmem:[%s10775_s1 + $0x3e0] sm:$0xff]  ;;  %v101_v38 = vld [vmem:[%s10774_s0 + $0x268] sm:$0xff] }
  0x57   :  { %v88_v30 = vld [vmem:[%s10774_s0 + $0x200] sm:$0xff]  ;;  %v113_v44 = vld [vmem:[%s10774_s0 + $0x2c8] sm:$0xff] }
  0x58   :  { %459 = vmatmul.mubr.f32.gmra.mrb[10].mxu1 %v44_v16  ;;  %v76_v16 = vld [vmem:[%s10774_s0 + $0x1a0] sm:$0xff]  ;;  %v117_v46 = vld [vmem:[%s10774_s0 + $0x2e8] sm:$0xff] }
  0x59   :  { %464 = vmatprep.mubr.f32.mxu1 %v49_v18  ;;  %6905 = vmatpush1.bf16.msra.mxu1 %v6904_v17  ;;  %v6936_v17 = vpack.c.bf16 %v342_v13, %v340_v12  ;;  %v81_v18 = vld [vmem:[%s10774_s0 + $0x1c8] sm:$0xff]  ;;  %v96_v37 = vld [vmem:[%s10774_s0 + $0x240] sm:$0xff] }
  0x5a   :  { %6907 = vmatprep.subr.bf16.mxu1 %v6906_v19  ;;  %v6938_v19 = vpack.c.bf16 %v347_v15, %v345_v14  ;;  %v100_v39 = vld [vmem:[%s10774_s0 + $0x260] sm:$0xff]  ;;  %v129_v52 = vld [vmem:[%s10774_s0 + $0x348] sm:$0xff] }
  0x5b   :  { %v112_v45 = vld [vmem:[%s10774_s0 + $0x2c0] sm:$0xff]  ;;  %v133_v54 = vld [vmem:[%s10774_s0 + $0x368] sm:$0xff] }
  0x5c   :  { %465 = vmatmul.mubr.f32.gmra.mrb[12].mxu1 %v48_v24  ;;  %v85_v24 = vld [vmem:[%s10774_s0 + $0x1e8] sm:$0xff]  ;;  %v116_v47 = vld [vmem:[%s10774_s0 + $0x2e0] sm:$0xff] }
  0x5d   :  { %470 = vmatprep.mubr.f32.mxu1 %v53_v26  ;;  %6909 = vmatpush1.bf16.msra.mxu1 %v6908_v25  ;;  %v84_v25 = vld [vmem:[%s10774_s0 + $0x1e0] sm:$0xff]  ;;  %v89_v26 = vld [vmem:[%s10774_s0 + $0x208] sm:$0xff] }
  0x5e   :  { %6911 = vmatprep.subr.bf16.mxu1 %v6910_v27  ;;  %v349_v27 = vld [vmem:[%s10775_s1 + $0x3e8] sm:$0xff]  ;;  %v128_v53 = vld [vmem:[%s10774_s0 + $0x340] sm:$0xff] }
  0x5f   :  { %v6942_v31 = vpack.c.bf16 %v351_v28, %v349_v27  ;;  %v132_v55 = vld [vmem:[%s10774_s0 + $0x360] sm:$0xff]  ;;  %v145_v60 = vld [vmem:[%s10774_s0 + $0x3c8] sm:$0xff] }
  0x60   :  { %471 = vmatmul.mubr.f32.gmra.mrb[14].mxu1 %v52_v32  ;;  %v350_v32 = vld [vmem:[%s10775_s1 + $0x3f0] sm:$0xff]  ;;  %v144_v61 = vld [vmem:[%s10774_s0 + $0x3c0] sm:$0xff]  ;;  %v149_v62 = vld [vmem:[%s10774_s0 + $0x3e8] sm:$0xff] }
  0x61   :  { %476 = vmatprep.mubr.f32.mxu1 %v57_v34  ;;  %6913 = vmatpush1.bf16.msra.mxu1 %v6912_v33  ;;  %v93_v33 = vld [vmem:[%s10774_s0 + $0x228] sm:$0xff]  ;;  %v6944_v34 = vpack.c.bf16 %v350_v32, %v348_v29  ;;  %v148_v63 = vld [vmem:[%s10774_s0 + $0x3e0] sm:$0xff] }
  0x62   :  { %6915 = vmatprep.subr.bf16.mxu1 %v6914_v35  ;;  %v92_v35 = vld [vmem:[%s10774_s0 + $0x220] sm:$0xff]  ;;  %v161_v4 = vld [vmem:[%s10774_s0 + $0x448] sm:$0xff] }
  0x63   :  { %v160_v5 = vld [vmem:[%s10774_s0 + $0x440] sm:$0xff]  ;;  %v165_v6 = vld [vmem:[%s10774_s0 + $0x468] sm:$0xff] }
  0x64   :  { %477 = vmatmul.mubr.f32.gmra.mrb[16].mxu1 %v56_v40  ;;  %v105_v40 = vld [vmem:[%s10774_s0 + $0x288] sm:$0xff]  ;;  %v164_v7 = vld [vmem:[%s10774_s0 + $0x460] sm:$0xff] }
  0x65   :  { %482 = vmatprep.mubr.f32.mxu1 %v61_v42  ;;  %6917 = vmatpush1.bf16.msra.mxu1 %v6916_v41  ;;  %v104_v41 = vld [vmem:[%s10774_s0 + $0x280] sm:$0xff]  ;;  %v109_v42 = vld [vmem:[%s10774_s0 + $0x2a8] sm:$0xff] }
  0x66   :  { %6919 = vmatprep.subr.bf16.mxu1 %v6918_v43  ;;  %v108_v43 = vld [vmem:[%s10774_s0 + $0x2a0] sm:$0xff]  ;;  %v177_v12 = vld [vmem:[%s10774_s0 + $0x4c8] sm:$0xff] }
  0x67   :  { %v176_v13 = vld [vmem:[%s10774_s0 + $0x4c0] sm:$0xff]  ;;  %v181_v14 = vld [vmem:[%s10774_s0 + $0x4e8] sm:$0xff] }
  0x68   :  { %483 = vmatmul.mubr.f32.gmra.mrb[18].mxu1 %v60_v48  ;;  %v121_v48 = vld [vmem:[%s10774_s0 + $0x308] sm:$0xff]  ;;  %v180_v15 = vld [vmem:[%s10774_s0 + $0x4e0] sm:$0xff] }
  0x69   :  { %488 = vmatprep.mubr.f32.mxu1 %v65_v50  ;;  %6921 = vmatpush1.bf16.msra.mxu1 %v6920_v49  ;;  %v120_v49 = vld [vmem:[%s10774_s0 + $0x300] sm:$0xff]  ;;  %v125_v50 = vld [vmem:[%s10774_s0 + $0x328] sm:$0xff] }
  0x6a   :  { %6923 = vmatprep.subr.bf16.mxu1 %v6922_v51  ;;  %v124_v51 = vld [vmem:[%s10774_s0 + $0x320] sm:$0xff]  ;;  %v193_v20 = vld [vmem:[%s10774_s0 + $0x548] sm:$0xff] }
  0x6b   :  { %v192_v21 = vld [vmem:[%s10774_s0 + $0x540] sm:$0xff]  ;;  %v209_v28 = vld [vmem:[%s10774_s0 + $0x5c8] sm:$0xff] }
  0x6c   :  { %489 = vmatmul.mubr.f32.gmra.mrb[20].mxu1 %v64_v56  ;;  %v137_v56 = vld [vmem:[%s10774_s0 + $0x388] sm:$0xff]  ;;  %v204_v27 = vld [vmem:[%s10774_s0 + $0x5a0] sm:$0xff] }
  0x6d   :  { %494 = vmatprep.mubr.f32.mxu1 %v69_v58  ;;  %6925 = vmatpush1.bf16.msra.mxu1 %v6924_v57  ;;  %v136_v57 = vld [vmem:[%s10774_s0 + $0x380] sm:$0xff]  ;;  %v141_v58 = vld [vmem:[%s10774_s0 + $0x3a8] sm:$0xff] }
  0x6e   :  { %6927 = vmatprep.subr.bf16.mxu1 %v6926_v59  ;;  %v140_v59 = vld [vmem:[%s10774_s0 + $0x3a0] sm:$0xff]  ;;  %v217_v32 = vld [vmem:[%s10774_s0 + $0x608] sm:$0xff] }
  0x6f   :  { %v208_v29 = vld [vmem:[%s10774_s0 + $0x5c0] sm:$0xff] }
  0x70   :  { %495 = vmatmul.mubr.f32.gmra.mrb[22].mxu1 %v68_v0  ;;  %v153_v0 = vld [vmem:[%s10774_s0 + $0x408] sm:$0xff] }
  0x71   :  { %500 = vmatprep.mubr.f32.mxu1 %v73_v2  ;;  %6929 = vmatpush1.bf16.msra.mxu1 %v6928_v1  ;;  %v152_v1 = vld [vmem:[%s10774_s0 + $0x400] sm:$0xff]  ;;  %v157_v2 = vld [vmem:[%s10774_s0 + $0x428] sm:$0xff] }
  0x72   :  { %6931 = vmatprep.subr.bf16.mxu1 %v6930_v3  ;;  %v156_v3 = vld [vmem:[%s10774_s0 + $0x420] sm:$0xff] }
  0x74   :  { %501 = vmatmul.mubr.f32.gmra.mrb[24].mxu1 %v72_v8  ;;  %v169_v8 = vld [vmem:[%s10774_s0 + $0x488] sm:$0xff] }
  0x75   :  { %506 = vmatprep.mubr.f32.mxu1 %v77_v10  ;;  %6933 = vmatpush1.bf16.msra.mxu1 %v6932_v9  ;;  %v168_v9 = vld [vmem:[%s10774_s0 + $0x480] sm:$0xff]  ;;  %v173_v10 = vld [vmem:[%s10774_s0 + $0x4a8] sm:$0xff] }
  0x76   :  { %6935 = vmatprep.subr.bf16.mxu1 %v6934_v11  ;;  %v172_v11 = vld [vmem:[%s10774_s0 + $0x4a0] sm:$0xff] }
  0x78   :  { %507 = vmatmul.mubr.f32.gmra.mrb[26].mxu1 %v76_v16  ;;  %v185_v16 = vld [vmem:[%s10774_s0 + $0x508] sm:$0xff] }
  0x79   :  { %512 = vmatprep.mubr.f32.mxu1 %v81_v18  ;;  %6937 = vmatpush1.bf16.msra.mxu1 %v6936_v17  ;;  %v184_v17 = vld [vmem:[%s10774_s0 + $0x500] sm:$0xff]  ;;  %v189_v18 = vld [vmem:[%s10774_s0 + $0x528] sm:$0xff] }
  0x7a   :  { %6939 = vmatprep.subr.bf16.mxu1 %v6938_v19  ;;  %v188_v19 = vld [vmem:[%s10774_s0 + $0x520] sm:$0xff] }
  0x7c   :  { %513 = vmatmul.mubr.f32.gmra.mrb[28].mxu1 %v80_v22  ;;  %v197_v22 = vld [vmem:[%s10774_s0 + $0x568] sm:$0xff] }
  0x7d   :  { %518 = vmatprep.mubr.f32.mxu1 %v85_v24  ;;  %6941 = vmatpush1.bf16.msra.mxu1 %v6940_v23  ;;  %v196_v23 = vld [vmem:[%s10774_s0 + $0x560] sm:$0xff]  ;;  %v201_v24 = vld [vmem:[%s10774_s0 + $0x588] sm:$0xff] }
  0x7e   :  { %6943 = vmatprep.subr.bf16.mxu1 %v6942_v31  ;;  %v212_v31 = vld [vmem:[%s10774_s0 + $0x5e0] sm:$0xff] }
  0x80   :  { %519 = vmatmul.mubr.f32.gmra.mrb[30].mxu1 %v84_v25  ;;  %v200_v25 = vld [vmem:[%s10774_s0 + $0x580] sm:$0xff] }
  0x81   :  { %524 = vmatprep.mubr.f32.mxu1 %v89_v26  ;;  %6945 = vmatpush1.bf16.msra.mxu1 %v6944_v34  ;;  %v205_v26 = vld [vmem:[%s10774_s0 + $0x5a8] sm:$0xff] }
  0x82   :  { %v221_v34 = vld [vmem:[%s10774_s0 + $0x628] sm:$0xff] }
  0x84   :  { %525 = vmatmul.mubr.f32.gmra.mrb[32].mxu1 %v88_v30  ;;  %v213_v30 = vld [vmem:[%s10774_s0 + $0x5e8] sm:$0xff] }
  0x85   :  { %530 = vmatprep.mubr.f32.mxu1 %v93_v33  ;;  %v216_v33 = vld [vmem:[%s10774_s0 + $0x600] sm:$0xff] }
  0x88   :  { %531 = vmatmul.mubr.f32.gmra.mrb[34].mxu1 %v92_v35  ;;  %v220_v35 = vld [vmem:[%s10774_s0 + $0x620] sm:$0xff] }
  0x89   :  { %536 = vmatprep.mubr.f32.mxu1 %v97_v36  ;;  %v27_v36 = vld [vmem:[%s10774_s0 + $0x18] sm:$0xff] }
  0x8c   :  { %537 = vmatmul.mubr.f32.gmra.mrb[36].mxu1 %v96_v37  ;;  %v26_v37 = vld [vmem:[%s10774_s0 + $0x10] sm:$0xff] }
  0x8d   :  { %542 = vmatprep.mubr.f32.mxu1 %v101_v38  ;;  %v31_v38 = vld [vmem:[%s10774_s0 + $0x38] sm:$0xff] }
  0x90   :  { %543 = vmatmul.mubr.f32.gmra.mrb[38].mxu1 %v100_v39  ;;  %v30_v39 = vld [vmem:[%s10774_s0 + $0x30] sm:$0xff] }
  0x91   :  { %548 = vmatprep.mubr.f32.mxu1 %v105_v40  ;;  %v35_v40 = vld [vmem:[%s10774_s0 + $0x58] sm:$0xff] }
  0x94   :  { %549 = vmatmul.mubr.f32.gmra.mrb[40].mxu1 %v104_v41  ;;  %v34_v41 = vld [vmem:[%s10774_s0 + $0x50] sm:$0xff] }
  0x95   :  { %554 = vmatprep.mubr.f32.mxu1 %v109_v42  ;;  %v39_v42 = vld [vmem:[%s10774_s0 + $0x78] sm:$0xff] }
  0x98   :  { %555 = vmatmul.mubr.f32.gmra.mrb[42].mxu1 %v108_v43  ;;  %v38_v43 = vld [vmem:[%s10774_s0 + $0x70] sm:$0xff] }
  0x99   :  { %560 = vmatprep.mubr.f32.mxu1 %v113_v44  ;;  %v43_v44 = vld [vmem:[%s10774_s0 + $0x98] sm:$0xff] }
  0x9c   :  { %561 = vmatmul.mubr.f32.gmra.mrb[44].mxu1 %v112_v45  ;;  %v42_v45 = vld [vmem:[%s10774_s0 + $0x90] sm:$0xff] }
  0x9d   :  { %566 = vmatprep.mubr.f32.mxu1 %v117_v46  ;;  %v47_v46 = vld [vmem:[%s10774_s0 + $0xb8] sm:$0xff] }
  0xa0   :  { %567 = vmatmul.mubr.f32.gmra.mrb[46].mxu1 %v116_v47  ;;  %v46_v47 = vld [vmem:[%s10774_s0 + $0xb0] sm:$0xff] }
  0xa1   :  { %572 = vmatprep.mubr.f32.mxu1 %v121_v48  ;;  %v51_v48 = vld [vmem:[%s10774_s0 + $0xd8] sm:$0xff] }
  0xa4   :  { %573 = vmatmul.mubr.f32.gmra.mrb[48].mxu1 %v120_v49  ;;  %v50_v49 = vld [vmem:[%s10774_s0 + $0xd0] sm:$0xff] }
  0xa5   :  { %578 = vmatprep.mubr.f32.mxu1 %v125_v50  ;;  %v55_v50 = vld [vmem:[%s10774_s0 + $0xf8] sm:$0xff] }
  0xa8   :  { %579 = vmatmul.mubr.f32.gmra.mrb[50].mxu1 %v124_v51  ;;  %v54_v51 = vld [vmem:[%s10774_s0 + $0xf0] sm:$0xff] }
  0xa9   :  { %584 = vmatprep.mubr.f32.mxu1 %v129_v52  ;;  %v59_v52 = vld [vmem:[%s10774_s0 + $0x118] sm:$0xff] }
  0xac   :  { %585 = vmatmul.mubr.f32.gmra.mrb[52].mxu1 %v128_v53  ;;  %v58_v53 = vld [vmem:[%s10774_s0 + $0x110] sm:$0xff] }
  0xad   :  { %590 = vmatprep.mubr.f32.mxu1 %v133_v54  ;;  %v63_v54 = vld [vmem:[%s10774_s0 + $0x138] sm:$0xff] }
  0xb0   :  { %591 = vmatmul.mubr.f32.gmra.mrb[54].mxu1 %v132_v55  ;;  %v62_v55 = vld [vmem:[%s10774_s0 + $0x130] sm:$0xff] }
  0xb1   :  { %596 = vmatprep.mubr.f32.mxu1 %v137_v56  ;;  %v67_v56 = vld [vmem:[%s10774_s0 + $0x158] sm:$0xff] }
  0xb4   :  { %597 = vmatmul.mubr.f32.gmra.mrb[56].mxu1 %v136_v57  ;;  %v66_v57 = vld [vmem:[%s10774_s0 + $0x150] sm:$0xff] }
  0xb5   :  { %602 = vmatprep.mubr.f32.mxu1 %v141_v58  ;;  %v71_v58 = vld [vmem:[%s10774_s0 + $0x178] sm:$0xff] }
  0xb8   :  { %603 = vmatmul.mubr.f32.gmra.mrb[58].mxu1 %v140_v59  ;;  %v70_v59 = vld [vmem:[%s10774_s0 + $0x170] sm:$0xff] }
  0xb9   :  { %608 = vmatprep.mubr.f32.mxu1 %v145_v60  ;;  %v75_v60 = vld [vmem:[%s10774_s0 + $0x198] sm:$0xff] }
  0xbc   :  { %609 = vmatmul.mubr.f32.gmra.mrb[60].mxu1 %v144_v61  ;;  %v74_v61 = vld [vmem:[%s10774_s0 + $0x190] sm:$0xff] }
  0xbd   :  { %614 = vmatprep.mubr.f32.mxu1 %v149_v62  ;;  %v79_v62 = vld [vmem:[%s10774_s0 + $0x1b8] sm:$0xff] }
  0xc0   :  { %615 = vmatmul.mubr.f32.gmra.mrb[62].mxu1 %v148_v63  ;;  %v78_v63 = vld [vmem:[%s10774_s0 + $0x1b0] sm:$0xff] }
  0xc1   :  { %620 = vmatprep.mubr.f32.mxu1 %v153_v0  ;;  %v83_v0 = vld [vmem:[%s10774_s0 + $0x1d8] sm:$0xff] }
  0xc4   :  { %621 = vmatmul.mubr.f32.gmra.mrb[64].mxu1 %v152_v1  ;;  %v82_v1 = vld [vmem:[%s10774_s0 + $0x1d0] sm:$0xff] }
  0xc5   :  { %626 = vmatprep.mubr.f32.mxu1 %v157_v2  ;;  %v87_v2 = vld [vmem:[%s10774_s0 + $0x1f8] sm:$0xff] }
  0xc8   :  { %627 = vmatmul.mubr.f32.gmra.mrb[66].mxu1 %v156_v3  ;;  %v86_v3 = vld [vmem:[%s10774_s0 + $0x1f0] sm:$0xff] }
  0xc9   :  { %632 = vmatprep.mubr.f32.mxu1 %v161_v4  ;;  %v91_v4 = vld [vmem:[%s10774_s0 + $0x218] sm:$0xff] }
  0xcc   :  { %633 = vmatmul.mubr.f32.gmra.mrb[68].mxu1 %v160_v5  ;;  %v90_v5 = vld [vmem:[%s10774_s0 + $0x210] sm:$0xff] }
  0xcd   :  { %638 = vmatprep.mubr.f32.mxu1 %v165_v6  ;;  %v95_v6 = vld [vmem:[%s10774_s0 + $0x238] sm:$0xff] }
  0xd0   :  { %639 = vmatmul.mubr.f32.gmra.mrb[70].mxu1 %v164_v7  ;;  %v94_v7 = vld [vmem:[%s10774_s0 + $0x230] sm:$0xff] }
  0xd1   :  { %644 = vmatprep.mubr.f32.mxu1 %v169_v8  ;;  %v99_v8 = vld [vmem:[%s10774_s0 + $0x258] sm:$0xff] }
  0xd4   :  { %645 = vmatmul.mubr.f32.gmra.mrb[72].mxu1 %v168_v9  ;;  %v98_v9 = vld [vmem:[%s10774_s0 + $0x250] sm:$0xff] }
  0xd5   :  { %650 = vmatprep.mubr.f32.mxu1 %v173_v10  ;;  %v103_v10 = vld [vmem:[%s10774_s0 + $0x278] sm:$0xff] }
  0xd8   :  { %651 = vmatmul.mubr.f32.gmra.mrb[74].mxu1 %v172_v11  ;;  %v102_v11 = vld [vmem:[%s10774_s0 + $0x270] sm:$0xff] }
  0xd9   :  { %656 = vmatprep.mubr.f32.mxu1 %v177_v12  ;;  %v107_v12 = vld [vmem:[%s10774_s0 + $0x298] sm:$0xff] }
  0xdc   :  { %657 = vmatmul.mubr.f32.gmra.mrb[76].mxu1 %v176_v13  ;;  %v106_v13 = vld [vmem:[%s10774_s0 + $0x290] sm:$0xff] }
  0xdd   :  { %662 = vmatprep.mubr.f32.mxu1 %v181_v14  ;;  %v111_v14 = vld [vmem:[%s10774_s0 + $0x2b8] sm:$0xff] }
  0xe0   :  { %663 = vmatmul.mubr.f32.gmra.mrb[78].mxu1 %v180_v15  ;;  %v110_v15 = vld [vmem:[%s10774_s0 + $0x2b0] sm:$0xff] }
  0xe1   :  { %668 = vmatprep.mubr.f32.mxu1 %v185_v16  ;;  %v115_v16 = vld [vmem:[%s10774_s0 + $0x2d8] sm:$0xff] }
  0xe4   :  { %669 = vmatmul.mubr.f32.gmra.mrb[80].mxu1 %v184_v17  ;;  %v114_v17 = vld [vmem:[%s10774_s0 + $0x2d0] sm:$0xff] }
  0xe5   :  { %674 = vmatprep.mubr.f32.mxu1 %v189_v18  ;;  %v119_v18 = vld [vmem:[%s10774_s0 + $0x2f8] sm:$0xff] }
  0xe8   :  { %675 = vmatmul.mubr.f32.gmra.mrb[82].mxu1 %v188_v19  ;;  %v118_v19 = vld [vmem:[%s10774_s0 + $0x2f0] sm:$0xff] }
  0xe9   :  { %680 = vmatprep.mubr.f32.mxu1 %v193_v20  ;;  %v123_v20 = vld [vmem:[%s10774_s0 + $0x318] sm:$0xff] }
  0xec   :  { %681 = vmatmul.mubr.f32.gmra.mrb[84].mxu1 %v192_v21  ;;  %v122_v21 = vld [vmem:[%s10774_s0 + $0x310] sm:$0xff] }
  0xed   :  { %686 = vmatprep.mubr.f32.mxu1 %v197_v22  ;;  %v127_v22 = vld [vmem:[%s10774_s0 + $0x338] sm:$0xff] }
  0xf0   :  { %687 = vmatmul.mubr.f32.gmra.mrb[86].mxu1 %v196_v23  ;;  %v126_v23 = vld [vmem:[%s10774_s0 + $0x330] sm:$0xff] }
  0xf1   :  { %692 = vmatprep.mubr.f32.mxu1 %v201_v24  ;;  %v131_v24 = vld [vmem:[%s10774_s0 + $0x358] sm:$0xff] }
  0xf4   :  { %693 = vmatmul.mubr.f32.gmra.mrb[88].mxu1 %v200_v25  ;;  %v130_v25 = vld [vmem:[%s10774_s0 + $0x350] sm:$0xff] }
  0xf5   :  { %698 = vmatprep.mubr.f32.mxu1 %v205_v26  ;;  %v135_v26 = vld [vmem:[%s10774_s0 + $0x378] sm:$0xff] }
  0xf8   :  { %699 = vmatmul.mubr.f32.gmra.mrb[90].mxu1 %v204_v27  ;;  %v134_v27 = vld [vmem:[%s10774_s0 + $0x370] sm:$0xff] }
  0xf9   :  { %704 = vmatprep.mubr.f32.mxu1 %v209_v28  ;;  %v139_v28 = vld [vmem:[%s10774_s0 + $0x398] sm:$0xff] }
  0xfc   :  { %705 = vmatmul.mubr.f32.gmra.mrb[92].mxu1 %v208_v29  ;;  %v138_v29 = vld [vmem:[%s10774_s0 + $0x390] sm:$0xff] }
  0xfd   :  { %710 = vmatprep.mubr.f32.mxu1 %v213_v30  ;;  %v143_v30 = vld [vmem:[%s10774_s0 + $0x3b8] sm:$0xff] }
 0x100   :  { %711 = vmatmul.mubr.f32.gmra.mrb[94].mxu1 %v212_v31  ;;  %v142_v31 = vld [vmem:[%s10774_s0 + $0x3b0] sm:$0xff] }
 0x101   :  { %716 = vmatprep.mubr.f32.mxu1 %v217_v32  ;;  %v147_v32 = vld [vmem:[%s10774_s0 + $0x3d8] sm:$0xff] }
 0x104   :  { %717 = vmatmul.mubr.f32.gmra.mrb[96].mxu1 %v216_v33  ;;  %v146_v33 = vld [vmem:[%s10774_s0 + $0x3d0] sm:$0xff] }
 0x105   :  { %722 = vmatprep.mubr.f32.mxu1 %v221_v34  ;;  %v151_v34 = vld [vmem:[%s10774_s0 + $0x3f8] sm:$0xff] }
 0x108   :  { %723 = vmatmul.mubr.f32.gmra.mrb[98].mxu1 %v220_v35  ;;  %v150_v35 = vld [vmem:[%s10774_s0 + $0x3f0] sm:$0xff] }
 0x109   :  { %793 = vmatprep.mubr.f32.mxu1 %v27_v36  ;;  %v155_v36 = vld [vmem:[%s10774_s0 + $0x418] sm:$0xff] }
 0x10c   :  { %794 = vmatmul.mubr.f32.vlgmr.msra.gmra.mrb[0].mxu1 %v26_v37  ;;  %v154_v37 = vld [vmem:[%s10774_s0 + $0x410] sm:$0xff] }
 0x10d   :  { %799 = vmatprep.mubr.f32.mxu1 %v31_v38  ;;  %v159_v38 = vld [vmem:[%s10774_s0 + $0x438] sm:$0xff] }
 0x110   :  { %800 = vmatmul.mubr.f32.gmra.mrb[2].mxu1 %v30_v39  ;;  %v158_v39 = vld [vmem:[%s10774_s0 + $0x430] sm:$0xff] }
 0x111   :  { %805 = vmatprep.mubr.f32.mxu1 %v35_v40  ;;  %v163_v40 = vld [vmem:[%s10774_s0 + $0x458] sm:$0xff] }
 0x114   :  { %806 = vmatmul.mubr.f32.gmra.mrb[4].mxu1 %v34_v41  ;;  %v162_v41 = vld [vmem:[%s10774_s0 + $0x450] sm:$0xff] }
 0x115   :  { %811 = vmatprep.mubr.f32.mxu1 %v39_v42  ;;  %v167_v42 = vld [vmem:[%s10774_s0 + $0x478] sm:$0xff] }
 0x118   :  { %812 = vmatmul.mubr.f32.gmra.mrb[6].mxu1 %v38_v43  ;;  %v166_v43 = vld [vmem:[%s10774_s0 + $0x470] sm:$0xff] }
 0x119   :  { %817 = vmatprep.mubr.f32.mxu1 %v43_v44  ;;  %v171_v44 = vld [vmem:[%s10774_s0 + $0x498] sm:$0xff] }
 0x11c   :  { %818 = vmatmul.mubr.f32.gmra.mrb[8].mxu1 %v42_v45  ;;  %v170_v45 = vld [vmem:[%s10774_s0 + $0x490] sm:$0xff] }
 0x11d   :  { %823 = vmatprep.mubr.f32.mxu1 %v47_v46  ;;  %v175_v46 = vld [vmem:[%s10774_s0 + $0x4b8] sm:$0xff] }
 0x120   :  { %824 = vmatmul.mubr.f32.gmra.mrb[10].mxu1 %v46_v47  ;;  %v174_v47 = vld [vmem:[%s10774_s0 + $0x4b0] sm:$0xff] }
 0x121   :  { %829 = vmatprep.mubr.f32.mxu1 %v51_v48  ;;  %v179_v48 = vld [vmem:[%s10774_s0 + $0x4d8] sm:$0xff] }
 0x124   :  { %830 = vmatmul.mubr.f32.gmra.mrb[12].mxu1 %v50_v49  ;;  %v178_v49 = vld [vmem:[%s10774_s0 + $0x4d0] sm:$0xff] }
 0x125   :  { %835 = vmatprep.mubr.f32.mxu1 %v55_v50  ;;  %v183_v50 = vld [vmem:[%s10774_s0 + $0x4f8] sm:$0xff] }
 0x128   :  { %836 = vmatmul.mubr.f32.gmra.mrb[14].mxu1 %v54_v51  ;;  %v182_v51 = vld [vmem:[%s10774_s0 + $0x4f0] sm:$0xff] }
 0x129   :  { %841 = vmatprep.mubr.f32.mxu1 %v59_v52  ;;  %v187_v52 = vld [vmem:[%s10774_s0 + $0x518] sm:$0xff] }
 0x12c   :  { %842 = vmatmul.mubr.f32.gmra.mrb[16].mxu1 %v58_v53  ;;  %v186_v53 = vld [vmem:[%s10774_s0 + $0x510] sm:$0xff] }
 0x12d   :  { %847 = vmatprep.mubr.f32.mxu1 %v63_v54  ;;  %v1229_v54 = vld [vmem:[%s10776_s2 + $0x8] sm:$0xff] }
 0x130   :  { %848 = vmatmul.mubr.f32.gmra.mrb[18].mxu1 %v62_v55  ;;  %v1231_v55 = vld [vmem:[%s10776_s2 + $0x18] sm:$0xff] }
 0x131   :  { %853 = vmatprep.mubr.f32.mxu1 %v67_v56  ;;  %v191_v56 = vld [vmem:[%s10774_s0 + $0x538] sm:$0xff] }
 0x134   :  { %854 = vmatmul.mubr.f32.gmra.mrb[20].mxu1 %v66_v57  ;;  %v9672_v57 = vpack.c.bf16 %v1231_v55, %v1229_v54 }
 0x135   :  { %859 = vmatprep.mubr.f32.mxu1 %v71_v58  ;;  %v1228_v58 = vld [vmem:[%s10776_s2] sm:$0xff] }
 0x136   :  { %6947 = vmatprep.subr.bf16.mxu1 %v9672_v57  ;;  %7107 = vmatprep.subr.bf16.mxu0 %v9672_v57 }
 0x138   :  { %860 = vmatmul.mubr.f32.gmra.mrb[22].mxu1 %v70_v59  ;;  %v1230_v59 = vld [vmem:[%s10776_s2 + $0x10] sm:$0xff] }
 0x139   :  { %865 = vmatprep.mubr.f32.mxu1 %v75_v60  ;;  %v190_v60 = vld [vmem:[%s10774_s0 + $0x530] sm:$0xff] }
 0x13c   :  { %866 = vmatmul.mubr.f32.gmra.mrb[24].mxu1 %v74_v61  ;;  %v9684_v61 = vpack.c.bf16 %v1230_v59, %v1228_v58 }
 0x13d   :  { %871 = vmatprep.mubr.f32.mxu1 %v79_v62  ;;  %v195_v62 = vld [vmem:[%s10774_s0 + $0x558] sm:$0xff] }
 0x13e   :  { %6949 = vmatpush1.bf16.msra.mxu1 %v9684_v61  ;;  %7109 = vmatpush1.bf16.msra.mxu0 %v9684_v61 }
 0x140   :  { %872 = vmatmul.mubr.f32.gmra.mrb[26].mxu1 %v78_v63  ;;  %v194_v63 = vld [vmem:[%s10774_s0 + $0x550] sm:$0xff] }
 0x141   :  { %877 = vmatprep.mubr.f32.mxu1 %v83_v0  ;;  %v199_v0 = vld [vmem:[%s10774_s0 + $0x578] sm:$0xff] }
 0x144   :  { %878 = vmatmul.mubr.f32.gmra.mrb[28].mxu1 %v82_v1  ;;  %v198_v1 = vld [vmem:[%s10774_s0 + $0x570] sm:$0xff] }
 0x145   :  { %883 = vmatprep.mubr.f32.mxu1 %v87_v2  ;;  %v203_v2 = vld [vmem:[%s10774_s0 + $0x598] sm:$0xff] }
 0x148   :  { %884 = vmatmul.mubr.f32.gmra.mrb[30].mxu1 %v86_v3  ;;  %v202_v3 = vld [vmem:[%s10774_s0 + $0x590] sm:$0xff] }
 0x149   :  { %889 = vmatprep.mubr.f32.mxu1 %v91_v4  ;;  %v207_v4 = vld [vmem:[%s10774_s0 + $0x5b8] sm:$0xff] }
 0x14c   :  { %890 = vmatmul.mubr.f32.gmra.mrb[32].mxu1 %v90_v5  ;;  %v206_v5 = vld [vmem:[%s10774_s0 + $0x5b0] sm:$0xff] }
 0x14d   :  { %895 = vmatprep.mubr.f32.mxu1 %v95_v6  ;;  %v211_v6 = vld [vmem:[%s10774_s0 + $0x5d8] sm:$0xff] }
 0x150   :  { %896 = vmatmul.mubr.f32.gmra.mrb[34].mxu1 %v94_v7  ;;  %v210_v7 = vld [vmem:[%s10774_s0 + $0x5d0] sm:$0xff] }
 0x151   :  { %901 = vmatprep.mubr.f32.mxu1 %v99_v8  ;;  %v215_v8 = vld [vmem:[%s10774_s0 + $0x5f8] sm:$0xff] }
 0x154   :  { %902 = vmatmul.mubr.f32.gmra.mrb[36].mxu1 %v98_v9  ;;  %v214_v9 = vld [vmem:[%s10774_s0 + $0x5f0] sm:$0xff] }
 0x155   :  { %907 = vmatprep.mubr.f32.mxu1 %v103_v10  ;;  %v219_v10 = vld [vmem:[%s10774_s0 + $0x618] sm:$0xff] }
 0x158   :  { %908 = vmatmul.mubr.f32.gmra.mrb[38].mxu1 %v102_v11  ;;  %v218_v11 = vld [vmem:[%s10774_s0 + $0x610] sm:$0xff] }
 0x159   :  { %913 = vmatprep.mubr.f32.mxu1 %v107_v12  ;;  %v223_v12 = vld [vmem:[%s10774_s0 + $0x638] sm:$0xff] }
 0x15c   :  { %914 = vmatmul.mubr.f32.gmra.mrb[40].mxu1 %v106_v13  ;;  %v222_v13 = vld [vmem:[%s10774_s0 + $0x630] sm:$0xff] }
 0x15d   :  { %919 = vmatprep.mubr.f32.mxu1 %v111_v14  ;;  %v354_v14 = vlaneseq }
 0x160   :  { %920 = vmatmul.mubr.f32.gmra.mrb[42].mxu1 %v110_v15  ;;  %v9737_v15 = vshrl.u32 %v354_v14, 7 }
 0x161   :  { %925 = vmatprep.mubr.f32.mxu1 %v115_v16 }
 0x162   :  { %10787 = vst [vmem:[#allocation6_spill] sm:$0xff] %v9737_v15  ;;  %v10782_v16 = vsub.s32 0, %v9737_v15 }
 0x164   :  { %926 = vmatmul.mubr.f32.gmra.mrb[44].mxu1 %v114_v17  ;;  %v352_v17 = vld [vmem:[%s10777_s3] sm:$0x3] }
 0x165   :  { %931 = vmatprep.mubr.f32.mxu1 %v119_v18  ;;  %v9745_v18 = vrot.slane %v352_v17, %v10782_v16 }
 0x168   :  { %932 = vmatmul.mubr.f32.gmra.mrb[46].mxu1 %v118_v19  ;;  %v1233_v19 = vld [vmem:[%s10776_s2 + $0x28] sm:$0xff] }
 0x169   :  { %937 = vmatprep.mubr.f32.mxu1 %v123_v20  ;;  %v1235_v20 = vld [vmem:[%s10776_s2 + $0x38] sm:$0xff] }
 0x16c   :  { %938 = vmatmul.mubr.f32.gmra.mrb[48].mxu1 %v122_v21  ;;  %v1232_v21 = vld [vmem:[%s10776_s2 + $0x20] sm:$0xff] }
 0x16d   :  { %943 = vmatprep.mubr.f32.mxu1 %v127_v22  ;;  %v9756_v22 = vpack.c.bf16 %v1235_v20, %v1233_v19 }
 0x16f   :  { %6951 = vmatprep.subr.bf16.mxu1 %v9756_v22  ;;  %7111 = vmatprep.subr.bf16.mxu0 %v9756_v22 }
 0x170   :  { %944 = vmatmul.mubr.f32.gmra.mrb[50].mxu1 %v126_v23  ;;  %v1234_v23 = vld [vmem:[%s10776_s2 + $0x30] sm:$0xff] }
 0x171   :  { %949 = vmatprep.mubr.f32.mxu1 %v131_v24 }
 0x174   :  { %950 = vmatmul.mubr.f32.gmra.mrb[52].mxu1 %v130_v25  ;;  %v9761_v25 = vpack.c.bf16 %v1234_v23, %v1232_v21 }
 0x175   :  { %955 = vmatprep.mubr.f32.mxu1 %v135_v26 }
 0x176   :  { %6953 = vmatpush1.bf16.msra.mxu1 %v9761_v25  ;;  %7113 = vmatpush1.bf16.msra.mxu0 %v9761_v25 }
 0x178   :  { %956 = vmatmul.mubr.f32.gmra.mrb[54].mxu1 %v134_v27 }
 0x179   :  { %961 = vmatprep.mubr.f32.mxu1 %v139_v28 }
 0x17c   :  { %962 = vmatmul.mubr.f32.gmra.mrb[56].mxu1 %v138_v29  ;;  %v10781_v29 = vsub.s32 1, %v9737_v15 }
 0x17d   :  { %967 = vmatprep.mubr.f32.mxu1 %v143_v30 }
 0x17e   :  { %v9771_v30 = vrot.slane %v352_v17, %v10781_v29 }
 0x180   :  { %968 = vmatmul.mubr.f32.gmra.mrb[58].mxu1 %v142_v31 }
 0x181   :  { %973 = vmatprep.mubr.f32.mxu1 %v147_v32 }
 0x184   :  { %974 = vmatmul.mubr.f32.gmra.mrb[60].mxu1 %v146_v33 }
 0x185   :  { %979 = vmatprep.mubr.f32.mxu1 %v151_v34 }
 0x188   :  { %980 = vmatmul.mubr.f32.gmra.mrb[62].mxu1 %v150_v35 }
 0x189   :  { %985 = vmatprep.mubr.f32.mxu1 %v155_v36 }
 0x18c   :  { %986 = vmatmul.mubr.f32.gmra.mrb[64].mxu1 %v154_v37 }
 0x18d   :  { %991 = vmatprep.mubr.f32.mxu1 %v159_v38 }
 0x190   :  { %992 = vmatmul.mubr.f32.gmra.mrb[66].mxu1 %v158_v39 }
 0x191   :  { %997 = vmatprep.mubr.f32.mxu1 %v163_v40 }
 0x194   :  { %998 = vmatmul.mubr.f32.gmra.mrb[68].mxu1 %v162_v41  ;;  %v1237_v41 = vld [vmem:[%s10776_s2 + $0x48] sm:$0xff] }
 0x195   :  { %1003 = vmatprep.mubr.f32.mxu1 %v167_v42  ;;  %v1239_v42 = vld [vmem:[%s10776_s2 + $0x58] sm:$0xff] }
 0x198   :  { %1004 = vmatmul.mubr.f32.gmra.mrb[70].mxu1 %v166_v43  ;;  %v9790_v43 = vpack.c.bf16 %v1239_v42, %v1237_v41 }
 0x199   :  { %1009 = vmatprep.mubr.f32.mxu1 %v171_v44 }
 0x19a   :  { %6955 = vmatprep.subr.bf16.mxu1 %v9790_v43  ;;  %7115 = vmatprep.subr.bf16.mxu0 %v9790_v43 }
 0x19c   :  { %1010 = vmatmul.mubr.f32.gmra.mrb[72].mxu1 %v170_v45 }
 0x19d   :  { %1015 = vmatprep.mubr.f32.mxu1 %v175_v46  ;;  %v1236_v46 = vld [vmem:[%s10776_s2 + $0x40] sm:$0xff] }
 0x1a0   :  { %1016 = vmatmul.mubr.f32.gmra.mrb[74].mxu1 %v174_v47  ;;  %v1238_v47 = vld [vmem:[%s10776_s2 + $0x50] sm:$0xff] }
 0x1a1   :  { %1021 = vmatprep.mubr.f32.mxu1 %v179_v48  ;;  %v9804_v48 = vpack.c.bf16 %v1238_v47, %v1236_v46 }
 0x1a3   :  { %6957 = vmatpush1.bf16.msra.mxu1 %v9804_v48  ;;  %7117 = vmatpush1.bf16.msra.mxu0 %v9804_v48 }
 0x1a4   :  { %1022 = vmatmul.mubr.f32.gmra.mrb[76].mxu1 %v178_v49 }
 0x1a5   :  { %1027 = vmatprep.mubr.f32.mxu1 %v183_v50 }
 0x1a8   :  { %1028 = vmatmul.mubr.f32.gmra.mrb[78].mxu1 %v182_v51 }
 0x1a9   :  { %1033 = vmatprep.mubr.f32.mxu1 %v187_v52 }
 0x1ac   :  { %1034 = vmatmul.mubr.f32.gmra.mrb[80].mxu1 %v186_v53 }
 0x1ad   :  { %1039 = vmatprep.mubr.f32.mxu1 %v191_v56 }
 0x1b0   :  { %1040 = vmatmul.mubr.f32.gmra.mrb[82].mxu1 %v190_v60  ;;  %v1241_v60 = vld [vmem:[%s10776_s2 + $0x68] sm:$0xff] }
 0x1b1   :  { %1045 = vmatprep.mubr.f32.mxu1 %v195_v62  ;;  %v1243_v62 = vld [vmem:[%s10776_s2 + $0x78] sm:$0xff] }
 0x1b4   :  { %1046 = vmatmul.mubr.f32.gmra.mrb[84].mxu1 %v194_v63  ;;  %v1240_v63 = vld [vmem:[%s10776_s2 + $0x60] sm:$0xff] }
 0x1b5   :  { %1051 = vmatprep.mubr.f32.mxu1 %v199_v0  ;;  %v9837_v0 = vpack.c.bf16 %v1243_v62, %v1241_v60 }
 0x1b7   :  { %6959 = vmatprep.subr.bf16.mxu1 %v9837_v0  ;;  %7119 = vmatprep.subr.bf16.mxu0 %v9837_v0 }
 0x1b8   :  { %1052 = vmatmul.mubr.f32.gmra.mrb[86].mxu1 %v198_v1  ;;  %v1242_v1 = vld [vmem:[%s10776_s2 + $0x70] sm:$0xff] }
 0x1b9   :  { %1057 = vmatprep.mubr.f32.mxu1 %v203_v2 }
 0x1bc   :  { %1058 = vmatmul.mubr.f32.gmra.mrb[88].mxu1 %v202_v3  ;;  %v9844_v3 = vpack.c.bf16 %v1242_v1, %v1240_v63 }
 0x1bd   :  { %1063 = vmatprep.mubr.f32.mxu1 %v207_v4 }
 0x1be   :  { %6961 = vmatpush1.bf16.msra.mxu1 %v9844_v3  ;;  %7121 = vmatpush1.bf16.msra.mxu0 %v9844_v3 }
 0x1bf   :  { %6963 = vmatprep.subr.bf16.mxu1 %v9672_v57  ;;  %7123 = vmatprep.subr.bf16.mxu0 %v9672_v57 }
 0x1c0   :  { %1064 = vmatmul.mubr.f32.gmra.mrb[90].mxu1 %v206_v5 }
 0x1c1   :  { %1069 = vmatprep.mubr.f32.mxu1 %v211_v6 }
 0x1c4   :  { %1070 = vmatmul.mubr.f32.gmra.mrb[92].mxu1 %v210_v7 }
 0x1c5   :  { %1075 = vmatprep.mubr.f32.mxu1 %v215_v8 }
 0x1c8   :  { %1076 = vmatmul.mubr.f32.gmra.mrb[94].mxu1 %v214_v9 }
 0x1c9   :  { %1081 = vmatprep.mubr.f32.mxu1 %v219_v10 }
 0x1cc   :  { %1082 = vmatmul.mubr.f32.gmra.mrb[96].mxu1 %v218_v11 }
 0x1cd   :  { %1087 = vmatprep.mubr.f32.mxu1 %v223_v12 }
 0x1d0   :  { %1088 = vmatmul.mubr.f32.gmra.mrb[98].mxu1 %v222_v13 }
 0x1df   :  { %v795_v24 = vpop.f32.mrb[0].mxu1 }
 0x1e0   :  { %v7752_v26 = vadd.f32 %v795_v24, %v9745_v18  ;;  %v797_v27 = vpop.f32.mrb[1].mxu1 }
 0x1e1   :  { %v9774_v31 = vadd.f32 %v797_v27, %v9771_v30 }
 0x1e2   :  { %v6648_v28 = vmul.f32 -1.442695, %v7752_v26 }
 0x1e4   :  { %8056 = vpow2.f32 %v6648_v28 }
 0x1e5   :  { %8058 = vtanh.f32 %v9774_v31 }
 0x1ee   :  { %v8057_v32 = vpop.eup %8056 }
 0x1ef   :  { %v1199_v33 = vadd.f32 1.0, %v8057_v32  ;;  %v8059_v34 = vpop.eup %8058 }
 0x1f1   :  { %8060 = vrcp.f32 %v1199_v33 }
 0x1fb   :  { %v8061_v35 = vpop.eup %8060 }
 0x1fc   :  { %v1203_v36 = vmul.f32 %v8061_v35, %v8059_v34 }
 0x1fe   :  { %v1222_v37 = vsel %vm1220_vm0, %v1203_v36, 0.0  ;;  %8062 = vtanh.f32 %v1203_v36 }
 0x1ff   :  { %1335 = vrot.lane.b32.xlu1 %v1222_v37, %s8692_s8 }
 0x208   :  { %v8063_v38 = vpop.eup %8062 }
 0x209   :  { %1212 = vrot.lane.b32.xlu0 %v8063_v38, %s8692_s8  ;;  %v6649_v38 = vmul.f32 -1.442695, %v9774_v31 }
 0x20b   :  { %v9780_v39 = vpop.f32.mrb[22].mxu1  ;;  %8064 = vpow2.f32 %v6649_v38  ;;  %v10785_v38 = vmov 0.0  }
 0x20c   :  { %v9782_v40 = vpop.f32.mrb[23].mxu1  ;;  %1312 = vmatprep.mubr.f32.mxu1 %v10785_v38  ;;  %2366 = vmatprep.mubr.f32.mxu0 %v10785_v38 }
 0x20f   :  { %v9792_v44 = vpop.f32.mrb[24].mxu1 }
 0x210   :  { %v9794_v45 = vpop.f32.mrb[25].mxu1 }
 0x213   :  { %v9806_v49 = vpop.f32.mrb[26].mxu1 }
 0x214   :  { %v9810_v50 = vpop.f32.mrb[27].mxu1 }
 0x215   :  { %v8065_v1 = vpop.eup %8064 }
 0x216   :  { %v1207_v31 = vadd.f32 1.0, %v8065_v1 }
 0x217   :  { %v9812_v51 = vpop.f32.mrb[28].mxu1 }
 0x218   :  { %v9814_v52 = vpop.f32.mrb[29].mxu1  ;;  %8066 = vrcp.f32 %v1207_v31 }
 0x21b   :  { %v9816_v53 = vpop.f32.mrb[30].mxu1 }
 0x21c   :  { %v9818_v54 = vpop.f32.mrb[31].mxu1 }
 0x21f   :  { %v9820_v55 = vpop.f32.mrb[32].mxu1 }
 0x220   :  { %v9822_v56 = vpop.f32.mrb[33].mxu1 }
 0x223   :  { %v9824_v58 = vpop.f32.mrb[34].mxu1 }
 0x224   :  { %v9826_v59 = vpop.f32.mrb[35].mxu1 }
 0x227   :  { %v9842_v2 = vpop.f32.mrb[36].mxu1 }
 0x228   :  { %v9846_v4 = vpop.f32.mrb[37].mxu1 }
 0x22b   :  { %v9854_v5 = vpop.f32.mrb[38].mxu1 }
 0x22c   :  { %v9856_v6 = vpop.f32.mrb[39].mxu1 }
 0x22f   :  { %v9858_v7 = vpop.f32.mrb[40].mxu1 }
 0x230   :  { %v9860_v8 = vpop.f32.mrb[41].mxu1 }
 0x233   :  { %v9862_v9 = vpop.f32.mrb[42].mxu1 }
 0x234   :  { %v9864_v10 = vpop.f32.mrb[43].mxu1 }
 0x237   :  { %v9866_v11 = vpop.f32.mrb[44].mxu1 }
 0x238   :  { %v9868_v12 = vpop.f32.mrb[45].mxu1 }
 0x23b   :  { %v9870_v13 = vpop.f32.mrb[46].mxu1 }
 0x23c   :  { %v9872_v14 = vpop.f32.mrb[47].mxu1 }
 0x23f   :  { %v9874_v17 = vpop.f32.mrb[48].mxu1 }
 0x240   :  { %v9876_v19 = vpop.f32.mrb[49].mxu1 }
 0x243   :  { %v9878_v20 = vpop.f32.mrb[50].mxu1 }
 0x244   :  { %v9880_v21 = vpop.f32.mrb[51].mxu1 }
 0x247   :  { %v9882_v23 = vpop.f32.mrb[52].mxu1 }
 0x248   :  { %v9884_v24 = vpop.f32.mrb[53].mxu1 }
 0x24b   :  { %v9886_v26 = vpop.f32.mrb[54].mxu1 }
 0x24c   :  { %v9888_v27 = vpop.f32.mrb[55].mxu1 }
 0x24f   :  { %v9890_v28 = vpop.f32.mrb[56].mxu1 }
 0x250   :  { %v9892_v32 = vpop.f32.mrb[57].mxu1 }
 0x253   :  { %v9894_v33 = vpop.f32.mrb[58].mxu1 }
 0x254   :  { %v9896_v34 = vpop.f32.mrb[59].mxu1 }
 0x255   :  { %10788 = vst [vmem:[#allocation7_spill] sm:$0xff] %v9896_v34 }
 0x257   :  { %v9898_v35 = vpop.f32.mrb[60].mxu1 }
 0x258   :  { %10789 = vst [vmem:[#allocation8_spill] sm:$0xff] %v9898_v35  ;;  %v9900_v36 = vpop.f32.mrb[61].mxu1 }
 0x259   :  { %10790 = vst [vmem:[#allocation9_spill] sm:$0xff] %v9900_v36 }
 0x25b   :  { %v9902_v37 = vpop.f32.mrb[62].mxu1 }
 0x25c   :  { %10791 = vst [vmem:[#allocation10_spill] sm:$0xff] %v9902_v37  ;;  %v9905_v41 = vpop.f32.mrb[63].mxu1 }
 0x25d   :  { %10792 = vst [vmem:[#allocation11_spill] sm:$0xff] %v9905_v41 }
 0x25f   :  { %v9907_v42 = vpop.f32.mrb[64].mxu1 }
 0x260   :  { %10793 = vst [vmem:[#allocation12_spill] sm:$0xff] %v9907_v42  ;;  %v9909_v46 = vpop.f32.mrb[65].mxu1 }
 0x261   :  { %10794 = vst [vmem:[#allocation13_spill] sm:$0xff] %v9909_v46 }
 0x263   :  { %v9911_v47 = vpop.f32.mrb[66].mxu1 }
 0x264   :  { %10795 = vst [vmem:[#allocation14_spill] sm:$0xff] %v9911_v47  ;;  %v9913_v60 = vpop.f32.mrb[67].mxu1 }
 0x265   :  { %10796 = vst [vmem:[#allocation15_spill] sm:$0xff] %v9913_v60 }
 0x267   :  { %v9915_v62 = vpop.f32.mrb[68].mxu1 }
 0x268   :  { %10797 = vst [vmem:[#allocation16_spill] sm:$0xff] %v9915_v62  ;;  %v9917_v63 = vpop.f32.mrb[69].mxu1 }
 0x269   :  { %10798 = vst [vmem:[#allocation17_spill] sm:$0xff] %v9917_v63 }
 0x26b   :  { %v9919_v29 = vpop.f32.mrb[70].mxu1 }
 0x26c   :  { %10799 = vst [vmem:[#allocation18_spill] sm:$0xff] %v9919_v29  ;;  %v9921_v16 = vpop.f32.mrb[71].mxu1 }
 0x26d   :  { %10800 = vst [vmem:[#allocation19_spill] sm:$0xff] %v9921_v16  ;;  %v8067_v16 = vpop.eup %8066 }
 0x26f   :  { %v9923_v15 = vpop.f32.mrb[72].mxu1 }
 0x270   :  { %10801 = vst [vmem:[#allocation20_spill] sm:$0xff] %v9923_v15  ;;  %v9925_v42 = vpop.f32.mrb[73].mxu1 }
 0x271   :  { %10802 = vst [vmem:[#allocation21_spill] sm:$0xff] %v9925_v42  ;;  %v1336_v37 = vpop.permute.xlu1 %1335 }
 0x273   :  { %v9929_v60 = vpop.f32.mrb[74].mxu1 }
 0x274   :  { %10803 = vst [vmem:[#allocation22_spill] sm:$0xff] %v9929_v60  ;;  %v9931_v62 = vpop.f32.mrb[75].mxu1 }
 0x275   :  { %10804 = vst [vmem:[#allocation23_spill] sm:$0xff] %v9931_v62 }
 0x277   :  { %v9933_v63 = vpop.f32.mrb[76].mxu1 }
 0x278   :  { %10805 = vst [vmem:[#allocation24_spill] sm:$0xff] %v9933_v63  ;;  %v9935_v29 = vpop.f32.mrb[77].mxu1 }
 0x279   :  { %10806 = vst [vmem:[#allocation25_spill] sm:$0xff] %v9935_v29 }
 0x27b   :  { %v9937_v1 = vpop.f32.mrb[78].mxu1  ;;  %v1213_v15 = vpop.permute.xlu0 %1212 }
 0x27c   :  { %10807 = vst [vmem:[#allocation26_spill] sm:$0xff] %v9937_v1  ;;  %v1215_v47 = vmul.f32 %v8067_v16, %v1213_v15  ;;  %v9939_v42 = vpop.f32.mrb[79].mxu1 }
 0x27d   :  { %10808 = vst [vmem:[#allocation27_spill] sm:$0xff] %v9939_v42 }
 0x27e   :  { %1217 = vrot.lane.b32.xlu0 %v1215_v47, %s8692_s8 }
 0x27f   :  { %v9942_v31 = vpop.f32.mrb[80].mxu1 }
 0x280   :  { %10809 = vst [vmem:[#allocation28_spill] sm:$0xff] %v9942_v31  ;;  %v9944_v38 = vpop.f32.mrb[81].mxu1 }
 0x281   :  { %10810 = vst [vmem:[#allocation29_spill] sm:$0xff] %v9944_v38 }
 0x283   :  { %v9946_v60 = vpop.f32.mrb[82].mxu1 }
 0x284   :  { %10811 = vst [vmem:[#allocation30_spill] sm:$0xff] %v9946_v60  ;;  %v9948_v62 = vpop.f32.mrb[83].mxu1 }
 0x285   :  { %10812 = vst [vmem:[#allocation31_spill] sm:$0xff] %v9948_v62 }
 0x287   :  { %v9950_v63 = vpop.f32.mrb[84].mxu1 }
 0x288   :  { %10813 = vst [vmem:[#allocation32_spill] sm:$0xff] %v9950_v63  ;;  %v9952_v29 = vpop.f32.mrb[85].mxu1 }
 0x289   :  { %10814 = vst [vmem:[#allocation33_spill] sm:$0xff] %v9952_v29 }
 0x28b   :  { %v9954_v46 = vpop.f32.mrb[86].mxu1 }
 0x28c   :  { %10815 = vst [vmem:[#allocation34_spill] sm:$0xff] %v9954_v46  ;;  %v9956_v1 = vpop.f32.mrb[87].mxu1 }
 0x28d   :  { %10816 = vst [vmem:[#allocation35_spill] sm:$0xff] %v9956_v1 }
 0x28f   :  { %v9958_v15 = vpop.f32.mrb[88].mxu1 }
 0x290   :  { %10817 = vst [vmem:[#allocation36_spill] sm:$0xff] %v9958_v15  ;;  %v9960_v16 = vpop.f32.mrb[89].mxu1 }
 0x291   :  { %10818 = vst [vmem:[#allocation37_spill] sm:$0xff] %v9960_v16 }
 0x293   :  { %v9962_v47 = vpop.f32.mrb[90].mxu1 }
 0x294   :  { %10819 = vst [vmem:[#allocation38_spill] sm:$0xff] %v9962_v47  ;;  %v9964_v31 = vpop.f32.mrb[91].mxu1 }
 0x295   :  { %10820 = vst [vmem:[#allocation39_spill] sm:$0xff] %v9964_v31 }
 0x297   :  { %v9966_v38 = vpop.f32.mrb[92].mxu1 }
 0x298   :  { %10821 = vst [vmem:[#allocation40_spill] sm:$0xff] %v9966_v38  ;;  %v9968_v60 = vpop.f32.mrb[93].mxu1 }
 0x299   :  { %10822 = vst [vmem:[#allocation41_spill] sm:$0xff] %v9968_v60  ;;  %v10829_v60 = vmov 0.0  }
 0x29b   :  { %v9970_v62 = vpop.f32.mrb[94].mxu1 }
 0x29c   :  { %10823 = vst [vmem:[#allocation42_spill] sm:$0xff] %v9970_v62  ;;  %v9972_v63 = vpop.f32.mrb[95].mxu1 }
 0x29d   :  { %10824 = vst [vmem:[#allocation43_spill] sm:$0xff] %v9972_v63 }
 0x29f   :  { %v9974_v29 = vpop.f32.mrb[96].mxu1 }
 0x2a0   :  { %10825 = vst [vmem:[#allocation44_spill] sm:$0xff] %v9974_v29  ;;  %v9976_v46 = vpop.f32.mrb[97].mxu1 }
 0x2a1   :  { %10826 = vst [vmem:[#allocation45_spill] sm:$0xff] %v9976_v46 }
 0x2a3   :  { %v9978_v1 = vpop.f32.mrb[98].mxu1 }
 0x2a4   :  { %10827 = vst [vmem:[#allocation46_spill] sm:$0xff] %v9978_v1  ;;  %v9980_v15 = vpop.f32.mrb[99].mxu1 }
 0x2a5   :  { %10828 = vst [vmem:[#allocation47_spill] sm:$0xff] %v9980_v15 }
 0x2f0   :  { %v1218_v47 = vpop.permute.xlu0 %1217 }
 0x2f1   :  { %v1221_v31 = vsel %vm1220_vm0, %v1218_v47, 0.0 }
 0x2f2   :  { %6650 = vmatmul.mubr.msk.f32.vlgmr.msra.gmra.mrb[2].mxu1 %vm1244_vm1, %v1221_v31 }
 0x2f3   :  { %6965 = vmatpush1.bf16.msra.mxu1 %v9684_v61  ;;  %1421 = vmatprep.mubr.f32.mxu1 %v10829_v60 }
 0x2f4   :  { %6967 = vmatprep.subr.bf16.mxu1 %v9756_v22 }
 0x2f7   :  { %6969 = vmatpush1.bf16.msra.mxu1 %v9761_v25 }
 0x2f8   :  { %6971 = vmatprep.subr.bf16.mxu1 %v9790_v43 }
 0x2fb   :  { %6973 = vmatpush1.bf16.msra.mxu1 %v9804_v48 }
 0x2fc   :  { %6975 = vmatprep.subr.bf16.mxu1 %v9837_v0 }
 0x2ff   :  { %6977 = vmatpush1.bf16.msra.mxu1 %v9844_v3 }
 0x300   :  { %6979 = vmatprep.subr.bf16.mxu1 %v9672_v57 }
 0x3c5   :  { %v1314_v47 = vpop.f32.mrb[2].mxu1 }
 0x3c6   :  { %v7754_v31 = vadd.f32 %v1314_v47, %v9745_v18  ;;  %v1316_v15 = vpop.f32.mrb[3].mxu1 }
 0x3c7   :  { %v7755_v46 = vadd.f32 %v1316_v15, %v9771_v30 }
 0x3c8   :  { %v6651_v1 = vmul.f32 -1.442695, %v7754_v31 }
 0x3c9   :  { %v6652_v42 = vmul.f32 -1.442695, %v7755_v46 }
 0x3ca   :  { %8068 = vpow2.f32 %v6651_v1 }
 0x3cb   :  { %8070 = vtanh.f32 %v7755_v46 }
 0x3d4   :  { %v8069_v29 = vpop.eup %8068 }
 0x3d5   :  { %v1327_v63 = vadd.f32 1.0, %v8069_v29  ;;  %v8071_v62 = vpop.eup %8070 }
 0x3d7   :  { %8072 = vrcp.f32 %v1327_v63 }
 0x3d8   :  { %8074 = vpow2.f32 %v6652_v42 }
 0x3e1   :  { %v8073_v38 = vpop.eup %8072 }
 0x3e2   :  { %v1339_v16 = vmul.f32 %v8073_v38, %v8071_v62  ;;  %v8075_v41 = vpop.eup %8074  ;;  %v1338_v47 = vmul.f32 %v8073_v38, %v1336_v37 }
 0x3e3   :  { %v1328_v36 = vadd.f32 1.0, %v8075_v41 }
 0x3e4   :  { %1341 = vrot.lane.b32.xlu1 %v1339_v16, %s8692_s8 }
 0x3e5   :  { %8076 = vrcp.f32 %v1328_v36 }
 0x3ef   :  { %v8077_v1 = vpop.eup %8076 }
 0x456   :  { %v1342_v35 = vpop.permute.xlu1 %1341 }
 0x457   :  { %v1344_v31 = vadd.f32 %v1342_v35, %v1338_v47 }
 0x459   :  { %8078 = vtanh.f32 %v1344_v31 }
 0x463   :  { %v8079_v15 = vpop.eup %8078 }
 0x464   :  { %v1346_v29 = vmul.f32 %v8079_v15, %v8077_v1 }
 0x466   :  { %1353 = vrot.lane.b32.xlu0 %v1346_v29, %s8692_s8 }
 0x4d8   :  { %v1354_v63 = vpop.permute.xlu0 %1353 }
 0x4d9   :  { %6653 = vmatmul.mubr.msk.f32.vlgmr.msra.gmra.mrb[4].mxu1 %vm1244_vm1, %v1354_v63 }
 0x4da   :  { %6981 = vmatpush1.bf16.msra.mxu1 %v9684_v61  ;;  %1526 = vmatprep.mubr.f32.mxu1 %v10829_v60 }
 0x4db   :  { %6983 = vmatprep.subr.bf16.mxu1 %v9756_v22 }
 0x4de   :  { %6985 = vmatpush1.bf16.msra.mxu1 %v9761_v25 }
 0x4df   :  { %6987 = vmatprep.subr.bf16.mxu1 %v9790_v43 }
 0x4e2   :  { %6989 = vmatpush1.bf16.msra.mxu1 %v9804_v48 }
 0x4e3   :  { %6991 = vmatprep.subr.bf16.mxu1 %v9837_v0 }
 0x4e6   :  { %6993 = vmatpush1.bf16.msra.mxu1 %v9844_v3 }
 0x4e7   :  { %6995 = vmatprep.subr.bf16.mxu1 %v9672_v57 }
 0x5ac   :  { %v1423_v35 = vpop.f32.mrb[4].mxu1 }
 0x5ad   :  { %v7756_v36 = vadd.f32 %v1423_v35, %v9745_v18  ;;  %v1425_v37 = vpop.f32.mrb[5].mxu1 }
 0x5ae   :  { %v7757_v42 = vadd.f32 %v1425_v37, %v9771_v30 }
 0x5af   :  { %v6654_v41 = vmul.f32 -1.442695, %v7756_v36 }
 0x5b0   :  { %v6655_v1 = vmul.f32 -1.442695, %v7757_v42 }
 0x5b1   :  { %8080 = vpow2.f32 %v6654_v41 }
 0x5b2   :  { %8082 = vtanh.f32 %v7757_v42 }
 0x5bb   :  { %v8081_v46 = vpop.eup %8080 }
 0x5bc   :  { %v1436_v62 = vadd.f32 1.0, %v8081_v46  ;;  %v8083_v38 = vpop.eup %8082 }
 0x5be   :  { %8084 = vrcp.f32 %v1436_v62 }
 0x5bf   :  { %8086 = vpow2.f32 %v6655_v1 }
 0x5c8   :  { %v8085_v16 = vpop.eup %8084 }
 0x5c9   :  { %v1444_v47 = vmul.f32 %v8085_v16, %v8083_v38  ;;  %v8087_v15 = vpop.eup %8086  ;;  %v1443_v63 = vmul.f32 %v8085_v16, %v1344_v31 }
 0x5ca   :  { %v1437_v29 = vadd.f32 1.0, %v8087_v15 }
 0x5cb   :  { %1446 = vrot.lane.b32.xlu1 %v1444_v47, %s8692_s8 }
 0x5cc   :  { %8088 = vrcp.f32 %v1437_v29 }
 0x5d6   :  { %v8089_v36 = vpop.eup %8088 }
 0x63d   :  { %v1447_v35 = vpop.permute.xlu1 %1446 }
 0x63e   :  { %v1449_v34 = vadd.f32 %v1447_v35, %v1443_v63 }
 0x640   :  { %8090 = vtanh.f32 %v1449_v34 }
 0x64a   :  { %v8091_v37 = vpop.eup %8090 }
 0x64b   :  { %v1451_v41 = vmul.f32 %v8091_v37, %v8089_v36 }
 0x64d   :  { %1458 = vrot.lane.b32.xlu0 %v1451_v41, %s8692_s8 }
 0x6bf   :  { %v1459_v46 = vpop.permute.xlu0 %1458 }
 0x6c0   :  { %6656 = vmatmul.mubr.msk.f32.vlgmr.msra.gmra.mrb[6].mxu1 %vm1244_vm1, %v1459_v46 }
 0x6c1   :  { %6997 = vmatpush1.bf16.msra.mxu1 %v9684_v61  ;;  %1631 = vmatprep.mubr.f32.mxu1 %v10829_v60 }
 0x6c2   :  { %6999 = vmatprep.subr.bf16.mxu1 %v9756_v22 }
 0x6c5   :  { %7001 = vmatpush1.bf16.msra.mxu1 %v9761_v25 }
 0x6c6   :  { %7003 = vmatprep.subr.bf16.mxu1 %v9790_v43 }
 0x6c9   :  { %7005 = vmatpush1.bf16.msra.mxu1 %v9804_v48 }
 0x6ca   :  { %7007 = vmatprep.subr.bf16.mxu1 %v9837_v0 }
 0x6cd   :  { %7009 = vmatpush1.bf16.msra.mxu1 %v9844_v3 }
 0x6ce   :  { %7011 = vmatprep.subr.bf16.mxu1 %v9672_v57 }
 0x793   :  { %v1528_v31 = vpop.f32.mrb[6].mxu1 }
 0x794   :  { %v7758_v42 = vadd.f32 %v1528_v31, %v9745_v18  ;;  %v1530_v62 = vpop.f32.mrb[7].mxu1 }
 0x795   :  { %v7759_v16 = vadd.f32 %v1530_v62, %v9771_v30 }
 0x796   :  { %v6657_v38 = vmul.f32 -1.442695, %v7758_v42 }
 0x797   :  { %v6658_v35 = vmul.f32 -1.442695, %v7759_v16 }
 0x798   :  { %8092 = vpow2.f32 %v6657_v38 }
 0x799   :  { %8094 = vtanh.f32 %v7759_v16 }
 0x7a2   :  { %v8093_v47 = vpop.eup %8092 }
 0x7a3   :  { %v1541_v1 = vadd.f32 1.0, %v8093_v47  ;;  %v8095_v15 = vpop.eup %8094 }
 0x7a5   :  { %8096 = vrcp.f32 %v1541_v1 }
 0x7a6   :  { %8098 = vpow2.f32 %v6658_v35 }
 0x7af   :  { %v8097_v29 = vpop.eup %8096 }
 0x7b0   :  { %v1549_v63 = vmul.f32 %v8097_v29, %v8095_v15  ;;  %v8099_v36 = vpop.eup %8098  ;;  %v1548_v41 = vmul.f32 %v8097_v29, %v1449_v34 }
 0x7b1   :  { %v1542_v37 = vadd.f32 1.0, %v8099_v36 }
 0x7b2   :  { %1551 = vrot.lane.b32.xlu1 %v1549_v63, %s8692_s8 }
 0x7b3   :  { %8100 = vrcp.f32 %v1542_v37 }
 0x7bd   :  { %v8101_v42 = vpop.eup %8100 }
 0x824   :  { %v1552_v46 = vpop.permute.xlu1 %1551 }
 0x825   :  { %v1554_v31 = vadd.f32 %v1552_v46, %v1548_v41 }
 0x827   :  { %8102 = vtanh.f32 %v1554_v31 }
 0x831   :  { %v8103_v62 = vpop.eup %8102 }
 0x832   :  { %v1556_v38 = vmul.f32 %v8103_v62, %v8101_v42 }
 0x834   :  { %1563 = vrot.lane.b32.xlu0 %v1556_v38, %s8692_s8 }
 0x8a6   :  { %v1564_v47 = vpop.permute.xlu0 %1563 }
 0x8a7   :  { %6659 = vmatmul.mubr.msk.f32.vlgmr.msra.gmra.mrb[8].mxu1 %vm1244_vm1, %v1564_v47 }
 0x8a8   :  { %7013 = vmatpush1.bf16.msra.mxu1 %v9684_v61  ;;  %1736 = vmatprep.mubr.f32.mxu1 %v10829_v60 }
 0x8a9   :  { %7015 = vmatprep.subr.bf16.mxu1 %v9756_v22 }
 0x8ac   :  { %7017 = vmatpush1.bf16.msra.mxu1 %v9761_v25 }
 0x8ad   :  { %7019 = vmatprep.subr.bf16.mxu1 %v9790_v43 }
 0x8b0   :  { %7021 = vmatpush1.bf16.msra.mxu1 %v9804_v48 }
 0x8b1   :  { %7023 = vmatprep.subr.bf16.mxu1 %v9837_v0 }
 0x8b4   :  { %7025 = vmatpush1.bf16.msra.mxu1 %v9844_v3 }
 0x8b5   :  { %7027 = vmatprep.subr.bf16.mxu1 %v9672_v57 }
 0x97a   :  { %v1633_v34 = vpop.f32.mrb[8].mxu1 }
 0x97b   :  { %v7760_v16 = vadd.f32 %v1633_v34, %v9745_v18  ;;  %v1635_v1 = vpop.f32.mrb[9].mxu1 }
 0x97c   :  { %v7761_v29 = vadd.f32 %v1635_v1, %v9771_v30 }
 0x97d   :  { %v6660_v15 = vmul.f32 -1.442695, %v7760_v16 }
 0x97e   :  { %v6661_v46 = vmul.f32 -1.442695, %v7761_v29 }
 0x97f   :  { %8104 = vpow2.f32 %v6660_v15 }
 0x980   :  { %8106 = vtanh.f32 %v7761_v29 }
 0x989   :  { %v8105_v63 = vpop.eup %8104 }
 0x98a   :  { %v1646_v35 = vadd.f32 1.0, %v8105_v63  ;;  %v8107_v36 = vpop.eup %8106 }
 0x98c   :  { %8108 = vrcp.f32 %v1646_v35 }
 0x98d   :  { %8110 = vpow2.f32 %v6661_v46 }
 0x996   :  { %v8109_v37 = vpop.eup %8108 }
 0x997   :  { %v1654_v41 = vmul.f32 %v8109_v37, %v8107_v36  ;;  %v8111_v42 = vpop.eup %8110  ;;  %v1653_v38 = vmul.f32 %v8109_v37, %v1554_v31 }
 0x998   :  { %v1647_v62 = vadd.f32 1.0, %v8111_v42 }
 0x999   :  { %1656 = vrot.lane.b32.xlu1 %v1654_v41, %s8692_s8 }
 0x99a   :  { %8112 = vrcp.f32 %v1647_v62 }
 0x9a4   :  { %v8113_v16 = vpop.eup %8112 }
 0xa0b   :  { %v1657_v47 = vpop.permute.xlu1 %1656 }
 0xa0c   :  { %v1659_v34 = vadd.f32 %v1657_v47, %v1653_v38 }
 0xa0e   :  { %8114 = vtanh.f32 %v1659_v34 }
 0xa18   :  { %v8115_v1 = vpop.eup %8114 }
 0xa19   :  { %v1661_v15 = vmul.f32 %v8115_v1, %v8113_v16 }
 0xa1b   :  { %1668 = vrot.lane.b32.xlu0 %v1661_v15, %s8692_s8 }
 0xa8d   :  { %v1669_v63 = vpop.permute.xlu0 %1668 }
 0xa8e   :  { %6662 = vmatmul.mubr.msk.f32.vlgmr.msra.gmra.mrb[10].mxu1 %vm1244_vm1, %v1669_v63 }
 0xa8f   :  { %7029 = vmatpush1.bf16.msra.mxu1 %v9684_v61  ;;  %1841 = vmatprep.mubr.f32.mxu1 %v10829_v60 }
 0xa90   :  { %7031 = vmatprep.subr.bf16.mxu1 %v9756_v22 }
 0xa93   :  { %7033 = vmatpush1.bf16.msra.mxu1 %v9761_v25 }
 0xa94   :  { %7035 = vmatprep.subr.bf16.mxu1 %v9790_v43 }
 0xa97   :  { %7037 = vmatpush1.bf16.msra.mxu1 %v9804_v48 }
 0xa98   :  { %7039 = vmatprep.subr.bf16.mxu1 %v9837_v0 }
 0xa9b   :  { %7041 = vmatpush1.bf16.msra.mxu1 %v9844_v3 }
 0xa9c   :  { %7043 = vmatprep.subr.bf16.mxu1 %v9672_v57 }
 0xb61   :  { %v1738_v31 = vpop.f32.mrb[10].mxu1 }
 0xb62   :  { %v7762_v29 = vadd.f32 %v1738_v31, %v9745_v18  ;;  %v1740_v35 = vpop.f32.mrb[11].mxu1 }
 0xb63   :  { %v7763_v37 = vadd.f32 %v1740_v35, %v9771_v30 }
 0xb64   :  { %v6663_v36 = vmul.f32 -1.442695, %v7762_v29 }
 0xb65   :  { %v6664_v47 = vmul.f32 -1.442695, %v7763_v37 }
 0xb66   :  { %8116 = vpow2.f32 %v6663_v36 }
 0xb67   :  { %8118 = vtanh.f32 %v7763_v37 }
 0xb70   :  { %v8117_v41 = vpop.eup %8116 }
 0xb71   :  { %v1751_v46 = vadd.f32 1.0, %v8117_v41  ;;  %v8119_v42 = vpop.eup %8118 }
 0xb73   :  { %8120 = vrcp.f32 %v1751_v46 }
 0xb74   :  { %8122 = vpow2.f32 %v6664_v47 }
 0xb7d   :  { %v8121_v62 = vpop.eup %8120 }
 0xb7e   :  { %v1759_v38 = vmul.f32 %v8121_v62, %v8119_v42  ;;  %v8123_v16 = vpop.eup %8122  ;;  %v1758_v15 = vmul.f32 %v8121_v62, %v1659_v34 }
 0xb7f   :  { %v1752_v1 = vadd.f32 1.0, %v8123_v16 }
 0xb80   :  { %1761 = vrot.lane.b32.xlu1 %v1759_v38, %s8692_s8 }
 0xb81   :  { %8124 = vrcp.f32 %v1752_v1 }
 0xb8b   :  { %v8125_v29 = vpop.eup %8124 }
 0xbf2   :  { %v1762_v63 = vpop.permute.xlu1 %1761 }
 0xbf3   :  { %v1764_v31 = vadd.f32 %v1762_v63, %v1758_v15 }
 0xbf5   :  { %8126 = vtanh.f32 %v1764_v31 }
 0xbff   :  { %v8127_v35 = vpop.eup %8126 }
 0xc00   :  { %v1766_v36 = vmul.f32 %v8127_v35, %v8125_v29 }
 0xc02   :  { %1773 = vrot.lane.b32.xlu0 %v1766_v36, %s8692_s8 }
 0xc74   :  { %v1774_v41 = vpop.permute.xlu0 %1773 }
 0xc75   :  { %6665 = vmatmul.mubr.msk.f32.vlgmr.msra.gmra.mrb[12].mxu1 %vm1244_vm1, %v1774_v41 }
 0xc76   :  { %7045 = vmatpush1.bf16.msra.mxu1 %v9684_v61  ;;  %1946 = vmatprep.mubr.f32.mxu1 %v10829_v60 }
 0xc77   :  { %7047 = vmatprep.subr.bf16.mxu1 %v9756_v22 }
 0xc7a   :  { %7049 = vmatpush1.bf16.msra.mxu1 %v9761_v25 }
 0xc7b   :  { %7051 = vmatprep.subr.bf16.mxu1 %v9790_v43 }
 0xc7e   :  { %7053 = vmatpush1.bf16.msra.mxu1 %v9804_v48 }
 0xc7f   :  { %7055 = vmatprep.subr.bf16.mxu1 %v9837_v0 }
 0xc82   :  { %7057 = vmatpush1.bf16.msra.mxu1 %v9844_v3 }
 0xc83   :  { %7059 = vmatprep.subr.bf16.mxu1 %v9672_v57 }
 0xd48   :  { %v1843_v34 = vpop.f32.mrb[12].mxu1 }
 0xd49   :  { %v7764_v37 = vadd.f32 %v1843_v34, %v9745_v18  ;;  %v1845_v46 = vpop.f32.mrb[13].mxu1 }
 0xd4a   :  { %v7765_v62 = vadd.f32 %v1845_v46, %v9771_v30 }
 0xd4b   :  { %v6666_v42 = vmul.f32 -1.442695, %v7764_v37 }
 0xd4c   :  { %v6667_v63 = vmul.f32 -1.442695, %v7765_v62 }
 0xd4d   :  { %8128 = vpow2.f32 %v6666_v42 }
 0xd4e   :  { %8130 = vtanh.f32 %v7765_v62 }
 0xd57   :  { %v8129_v38 = vpop.eup %8128 }
 0xd58   :  { %v1856_v47 = vadd.f32 1.0, %v8129_v38  ;;  %v8131_v16 = vpop.eup %8130 }
 0xd5a   :  { %8132 = vrcp.f32 %v1856_v47 }
 0xd5b   :  { %8134 = vpow2.f32 %v6667_v63 }
 0xd64   :  { %v8133_v1 = vpop.eup %8132 }
 0xd65   :  { %v1864_v15 = vmul.f32 %v8133_v1, %v8131_v16  ;;  %v8135_v29 = vpop.eup %8134  ;;  %v1863_v36 = vmul.f32 %v8133_v1, %v1764_v31 }
 0xd66   :  { %v1857_v35 = vadd.f32 1.0, %v8135_v29 }
 0xd67   :  { %1866 = vrot.lane.b32.xlu1 %v1864_v15, %s8692_s8 }
 0xd68   :  { %8136 = vrcp.f32 %v1857_v35 }
 0xd72   :  { %v8137_v37 = vpop.eup %8136 }
 0xdd9   :  { %v1867_v41 = vpop.permute.xlu1 %1866 }
 0xdda   :  { %v1869_v34 = vadd.f32 %v1867_v41, %v1863_v36 }
 0xddc   :  { %8138 = vtanh.f32 %v1869_v34 }
 0xde6   :  { %v8139_v46 = vpop.eup %8138 }
 0xde7   :  { %v1871_v42 = vmul.f32 %v8139_v46, %v8137_v37 }
 0xde9   :  { %1878 = vrot.lane.b32.xlu0 %v1871_v42, %s8692_s8 }
 0xe5b   :  { %v1879_v38 = vpop.permute.xlu0 %1878 }
 0xe5c   :  { %6668 = vmatmul.mubr.msk.f32.vlgmr.msra.gmra.mrb[14].mxu1 %vm1244_vm1, %v1879_v38 }
 0xe5d   :  { %7061 = vmatpush1.bf16.msra.mxu1 %v9684_v61  ;;  %2051 = vmatprep.mubr.f32.mxu1 %v10829_v60 }
 0xe5e   :  { %7063 = vmatprep.subr.bf16.mxu1 %v9756_v22 }
 0xe61   :  { %7065 = vmatpush1.bf16.msra.mxu1 %v9761_v25 }
 0xe62   :  { %7067 = vmatprep.subr.bf16.mxu1 %v9790_v43 }
 0xe65   :  { %7069 = vmatpush1.bf16.msra.mxu1 %v9804_v48 }
 0xe66   :  { %7071 = vmatprep.subr.bf16.mxu1 %v9837_v0 }
 0xe69   :  { %7073 = vmatpush1.bf16.msra.mxu1 %v9844_v3 }
 0xe6a   :  { %7075 = vmatprep.subr.bf16.mxu1 %v9672_v57 }
 0xf2f   :  { %v1948_v31 = vpop.f32.mrb[14].mxu1 }
 0xf30   :  { %v7766_v62 = vadd.f32 %v1948_v31, %v9745_v18  ;;  %v1950_v47 = vpop.f32.mrb[15].mxu1 }
 0xf31   :  { %v7767_v1 = vadd.f32 %v1950_v47, %v9771_v30 }
 0xf32   :  { %v6669_v16 = vmul.f32 -1.442695, %v7766_v62 }
 0xf33   :  { %v6670_v41 = vmul.f32 -1.442695, %v7767_v1 }
 0xf34   :  { %8140 = vpow2.f32 %v6669_v16 }
 0xf35   :  { %8142 = vtanh.f32 %v7767_v1 }
 0xf3e   :  { %v8141_v15 = vpop.eup %8140 }
 0xf3f   :  { %v1961_v63 = vadd.f32 1.0, %v8141_v15  ;;  %v8143_v29 = vpop.eup %8142 }
 0xf41   :  { %8144 = vrcp.f32 %v1961_v63 }
 0xf42   :  { %8146 = vpow2.f32 %v6670_v41 }
 0xf4b   :  { %v8145_v35 = vpop.eup %8144 }
 0xf4c   :  { %v1969_v36 = vmul.f32 %v8145_v35, %v8143_v29  ;;  %v8147_v37 = vpop.eup %8146  ;;  %v1968_v42 = vmul.f32 %v8145_v35, %v1869_v34 }
 0xf4d   :  { %v1962_v46 = vadd.f32 1.0, %v8147_v37 }
 0xf4e   :  { %1971 = vrot.lane.b32.xlu1 %v1969_v36, %s8692_s8 }
 0xf4f   :  { %8148 = vrcp.f32 %v1962_v46 }
 0xf59   :  { %v8149_v62 = vpop.eup %8148 }
 0xfc0   :  { %v1972_v38 = vpop.permute.xlu1 %1971 }
 0xfc1   :  { %v1974_v31 = vadd.f32 %v1972_v38, %v1968_v42 }
 0xfc3   :  { %8150 = vtanh.f32 %v1974_v31 }
 0xfcd   :  { %v8151_v47 = vpop.eup %8150 }
 0xfce   :  { %v1976_v16 = vmul.f32 %v8151_v47, %v8149_v62 }
 0xfd0   :  { %1983 = vrot.lane.b32.xlu0 %v1976_v16, %s8692_s8 }
0x1042   :  { %v1984_v15 = vpop.permute.xlu0 %1983 }
0x1043   :  { %6671 = vmatmul.mubr.msk.f32.vlgmr.msra.gmra.mrb[16].mxu1 %vm1244_vm1, %v1984_v15 }
0x1044   :  { %7077 = vmatpush1.bf16.msra.mxu1 %v9684_v61  ;;  %2156 = vmatprep.mubr.f32.mxu1 %v10829_v60 }
0x1045   :  { %7079 = vmatprep.subr.bf16.mxu1 %v9756_v22 }
0x1048   :  { %7081 = vmatpush1.bf16.msra.mxu1 %v9761_v25 }
0x1049   :  { %7083 = vmatprep.subr.bf16.mxu1 %v9790_v43 }
0x104c   :  { %7085 = vmatpush1.bf16.msra.mxu1 %v9804_v48 }
0x104d   :  { %7087 = vmatprep.subr.bf16.mxu1 %v9837_v0 }
0x1050   :  { %7089 = vmatpush1.bf16.msra.mxu1 %v9844_v3 }
0x1051   :  { %7091 = vmatprep.subr.bf16.mxu1 %v9672_v57 }
0x1116   :  { %v2053_v34 = vpop.f32.mrb[16].mxu1 }
0x1117   :  { %v7768_v1 = vadd.f32 %v2053_v34, %v9745_v18  ;;  %v2055_v63 = vpop.f32.mrb[17].mxu1 }
0x1118   :  { %v7769_v35 = vadd.f32 %v2055_v63, %v9771_v30 }
0x1119   :  { %v6672_v29 = vmul.f32 -1.442695, %v7768_v1 }
0x111a   :  { %v6673_v38 = vmul.f32 -1.442695, %v7769_v35 }
0x111b   :  { %8152 = vpow2.f32 %v6672_v29 }
0x111c   :  { %8154 = vtanh.f32 %v7769_v35 }
0x1125   :  { %v8153_v36 = vpop.eup %8152 }
0x1126   :  { %v2066_v41 = vadd.f32 1.0, %v8153_v36  ;;  %v8155_v37 = vpop.eup %8154 }
0x1128   :  { %8156 = vrcp.f32 %v2066_v41 }
0x1129   :  { %8158 = vpow2.f32 %v6673_v38 }
0x1132   :  { %v8157_v46 = vpop.eup %8156 }
0x1133   :  { %v2074_v42 = vmul.f32 %v8157_v46, %v8155_v37  ;;  %v8159_v62 = vpop.eup %8158  ;;  %v2073_v16 = vmul.f32 %v8157_v46, %v1974_v31 }
0x1134   :  { %v2067_v47 = vadd.f32 1.0, %v8159_v62 }
0x1135   :  { %2076 = vrot.lane.b32.xlu1 %v2074_v42, %s8692_s8 }
0x1136   :  { %8160 = vrcp.f32 %v2067_v47 }
0x1140   :  { %v8161_v1 = vpop.eup %8160 }
0x11a7   :  { %v2077_v15 = vpop.permute.xlu1 %2076 }
0x11a8   :  { %v2079_v34 = vadd.f32 %v2077_v15, %v2073_v16 }
0x11aa   :  { %8162 = vtanh.f32 %v2079_v34 }
0x11b4   :  { %v8163_v63 = vpop.eup %8162 }
0x11b5   :  { %v2081_v29 = vmul.f32 %v8163_v63, %v8161_v1 }
0x11b7   :  { %2088 = vrot.lane.b32.xlu0 %v2081_v29, %s8692_s8 }
0x1229   :  { %v2089_v36 = vpop.permute.xlu0 %2088 }
0x122a   :  { %6674 = vmatmul.mubr.msk.f32.vlgmr.msra.gmra.mrb[18].mxu1 %vm1244_vm1, %v2089_v36 }
0x122b   :  { %7093 = vmatpush1.bf16.msra.mxu1 %v9684_v61  ;;  %2261 = vmatprep.mubr.f32.mxu1 %v10829_v60 }
0x122c   :  { %7095 = vmatprep.subr.bf16.mxu1 %v9756_v22 }
0x122f   :  { %7097 = vmatpush1.bf16.msra.mxu1 %v9761_v25 }
0x1230   :  { %7099 = vmatprep.subr.bf16.mxu1 %v9790_v43 }
0x1233   :  { %7101 = vmatpush1.bf16.msra.mxu1 %v9804_v48 }
0x1234   :  { %7103 = vmatprep.subr.bf16.mxu1 %v9837_v0 }
0x1237   :  { %7105 = vmatpush1.bf16.msra.mxu1 %v9844_v3 }
0x1238   :  { %7731 = vmatprep.subr.bf16.mxu1 %v9672_v57 }
0x12fd   :  { %v2158_v31 = vpop.f32.mrb[18].mxu1 }
0x12fe   :  { %v7770_v35 = vadd.f32 %v2158_v31, %v9745_v18  ;;  %v2160_v41 = vpop.f32.mrb[19].mxu1 }
0x12ff   :  { %v7771_v46 = vadd.f32 %v2160_v41, %v9771_v30 }
0x1300   :  { %v6675_v37 = vmul.f32 -1.442695, %v7770_v35 }
0x1301   :  { %v6676_v15 = vmul.f32 -1.442695, %v7771_v46 }
0x1302   :  { %8164 = vpow2.f32 %v6675_v37 }
0x1303   :  { %8166 = vtanh.f32 %v7771_v46 }
0x130c   :  { %v8165_v42 = vpop.eup %8164 }
0x130d   :  { %v2171_v38 = vadd.f32 1.0, %v8165_v42  ;;  %v8167_v62 = vpop.eup %8166 }
0x130f   :  { %8168 = vrcp.f32 %v2171_v38 }
0x1310   :  { %8170 = vpow2.f32 %v6676_v15 }
0x1319   :  { %v8169_v47 = vpop.eup %8168 }
0x131a   :  { %v2179_v16 = vmul.f32 %v8169_v47, %v8167_v62  ;;  %v8171_v1 = vpop.eup %8170  ;;  %v2178_v29 = vmul.f32 %v8169_v47, %v2079_v34 }
0x131b   :  { %v2172_v63 = vadd.f32 1.0, %v8171_v1 }
0x131c   :  { %2181 = vrot.lane.b32.xlu1 %v2179_v16, %s8692_s8 }
0x131d   :  { %8172 = vrcp.f32 %v2172_v63 }
0x1327   :  { %v8173_v35 = vpop.eup %8172 }
0x138e   :  { %v2182_v36 = vpop.permute.xlu1 %2181 }
0x138f   :  { %v2184_v31 = vadd.f32 %v2182_v36, %v2178_v29 }
0x1391   :  { %8174 = vtanh.f32 %v2184_v31 }
0x139b   :  { %v8175_v41 = vpop.eup %8174 }
0x139c   :  { %v2186_v37 = vmul.f32 %v8175_v41, %v8173_v35 }
0x139e   :  { %2193 = vrot.lane.b32.xlu0 %v2186_v37, %s8692_s8 }
0x1410   :  { %v2194_v42 = vpop.permute.xlu0 %2193 }
0x1411   :  { %6677 = vmatmul.mubr.msk.f32.vlgmr.msra.gmra.mrb[20].mxu1 %vm1244_vm1, %v2194_v42 }
0x1412   :  { %7733 = vmatpush1.bf16.msra.mxu1 %v9684_v61  ;;  %6468 = vmatprep.mubr.f32.mxu1 %v10829_v60 }
0x1413   :  { %7735 = vmatprep.subr.bf16.mxu1 %v9756_v22 }
0x1416   :  { %7737 = vmatpush1.bf16.msra.mxu1 %v9761_v25 }
0x1417   :  { %7739 = vmatprep.subr.bf16.mxu1 %v9790_v43 }
0x141a   :  { %7741 = vmatpush1.bf16.msra.mxu1 %v9804_v48 }
0x141b   :  { %7743 = vmatprep.subr.bf16.mxu1 %v9837_v0 }
0x141e   :  { %7745 = vmatpush1.bf16.msra.mxu1 %v9844_v3 }
0x14e4   :  { %v2263_v34 = vpop.f32.mrb[20].mxu1 }
0x14e5   :  { %v7772_v46 = vadd.f32 %v2263_v34, %v9745_v18  ;;  %v2265_v38 = vpop.f32.mrb[21].mxu1 }
0x14e6   :  { %v7773_v47 = vadd.f32 %v2265_v38, %v9771_v30 }
0x14e7   :  { %v6678_v62 = vmul.f32 -1.442695, %v7772_v46 }
0x14e8   :  { %v6679_v36 = vmul.f32 -1.442695, %v7773_v47 }
0x14e9   :  { %8176 = vpow2.f32 %v6678_v62 }
0x14ea   :  { %8178 = vtanh.f32 %v7773_v47  ;;  %v7776_v47 = vadd.f32 %v9782_v40, %v9771_v30 }
0x14f3   :  { %v8177_v16 = vpop.eup %8176 }
0x14f4   :  { %v2276_v15 = vadd.f32 1.0, %v8177_v16  ;;  %v8179_v1 = vpop.eup %8178 }
0x14f6   :  { %8180 = vrcp.f32 %v2276_v15 }
0x14f7   :  { %8182 = vpow2.f32 %v6679_v36 }
0x1500   :  { %v8181_v63 = vpop.eup %8180 }
0x1501   :  { %v2284_v29 = vmul.f32 %v8181_v63, %v8179_v1  ;;  %v8183_v35 = vpop.eup %8182  ;;  %v2283_v37 = vmul.f32 %v8181_v63, %v2184_v31  ;;  %v7774_v31 = vadd.f32 %v9780_v39, %v9745_v18 }
0x1502   :  { %v2277_v41 = vadd.f32 1.0, %v8183_v35 }
0x1503   :  { %2286 = vrot.lane.b32.xlu1 %v2284_v29, %s8692_s8 }
0x1504   :  { %8184 = vrcp.f32 %v2277_v41 }
0x150e   :  { %v8185_v46 = vpop.eup %8184 }
0x1575   :  { %v2287_v42 = vpop.permute.xlu1 %2286 }
0x1576   :  { %v2289_v34 = vadd.f32 %v2287_v42, %v2283_v37 }
0x1578   :  { %8186 = vtanh.f32 %v2289_v34 }
0x1582   :  { %v8187_v38 = vpop.eup %8186 }
0x1583   :  { %v2291_v62 = vmul.f32 %v8187_v38, %v8185_v46 }
0x1585   :  { %2298 = vrot.lane.b32.xlu0 %v2291_v62, %s8692_s8 }
0x15f7   :  { %v2299_v16 = vpop.permute.xlu0 %2298 }
0x15f8   :  { %6680 = vmatmul.mubr.msk.f32.vlgmr.msra.gmra.mrb[0].mxu0 %vm1244_vm1, %v2299_v16 }
0x15f9   :  { %7125 = vmatpush1.bf16.msra.mxu0 %v9684_v61  ;;  %2471 = vmatprep.mubr.f32.mxu0 %v10829_v60 }
0x15fa   :  { %7127 = vmatprep.subr.bf16.mxu0 %v9756_v22 }
0x15fd   :  { %7129 = vmatpush1.bf16.msra.mxu0 %v9761_v25 }
0x15fe   :  { %7131 = vmatprep.subr.bf16.mxu0 %v9790_v43 }
0x1601   :  { %7133 = vmatpush1.bf16.msra.mxu0 %v9804_v48 }
0x1602   :  { %7135 = vmatprep.subr.bf16.mxu0 %v9837_v0 }
0x1605   :  { %7137 = vmatpush1.bf16.msra.mxu0 %v9844_v3 }
0x1606   :  { %7139 = vmatprep.subr.bf16.mxu0 %v9672_v57 }
0x16cb   :  { %v2368_v15 = vpop.f32.mrb[0].mxu0 }
0x16cc   :  { %v7775_v1 = vadd.f32 %v7774_v31, %v2368_v15  ;;  %v2370_v63 = vpop.f32.mrb[1].mxu0 }
0x16cd   :  { %v7777_v29 = vadd.f32 %v7776_v47, %v2370_v63 }
0x16ce   :  { %v6681_v36 = vmul.f32 -1.442695, %v7775_v1 }
0x16cf   :  { %v6682_v38 = vmul.f32 -1.442695, %v7777_v29 }
0x16d0   :  { %8188 = vpow2.f32 %v6681_v36 }
0x16d1   :  { %8190 = vtanh.f32 %v7777_v29  ;;  %v7780_v29 = vadd.f32 %v9794_v45, %v9771_v30 }
0x16da   :  { %v8189_v35 = vpop.eup %8188 }
0x16db   :  { %v2381_v41 = vadd.f32 1.0, %v8189_v35  ;;  %v8191_v37 = vpop.eup %8190 }
0x16dd   :  { %8192 = vrcp.f32 %v2381_v41 }
0x16de   :  { %8194 = vpow2.f32 %v6682_v38 }
0x16e7   :  { %v8193_v42 = vpop.eup %8192 }
0x16e8   :  { %v2389_v46 = vmul.f32 %v8193_v42, %v8191_v37  ;;  %v8195_v39 = vpop.eup %8194  ;;  %v2388_v40 = vmul.f32 %v8193_v42, %v2289_v34  ;;  %v7778_v34 = vadd.f32 %v9792_v44, %v9745_v18 }
0x16e9   :  { %v2382_v62 = vadd.f32 1.0, %v8195_v39 }
0x16ea   :  { %2391 = vrot.lane.b32.xlu1 %v2389_v46, %s8692_s8 }
0x16eb   :  { %8196 = vrcp.f32 %v2382_v62 }
0x16f5   :  { %v8197_v47 = vpop.eup %8196 }
0x175c   :  { %v2392_v16 = vpop.permute.xlu1 %2391 }
0x175d   :  { %v2394_v31 = vadd.f32 %v2392_v16, %v2388_v40 }
0x175f   :  { %8198 = vtanh.f32 %v2394_v31 }
0x1769   :  { %v8199_v15 = vpop.eup %8198 }
0x176a   :  { %v2396_v1 = vmul.f32 %v8199_v15, %v8197_v47 }
0x176c   :  { %2403 = vrot.lane.b32.xlu0 %v2396_v1, %s8692_s8 }
0x17de   :  { %v2404_v63 = vpop.permute.xlu0 %2403 }
0x17df   :  { %6683 = vmatmul.mubr.msk.f32.vlgmr.msra.gmra.mrb[2].mxu0 %vm1244_vm1, %v2404_v63 }
0x17e0   :  { %7141 = vmatpush1.bf16.msra.mxu0 %v9684_v61  ;;  %2576 = vmatprep.mubr.f32.mxu0 %v10829_v60 }
0x17e1   :  { %7143 = vmatprep.subr.bf16.mxu0 %v9756_v22 }
0x17e4   :  { %7145 = vmatpush1.bf16.msra.mxu0 %v9761_v25 }
0x17e5   :  { %7147 = vmatprep.subr.bf16.mxu0 %v9790_v43 }
0x17e8   :  { %7149 = vmatpush1.bf16.msra.mxu0 %v9804_v48 }
0x17e9   :  { %7151 = vmatprep.subr.bf16.mxu0 %v9837_v0 }
0x17ec   :  { %7153 = vmatpush1.bf16.msra.mxu0 %v9844_v3 }
0x17ed   :  { %7155 = vmatprep.subr.bf16.mxu0 %v9672_v57 }
0x18b2   :  { %v2473_v36 = vpop.f32.mrb[2].mxu0 }
0x18b3   :  { %v7779_v35 = vadd.f32 %v7778_v34, %v2473_v36  ;;  %v2475_v41 = vpop.f32.mrb[3].mxu0 }
0x18b4   :  { %v7781_v37 = vadd.f32 %v7780_v29, %v2475_v41 }
0x18b5   :  { %v6684_v42 = vmul.f32 -1.442695, %v7779_v35  ;;  %v7784_v35 = vadd.f32 %v9810_v50, %v9771_v30 }
0x18b6   :  { %v6685_v16 = vmul.f32 -1.442695, %v7781_v37 }
0x18b7   :  { %8200 = vpow2.f32 %v6684_v42 }
0x18b8   :  { %8202 = vtanh.f32 %v7781_v37 }
0x18c1   :  { %v8201_v46 = vpop.eup %8200 }
0x18c2   :  { %v2486_v38 = vadd.f32 1.0, %v8201_v46  ;;  %v8203_v39 = vpop.eup %8202 }
0x18c4   :  { %8204 = vrcp.f32 %v2486_v38 }
0x18c5   :  { %8206 = vpow2.f32 %v6685_v16 }
0x18ce   :  { %v8205_v62 = vpop.eup %8204 }
0x18cf   :  { %v2494_v40 = vmul.f32 %v8205_v62, %v8203_v39  ;;  %v8207_v44 = vpop.eup %8206  ;;  %v2493_v45 = vmul.f32 %v8205_v62, %v2394_v31  ;;  %v7782_v31 = vadd.f32 %v9806_v49, %v9745_v18 }
0x18d0   :  { %v2487_v47 = vadd.f32 1.0, %v8207_v44 }
0x18d1   :  { %2496 = vrot.lane.b32.xlu1 %v2494_v40, %s8692_s8 }
0x18d2   :  { %8208 = vrcp.f32 %v2487_v47 }
0x18dc   :  { %v8209_v63 = vpop.eup %8208 }
0x1943   :  { %v2497_v15 = vpop.permute.xlu1 %2496 }
0x1944   :  { %v2499_v1 = vadd.f32 %v2497_v15, %v2493_v45 }
0x1946   :  { %8210 = vtanh.f32 %v2499_v1 }
0x1950   :  { %v8211_v34 = vpop.eup %8210 }
0x1951   :  { %v2501_v29 = vmul.f32 %v8211_v34, %v8209_v63 }
0x1953   :  { %2508 = vrot.lane.b32.xlu0 %v2501_v29, %s8692_s8 }
0x19c5   :  { %v2509_v36 = vpop.permute.xlu0 %2508 }
0x19c6   :  { %6686 = vmatmul.mubr.msk.f32.vlgmr.msra.gmra.mrb[4].mxu0 %vm1244_vm1, %v2509_v36 }
0x19c7   :  { %7157 = vmatpush1.bf16.msra.mxu0 %v9684_v61  ;;  %2681 = vmatprep.mubr.f32.mxu0 %v10829_v60 }
0x19c8   :  { %7159 = vmatprep.subr.bf16.mxu0 %v9756_v22 }
0x19cb   :  { %7161 = vmatpush1.bf16.msra.mxu0 %v9761_v25 }
0x19cc   :  { %7163 = vmatprep.subr.bf16.mxu0 %v9790_v43 }
0x19cf   :  { %7165 = vmatpush1.bf16.msra.mxu0 %v9804_v48 }
0x19d0   :  { %7167 = vmatprep.subr.bf16.mxu0 %v9837_v0 }
0x19d3   :  { %7169 = vmatpush1.bf16.msra.mxu0 %v9844_v3 }
0x19d4   :  { %7171 = vmatprep.subr.bf16.mxu0 %v9672_v57 }
0x1a99   :  { %v2578_v41 = vpop.f32.mrb[4].mxu0 }
0x1a9a   :  { %v7783_v37 = vadd.f32 %v7782_v31, %v2578_v41  ;;  %v2580_v42 = vpop.f32.mrb[5].mxu0 }
0x1a9b   :  { %v7785_v46 = vadd.f32 %v7784_v35, %v2580_v42  ;;  %v7788_v35 = vadd.f32 %v9814_v52, %v9771_v30 }
0x1a9c   :  { %v6687_v38 = vmul.f32 -1.442695, %v7783_v37 }
0x1a9d   :  { %v6688_v47 = vmul.f32 -1.442695, %v7785_v46 }
0x1a9e   :  { %8212 = vpow2.f32 %v6687_v38 }
0x1a9f   :  { %8214 = vtanh.f32 %v7785_v46 }
0x1aa8   :  { %v8213_v39 = vpop.eup %8212 }
0x1aa9   :  { %v2591_v62 = vadd.f32 1.0, %v8213_v39  ;;  %v8215_v40 = vpop.eup %8214 }
0x1aab   :  { %8216 = vrcp.f32 %v2591_v62 }
0x1aac   :  { %8218 = vpow2.f32 %v6688_v47 }
0x1ab5   :  { %v8217_v16 = vpop.eup %8216 }
0x1ab6   :  { %v2599_v44 = vmul.f32 %v8217_v16, %v8215_v40  ;;  %v8219_v49 = vpop.eup %8218  ;;  %v2598_v50 = vmul.f32 %v8217_v16, %v2499_v1  ;;  %v7786_v1 = vadd.f32 %v9812_v51, %v9745_v18 }
0x1ab7   :  { %v2592_v45 = vadd.f32 1.0, %v8219_v49 }
0x1ab8   :  { %2601 = vrot.lane.b32.xlu1 %v2599_v44, %s8692_s8 }
0x1ab9   :  { %8220 = vrcp.f32 %v2592_v45 }
0x1ac3   :  { %v8221_v34 = vpop.eup %8220 }
0x1b2a   :  { %v2602_v15 = vpop.permute.xlu1 %2601 }
0x1b2b   :  { %v2604_v63 = vadd.f32 %v2602_v15, %v2598_v50 }
0x1b2d   :  { %8222 = vtanh.f32 %v2604_v63 }
0x1b37   :  { %v8223_v29 = vpop.eup %8222 }
0x1b38   :  { %v2606_v36 = vmul.f32 %v8223_v29, %v8221_v34 }
0x1b3a   :  { %2613 = vrot.lane.b32.xlu0 %v2606_v36, %s8692_s8 }
0x1bac   :  { %v2614_v31 = vpop.permute.xlu0 %2613 }
0x1bad   :  { %6689 = vmatmul.mubr.msk.f32.vlgmr.msra.gmra.mrb[6].mxu0 %vm1244_vm1, %v2614_v31  ;;  %v7792_v31 = vadd.f32 %v9818_v54, %v9771_v30 }
0x1bae   :  { %7173 = vmatpush1.bf16.msra.mxu0 %v9684_v61  ;;  %2786 = vmatprep.mubr.f32.mxu0 %v10829_v60 }
0x1baf   :  { %7175 = vmatprep.subr.bf16.mxu0 %v9756_v22 }
0x1bb2   :  { %7177 = vmatpush1.bf16.msra.mxu0 %v9761_v25 }
0x1bb3   :  { %7179 = vmatprep.subr.bf16.mxu0 %v9790_v43 }
0x1bb6   :  { %7181 = vmatpush1.bf16.msra.mxu0 %v9804_v48 }
0x1bb7   :  { %7183 = vmatprep.subr.bf16.mxu0 %v9837_v0 }
0x1bba   :  { %7185 = vmatpush1.bf16.msra.mxu0 %v9844_v3 }
0x1bbb   :  { %7187 = vmatprep.subr.bf16.mxu0 %v9672_v57 }
0x1c80   :  { %v2683_v41 = vpop.f32.mrb[6].mxu0 }
0x1c81   :  { %v7787_v37 = vadd.f32 %v7786_v1, %v2683_v41  ;;  %v2685_v42 = vpop.f32.mrb[7].mxu0 }
0x1c82   :  { %v7789_v46 = vadd.f32 %v7788_v35, %v2685_v42 }
0x1c83   :  { %v6690_v38 = vmul.f32 -1.442695, %v7787_v37 }
0x1c84   :  { %v6691_v47 = vmul.f32 -1.442695, %v7789_v46 }
0x1c85   :  { %8224 = vpow2.f32 %v6690_v38 }
0x1c86   :  { %8226 = vtanh.f32 %v7789_v46 }
0x1c8f   :  { %v8225_v39 = vpop.eup %8224 }
0x1c90   :  { %v2696_v62 = vadd.f32 1.0, %v8225_v39  ;;  %v8227_v40 = vpop.eup %8226 }
0x1c92   :  { %8228 = vrcp.f32 %v2696_v62 }
0x1c93   :  { %8230 = vpow2.f32 %v6691_v47 }
0x1c9c   :  { %v8229_v16 = vpop.eup %8228 }
0x1c9d   :  { %v2704_v44 = vmul.f32 %v8229_v16, %v8227_v40  ;;  %v8231_v51 = vpop.eup %8230  ;;  %v2703_v52 = vmul.f32 %v8229_v16, %v2604_v63  ;;  %v7790_v63 = vadd.f32 %v9816_v53, %v9745_v18 }
0x1c9e   :  { %v2697_v49 = vadd.f32 1.0, %v8231_v51 }
0x1c9f   :  { %2706 = vrot.lane.b32.xlu1 %v2704_v44, %s8692_s8 }
0x1ca0   :  { %8232 = vrcp.f32 %v2697_v49 }
0x1caa   :  { %v8233_v15 = vpop.eup %8232 }
0x1d11   :  { %v2707_v45 = vpop.permute.xlu1 %2706 }
0x1d12   :  { %v2709_v50 = vadd.f32 %v2707_v45, %v2703_v52 }
0x1d14   :  { %8234 = vtanh.f32 %v2709_v50 }
0x1d1e   :  { %v8235_v34 = vpop.eup %8234 }
0x1d1f   :  { %v2711_v29 = vmul.f32 %v8235_v34, %v8233_v15  ;;  %v7796_v34 = vadd.f32 %v9822_v56, %v9771_v30 }
0x1d21   :  { %2718 = vrot.lane.b32.xlu0 %v2711_v29, %s8692_s8 }
0x1d93   :  { %v2719_v36 = vpop.permute.xlu0 %2718 }
0x1d94   :  { %6692 = vmatmul.mubr.msk.f32.vlgmr.msra.gmra.mrb[8].mxu0 %vm1244_vm1, %v2719_v36 }
0x1d95   :  { %7189 = vmatpush1.bf16.msra.mxu0 %v9684_v61  ;;  %2891 = vmatprep.mubr.f32.mxu0 %v10829_v60 }
0x1d96   :  { %7191 = vmatprep.subr.bf16.mxu0 %v9756_v22 }
0x1d99   :  { %7193 = vmatpush1.bf16.msra.mxu0 %v9761_v25 }
0x1d9a   :  { %7195 = vmatprep.subr.bf16.mxu0 %v9790_v43 }
0x1d9d   :  { %7197 = vmatpush1.bf16.msra.mxu0 %v9804_v48 }
0x1d9e   :  { %7199 = vmatprep.subr.bf16.mxu0 %v9837_v0 }
0x1da1   :  { %7201 = vmatpush1.bf16.msra.mxu0 %v9844_v3 }
0x1da2   :  { %7203 = vmatprep.subr.bf16.mxu0 %v9672_v57 }
0x1e67   :  { %v2788_v1 = vpop.f32.mrb[8].mxu0 }
0x1e68   :  { %v7791_v35 = vadd.f32 %v7790_v63, %v2788_v1  ;;  %v2790_v41 = vpop.f32.mrb[9].mxu0 }
0x1e69   :  { %v7793_v37 = vadd.f32 %v7792_v31, %v2790_v41 }
0x1e6a   :  { %v6693_v42 = vmul.f32 -1.442695, %v7791_v35 }
0x1e6b   :  { %v6694_v16 = vmul.f32 -1.442695, %v7793_v37 }
0x1e6c   :  { %8236 = vpow2.f32 %v6693_v42 }
0x1e6d   :  { %8238 = vtanh.f32 %v7793_v37 }
0x1e76   :  { %v8237_v46 = vpop.eup %8236 }
0x1e77   :  { %v2801_v38 = vadd.f32 1.0, %v8237_v46  ;;  %v8239_v39 = vpop.eup %8238 }
0x1e79   :  { %8240 = vrcp.f32 %v2801_v38 }
0x1e7a   :  { %8242 = vpow2.f32 %v6694_v16 }
0x1e83   :  { %v8241_v62 = vpop.eup %8240 }
0x1e84   :  { %v2809_v40 = vmul.f32 %v8241_v62, %v8239_v39  ;;  %v8243_v53 = vpop.eup %8242  ;;  %v2808_v54 = vmul.f32 %v8241_v62, %v2709_v50  ;;  %v7794_v50 = vadd.f32 %v9820_v55, %v9745_v18 }
0x1e85   :  { %v2802_v44 = vadd.f32 1.0, %v8243_v53 }
0x1e86   :  { %2811 = vrot.lane.b32.xlu1 %v2809_v40, %s8692_s8 }
0x1e87   :  { %8244 = vrcp.f32 %v2802_v44 }
0x1e91   :  { %v8245_v49 = vpop.eup %8244 }
0x1ef8   :  { %v2812_v47 = vpop.permute.xlu1 %2811 }
0x1ef9   :  { %v2814_v51 = vadd.f32 %v2812_v47, %v2808_v54  ;;  %v7798_v47 = vadd.f32 %v9824_v58, %v9745_v18 }
0x1efb   :  { %8246 = vtanh.f32 %v2814_v51 }
0x1f05   :  { %v8247_v52 = vpop.eup %8246 }
0x1f06   :  { %v2816_v45 = vmul.f32 %v8247_v52, %v8245_v49 }
0x1f08   :  { %2823 = vrot.lane.b32.xlu0 %v2816_v45, %s8692_s8 }
0x1f7a   :  { %v2824_v15 = vpop.permute.xlu0 %2823 }
0x1f7b   :  { %6695 = vmatmul.mubr.msk.f32.vlgmr.msra.gmra.mrb[10].mxu0 %vm1244_vm1, %v2824_v15 }
0x1f7c   :  { %7205 = vmatpush1.bf16.msra.mxu0 %v9684_v61  ;;  %2996 = vmatprep.mubr.f32.mxu0 %v10829_v60 }
0x1f7d   :  { %7207 = vmatprep.subr.bf16.mxu0 %v9756_v22 }
0x1f80   :  { %7209 = vmatpush1.bf16.msra.mxu0 %v9761_v25 }
0x1f81   :  { %7211 = vmatprep.subr.bf16.mxu0 %v9790_v43 }
0x1f84   :  { %7213 = vmatpush1.bf16.msra.mxu0 %v9804_v48 }
0x1f85   :  { %7215 = vmatprep.subr.bf16.mxu0 %v9837_v0 }
0x1f88   :  { %7217 = vmatpush1.bf16.msra.mxu0 %v9844_v3 }
0x1f89   :  { %7219 = vmatprep.subr.bf16.mxu0 %v9672_v57 }
0x204e   :  { %v2893_v29 = vpop.f32.mrb[10].mxu0 }
0x204f   :  { %v7795_v36 = vadd.f32 %v7794_v50, %v2893_v29  ;;  %v2895_v63 = vpop.f32.mrb[11].mxu0 }
0x2050   :  { %v7797_v31 = vadd.f32 %v7796_v34, %v2895_v63 }
0x2051   :  { %v6696_v1 = vmul.f32 -1.442695, %v7795_v36 }
0x2052   :  { %v6697_v38 = vmul.f32 -1.442695, %v7797_v31 }
0x2053   :  { %8248 = vpow2.f32 %v6696_v1 }
0x2054   :  { %8250 = vtanh.f32 %v7797_v31 }
0x205d   :  { %v8249_v35 = vpop.eup %8248 }
0x205e   :  { %v2906_v41 = vadd.f32 1.0, %v8249_v35  ;;  %v8251_v37 = vpop.eup %8250 }
0x2060   :  { %8252 = vrcp.f32 %v2906_v41 }
0x2061   :  { %8254 = vpow2.f32 %v6697_v38 }
0x206a   :  { %v8253_v42 = vpop.eup %8252 }
0x206b   :  { %v2914_v46 = vmul.f32 %v8253_v42, %v8251_v37  ;;  %v8255_v55 = vpop.eup %8254  ;;  %v2913_v56 = vmul.f32 %v8253_v42, %v2814_v51  ;;  %v7800_v51 = vadd.f32 %v9826_v59, %v9771_v30 }
0x206c   :  { %v2907_v39 = vadd.f32 1.0, %v8255_v55 }
0x206d   :  { %2916 = vrot.lane.b32.xlu1 %v2914_v46, %s8692_s8 }
0x206e   :  { %8256 = vrcp.f32 %v2907_v39  ;;  %v7802_v39 = vadd.f32 %v9842_v2, %v9745_v18 }
0x2078   :  { %v8257_v16 = vpop.eup %8256 }
0x20df   :  { %v2917_v62 = vpop.permute.xlu1 %2916 }
0x20e0   :  { %v2919_v40 = vadd.f32 %v2917_v62, %v2913_v56  ;;  %v7804_v56 = vadd.f32 %v9846_v4, %v9771_v30 }
0x20e2   :  { %8258 = vtanh.f32 %v2919_v40 }
0x20ec   :  { %v8259_v53 = vpop.eup %8258 }
0x20ed   :  { %v2921_v44 = vmul.f32 %v8259_v53, %v8257_v16 }
0x20ef   :  { %2928 = vrot.lane.b32.xlu0 %v2921_v44, %s8692_s8 }
0x2161   :  { %v2929_v54 = vpop.permute.xlu0 %2928 }
0x2162   :  { %6698 = vmatmul.mubr.msk.f32.vlgmr.msra.gmra.mrb[12].mxu0 %vm1244_vm1, %v2929_v54 }
0x2163   :  { %7221 = vmatpush1.bf16.msra.mxu0 %v9684_v61  ;;  %3101 = vmatprep.mubr.f32.mxu0 %v10829_v60 }
0x2164   :  { %7223 = vmatprep.subr.bf16.mxu0 %v9756_v22 }
0x2167   :  { %7225 = vmatpush1.bf16.msra.mxu0 %v9761_v25 }
0x2168   :  { %7227 = vmatprep.subr.bf16.mxu0 %v9790_v43 }
0x216b   :  { %7229 = vmatpush1.bf16.msra.mxu0 %v9804_v48 }
0x216c   :  { %7231 = vmatprep.subr.bf16.mxu0 %v9837_v0 }
0x216f   :  { %7233 = vmatpush1.bf16.msra.mxu0 %v9844_v3 }
0x2170   :  { %7235 = vmatprep.subr.bf16.mxu0 %v9672_v57 }
0x2235   :  { %v2998_v49 = vpop.f32.mrb[12].mxu0 }
0x2236   :  { %v7799_v52 = vadd.f32 %v7798_v47, %v2998_v49  ;;  %v3000_v45 = vpop.f32.mrb[13].mxu0 }
0x2237   :  { %v7801_v15 = vadd.f32 %v7800_v51, %v3000_v45 }
0x2238   :  { %v6699_v50 = vmul.f32 -1.442695, %v7799_v52 }
0x2239   :  { %v6700_v1 = vmul.f32 -1.442695, %v7801_v15 }
0x223a   :  { %8260 = vpow2.f32 %v6699_v50 }
0x223b   :  { %8262 = vtanh.f32 %v7801_v15 }
0x2244   :  { %v8261_v34 = vpop.eup %8260 }
0x2245   :  { %v3011_v29 = vadd.f32 1.0, %v8261_v34  ;;  %v8263_v36 = vpop.eup %8262 }
0x2247   :  { %8264 = vrcp.f32 %v3011_v29 }
0x2248   :  { %8266 = vpow2.f32 %v6700_v1  ;;  %v7806_v1 = vadd.f32 %v9854_v5, %v9745_v18 }
0x2251   :  { %v8265_v63 = vpop.eup %8264 }
0x2252   :  { %v3019_v31 = vmul.f32 %v8265_v63, %v8263_v36  ;;  %v8267_v58 = vpop.eup %8266  ;;  %v3018_v59 = vmul.f32 %v8265_v63, %v2919_v40 }
0x2253   :  { %v3012_v35 = vadd.f32 1.0, %v8267_v58  ;;  %v7808_v58 = vadd.f32 %v9856_v6, %v9771_v30 }
0x2254   :  { %3021 = vrot.lane.b32.xlu1 %v3019_v31, %s8692_s8 }
0x2255   :  { %8268 = vrcp.f32 %v3012_v35 }
0x225f   :  { %v8269_v42 = vpop.eup %8268 }
0x22c6   :  { %v3022_v41 = vpop.permute.xlu1 %3021 }
0x22c7   :  { %v3024_v37 = vadd.f32 %v3022_v41, %v3018_v59 }
0x22c9   :  { %8270 = vtanh.f32 %v3024_v37 }
0x22d3   :  { %v8271_v46 = vpop.eup %8270 }
0x22d4   :  { %v3026_v38 = vmul.f32 %v8271_v46, %v8269_v42 }
0x22d6   :  { %3033 = vrot.lane.b32.xlu0 %v3026_v38, %s8692_s8 }
0x2348   :  { %v3034_v55 = vpop.permute.xlu0 %3033 }
0x2349   :  { %6701 = vmatmul.mubr.msk.f32.vlgmr.msra.gmra.mrb[14].mxu0 %vm1244_vm1, %v3034_v55 }
0x234a   :  { %7237 = vmatpush1.bf16.msra.mxu0 %v9684_v61  ;;  %3206 = vmatprep.mubr.f32.mxu0 %v10829_v60 }
0x234b   :  { %7239 = vmatprep.subr.bf16.mxu0 %v9756_v22 }
0x234e   :  { %7241 = vmatpush1.bf16.msra.mxu0 %v9761_v25 }
0x234f   :  { %7243 = vmatprep.subr.bf16.mxu0 %v9790_v43 }
0x2352   :  { %7245 = vmatpush1.bf16.msra.mxu0 %v9804_v48 }
0x2353   :  { %7247 = vmatprep.subr.bf16.mxu0 %v9837_v0 }
0x2356   :  { %7249 = vmatpush1.bf16.msra.mxu0 %v9844_v3 }
0x2357   :  { %7251 = vmatprep.subr.bf16.mxu0 %v9672_v57 }
0x241c   :  { %v3103_v62 = vpop.f32.mrb[14].mxu0 }
0x241d   :  { %v7803_v40 = vadd.f32 %v7802_v39, %v3103_v62  ;;  %v3105_v16 = vpop.f32.mrb[15].mxu0 }
0x241e   :  { %v7805_v53 = vadd.f32 %v7804_v56, %v3105_v16 }
0x241f   :  { %v6702_v44 = vmul.f32 -1.442695, %v7803_v40 }
0x2420   :  { %v6703_v45 = vmul.f32 -1.442695, %v7805_v53 }
0x2421   :  { %8272 = vpow2.f32 %v6702_v44 }
0x2422   :  { %8274 = vtanh.f32 %v7805_v53 }
0x242b   :  { %v8273_v54 = vpop.eup %8272 }
0x242c   :  { %v3116_v47 = vadd.f32 1.0, %v8273_v54  ;;  %v8275_v51 = vpop.eup %8274 }
0x242e   :  { %8276 = vrcp.f32 %v3116_v47 }
0x242f   :  { %8278 = vpow2.f32 %v6703_v45 }
0x2438   :  { %v8277_v49 = vpop.eup %8276 }
0x2439   :  { %v3124_v52 = vmul.f32 %v8277_v49, %v8275_v51  ;;  %v8279_v2 = vpop.eup %8278  ;;  %v3123_v4 = vmul.f32 %v8277_v49, %v3024_v37  ;;  %v7810_v49 = vadd.f32 %v9858_v7, %v9745_v18 }
0x243a   :  { %v3117_v15 = vadd.f32 1.0, %v8279_v2 }
0x243b   :  { %3126 = vrot.lane.b32.xlu1 %v3124_v52, %s8692_s8  ;;  %v7812_v52 = vadd.f32 %v9860_v8, %v9771_v30 }
0x243c   :  { %8280 = vrcp.f32 %v3117_v15 }
0x2446   :  { %v8281_v29 = vpop.eup %8280 }
0x24ad   :  { %v3127_v50 = vpop.permute.xlu1 %3126 }
0x24ae   :  { %v3129_v34 = vadd.f32 %v3127_v50, %v3123_v4 }
0x24b0   :  { %8282 = vtanh.f32 %v3129_v34 }
0x24ba   :  { %v8283_v36 = vpop.eup %8282 }
0x24bb   :  { %v3131_v63 = vmul.f32 %v8283_v36, %v8281_v29 }
0x24bd   :  { %3138 = vrot.lane.b32.xlu0 %v3131_v63, %s8692_s8 }
0x252f   :  { %v3139_v31 = vpop.permute.xlu0 %3138 }
0x2530   :  { %6704 = vmatmul.mubr.msk.f32.vlgmr.msra.gmra.mrb[16].mxu0 %vm1244_vm1, %v3139_v31 }
0x2531   :  { %7253 = vmatpush1.bf16.msra.mxu0 %v9684_v61  ;;  %3311 = vmatprep.mubr.f32.mxu0 %v10829_v60 }
0x2532   :  { %7255 = vmatprep.subr.bf16.mxu0 %v9756_v22 }
0x2535   :  { %7257 = vmatpush1.bf16.msra.mxu0 %v9761_v25 }
0x2536   :  { %7259 = vmatprep.subr.bf16.mxu0 %v9790_v43 }
0x2539   :  { %7261 = vmatpush1.bf16.msra.mxu0 %v9804_v48 }
0x253a   :  { %7263 = vmatprep.subr.bf16.mxu0 %v9837_v0 }
0x253d   :  { %7265 = vmatpush1.bf16.msra.mxu0 %v9844_v3 }
0x253e   :  { %7267 = vmatprep.subr.bf16.mxu0 %v9672_v57 }
0x2603   :  { %v3208_v35 = vpop.f32.mrb[16].mxu0 }
0x2604   :  { %v7807_v59 = vadd.f32 %v7806_v1, %v3208_v35  ;;  %v3210_v41 = vpop.f32.mrb[17].mxu0 }
0x2605   :  { %v7809_v37 = vadd.f32 %v7808_v58, %v3210_v41 }
0x2606   :  { %v6705_v42 = vmul.f32 -1.442695, %v7807_v59 }
0x2607   :  { %v6706_v62 = vmul.f32 -1.442695, %v7809_v37 }
0x2608   :  { %8284 = vpow2.f32 %v6705_v42 }
0x2609   :  { %8286 = vtanh.f32 %v7809_v37 }
0x2612   :  { %v8285_v46 = vpop.eup %8284 }
0x2613   :  { %v3221_v38 = vadd.f32 1.0, %v8285_v46  ;;  %v8287_v55 = vpop.eup %8286 }
0x2615   :  { %8288 = vrcp.f32 %v3221_v38  ;;  %v7814_v38 = vadd.f32 %v9862_v9, %v9745_v18 }
0x2616   :  { %8290 = vpow2.f32 %v6706_v62 }
0x261f   :  { %v8289_v39 = vpop.eup %8288 }
0x2620   :  { %v3229_v56 = vmul.f32 %v8289_v39, %v8287_v55  ;;  %v8291_v5 = vpop.eup %8290  ;;  %v3228_v6 = vmul.f32 %v8289_v39, %v3129_v34  ;;  %v7816_v55 = vadd.f32 %v9864_v10, %v9771_v30 }
0x2621   :  { %v3222_v40 = vadd.f32 1.0, %v8291_v5 }
0x2622   :  { %3231 = vrot.lane.b32.xlu1 %v3229_v56, %s8692_s8 }
0x2623   :  { %8292 = vrcp.f32 %v3222_v40 }
0x262d   :  { %v8293_v44 = vpop.eup %8292 }
0x2694   :  { %v3232_v16 = vpop.permute.xlu1 %3231 }
0x2695   :  { %v3234_v53 = vadd.f32 %v3232_v16, %v3228_v6 }
0x2697   :  { %8294 = vtanh.f32 %v3234_v53 }
0x26a1   :  { %v8295_v54 = vpop.eup %8294 }
0x26a2   :  { %v3236_v47 = vmul.f32 %v8295_v54, %v8293_v44 }
0x26a4   :  { %3243 = vrot.lane.b32.xlu0 %v3236_v47, %s8692_s8 }
0x2716   :  { %v3244_v51 = vpop.permute.xlu0 %3243 }
0x2717   :  { %6707 = vmatmul.mubr.msk.f32.vlgmr.msra.gmra.mrb[18].mxu0 %vm1244_vm1, %v3244_v51 }
0x2718   :  { %7269 = vmatpush1.bf16.msra.mxu0 %v9684_v61  ;;  %3416 = vmatprep.mubr.f32.mxu0 %v10829_v60 }
0x2719   :  { %7271 = vmatprep.subr.bf16.mxu0 %v9756_v22 }
0x271c   :  { %7273 = vmatpush1.bf16.msra.mxu0 %v9761_v25 }
0x271d   :  { %7275 = vmatprep.subr.bf16.mxu0 %v9790_v43 }
0x2720   :  { %7277 = vmatpush1.bf16.msra.mxu0 %v9804_v48 }
0x2721   :  { %7279 = vmatprep.subr.bf16.mxu0 %v9837_v0 }
0x2724   :  { %7281 = vmatpush1.bf16.msra.mxu0 %v9844_v3 }
0x2725   :  { %7283 = vmatprep.subr.bf16.mxu0 %v9672_v57 }
0x27ea   :  { %v3313_v45 = vpop.f32.mrb[18].mxu0 }
0x27eb   :  { %v7811_v2 = vadd.f32 %v7810_v49, %v3313_v45  ;;  %v3315_v15 = vpop.f32.mrb[19].mxu0 }
0x27ec   :  { %v7813_v4 = vadd.f32 %v7812_v52, %v3315_v15 }
0x27ed   :  { %v6708_v50 = vmul.f32 -1.442695, %v7811_v2 }
0x27ee   :  { %v6709_v1 = vmul.f32 -1.442695, %v7813_v4 }
0x27ef   :  { %8296 = vpow2.f32 %v6708_v50  ;;  %v7818_v50 = vadd.f32 %v9866_v11, %v9745_v18 }
0x27f0   :  { %8298 = vtanh.f32 %v7813_v4 }
0x27f9   :  { %v8297_v34 = vpop.eup %8296 }
0x27fa   :  { %v3326_v29 = vadd.f32 1.0, %v8297_v34  ;;  %v8299_v36 = vpop.eup %8298  ;;  %v7820_v34 = vadd.f32 %v9868_v12, %v9771_v30 }
0x27fc   :  { %8300 = vrcp.f32 %v3326_v29 }
0x27fd   :  { %8302 = vpow2.f32 %v6709_v1 }
0x2806   :  { %v8301_v63 = vpop.eup %8300 }
0x2807   :  { %v3334_v31 = vmul.f32 %v8301_v63, %v8299_v36  ;;  %v8303_v7 = vpop.eup %8302  ;;  %v3333_v8 = vmul.f32 %v8301_v63, %v3234_v53 }
0x2808   :  { %v3327_v58 = vadd.f32 1.0, %v8303_v7 }
0x2809   :  { %3336 = vrot.lane.b32.xlu1 %v3334_v31, %s8692_s8 }
0x280a   :  { %8304 = vrcp.f32 %v3327_v58 }
0x2814   :  { %v8305_v41 = vpop.eup %8304 }
0x287b   :  { %v3337_v35 = vpop.permute.xlu1 %3336 }
0x287c   :  { %v3339_v59 = vadd.f32 %v3337_v35, %v3333_v8 }
0x287e   :  { %8306 = vtanh.f32 %v3339_v59 }
0x2888   :  { %v8307_v37 = vpop.eup %8306 }
0x2889   :  { %v3341_v42 = vmul.f32 %v8307_v37, %v8305_v41 }
0x288b   :  { %3348 = vrot.lane.b32.xlu0 %v3341_v42, %s8692_s8 }
0x28fd   :  { %v3349_v46 = vpop.permute.xlu0 %3348 }
0x28fe   :  { %6710 = vmatmul.mubr.msk.f32.vlgmr.msra.gmra.mrb[20].mxu0 %vm1244_vm1, %v3349_v46 }
0x28ff   :  { %7285 = vmatpush1.bf16.msra.mxu0 %v9684_v61  ;;  %3521 = vmatprep.mubr.f32.mxu0 %v10829_v60 }
0x2900   :  { %7287 = vmatprep.subr.bf16.mxu0 %v9756_v22 }
0x2903   :  { %7289 = vmatpush1.bf16.msra.mxu0 %v9761_v25 }
0x2904   :  { %7291 = vmatprep.subr.bf16.mxu0 %v9790_v43 }
0x2907   :  { %7293 = vmatpush1.bf16.msra.mxu0 %v9804_v48 }
0x2908   :  { %7295 = vmatprep.subr.bf16.mxu0 %v9837_v0 }
0x290b   :  { %7297 = vmatpush1.bf16.msra.mxu0 %v9844_v3 }
0x290c   :  { %7299 = vmatprep.subr.bf16.mxu0 %v9672_v57 }
0x29d1   :  { %v3418_v39 = vpop.f32.mrb[20].mxu0 }
0x29d2   :  { %v7815_v56 = vadd.f32 %v7814_v38, %v3418_v39  ;;  %v3420_v62 = vpop.f32.mrb[21].mxu0 }
0x29d3   :  { %v7817_v5 = vadd.f32 %v7816_v55, %v3420_v62  ;;  %v7822_v62 = vadd.f32 %v9870_v13, %v9745_v18 }
0x29d4   :  { %v6711_v40 = vmul.f32 -1.442695, %v7815_v56 }
0x29d5   :  { %v6712_v47 = vmul.f32 -1.442695, %v7817_v5 }
0x29d6   :  { %8308 = vpow2.f32 %v6711_v40 }
0x29d7   :  { %8310 = vtanh.f32 %v7817_v5  ;;  %v7824_v5 = vadd.f32 %v9872_v14, %v9771_v30 }
0x29e0   :  { %v8309_v6 = vpop.eup %8308 }
0x29e1   :  { %v3431_v16 = vadd.f32 1.0, %v8309_v6  ;;  %v8311_v53 = vpop.eup %8310 }
0x29e3   :  { %8312 = vrcp.f32 %v3431_v16 }
0x29e4   :  { %8314 = vpow2.f32 %v6712_v47 }
0x29ed   :  { %v8313_v44 = vpop.eup %8312 }
0x29ee   :  { %v3439_v54 = vmul.f32 %v8313_v44, %v8311_v53  ;;  %v8315_v9 = vpop.eup %8314  ;;  %v3438_v10 = vmul.f32 %v8313_v44, %v3339_v59 }
0x29ef   :  { %v3432_v51 = vadd.f32 1.0, %v8315_v9 }
0x29f0   :  { %3441 = vrot.lane.b32.xlu1 %v3439_v54, %s8692_s8 }
0x29f1   :  { %8316 = vrcp.f32 %v3432_v51 }
0x29fb   :  { %v8317_v45 = vpop.eup %8316 }
0x2a62   :  { %v3442_v49 = vpop.permute.xlu1 %3441 }
0x2a63   :  { %v3444_v52 = vadd.f32 %v3442_v49, %v3438_v10 }
0x2a65   :  { %8318 = vtanh.f32 %v3444_v52 }
0x2a6f   :  { %v8319_v2 = vpop.eup %8318 }
0x2a70   :  { %v3446_v15 = vmul.f32 %v8319_v2, %v8317_v45 }
0x2a72   :  { %3453 = vrot.lane.b32.xlu0 %v3446_v15, %s8692_s8 }
0x2ae4   :  { %v3454_v4 = vpop.permute.xlu0 %3453 }
0x2ae5   :  { %6713 = vmatmul.mubr.msk.f32.vlgmr.msra.gmra.mrb[22].mxu0 %vm1244_vm1, %v3454_v4 }
0x2ae6   :  { %7301 = vmatpush1.bf16.msra.mxu0 %v9684_v61  ;;  %3626 = vmatprep.mubr.f32.mxu0 %v10829_v60 }
0x2ae7   :  { %7303 = vmatprep.subr.bf16.mxu0 %v9756_v22 }
0x2aea   :  { %7305 = vmatpush1.bf16.msra.mxu0 %v9761_v25 }
0x2aeb   :  { %7307 = vmatprep.subr.bf16.mxu0 %v9790_v43 }
0x2aee   :  { %7309 = vmatpush1.bf16.msra.mxu0 %v9804_v48 }
0x2aef   :  { %7311 = vmatprep.subr.bf16.mxu0 %v9837_v0 }
0x2af2   :  { %7313 = vmatpush1.bf16.msra.mxu0 %v9844_v3 }
0x2af3   :  { %7315 = vmatprep.subr.bf16.mxu0 %v9672_v57 }
0x2bb8   :  { %v3523_v29 = vpop.f32.mrb[22].mxu0 }
0x2bb9   :  { %v7819_v36 = vadd.f32 %v7818_v50, %v3523_v29  ;;  %v3525_v63 = vpop.f32.mrb[23].mxu0  ;;  %v7826_v29 = vadd.f32 %v9874_v17, %v9745_v18 }
0x2bba   :  { %v7821_v31 = vadd.f32 %v7820_v34, %v3525_v63 }
0x2bbb   :  { %v6714_v1 = vmul.f32 -1.442695, %v7819_v36  ;;  %v7828_v36 = vadd.f32 %v9876_v19, %v9771_v30 }
0x2bbc   :  { %v6715_v41 = vmul.f32 -1.442695, %v7821_v31 }
0x2bbd   :  { %8320 = vpow2.f32 %v6714_v1 }
0x2bbe   :  { %8322 = vtanh.f32 %v7821_v31 }
0x2bc7   :  { %v8321_v7 = vpop.eup %8320 }
0x2bc8   :  { %v3536_v58 = vadd.f32 1.0, %v8321_v7  ;;  %v8323_v8 = vpop.eup %8322 }
0x2bca   :  { %8324 = vrcp.f32 %v3536_v58 }
0x2bcb   :  { %8326 = vpow2.f32 %v6715_v41 }
0x2bd4   :  { %v8325_v35 = vpop.eup %8324 }
0x2bd5   :  { %v3544_v59 = vmul.f32 %v8325_v35, %v8323_v8  ;;  %v8327_v11 = vpop.eup %8326  ;;  %v3543_v12 = vmul.f32 %v8325_v35, %v3444_v52 }
0x2bd6   :  { %v3537_v37 = vadd.f32 1.0, %v8327_v11 }
0x2bd7   :  { %3546 = vrot.lane.b32.xlu1 %v3544_v59, %s8692_s8 }
0x2bd8   :  { %8328 = vrcp.f32 %v3537_v37 }
0x2be2   :  { %v8329_v38 = vpop.eup %8328 }
0x2c49   :  { %v3547_v42 = vpop.permute.xlu1 %3546 }
0x2c4a   :  { %v3549_v46 = vadd.f32 %v3547_v42, %v3543_v12 }
0x2c4c   :  { %8330 = vtanh.f32 %v3549_v46 }
0x2c56   :  { %v8331_v55 = vpop.eup %8330 }
0x2c57   :  { %v3551_v39 = vmul.f32 %v8331_v55, %v8329_v38 }
0x2c59   :  { %3558 = vrot.lane.b32.xlu0 %v3551_v39, %s8692_s8 }
0x2ccb   :  { %v3559_v56 = vpop.permute.xlu0 %3558 }
0x2ccc   :  { %6716 = vmatmul.mubr.msk.f32.vlgmr.msra.gmra.mrb[24].mxu0 %vm1244_vm1, %v3559_v56 }
0x2ccd   :  { %7317 = vmatpush1.bf16.msra.mxu0 %v9684_v61  ;;  %3731 = vmatprep.mubr.f32.mxu0 %v10829_v60 }
0x2cce   :  { %7319 = vmatprep.subr.bf16.mxu0 %v9756_v22 }
0x2cd1   :  { %7321 = vmatpush1.bf16.msra.mxu0 %v9761_v25 }
0x2cd2   :  { %7323 = vmatprep.subr.bf16.mxu0 %v9790_v43 }
0x2cd5   :  { %7325 = vmatpush1.bf16.msra.mxu0 %v9804_v48 }
0x2cd6   :  { %7327 = vmatprep.subr.bf16.mxu0 %v9837_v0 }
0x2cd9   :  { %7329 = vmatpush1.bf16.msra.mxu0 %v9844_v3 }
0x2cda   :  { %7331 = vmatprep.subr.bf16.mxu0 %v9672_v57 }
0x2d9f   :  { %v3628_v40 = vpop.f32.mrb[24].mxu0 }
0x2da0   :  { %v7823_v6 = vadd.f32 %v7822_v62, %v3628_v40  ;;  %v3630_v16 = vpop.f32.mrb[25].mxu0  ;;  %v7830_v62 = vadd.f32 %v9878_v20, %v9745_v18 }
0x2da1   :  { %v7825_v53 = vadd.f32 %v7824_v5, %v3630_v16  ;;  %v7832_v5 = vadd.f32 %v9880_v21, %v9771_v30 }
0x2da2   :  { %v6717_v44 = vmul.f32 -1.442695, %v7823_v6 }
0x2da3   :  { %v6718_v49 = vmul.f32 -1.442695, %v7825_v53 }
0x2da4   :  { %8332 = vpow2.f32 %v6717_v44 }
0x2da5   :  { %8334 = vtanh.f32 %v7825_v53 }
0x2dae   :  { %v8333_v54 = vpop.eup %8332 }
0x2daf   :  { %v3641_v47 = vadd.f32 1.0, %v8333_v54  ;;  %v8335_v9 = vpop.eup %8334 }
0x2db1   :  { %8336 = vrcp.f32 %v3641_v47 }
0x2db2   :  { %8338 = vpow2.f32 %v6718_v49 }
0x2dbb   :  { %v8337_v51 = vpop.eup %8336 }
0x2dbc   :  { %v3649_v10 = vmul.f32 %v8337_v51, %v8335_v9  ;;  %v8339_v13 = vpop.eup %8338  ;;  %v3648_v14 = vmul.f32 %v8337_v51, %v3549_v46 }
0x2dbd   :  { %v3642_v52 = vadd.f32 1.0, %v8339_v13 }
0x2dbe   :  { %3651 = vrot.lane.b32.xlu1 %v3649_v10, %s8692_s8 }
0x2dbf   :  { %8340 = vrcp.f32 %v3642_v52 }
0x2dc9   :  { %v8341_v15 = vpop.eup %8340 }
0x2e30   :  { %v3652_v45 = vpop.permute.xlu1 %3651 }
0x2e31   :  { %v3654_v2 = vadd.f32 %v3652_v45, %v3648_v14 }
0x2e33   :  { %8342 = vtanh.f32 %v3654_v2 }
0x2e3d   :  { %v8343_v4 = vpop.eup %8342 }
0x2e3e   :  { %v3656_v50 = vmul.f32 %v8343_v4, %v8341_v15 }
0x2e40   :  { %3663 = vrot.lane.b32.xlu0 %v3656_v50, %s8692_s8  ;;  %v7834_v50 = vadd.f32 %v9882_v23, %v9745_v18 }
0x2eb2   :  { %v3664_v34 = vpop.permute.xlu0 %3663 }
0x2eb3   :  { %6719 = vmatmul.mubr.msk.f32.vlgmr.msra.gmra.mrb[26].mxu0 %vm1244_vm1, %v3664_v34  ;;  %v7836_v34 = vadd.f32 %v9884_v24, %v9771_v30 }
0x2eb4   :  { %7333 = vmatpush1.bf16.msra.mxu0 %v9684_v61  ;;  %3836 = vmatprep.mubr.f32.mxu0 %v10829_v60 }
0x2eb5   :  { %7335 = vmatprep.subr.bf16.mxu0 %v9756_v22 }
0x2eb8   :  { %7337 = vmatpush1.bf16.msra.mxu0 %v9761_v25 }
0x2eb9   :  { %7339 = vmatprep.subr.bf16.mxu0 %v9790_v43 }
0x2ebc   :  { %7341 = vmatpush1.bf16.msra.mxu0 %v9804_v48 }
0x2ebd   :  { %7343 = vmatprep.subr.bf16.mxu0 %v9837_v0 }
0x2ec0   :  { %7345 = vmatpush1.bf16.msra.mxu0 %v9844_v3 }
0x2ec1   :  { %7347 = vmatprep.subr.bf16.mxu0 %v9672_v57 }
0x2f86   :  { %v3733_v63 = vpop.f32.mrb[26].mxu0 }
0x2f87   :  { %v7827_v31 = vadd.f32 %v7826_v29, %v3733_v63  ;;  %v3735_v1 = vpop.f32.mrb[27].mxu0 }
0x2f88   :  { %v7829_v7 = vadd.f32 %v7828_v36, %v3735_v1 }
0x2f89   :  { %v6720_v58 = vmul.f32 -1.442695, %v7827_v31 }
0x2f8a   :  { %v6721_v37 = vmul.f32 -1.442695, %v7829_v7 }
0x2f8b   :  { %8344 = vpow2.f32 %v6720_v58 }
0x2f8c   :  { %8346 = vtanh.f32 %v7829_v7 }
0x2f95   :  { %v8345_v8 = vpop.eup %8344 }
0x2f96   :  { %v3746_v35 = vadd.f32 1.0, %v8345_v8  ;;  %v8347_v59 = vpop.eup %8346 }
0x2f98   :  { %8348 = vrcp.f32 %v3746_v35 }
0x2f99   :  { %8350 = vpow2.f32 %v6721_v37 }
0x2fa2   :  { %v8349_v41 = vpop.eup %8348 }
0x2fa3   :  { %v3754_v11 = vmul.f32 %v8349_v41, %v8347_v59  ;;  %v8351_v17 = vpop.eup %8350  ;;  %v3753_v19 = vmul.f32 %v8349_v41, %v3654_v2 }
0x2fa4   :  { %v3747_v12 = vadd.f32 1.0, %v8351_v17 }
0x2fa5   :  { %3756 = vrot.lane.b32.xlu1 %v3754_v11, %s8692_s8 }
0x2fa6   :  { %8352 = vrcp.f32 %v3747_v12 }
0x2fb0   :  { %v8353_v38 = vpop.eup %8352 }
0x3017   :  { %v3757_v42 = vpop.permute.xlu1 %3756 }
0x3018   :  { %v3759_v46 = vadd.f32 %v3757_v42, %v3753_v19 }
0x301a   :  { %8354 = vtanh.f32 %v3759_v46 }
0x3024   :  { %v8355_v55 = vpop.eup %8354 }
0x3025   :  { %v3761_v39 = vmul.f32 %v8355_v55, %v8353_v38  ;;  %v7838_v38 = vadd.f32 %v9886_v26, %v9745_v18  ;;  %v7840_v55 = vadd.f32 %v9888_v27, %v9771_v30 }
0x3027   :  { %3768 = vrot.lane.b32.xlu0 %v3761_v39, %s8692_s8 }
0x3099   :  { %v3769_v56 = vpop.permute.xlu0 %3768 }
0x309a   :  { %6722 = vmatmul.mubr.msk.f32.vlgmr.msra.gmra.mrb[28].mxu0 %vm1244_vm1, %v3769_v56 }
0x309b   :  { %7349 = vmatpush1.bf16.msra.mxu0 %v9684_v61  ;;  %3941 = vmatprep.mubr.f32.mxu0 %v10829_v60 }
0x309c   :  { %7351 = vmatprep.subr.bf16.mxu0 %v9756_v22 }
0x309f   :  { %7353 = vmatpush1.bf16.msra.mxu0 %v9761_v25 }
0x30a0   :  { %7355 = vmatprep.subr.bf16.mxu0 %v9790_v43 }
0x30a3   :  { %7357 = vmatpush1.bf16.msra.mxu0 %v9804_v48 }
0x30a4   :  { %7359 = vmatprep.subr.bf16.mxu0 %v9837_v0 }
0x30a7   :  { %7361 = vmatpush1.bf16.msra.mxu0 %v9844_v3 }
0x30a8   :  { %7363 = vmatprep.subr.bf16.mxu0 %v9672_v57 }
0x316d   :  { %v3838_v40 = vpop.f32.mrb[28].mxu0 }
0x316e   :  { %v7831_v6 = vadd.f32 %v7830_v62, %v3838_v40  ;;  %v3840_v16 = vpop.f32.mrb[29].mxu0 }
0x316f   :  { %v7833_v53 = vadd.f32 %v7832_v5, %v3840_v16 }
0x3170   :  { %v6723_v44 = vmul.f32 -1.442695, %v7831_v6 }
0x3171   :  { %v6724_v49 = vmul.f32 -1.442695, %v7833_v53 }
0x3172   :  { %8356 = vpow2.f32 %v6723_v44 }
0x3173   :  { %8358 = vtanh.f32 %v7833_v53 }
0x317c   :  { %v8357_v54 = vpop.eup %8356 }
0x317d   :  { %v3851_v47 = vadd.f32 1.0, %v8357_v54  ;;  %v8359_v9 = vpop.eup %8358 }
0x317f   :  { %8360 = vrcp.f32 %v3851_v47 }
0x3180   :  { %8362 = vpow2.f32 %v6724_v49 }
0x3189   :  { %v8361_v51 = vpop.eup %8360 }
0x318a   :  { %v3859_v10 = vmul.f32 %v8361_v51, %v8359_v9  ;;  %v8363_v20 = vpop.eup %8362  ;;  %v3858_v21 = vmul.f32 %v8361_v51, %v3759_v46 }
0x318b   :  { %v3852_v13 = vadd.f32 1.0, %v8363_v20 }
0x318c   :  { %3861 = vrot.lane.b32.xlu1 %v3859_v10, %s8692_s8 }
0x318d   :  { %8364 = vrcp.f32 %v3852_v13 }
0x3197   :  { %v8365_v45 = vpop.eup %8364 }
0x31fe   :  { %v3862_v52 = vpop.permute.xlu1 %3861 }
0x31ff   :  { %v3864_v14 = vadd.f32 %v3862_v52, %v3858_v21  ;;  %v7842_v52 = vadd.f32 %v9890_v28, %v9745_v18 }
0x3201   :  { %8366 = vtanh.f32 %v3864_v14 }
0x320b   :  { %v8367_v2 = vpop.eup %8366 }
0x320c   :  { %v3866_v15 = vmul.f32 %v8367_v2, %v8365_v45 }
0x320e   :  { %3873 = vrot.lane.b32.xlu0 %v3866_v15, %s8692_s8 }
0x3280   :  { %v3874_v4 = vpop.permute.xlu0 %3873 }
0x3281   :  { %6725 = vmatmul.mubr.msk.f32.vlgmr.msra.gmra.mrb[30].mxu0 %vm1244_vm1, %v3874_v4 }
0x3282   :  { %7365 = vmatpush1.bf16.msra.mxu0 %v9684_v61  ;;  %4046 = vmatprep.mubr.f32.mxu0 %v10829_v60 }
0x3283   :  { %7367 = vmatprep.subr.bf16.mxu0 %v9756_v22 }
0x3286   :  { %7369 = vmatpush1.bf16.msra.mxu0 %v9761_v25 }
0x3287   :  { %7371 = vmatprep.subr.bf16.mxu0 %v9790_v43 }
0x328a   :  { %7373 = vmatpush1.bf16.msra.mxu0 %v9804_v48 }
0x328b   :  { %7375 = vmatprep.subr.bf16.mxu0 %v9837_v0 }
0x328e   :  { %7377 = vmatpush1.bf16.msra.mxu0 %v9844_v3 }
0x328f   :  { %7379 = vmatprep.subr.bf16.mxu0 %v9672_v57 }
0x3354   :  { %v3943_v29 = vpop.f32.mrb[30].mxu0 }
0x3355   :  { %v7835_v36 = vadd.f32 %v7834_v50, %v3943_v29  ;;  %v3945_v63 = vpop.f32.mrb[31].mxu0 }
0x3356   :  { %v7837_v31 = vadd.f32 %v7836_v34, %v3945_v63 }
0x3357   :  { %v6726_v1 = vmul.f32 -1.442695, %v7835_v36 }
0x3358   :  { %v6727_v41 = vmul.f32 -1.442695, %v7837_v31 }
0x3359   :  { %8368 = vpow2.f32 %v6726_v1 }
0x335a   :  { %8370 = vtanh.f32 %v7837_v31 }
0x3363   :  { %v8369_v7 = vpop.eup %8368 }
0x3364   :  { %v3956_v58 = vadd.f32 1.0, %v8369_v7  ;;  %v8371_v8 = vpop.eup %8370 }
0x3366   :  { %8372 = vrcp.f32 %v3956_v58 }
0x3367   :  { %8374 = vpow2.f32 %v6727_v41 }
0x3370   :  { %v8373_v35 = vpop.eup %8372 }
0x3371   :  { %v3964_v59 = vmul.f32 %v8373_v35, %v8371_v8  ;;  %v8375_v23 = vpop.eup %8374  ;;  %v3963_v24 = vmul.f32 %v8373_v35, %v3864_v14  ;;  %v7844_v14 = vadd.f32 %v9892_v32, %v9771_v30 }
0x3372   :  { %v3957_v11 = vadd.f32 1.0, %v8375_v23 }
0x3373   :  { %3966 = vrot.lane.b32.xlu1 %v3964_v59, %s8692_s8 }
0x3374   :  { %8376 = vrcp.f32 %v3957_v11  ;;  %v7846_v11 = vadd.f32 %v9894_v33, %v9745_v18 }
0x337e   :  { %v8377_v12 = vpop.eup %8376 }
0x33e5   :  { %v3967_v37 = vpop.permute.xlu1 %3966 }
0x33e6   :  { %v3969_v17 = vadd.f32 %v3967_v37, %v3963_v24  ;;  %v10830_v24 = vld [vmem:[#allocation7_spill] sm:$0xff] }
0x33e7   :  { %v7848_v37 = vadd.f32 %v10830_v24, %v9771_v30 }
0x33e8   :  { %8378 = vtanh.f32 %v3969_v17 }
0x33f2   :  { %v8379_v19 = vpop.eup %8378 }
0x33f3   :  { %v3971_v42 = vmul.f32 %v8379_v19, %v8377_v12 }
0x33f5   :  { %3978 = vrot.lane.b32.xlu0 %v3971_v42, %s8692_s8 }
0x3467   :  { %v3979_v46 = vpop.permute.xlu0 %3978 }
0x3468   :  { %6728 = vmatmul.mubr.msk.f32.vlgmr.msra.gmra.mrb[32].mxu0 %vm1244_vm1, %v3979_v46 }
0x3469   :  { %7381 = vmatpush1.bf16.msra.mxu0 %v9684_v61  ;;  %4151 = vmatprep.mubr.f32.mxu0 %v10829_v60 }
0x346a   :  { %7383 = vmatprep.subr.bf16.mxu0 %v9756_v22 }
0x346d   :  { %7385 = vmatpush1.bf16.msra.mxu0 %v9761_v25 }
0x346e   :  { %7387 = vmatprep.subr.bf16.mxu0 %v9790_v43 }
0x3471   :  { %7389 = vmatpush1.bf16.msra.mxu0 %v9804_v48 }
0x3472   :  { %7391 = vmatprep.subr.bf16.mxu0 %v9837_v0 }
0x3475   :  { %7393 = vmatpush1.bf16.msra.mxu0 %v9844_v3 }
0x3476   :  { %7395 = vmatprep.subr.bf16.mxu0 %v9672_v57 }
0x353b   :  { %v4048_v39 = vpop.f32.mrb[32].mxu0 }
0x353c   :  { %v7839_v56 = vadd.f32 %v7838_v38, %v4048_v39  ;;  %v4050_v62 = vpop.f32.mrb[33].mxu0 }
0x353d   :  { %v7841_v5 = vadd.f32 %v7840_v55, %v4050_v62 }
0x353e   :  { %v6729_v40 = vmul.f32 -1.442695, %v7839_v56 }
0x353f   :  { %v6730_v47 = vmul.f32 -1.442695, %v7841_v5 }
0x3540   :  { %8380 = vpow2.f32 %v6729_v40 }
0x3541   :  { %8382 = vtanh.f32 %v7841_v5 }
0x354a   :  { %v8381_v6 = vpop.eup %8380 }
0x354b   :  { %v4061_v16 = vadd.f32 1.0, %v8381_v6  ;;  %v8383_v53 = vpop.eup %8382 }
0x354d   :  { %8384 = vrcp.f32 %v4061_v16 }
0x354e   :  { %8386 = vpow2.f32 %v6730_v47 }
0x3557   :  { %v8385_v44 = vpop.eup %8384 }
0x3558   :  { %v4069_v54 = vmul.f32 %v8385_v44, %v8383_v53  ;;  %v8387_v26 = vpop.eup %8386  ;;  %v4068_v27 = vmul.f32 %v8385_v44, %v3969_v17 }
0x3559   :  { %v4062_v9 = vadd.f32 1.0, %v8387_v26 }
0x355a   :  { %4071 = vrot.lane.b32.xlu1 %v4069_v54, %s8692_s8 }
0x355b   :  { %8388 = vrcp.f32 %v4062_v9  ;;  %v10831_v9 = vld [vmem:[#allocation8_spill] sm:$0xff] }
0x3565   :  { %v8389_v49 = vpop.eup %8388 }
0x35cc   :  { %v4072_v51 = vpop.permute.xlu1 %4071 }
0x35cd   :  { %v4074_v10 = vadd.f32 %v4072_v51, %v4068_v27  ;;  %v7850_v27 = vadd.f32 %v10831_v9, %v9745_v18  ;;  %v10832_v51 = vld [vmem:[#allocation9_spill] sm:$0xff] }
0x35cf   :  { %8390 = vtanh.f32 %v4074_v10 }
0x35d9   :  { %v8391_v20 = vpop.eup %8390 }
0x35da   :  { %v4076_v13 = vmul.f32 %v8391_v20, %v8389_v49 }
0x35dc   :  { %4083 = vrot.lane.b32.xlu0 %v4076_v13, %s8692_s8 }
0x364e   :  { %v4084_v21 = vpop.permute.xlu0 %4083 }
0x364f   :  { %6731 = vmatmul.mubr.msk.f32.vlgmr.msra.gmra.mrb[34].mxu0 %vm1244_vm1, %v4084_v21 }
0x3650   :  { %7397 = vmatpush1.bf16.msra.mxu0 %v9684_v61  ;;  %4256 = vmatprep.mubr.f32.mxu0 %v10829_v60 }
0x3651   :  { %7399 = vmatprep.subr.bf16.mxu0 %v9756_v22 }
0x3654   :  { %7401 = vmatpush1.bf16.msra.mxu0 %v9761_v25 }
0x3655   :  { %7403 = vmatprep.subr.bf16.mxu0 %v9790_v43 }
0x3658   :  { %7405 = vmatpush1.bf16.msra.mxu0 %v9804_v48 }
0x3659   :  { %7407 = vmatprep.subr.bf16.mxu0 %v9837_v0 }
0x365c   :  { %7409 = vmatpush1.bf16.msra.mxu0 %v9844_v3 }
0x365d   :  { %7411 = vmatprep.subr.bf16.mxu0 %v9672_v57 }
0x3722   :  { %v4153_v45 = vpop.f32.mrb[34].mxu0 }
0x3723   :  { %v7843_v2 = vadd.f32 %v7842_v52, %v4153_v45  ;;  %v4155_v15 = vpop.f32.mrb[35].mxu0 }
0x3724   :  { %v7845_v4 = vadd.f32 %v7844_v14, %v4155_v15 }
0x3725   :  { %v6732_v50 = vmul.f32 -1.442695, %v7843_v2 }
0x3726   :  { %v6733_v1 = vmul.f32 -1.442695, %v7845_v4 }
0x3727   :  { %8392 = vpow2.f32 %v6732_v50 }
0x3728   :  { %8394 = vtanh.f32 %v7845_v4 }
0x3731   :  { %v8393_v34 = vpop.eup %8392 }
0x3732   :  { %v4166_v29 = vadd.f32 1.0, %v8393_v34  ;;  %v8395_v36 = vpop.eup %8394 }
0x3734   :  { %8396 = vrcp.f32 %v4166_v29 }
0x3735   :  { %8398 = vpow2.f32 %v6733_v1 }
0x373e   :  { %v8397_v63 = vpop.eup %8396 }
0x373f   :  { %v4174_v31 = vmul.f32 %v8397_v63, %v8395_v36  ;;  %v8399_v28 = vpop.eup %8398  ;;  %v4173_v32 = vmul.f32 %v8397_v63, %v4074_v10  ;;  %v7852_v10 = vadd.f32 %v10832_v51, %v9771_v30 }
0x3740   :  { %v4167_v7 = vadd.f32 1.0, %v8399_v28 }
0x3741   :  { %4176 = vrot.lane.b32.xlu1 %v4174_v31, %s8692_s8 }
0x3742   :  { %8400 = vrcp.f32 %v4167_v7 }
0x374c   :  { %v8401_v35 = vpop.eup %8400 }
0x37b3   :  { %v4177_v58 = vpop.permute.xlu1 %4176 }
0x37b4   :  { %v4179_v8 = vadd.f32 %v4177_v58, %v4173_v32  ;;  %v10833_v58 = vld [vmem:[#allocation10_spill] sm:$0xff] }
0x37b6   :  { %8402 = vtanh.f32 %v4179_v8 }
0x37c0   :  { %v8403_v59 = vpop.eup %8402 }
0x37c1   :  { %v4181_v41 = vmul.f32 %v8403_v59, %v8401_v35  ;;  %v10834_v35 = vld [vmem:[#allocation11_spill] sm:$0xff] }
0x37c2   :  { %v7856_v59 = vadd.f32 %v10834_v35, %v9771_v30 }
0x37c3   :  { %4188 = vrot.lane.b32.xlu0 %v4181_v41, %s8692_s8 }
0x3835   :  { %v4189_v23 = vpop.permute.xlu0 %4188 }
0x3836   :  { %6734 = vmatmul.mubr.msk.f32.vlgmr.msra.gmra.mrb[36].mxu0 %vm1244_vm1, %v4189_v23 }
0x3837   :  { %7413 = vmatpush1.bf16.msra.mxu0 %v9684_v61  ;;  %4361 = vmatprep.mubr.f32.mxu0 %v10829_v60 }
0x3838   :  { %7415 = vmatprep.subr.bf16.mxu0 %v9756_v22 }
0x383b   :  { %7417 = vmatpush1.bf16.msra.mxu0 %v9761_v25 }
0x383c   :  { %7419 = vmatprep.subr.bf16.mxu0 %v9790_v43 }
0x383f   :  { %7421 = vmatpush1.bf16.msra.mxu0 %v9804_v48 }
0x3840   :  { %7423 = vmatprep.subr.bf16.mxu0 %v9837_v0 }
0x3843   :  { %7425 = vmatpush1.bf16.msra.mxu0 %v9844_v3 }
0x3844   :  { %7427 = vmatprep.subr.bf16.mxu0 %v9672_v57 }
0x3909   :  { %v4258_v17 = vpop.f32.mrb[36].mxu0 }
0x390a   :  { %v7847_v12 = vadd.f32 %v7846_v11, %v4258_v17  ;;  %v4260_v19 = vpop.f32.mrb[37].mxu0 }
0x390b   :  { %v7849_v42 = vadd.f32 %v7848_v37, %v4260_v19 }
0x390c   :  { %v6735_v46 = vmul.f32 -1.442695, %v7847_v12 }
0x390d   :  { %v6736_v5 = vmul.f32 -1.442695, %v7849_v42 }
0x390e   :  { %8404 = vpow2.f32 %v6735_v46 }
0x390f   :  { %8406 = vtanh.f32 %v7849_v42 }
0x3918   :  { %v8405_v38 = vpop.eup %8404 }
0x3919   :  { %v4271_v55 = vadd.f32 1.0, %v8405_v38  ;;  %v8407_v39 = vpop.eup %8406 }
0x391b   :  { %8408 = vrcp.f32 %v4271_v55 }
0x391c   :  { %8410 = vpow2.f32 %v6736_v5 }
0x3925   :  { %v8409_v56 = vpop.eup %8408 }
0x3926   :  { %v4279_v62 = vmul.f32 %v8409_v56, %v8407_v39  ;;  %v8411_v33 = vpop.eup %8410  ;;  %v4278_v6 = vmul.f32 %v8409_v56, %v4179_v8  ;;  %v7854_v8 = vadd.f32 %v10833_v58, %v9745_v18 }
0x3927   :  { %v4272_v40 = vadd.f32 1.0, %v8411_v33 }
0x3928   :  { %4281 = vrot.lane.b32.xlu1 %v4279_v62, %s8692_s8 }
0x3929   :  { %8412 = vrcp.f32 %v4272_v40 }
0x3933   :  { %v8413_v44 = vpop.eup %8412 }
0x399a   :  { %v4282_v16 = vpop.permute.xlu1 %4281 }
0x399b   :  { %v4284_v53 = vadd.f32 %v4282_v16, %v4278_v6 }
0x399d   :  { %8414 = vtanh.f32 %v4284_v53 }
0x39a7   :  { %v8415_v54 = vpop.eup %8414 }
0x39a8   :  { %v4286_v47 = vmul.f32 %v8415_v54, %v8413_v44  ;;  %v10836_v54 = vld [vmem:[#allocation13_spill] sm:$0xff] }
0x39aa   :  { %4293 = vrot.lane.b32.xlu0 %v4286_v47, %s8692_s8  ;;  %v7860_v47 = vadd.f32 %v10836_v54, %v9771_v30 }
0x3a1c   :  { %v4294_v26 = vpop.permute.xlu0 %4293 }
0x3a1d   :  { %6737 = vmatmul.mubr.msk.f32.vlgmr.msra.gmra.mrb[38].mxu0 %vm1244_vm1, %v4294_v26 }
0x3a1e   :  { %7429 = vmatpush1.bf16.msra.mxu0 %v9684_v61  ;;  %4466 = vmatprep.mubr.f32.mxu0 %v10829_v60 }
0x3a1f   :  { %7431 = vmatprep.subr.bf16.mxu0 %v9756_v22 }
0x3a22   :  { %7433 = vmatpush1.bf16.msra.mxu0 %v9761_v25 }
0x3a23   :  { %7435 = vmatprep.subr.bf16.mxu0 %v9790_v43 }
0x3a26   :  { %7437 = vmatpush1.bf16.msra.mxu0 %v9804_v48 }
0x3a27   :  { %7439 = vmatprep.subr.bf16.mxu0 %v9837_v0 }
0x3a2a   :  { %7441 = vmatpush1.bf16.msra.mxu0 %v9844_v3 }
0x3a2b   :  { %7443 = vmatprep.subr.bf16.mxu0 %v9672_v57 }
0x3af0   :  { %v4363_v49 = vpop.f32.mrb[38].mxu0 }
0x3af1   :  { %v7851_v20 = vadd.f32 %v7850_v27, %v4363_v49  ;;  %v4365_v13 = vpop.f32.mrb[39].mxu0 }
0x3af2   :  { %v7853_v21 = vadd.f32 %v7852_v10, %v4365_v13 }
0x3af3   :  { %v6738_v52 = vmul.f32 -1.442695, %v7851_v20 }
0x3af4   :  { %v6739_v50 = vmul.f32 -1.442695, %v7853_v21 }
0x3af5   :  { %8416 = vpow2.f32 %v6738_v52 }
0x3af6   :  { %8418 = vtanh.f32 %v7853_v21 }
0x3aff   :  { %v8417_v14 = vpop.eup %8416 }
0x3b00   :  { %v4376_v45 = vadd.f32 1.0, %v8417_v14  ;;  %v8419_v2 = vpop.eup %8418 }
0x3b02   :  { %8420 = vrcp.f32 %v4376_v45 }
0x3b03   :  { %8422 = vpow2.f32 %v6739_v50 }
0x3b0c   :  { %v8421_v15 = vpop.eup %8420 }
0x3b0d   :  { %v4384_v4 = vmul.f32 %v8421_v15, %v8419_v2  ;;  %v8423_v34 = vpop.eup %8422  ;;  %v4383_v36 = vmul.f32 %v8421_v15, %v4284_v53  ;;  %v10835_v53 = vld [vmem:[#allocation12_spill] sm:$0xff] }
0x3b0e   :  { %v4377_v29 = vadd.f32 1.0, %v8423_v34  ;;  %v7858_v44 = vadd.f32 %v10835_v53, %v9745_v18 }
0x3b0f   :  { %4386 = vrot.lane.b32.xlu1 %v4384_v4, %s8692_s8 }
0x3b10   :  { %8424 = vrcp.f32 %v4377_v29 }
0x3b1a   :  { %v8425_v1 = vpop.eup %8424 }
0x3b81   :  { %v4387_v63 = vpop.permute.xlu1 %4386 }
0x3b82   :  { %v4389_v31 = vadd.f32 %v4387_v63, %v4383_v36 }
0x3b84   :  { %8426 = vtanh.f32 %v4389_v31 }
0x3b8e   :  { %v8427_v28 = vpop.eup %8426 }
0x3b8f   :  { %v4391_v7 = vmul.f32 %v8427_v28, %v8425_v1  ;;  %v10838_v28 = vld [vmem:[#allocation15_spill] sm:$0xff] }
0x3b91   :  { %4398 = vrot.lane.b32.xlu0 %v4391_v7, %s8692_s8  ;;  %v7864_v7 = vadd.f32 %v10838_v28, %v9771_v30 }
0x3c03   :  { %v4399_v32 = vpop.permute.xlu0 %4398 }
0x3c04   :  { %6740 = vmatmul.mubr.msk.f32.vlgmr.msra.gmra.mrb[40].mxu0 %vm1244_vm1, %v4399_v32 }
0x3c05   :  { %7445 = vmatpush1.bf16.msra.mxu0 %v9684_v61  ;;  %4571 = vmatprep.mubr.f32.mxu0 %v10829_v60 }
0x3c06   :  { %7447 = vmatprep.subr.bf16.mxu0 %v9756_v22 }
0x3c09   :  { %7449 = vmatpush1.bf16.msra.mxu0 %v9761_v25 }
0x3c0a   :  { %7451 = vmatprep.subr.bf16.mxu0 %v9790_v43 }
0x3c0d   :  { %7453 = vmatpush1.bf16.msra.mxu0 %v9804_v48 }
0x3c0e   :  { %7455 = vmatprep.subr.bf16.mxu0 %v9837_v0 }
0x3c11   :  { %7457 = vmatpush1.bf16.msra.mxu0 %v9844_v3 }
0x3c12   :  { %7459 = vmatprep.subr.bf16.mxu0 %v9672_v57 }
0x3cd7   :  { %v4468_v41 = vpop.f32.mrb[40].mxu0 }
0x3cd8   :  { %v7855_v23 = vadd.f32 %v7854_v8, %v4468_v41  ;;  %v4470_v11 = vpop.f32.mrb[41].mxu0 }
0x3cd9   :  { %v7857_v24 = vadd.f32 %v7856_v59, %v4470_v11 }
0x3cda   :  { %v6741_v37 = vmul.f32 -1.442695, %v7855_v23 }
0x3cdb   :  { %v6742_v38 = vmul.f32 -1.442695, %v7857_v24 }
0x3cdc   :  { %8428 = vpow2.f32 %v6741_v37 }
0x3cdd   :  { %8430 = vtanh.f32 %v7857_v24 }
0x3ce6   :  { %v8429_v17 = vpop.eup %8428 }
0x3ce7   :  { %v4481_v12 = vadd.f32 1.0, %v8429_v17  ;;  %v8431_v19 = vpop.eup %8430 }
0x3ce9   :  { %8432 = vrcp.f32 %v4481_v12 }
0x3cea   :  { %8434 = vpow2.f32 %v6742_v38 }
0x3cf3   :  { %v8433_v42 = vpop.eup %8432 }
0x3cf4   :  { %v4489_v46 = vmul.f32 %v8433_v42, %v8431_v19  ;;  %v8435_v55 = vpop.eup %8434  ;;  %v4488_v56 = vmul.f32 %v8433_v42, %v4389_v31  ;;  %v10837_v31 = vld [vmem:[#allocation14_spill] sm:$0xff] }
0x3cf5   :  { %v4482_v39 = vadd.f32 1.0, %v8435_v55  ;;  %v7862_v1 = vadd.f32 %v10837_v31, %v9745_v18 }
0x3cf6   :  { %4491 = vrot.lane.b32.xlu1 %v4489_v46, %s8692_s8 }
0x3cf7   :  { %8436 = vrcp.f32 %v4482_v39 }
0x3d01   :  { %v8437_v33 = vpop.eup %8436 }
0x3d68   :  { %v4492_v62 = vpop.permute.xlu1 %4491 }
0x3d69   :  { %v4494_v5 = vadd.f32 %v4492_v62, %v4488_v56 }
0x3d6b   :  { %8438 = vtanh.f32 %v4494_v5 }
0x3d75   :  { %v8439_v40 = vpop.eup %8438 }
0x3d76   :  { %v4496_v6 = vmul.f32 %v8439_v40, %v8437_v33  ;;  %v10840_v40 = vld [vmem:[#allocation17_spill] sm:$0xff] }
0x3d78   :  { %4503 = vrot.lane.b32.xlu0 %v4496_v6, %s8692_s8  ;;  %v7868_v6 = vadd.f32 %v10840_v40, %v9771_v30 }
0x3dea   :  { %v4504_v16 = vpop.permute.xlu0 %4503 }
0x3deb   :  { %6743 = vmatmul.mubr.msk.f32.vlgmr.msra.gmra.mrb[42].mxu0 %vm1244_vm1, %v4504_v16 }
0x3dec   :  { %7461 = vmatpush1.bf16.msra.mxu0 %v9684_v61  ;;  %4676 = vmatprep.mubr.f32.mxu0 %v10829_v60 }
0x3ded   :  { %7463 = vmatprep.subr.bf16.mxu0 %v9756_v22 }
0x3df0   :  { %7465 = vmatpush1.bf16.msra.mxu0 %v9761_v25 }
0x3df1   :  { %7467 = vmatprep.subr.bf16.mxu0 %v9790_v43 }
0x3df4   :  { %7469 = vmatpush1.bf16.msra.mxu0 %v9804_v48 }
0x3df5   :  { %7471 = vmatprep.subr.bf16.mxu0 %v9837_v0 }
0x3df8   :  { %7473 = vmatpush1.bf16.msra.mxu0 %v9844_v3 }
0x3df9   :  { %7475 = vmatprep.subr.bf16.mxu0 %v9672_v57 }
0x3ebe   :  { %v4573_v26 = vpop.f32.mrb[42].mxu0 }
0x3ebf   :  { %v7859_v9 = vadd.f32 %v7858_v44, %v4573_v26  ;;  %v4575_v27 = vpop.f32.mrb[43].mxu0 }
0x3ec0   :  { %v7861_v51 = vadd.f32 %v7860_v47, %v4575_v27 }
0x3ec1   :  { %v6744_v10 = vmul.f32 -1.442695, %v7859_v9 }
0x3ec2   :  { %v6745_v14 = vmul.f32 -1.442695, %v7861_v51 }
0x3ec3   :  { %8440 = vpow2.f32 %v6744_v10 }
0x3ec4   :  { %8442 = vtanh.f32 %v7861_v51 }
0x3ecd   :  { %v8441_v49 = vpop.eup %8440 }
0x3ece   :  { %v4586_v20 = vadd.f32 1.0, %v8441_v49  ;;  %v8443_v13 = vpop.eup %8442 }
0x3ed0   :  { %8444 = vrcp.f32 %v4586_v20 }
0x3ed1   :  { %8446 = vpow2.f32 %v6745_v14 }
0x3eda   :  { %v8445_v21 = vpop.eup %8444 }
0x3edb   :  { %v4594_v52 = vmul.f32 %v8445_v21, %v8443_v13  ;;  %v8447_v45 = vpop.eup %8446  ;;  %v4593_v15 = vmul.f32 %v8445_v21, %v4494_v5  ;;  %v10839_v5 = vld [vmem:[#allocation16_spill] sm:$0xff] }
0x3edc   :  { %v4587_v2 = vadd.f32 1.0, %v8447_v45  ;;  %v7866_v33 = vadd.f32 %v10839_v5, %v9745_v18 }
0x3edd   :  { %4596 = vrot.lane.b32.xlu1 %v4594_v52, %s8692_s8 }
0x3ede   :  { %8448 = vrcp.f32 %v4587_v2 }
0x3ee8   :  { %v8449_v34 = vpop.eup %8448 }
0x3f4f   :  { %v4597_v4 = vpop.permute.xlu1 %4596 }
0x3f50   :  { %v4599_v50 = vadd.f32 %v4597_v4, %v4593_v15 }
0x3f52   :  { %8450 = vtanh.f32 %v4599_v50 }
0x3f5c   :  { %v8451_v29 = vpop.eup %8450 }
0x3f5d   :  { %v4601_v36 = vmul.f32 %v8451_v29, %v8449_v34  ;;  %v10842_v29 = vld [vmem:[#allocation19_spill] sm:$0xff] }
0x3f5f   :  { %4608 = vrot.lane.b32.xlu0 %v4601_v36, %s8692_s8  ;;  %v7872_v36 = vadd.f32 %v10842_v29, %v9771_v30 }
0x3fd1   :  { %v4609_v63 = vpop.permute.xlu0 %4608 }
0x3fd2   :  { %6746 = vmatmul.mubr.msk.f32.vlgmr.msra.gmra.mrb[44].mxu0 %vm1244_vm1, %v4609_v63 }
0x3fd3   :  { %7477 = vmatpush1.bf16.msra.mxu0 %v9684_v61  ;;  %4781 = vmatprep.mubr.f32.mxu0 %v10829_v60 }
0x3fd4   :  { %7479 = vmatprep.subr.bf16.mxu0 %v9756_v22 }
0x3fd7   :  { %7481 = vmatpush1.bf16.msra.mxu0 %v9761_v25 }
0x3fd8   :  { %7483 = vmatprep.subr.bf16.mxu0 %v9790_v43 }
0x3fdb   :  { %7485 = vmatpush1.bf16.msra.mxu0 %v9804_v48 }
0x3fdc   :  { %7487 = vmatprep.subr.bf16.mxu0 %v9837_v0 }
0x3fdf   :  { %7489 = vmatpush1.bf16.msra.mxu0 %v9844_v3 }
0x3fe0   :  { %7491 = vmatprep.subr.bf16.mxu0 %v9672_v57 }
0x40a5   :  { %v4678_v32 = vpop.f32.mrb[44].mxu0 }
0x40a6   :  { %v7863_v58 = vadd.f32 %v7862_v1, %v4678_v32  ;;  %v4680_v8 = vpop.f32.mrb[45].mxu0 }
0x40a7   :  { %v7865_v35 = vadd.f32 %v7864_v7, %v4680_v8 }
0x40a8   :  { %v6747_v59 = vmul.f32 -1.442695, %v7863_v58 }
0x40a9   :  { %v6748_v17 = vmul.f32 -1.442695, %v7865_v35 }
0x40aa   :  { %8452 = vpow2.f32 %v6747_v59 }
0x40ab   :  { %8454 = vtanh.f32 %v7865_v35 }
0x40b4   :  { %v8453_v41 = vpop.eup %8452 }
0x40b5   :  { %v4691_v23 = vadd.f32 1.0, %v8453_v41  ;;  %v8455_v11 = vpop.eup %8454 }
0x40b7   :  { %8456 = vrcp.f32 %v4691_v23 }
0x40b8   :  { %8458 = vpow2.f32 %v6748_v17 }
0x40c1   :  { %v8457_v24 = vpop.eup %8456 }
0x40c2   :  { %v4699_v37 = vmul.f32 %v8457_v24, %v8455_v11  ;;  %v8459_v12 = vpop.eup %8458  ;;  %v4698_v42 = vmul.f32 %v8457_v24, %v4599_v50  ;;  %v10841_v50 = vld [vmem:[#allocation18_spill] sm:$0xff] }
0x40c3   :  { %v4692_v19 = vadd.f32 1.0, %v8459_v12  ;;  %v7870_v34 = vadd.f32 %v10841_v50, %v9745_v18 }
0x40c4   :  { %4701 = vrot.lane.b32.xlu1 %v4699_v37, %s8692_s8 }
0x40c5   :  { %8460 = vrcp.f32 %v4692_v19 }
0x40cf   :  { %v8461_v55 = vpop.eup %8460 }
0x4136   :  { %v4702_v46 = vpop.permute.xlu1 %4701 }
0x4137   :  { %v4704_v38 = vadd.f32 %v4702_v46, %v4698_v42 }
0x4139   :  { %8462 = vtanh.f32 %v4704_v38 }
0x4143   :  { %v8463_v39 = vpop.eup %8462 }
0x4144   :  { %v4706_v56 = vmul.f32 %v8463_v39, %v8461_v55  ;;  %v10844_v39 = vld [vmem:[#allocation21_spill] sm:$0xff] }
0x4146   :  { %4713 = vrot.lane.b32.xlu0 %v4706_v56, %s8692_s8  ;;  %v7876_v56 = vadd.f32 %v10844_v39, %v9771_v30 }
0x41b8   :  { %v4714_v62 = vpop.permute.xlu0 %4713 }
0x41b9   :  { %6749 = vmatmul.mubr.msk.f32.vlgmr.msra.gmra.mrb[46].mxu0 %vm1244_vm1, %v4714_v62 }
0x41ba   :  { %7493 = vmatpush1.bf16.msra.mxu0 %v9684_v61  ;;  %4886 = vmatprep.mubr.f32.mxu0 %v10829_v60 }
0x41bb   :  { %7495 = vmatprep.subr.bf16.mxu0 %v9756_v22 }
0x41be   :  { %7497 = vmatpush1.bf16.msra.mxu0 %v9761_v25 }
0x41bf   :  { %7499 = vmatprep.subr.bf16.mxu0 %v9790_v43 }
0x41c2   :  { %7501 = vmatpush1.bf16.msra.mxu0 %v9804_v48 }
0x41c3   :  { %7503 = vmatprep.subr.bf16.mxu0 %v9837_v0 }
0x41c6   :  { %7505 = vmatpush1.bf16.msra.mxu0 %v9844_v3 }
0x41c7   :  { %7507 = vmatprep.subr.bf16.mxu0 %v9672_v57 }
0x428c   :  { %v4783_v16 = vpop.f32.mrb[46].mxu0 }
0x428d   :  { %v7867_v53 = vadd.f32 %v7866_v33, %v4783_v16  ;;  %v4785_v44 = vpop.f32.mrb[47].mxu0 }
0x428e   :  { %v7869_v54 = vadd.f32 %v7868_v6, %v4785_v44 }
0x428f   :  { %v6750_v47 = vmul.f32 -1.442695, %v7867_v53 }
0x4290   :  { %v6751_v49 = vmul.f32 -1.442695, %v7869_v54 }
0x4291   :  { %8464 = vpow2.f32 %v6750_v47 }
0x4292   :  { %8466 = vtanh.f32 %v7869_v54 }
0x429b   :  { %v8465_v26 = vpop.eup %8464 }
0x429c   :  { %v4796_v9 = vadd.f32 1.0, %v8465_v26  ;;  %v8467_v27 = vpop.eup %8466 }
0x429e   :  { %8468 = vrcp.f32 %v4796_v9 }
0x429f   :  { %8470 = vpow2.f32 %v6751_v49 }
0x42a8   :  { %v8469_v51 = vpop.eup %8468 }
0x42a9   :  { %v4804_v10 = vmul.f32 %v8469_v51, %v8467_v27  ;;  %v8471_v20 = vpop.eup %8470  ;;  %v4803_v21 = vmul.f32 %v8469_v51, %v4704_v38  ;;  %v10843_v38 = vld [vmem:[#allocation20_spill] sm:$0xff] }
0x42aa   :  { %v4797_v13 = vadd.f32 1.0, %v8471_v20  ;;  %v7874_v55 = vadd.f32 %v10843_v38, %v9745_v18 }
0x42ab   :  { %4806 = vrot.lane.b32.xlu1 %v4804_v10, %s8692_s8 }
0x42ac   :  { %8472 = vrcp.f32 %v4797_v13 }
0x42b6   :  { %v8473_v45 = vpop.eup %8472 }
0x431d   :  { %v4807_v52 = vpop.permute.xlu1 %4806 }
0x431e   :  { %v4809_v14 = vadd.f32 %v4807_v52, %v4803_v21 }
0x4320   :  { %8474 = vtanh.f32 %v4809_v14 }
0x432a   :  { %v8475_v2 = vpop.eup %8474 }
0x432b   :  { %v4811_v15 = vmul.f32 %v8475_v2, %v8473_v45  ;;  %v10846_v2 = vld [vmem:[#allocation23_spill] sm:$0xff] }
0x432d   :  { %4818 = vrot.lane.b32.xlu0 %v4811_v15, %s8692_s8  ;;  %v7880_v15 = vadd.f32 %v10846_v2, %v9771_v30 }
0x439f   :  { %v4819_v4 = vpop.permute.xlu0 %4818 }
0x43a0   :  { %6752 = vmatmul.mubr.msk.f32.vlgmr.msra.gmra.mrb[48].mxu0 %vm1244_vm1, %v4819_v4 }
0x43a1   :  { %7509 = vmatpush1.bf16.msra.mxu0 %v9684_v61  ;;  %4991 = vmatprep.mubr.f32.mxu0 %v10829_v60 }
0x43a2   :  { %7511 = vmatprep.subr.bf16.mxu0 %v9756_v22 }
0x43a5   :  { %7513 = vmatpush1.bf16.msra.mxu0 %v9761_v25 }
0x43a6   :  { %7515 = vmatprep.subr.bf16.mxu0 %v9790_v43 }
0x43a9   :  { %7517 = vmatpush1.bf16.msra.mxu0 %v9804_v48 }
0x43aa   :  { %7519 = vmatprep.subr.bf16.mxu0 %v9837_v0 }
0x43ad   :  { %7521 = vmatpush1.bf16.msra.mxu0 %v9844_v3 }
0x43ae   :  { %7523 = vmatprep.subr.bf16.mxu0 %v9672_v57 }
0x4473   :  { %v4888_v63 = vpop.f32.mrb[48].mxu0 }
0x4474   :  { %v7871_v31 = vadd.f32 %v7870_v34, %v4888_v63  ;;  %v4890_v1 = vpop.f32.mrb[49].mxu0 }
0x4475   :  { %v7873_v28 = vadd.f32 %v7872_v36, %v4890_v1 }
0x4476   :  { %v6753_v7 = vmul.f32 -1.442695, %v7871_v31 }
0x4477   :  { %v6754_v41 = vmul.f32 -1.442695, %v7873_v28 }
0x4478   :  { %8476 = vpow2.f32 %v6753_v7 }
0x4479   :  { %8478 = vtanh.f32 %v7873_v28 }
0x4482   :  { %v8477_v32 = vpop.eup %8476 }
0x4483   :  { %v4901_v58 = vadd.f32 1.0, %v8477_v32  ;;  %v8479_v8 = vpop.eup %8478 }
0x4485   :  { %8480 = vrcp.f32 %v4901_v58 }
0x4486   :  { %8482 = vpow2.f32 %v6754_v41 }
0x448f   :  { %v8481_v35 = vpop.eup %8480 }
0x4490   :  { %v4909_v59 = vmul.f32 %v8481_v35, %v8479_v8  ;;  %v8483_v23 = vpop.eup %8482  ;;  %v4908_v24 = vmul.f32 %v8481_v35, %v4809_v14  ;;  %v10845_v14 = vld [vmem:[#allocation22_spill] sm:$0xff] }
0x4491   :  { %v4902_v11 = vadd.f32 1.0, %v8483_v23  ;;  %v7878_v45 = vadd.f32 %v10845_v14, %v9745_v18 }
0x4492   :  { %4911 = vrot.lane.b32.xlu1 %v4909_v59, %s8692_s8 }
0x4493   :  { %8484 = vrcp.f32 %v4902_v11 }
0x449d   :  { %v8485_v12 = vpop.eup %8484 }
0x4504   :  { %v4912_v37 = vpop.permute.xlu1 %4911 }
0x4505   :  { %v4914_v17 = vadd.f32 %v4912_v37, %v4908_v24 }
0x4507   :  { %8486 = vtanh.f32 %v4914_v17 }
0x4511   :  { %v8487_v19 = vpop.eup %8486 }
0x4512   :  { %v4916_v42 = vmul.f32 %v8487_v19, %v8485_v12  ;;  %v10848_v19 = vld [vmem:[#allocation25_spill] sm:$0xff] }
0x4514   :  { %4923 = vrot.lane.b32.xlu0 %v4916_v42, %s8692_s8  ;;  %v7884_v42 = vadd.f32 %v10848_v19, %v9771_v30 }
0x4586   :  { %v4924_v46 = vpop.permute.xlu0 %4923 }
0x4587   :  { %6755 = vmatmul.mubr.msk.f32.vlgmr.msra.gmra.mrb[50].mxu0 %vm1244_vm1, %v4924_v46 }
0x4588   :  { %7525 = vmatpush1.bf16.msra.mxu0 %v9684_v61  ;;  %5096 = vmatprep.mubr.f32.mxu0 %v10829_v60 }
0x4589   :  { %7527 = vmatprep.subr.bf16.mxu0 %v9756_v22 }
0x458c   :  { %7529 = vmatpush1.bf16.msra.mxu0 %v9761_v25 }
0x458d   :  { %7531 = vmatprep.subr.bf16.mxu0 %v9790_v43 }
0x4590   :  { %7533 = vmatpush1.bf16.msra.mxu0 %v9804_v48 }
0x4591   :  { %7535 = vmatprep.subr.bf16.mxu0 %v9837_v0 }
0x4594   :  { %7537 = vmatpush1.bf16.msra.mxu0 %v9844_v3 }
0x4595   :  { %7539 = vmatprep.subr.bf16.mxu0 %v9672_v57 }
0x465a   :  { %v4993_v62 = vpop.f32.mrb[50].mxu0 }
0x465b   :  { %v7875_v5 = vadd.f32 %v7874_v55, %v4993_v62  ;;  %v4995_v33 = vpop.f32.mrb[51].mxu0 }
0x465c   :  { %v7877_v40 = vadd.f32 %v7876_v56, %v4995_v33 }
0x465d   :  { %v6756_v6 = vmul.f32 -1.442695, %v7875_v5 }
0x465e   :  { %v6757_v26 = vmul.f32 -1.442695, %v7877_v40 }
0x465f   :  { %8488 = vpow2.f32 %v6756_v6 }
0x4660   :  { %8490 = vtanh.f32 %v7877_v40 }
0x4669   :  { %v8489_v16 = vpop.eup %8488 }
0x466a   :  { %v5006_v53 = vadd.f32 1.0, %v8489_v16  ;;  %v8491_v44 = vpop.eup %8490 }
0x466c   :  { %8492 = vrcp.f32 %v5006_v53 }
0x466d   :  { %8494 = vpow2.f32 %v6757_v26 }
0x4676   :  { %v8493_v54 = vpop.eup %8492 }
0x4677   :  { %v5014_v47 = vmul.f32 %v8493_v54, %v8491_v44  ;;  %v8495_v9 = vpop.eup %8494  ;;  %v5013_v51 = vmul.f32 %v8493_v54, %v4914_v17  ;;  %v10847_v17 = vld [vmem:[#allocation24_spill] sm:$0xff] }
0x4678   :  { %v5007_v27 = vadd.f32 1.0, %v8495_v9  ;;  %v7882_v12 = vadd.f32 %v10847_v17, %v9745_v18 }
0x4679   :  { %5016 = vrot.lane.b32.xlu1 %v5014_v47, %s8692_s8 }
0x467a   :  { %8496 = vrcp.f32 %v5007_v27 }
0x4684   :  { %v8497_v20 = vpop.eup %8496 }
0x46eb   :  { %v5017_v10 = vpop.permute.xlu1 %5016 }
0x46ec   :  { %v5019_v49 = vadd.f32 %v5017_v10, %v5013_v51 }
0x46ee   :  { %8498 = vtanh.f32 %v5019_v49 }
0x46f8   :  { %v8499_v13 = vpop.eup %8498 }
0x46f9   :  { %v5021_v21 = vmul.f32 %v8499_v13, %v8497_v20  ;;  %v10850_v13 = vld [vmem:[#allocation27_spill] sm:$0xff] }
0x46fb   :  { %5028 = vrot.lane.b32.xlu0 %v5021_v21, %s8692_s8  ;;  %v7888_v21 = vadd.f32 %v10850_v13, %v9771_v30 }
0x476d   :  { %v5029_v52 = vpop.permute.xlu0 %5028 }
0x476e   :  { %6758 = vmatmul.mubr.msk.f32.vlgmr.msra.gmra.mrb[52].mxu0 %vm1244_vm1, %v5029_v52 }
0x476f   :  { %7541 = vmatpush1.bf16.msra.mxu0 %v9684_v61  ;;  %5201 = vmatprep.mubr.f32.mxu0 %v10829_v60 }
0x4770   :  { %7543 = vmatprep.subr.bf16.mxu0 %v9756_v22 }
0x4773   :  { %7545 = vmatpush1.bf16.msra.mxu0 %v9761_v25 }
0x4774   :  { %7547 = vmatprep.subr.bf16.mxu0 %v9790_v43 }
0x4777   :  { %7549 = vmatpush1.bf16.msra.mxu0 %v9804_v48 }
0x4778   :  { %7551 = vmatprep.subr.bf16.mxu0 %v9837_v0 }
0x477b   :  { %7553 = vmatpush1.bf16.msra.mxu0 %v9844_v3 }
0x477c   :  { %7555 = vmatprep.subr.bf16.mxu0 %v9672_v57 }
0x4841   :  { %v5098_v4 = vpop.f32.mrb[52].mxu0 }
0x4842   :  { %v7879_v50 = vadd.f32 %v7878_v45, %v5098_v4  ;;  %v5100_v34 = vpop.f32.mrb[53].mxu0 }
0x4843   :  { %v7881_v29 = vadd.f32 %v7880_v15, %v5100_v34 }
0x4844   :  { %v6759_v36 = vmul.f32 -1.442695, %v7879_v50 }
0x4845   :  { %v6760_v32 = vmul.f32 -1.442695, %v7881_v29 }
0x4846   :  { %8500 = vpow2.f32 %v6759_v36 }
0x4847   :  { %8502 = vtanh.f32 %v7881_v29 }
0x4850   :  { %v8501_v63 = vpop.eup %8500 }
0x4851   :  { %v5111_v31 = vadd.f32 1.0, %v8501_v63  ;;  %v8503_v1 = vpop.eup %8502 }
0x4853   :  { %8504 = vrcp.f32 %v5111_v31 }
0x4854   :  { %8506 = vpow2.f32 %v6760_v32 }
0x485d   :  { %v8505_v28 = vpop.eup %8504 }
0x485e   :  { %v5119_v7 = vmul.f32 %v8505_v28, %v8503_v1  ;;  %v8507_v58 = vpop.eup %8506  ;;  %v5118_v35 = vmul.f32 %v8505_v28, %v5019_v49  ;;  %v10849_v49 = vld [vmem:[#allocation26_spill] sm:$0xff] }
0x485f   :  { %v5112_v8 = vadd.f32 1.0, %v8507_v58  ;;  %v7886_v20 = vadd.f32 %v10849_v49, %v9745_v18 }
0x4860   :  { %5121 = vrot.lane.b32.xlu1 %v5119_v7, %s8692_s8 }
0x4861   :  { %8508 = vrcp.f32 %v5112_v8 }
0x486b   :  { %v8509_v23 = vpop.eup %8508 }
0x48d2   :  { %v5122_v59 = vpop.permute.xlu1 %5121 }
0x48d3   :  { %v5124_v41 = vadd.f32 %v5122_v59, %v5118_v35 }
0x48d5   :  { %8510 = vtanh.f32 %v5124_v41 }
0x48df   :  { %v8511_v11 = vpop.eup %8510 }
0x48e0   :  { %v5126_v24 = vmul.f32 %v8511_v11, %v8509_v23  ;;  %v10852_v11 = vld [vmem:[#allocation29_spill] sm:$0xff] }
0x48e2   :  { %5133 = vrot.lane.b32.xlu0 %v5126_v24, %s8692_s8  ;;  %v7892_v24 = vadd.f32 %v10852_v11, %v9771_v30 }
0x4954   :  { %v5134_v37 = vpop.permute.xlu0 %5133 }
0x4955   :  { %6761 = vmatmul.mubr.msk.f32.vlgmr.msra.gmra.mrb[54].mxu0 %vm1244_vm1, %v5134_v37 }
0x4956   :  { %7557 = vmatpush1.bf16.msra.mxu0 %v9684_v61  ;;  %5306 = vmatprep.mubr.f32.mxu0 %v10829_v60 }
0x4957   :  { %7559 = vmatprep.subr.bf16.mxu0 %v9756_v22 }
0x495a   :  { %7561 = vmatpush1.bf16.msra.mxu0 %v9761_v25 }
0x495b   :  { %7563 = vmatprep.subr.bf16.mxu0 %v9790_v43 }
0x495e   :  { %7565 = vmatpush1.bf16.msra.mxu0 %v9804_v48 }
0x495f   :  { %7567 = vmatprep.subr.bf16.mxu0 %v9837_v0 }
0x4962   :  { %7569 = vmatpush1.bf16.msra.mxu0 %v9844_v3 }
0x4963   :  { %7571 = vmatprep.subr.bf16.mxu0 %v9672_v57 }
0x4a28   :  { %v5203_v46 = vpop.f32.mrb[54].mxu0 }
0x4a29   :  { %v7883_v38 = vadd.f32 %v7882_v12, %v5203_v46  ;;  %v5205_v55 = vpop.f32.mrb[55].mxu0 }
0x4a2a   :  { %v7885_v39 = vadd.f32 %v7884_v42, %v5205_v55 }
0x4a2b   :  { %v6762_v56 = vmul.f32 -1.442695, %v7883_v38 }
0x4a2c   :  { %v6763_v16 = vmul.f32 -1.442695, %v7885_v39 }
0x4a2d   :  { %8512 = vpow2.f32 %v6762_v56 }
0x4a2e   :  { %8514 = vtanh.f32 %v7885_v39 }
0x4a37   :  { %v8513_v62 = vpop.eup %8512 }
0x4a38   :  { %v5216_v5 = vadd.f32 1.0, %v8513_v62  ;;  %v8515_v33 = vpop.eup %8514 }
0x4a3a   :  { %8516 = vrcp.f32 %v5216_v5 }
0x4a3b   :  { %8518 = vpow2.f32 %v6763_v16 }
0x4a44   :  { %v8517_v40 = vpop.eup %8516 }
0x4a45   :  { %v5224_v6 = vmul.f32 %v8517_v40, %v8515_v33  ;;  %v8519_v53 = vpop.eup %8518  ;;  %v5223_v54 = vmul.f32 %v8517_v40, %v5124_v41  ;;  %v10851_v41 = vld [vmem:[#allocation28_spill] sm:$0xff] }
0x4a46   :  { %v5217_v44 = vadd.f32 1.0, %v8519_v53  ;;  %v7890_v23 = vadd.f32 %v10851_v41, %v9745_v18 }
0x4a47   :  { %5226 = vrot.lane.b32.xlu1 %v5224_v6, %s8692_s8 }
0x4a48   :  { %8520 = vrcp.f32 %v5217_v44 }
0x4a52   :  { %v8521_v9 = vpop.eup %8520 }
0x4ab9   :  { %v5227_v47 = vpop.permute.xlu1 %5226 }
0x4aba   :  { %v5229_v26 = vadd.f32 %v5227_v47, %v5223_v54 }
0x4abc   :  { %8522 = vtanh.f32 %v5229_v26 }
0x4ac6   :  { %v8523_v27 = vpop.eup %8522 }
0x4ac7   :  { %v5231_v51 = vmul.f32 %v8523_v27, %v8521_v9  ;;  %v10854_v27 = vld [vmem:[#allocation31_spill] sm:$0xff] }
0x4ac9   :  { %5238 = vrot.lane.b32.xlu0 %v5231_v51, %s8692_s8  ;;  %v7896_v51 = vadd.f32 %v10854_v27, %v9771_v30 }
0x4b3b   :  { %v5239_v10 = vpop.permute.xlu0 %5238 }
0x4b3c   :  { %6764 = vmatmul.mubr.msk.f32.vlgmr.msra.gmra.mrb[56].mxu0 %vm1244_vm1, %v5239_v10 }
0x4b3d   :  { %7573 = vmatpush1.bf16.msra.mxu0 %v9684_v61  ;;  %5411 = vmatprep.mubr.f32.mxu0 %v10829_v60 }
0x4b3e   :  { %7575 = vmatprep.subr.bf16.mxu0 %v9756_v22 }
0x4b41   :  { %7577 = vmatpush1.bf16.msra.mxu0 %v9761_v25 }
0x4b42   :  { %7579 = vmatprep.subr.bf16.mxu0 %v9790_v43 }
0x4b45   :  { %7581 = vmatpush1.bf16.msra.mxu0 %v9804_v48 }
0x4b46   :  { %7583 = vmatprep.subr.bf16.mxu0 %v9837_v0 }
0x4b49   :  { %7585 = vmatpush1.bf16.msra.mxu0 %v9844_v3 }
0x4b4a   :  { %7587 = vmatprep.subr.bf16.mxu0 %v9672_v57 }
0x4c0f   :  { %v5308_v52 = vpop.f32.mrb[56].mxu0 }
0x4c10   :  { %v7887_v14 = vadd.f32 %v7886_v20, %v5308_v52  ;;  %v5310_v45 = vpop.f32.mrb[57].mxu0 }
0x4c11   :  { %v7889_v2 = vadd.f32 %v7888_v21, %v5310_v45 }
0x4c12   :  { %v6765_v15 = vmul.f32 -1.442695, %v7887_v14 }
0x4c13   :  { %v6766_v63 = vmul.f32 -1.442695, %v7889_v2 }
0x4c14   :  { %8524 = vpow2.f32 %v6765_v15 }
0x4c15   :  { %8526 = vtanh.f32 %v7889_v2 }
0x4c1e   :  { %v8525_v4 = vpop.eup %8524 }
0x4c1f   :  { %v5321_v50 = vadd.f32 1.0, %v8525_v4  ;;  %v8527_v34 = vpop.eup %8526 }
0x4c21   :  { %8528 = vrcp.f32 %v5321_v50 }
0x4c22   :  { %8530 = vpow2.f32 %v6766_v63 }
0x4c2b   :  { %v8529_v29 = vpop.eup %8528 }
0x4c2c   :  { %v5329_v36 = vmul.f32 %v8529_v29, %v8527_v34  ;;  %v8531_v31 = vpop.eup %8530  ;;  %v5328_v28 = vmul.f32 %v8529_v29, %v5229_v26  ;;  %v10853_v26 = vld [vmem:[#allocation30_spill] sm:$0xff] }
0x4c2d   :  { %v5322_v1 = vadd.f32 1.0, %v8531_v31  ;;  %v7894_v9 = vadd.f32 %v10853_v26, %v9745_v18 }
0x4c2e   :  { %5331 = vrot.lane.b32.xlu1 %v5329_v36, %s8692_s8 }
0x4c2f   :  { %8532 = vrcp.f32 %v5322_v1 }
0x4c39   :  { %v8533_v58 = vpop.eup %8532 }
0x4ca0   :  { %v5332_v7 = vpop.permute.xlu1 %5331 }
0x4ca1   :  { %v5334_v32 = vadd.f32 %v5332_v7, %v5328_v28 }
0x4ca3   :  { %8534 = vtanh.f32 %v5334_v32 }
0x4cad   :  { %v8535_v8 = vpop.eup %8534 }
0x4cae   :  { %v5336_v35 = vmul.f32 %v8535_v8, %v8533_v58  ;;  %v10856_v8 = vld [vmem:[#allocation33_spill] sm:$0xff] }
0x4cb0   :  { %5343 = vrot.lane.b32.xlu0 %v5336_v35, %s8692_s8  ;;  %v7900_v35 = vadd.f32 %v10856_v8, %v9771_v30 }
0x4d22   :  { %v5344_v59 = vpop.permute.xlu0 %5343 }
0x4d23   :  { %6767 = vmatmul.mubr.msk.f32.vlgmr.msra.gmra.mrb[58].mxu0 %vm1244_vm1, %v5344_v59 }
0x4d24   :  { %7589 = vmatpush1.bf16.msra.mxu0 %v9684_v61  ;;  %5516 = vmatprep.mubr.f32.mxu0 %v10829_v60 }
0x4d25   :  { %7591 = vmatprep.subr.bf16.mxu0 %v9756_v22 }
0x4d28   :  { %7593 = vmatpush1.bf16.msra.mxu0 %v9761_v25 }
0x4d29   :  { %7595 = vmatprep.subr.bf16.mxu0 %v9790_v43 }
0x4d2c   :  { %7597 = vmatpush1.bf16.msra.mxu0 %v9804_v48 }
0x4d2d   :  { %7599 = vmatprep.subr.bf16.mxu0 %v9837_v0 }
0x4d30   :  { %7601 = vmatpush1.bf16.msra.mxu0 %v9844_v3 }
0x4d31   :  { %7603 = vmatprep.subr.bf16.mxu0 %v9672_v57 }
0x4df6   :  { %v5413_v37 = vpop.f32.mrb[58].mxu0 }
0x4df7   :  { %v7891_v17 = vadd.f32 %v7890_v23, %v5413_v37  ;;  %v5415_v12 = vpop.f32.mrb[59].mxu0 }
0x4df8   :  { %v7893_v19 = vadd.f32 %v7892_v24, %v5415_v12 }
0x4df9   :  { %v6768_v42 = vmul.f32 -1.442695, %v7891_v17 }
0x4dfa   :  { %v6769_v62 = vmul.f32 -1.442695, %v7893_v19 }
0x4dfb   :  { %8536 = vpow2.f32 %v6768_v42 }
0x4dfc   :  { %8538 = vtanh.f32 %v7893_v19 }
0x4e05   :  { %v8537_v46 = vpop.eup %8536 }
0x4e06   :  { %v5426_v38 = vadd.f32 1.0, %v8537_v46  ;;  %v8539_v55 = vpop.eup %8538 }
0x4e08   :  { %8540 = vrcp.f32 %v5426_v38 }
0x4e09   :  { %8542 = vpow2.f32 %v6769_v62 }
0x4e12   :  { %v8541_v39 = vpop.eup %8540 }
0x4e13   :  { %v5434_v56 = vmul.f32 %v8541_v39, %v8539_v55  ;;  %v8543_v5 = vpop.eup %8542  ;;  %v5433_v40 = vmul.f32 %v8541_v39, %v5334_v32  ;;  %v10855_v32 = vld [vmem:[#allocation32_spill] sm:$0xff] }
0x4e14   :  { %v5427_v33 = vadd.f32 1.0, %v8543_v5  ;;  %v7898_v58 = vadd.f32 %v10855_v32, %v9745_v18 }
0x4e15   :  { %5436 = vrot.lane.b32.xlu1 %v5434_v56, %s8692_s8 }
0x4e16   :  { %8544 = vrcp.f32 %v5427_v33 }
0x4e20   :  { %v8545_v53 = vpop.eup %8544 }
0x4e87   :  { %v5437_v6 = vpop.permute.xlu1 %5436 }
0x4e88   :  { %v5439_v16 = vadd.f32 %v5437_v6, %v5433_v40 }
0x4e8a   :  { %8546 = vtanh.f32 %v5439_v16 }
0x4e94   :  { %v8547_v44 = vpop.eup %8546 }
0x4e95   :  { %v5441_v54 = vmul.f32 %v8547_v44, %v8545_v53  ;;  %v10858_v44 = vld [vmem:[#allocation35_spill] sm:$0xff] }
0x4e97   :  { %5448 = vrot.lane.b32.xlu0 %v5441_v54, %s8692_s8  ;;  %v7904_v54 = vadd.f32 %v10858_v44, %v9771_v30 }
0x4f09   :  { %v5449_v47 = vpop.permute.xlu0 %5448 }
0x4f0a   :  { %6770 = vmatmul.mubr.msk.f32.vlgmr.msra.gmra.mrb[60].mxu0 %vm1244_vm1, %v5449_v47 }
0x4f0b   :  { %7605 = vmatpush1.bf16.msra.mxu0 %v9684_v61  ;;  %5621 = vmatprep.mubr.f32.mxu0 %v10829_v60 }
0x4f0c   :  { %7607 = vmatprep.subr.bf16.mxu0 %v9756_v22 }
0x4f0f   :  { %7609 = vmatpush1.bf16.msra.mxu0 %v9761_v25 }
0x4f10   :  { %7611 = vmatprep.subr.bf16.mxu0 %v9790_v43 }
0x4f13   :  { %7613 = vmatpush1.bf16.msra.mxu0 %v9804_v48 }
0x4f14   :  { %7615 = vmatprep.subr.bf16.mxu0 %v9837_v0 }
0x4f17   :  { %7617 = vmatpush1.bf16.msra.mxu0 %v9844_v3 }
0x4f18   :  { %7619 = vmatprep.subr.bf16.mxu0 %v9672_v57 }
0x4fdd   :  { %v5518_v10 = vpop.f32.mrb[60].mxu0 }
0x4fde   :  { %v7895_v49 = vadd.f32 %v7894_v9, %v5518_v10  ;;  %v5520_v20 = vpop.f32.mrb[61].mxu0 }
0x4fdf   :  { %v7897_v13 = vadd.f32 %v7896_v51, %v5520_v20 }
0x4fe0   :  { %v6771_v21 = vmul.f32 -1.442695, %v7895_v49 }
0x4fe1   :  { %v6772_v4 = vmul.f32 -1.442695, %v7897_v13 }
0x4fe2   :  { %8548 = vpow2.f32 %v6771_v21 }
0x4fe3   :  { %8550 = vtanh.f32 %v7897_v13 }
0x4fec   :  { %v8549_v52 = vpop.eup %8548 }
0x4fed   :  { %v5531_v14 = vadd.f32 1.0, %v8549_v52  ;;  %v8551_v45 = vpop.eup %8550 }
0x4fef   :  { %8552 = vrcp.f32 %v5531_v14 }
0x4ff0   :  { %8554 = vpow2.f32 %v6772_v4 }
0x4ff9   :  { %v8553_v2 = vpop.eup %8552 }
0x4ffa   :  { %v5539_v15 = vmul.f32 %v8553_v2, %v8551_v45  ;;  %v8555_v50 = vpop.eup %8554  ;;  %v5538_v29 = vmul.f32 %v8553_v2, %v5439_v16  ;;  %v10857_v16 = vld [vmem:[#allocation34_spill] sm:$0xff] }
0x4ffb   :  { %v5532_v34 = vadd.f32 1.0, %v8555_v50  ;;  %v7902_v53 = vadd.f32 %v10857_v16, %v9745_v18 }
0x4ffc   :  { %5541 = vrot.lane.b32.xlu1 %v5539_v15, %s8692_s8 }
0x4ffd   :  { %8556 = vrcp.f32 %v5532_v34 }
0x5007   :  { %v8557_v31 = vpop.eup %8556 }
0x506e   :  { %v5542_v36 = vpop.permute.xlu1 %5541 }
0x506f   :  { %v5544_v63 = vadd.f32 %v5542_v36, %v5538_v29 }
0x5071   :  { %8558 = vtanh.f32 %v5544_v63 }
0x507b   :  { %v8559_v1 = vpop.eup %8558 }
0x507c   :  { %v5546_v28 = vmul.f32 %v8559_v1, %v8557_v31  ;;  %v10860_v1 = vld [vmem:[#allocation37_spill] sm:$0xff] }
0x507e   :  { %5553 = vrot.lane.b32.xlu0 %v5546_v28, %s8692_s8  ;;  %v7908_v28 = vadd.f32 %v10860_v1, %v9771_v30 }
0x50f0   :  { %v5554_v7 = vpop.permute.xlu0 %5553 }
0x50f1   :  { %6773 = vmatmul.mubr.msk.f32.vlgmr.msra.gmra.mrb[62].mxu0 %vm1244_vm1, %v5554_v7 }
0x50f2   :  { %7621 = vmatpush1.bf16.msra.mxu0 %v9684_v61  ;;  %5726 = vmatprep.mubr.f32.mxu0 %v10829_v60 }
0x50f3   :  { %7623 = vmatprep.subr.bf16.mxu0 %v9756_v22 }
0x50f6   :  { %7625 = vmatpush1.bf16.msra.mxu0 %v9761_v25 }
0x50f7   :  { %7627 = vmatprep.subr.bf16.mxu0 %v9790_v43 }
0x50fa   :  { %7629 = vmatpush1.bf16.msra.mxu0 %v9804_v48 }
0x50fb   :  { %7631 = vmatprep.subr.bf16.mxu0 %v9837_v0 }
0x50fe   :  { %7633 = vmatpush1.bf16.msra.mxu0 %v9844_v3 }
0x50ff   :  { %7635 = vmatprep.subr.bf16.mxu0 %v9672_v57 }
0x51c4   :  { %v5623_v59 = vpop.f32.mrb[62].mxu0 }
0x51c5   :  { %v7899_v41 = vadd.f32 %v7898_v58, %v5623_v59  ;;  %v5625_v23 = vpop.f32.mrb[63].mxu0 }
0x51c6   :  { %v7901_v11 = vadd.f32 %v7900_v35, %v5625_v23 }
0x51c7   :  { %v6774_v24 = vmul.f32 -1.442695, %v7899_v41 }
0x51c8   :  { %v6775_v46 = vmul.f32 -1.442695, %v7901_v11 }
0x51c9   :  { %8560 = vpow2.f32 %v6774_v24 }
0x51ca   :  { %8562 = vtanh.f32 %v7901_v11 }
0x51d3   :  { %v8561_v37 = vpop.eup %8560 }
0x51d4   :  { %v5636_v17 = vadd.f32 1.0, %v8561_v37  ;;  %v8563_v12 = vpop.eup %8562 }
0x51d6   :  { %8564 = vrcp.f32 %v5636_v17 }
0x51d7   :  { %8566 = vpow2.f32 %v6775_v46 }
0x51e0   :  { %v8565_v19 = vpop.eup %8564 }
0x51e1   :  { %v5644_v42 = vmul.f32 %v8565_v19, %v8563_v12  ;;  %v8567_v38 = vpop.eup %8566  ;;  %v5643_v39 = vmul.f32 %v8565_v19, %v5544_v63  ;;  %v10859_v63 = vld [vmem:[#allocation36_spill] sm:$0xff] }
0x51e2   :  { %v5637_v55 = vadd.f32 1.0, %v8567_v38  ;;  %v7906_v31 = vadd.f32 %v10859_v63, %v9745_v18 }
0x51e3   :  { %5646 = vrot.lane.b32.xlu1 %v5644_v42, %s8692_s8 }
0x51e4   :  { %8568 = vrcp.f32 %v5637_v55 }
0x51ee   :  { %v8569_v5 = vpop.eup %8568 }
0x5255   :  { %v5647_v56 = vpop.permute.xlu1 %5646 }
0x5256   :  { %v5649_v62 = vadd.f32 %v5647_v56, %v5643_v39 }
0x5258   :  { %8570 = vtanh.f32 %v5649_v62 }
0x5262   :  { %v8571_v33 = vpop.eup %8570 }
0x5263   :  { %v5651_v40 = vmul.f32 %v8571_v33, %v8569_v5  ;;  %v10862_v33 = vld [vmem:[#allocation39_spill] sm:$0xff] }
0x5265   :  { %5658 = vrot.lane.b32.xlu0 %v5651_v40, %s8692_s8  ;;  %v7912_v40 = vadd.f32 %v10862_v33, %v9771_v30 }
0x52d7   :  { %v5659_v6 = vpop.permute.xlu0 %5658 }
0x52d8   :  { %6776 = vmatmul.mubr.msk.f32.vlgmr.msra.gmra.mrb[64].mxu0 %vm1244_vm1, %v5659_v6 }
0x52d9   :  { %7637 = vmatpush1.bf16.msra.mxu0 %v9684_v61  ;;  %5831 = vmatprep.mubr.f32.mxu0 %v10829_v60 }
0x52da   :  { %7639 = vmatprep.subr.bf16.mxu0 %v9756_v22 }
0x52dd   :  { %7641 = vmatpush1.bf16.msra.mxu0 %v9761_v25 }
0x52de   :  { %7643 = vmatprep.subr.bf16.mxu0 %v9790_v43 }
0x52e1   :  { %7645 = vmatpush1.bf16.msra.mxu0 %v9804_v48 }
0x52e2   :  { %7647 = vmatprep.subr.bf16.mxu0 %v9837_v0 }
0x52e5   :  { %7649 = vmatpush1.bf16.msra.mxu0 %v9844_v3 }
0x52e6   :  { %7651 = vmatprep.subr.bf16.mxu0 %v9672_v57 }
0x53ab   :  { %v5728_v47 = vpop.f32.mrb[64].mxu0 }
0x53ac   :  { %v7903_v26 = vadd.f32 %v7902_v53, %v5728_v47  ;;  %v5730_v9 = vpop.f32.mrb[65].mxu0 }
0x53ad   :  { %v7905_v27 = vadd.f32 %v7904_v54, %v5730_v9 }
0x53ae   :  { %v6777_v51 = vmul.f32 -1.442695, %v7903_v26 }
0x53af   :  { %v6778_v52 = vmul.f32 -1.442695, %v7905_v27 }
0x53b0   :  { %8572 = vpow2.f32 %v6777_v51 }
0x53b1   :  { %8574 = vtanh.f32 %v7905_v27 }
0x53ba   :  { %v8573_v10 = vpop.eup %8572 }
0x53bb   :  { %v5741_v49 = vadd.f32 1.0, %v8573_v10  ;;  %v8575_v20 = vpop.eup %8574 }
0x53bd   :  { %8576 = vrcp.f32 %v5741_v49 }
0x53be   :  { %8578 = vpow2.f32 %v6778_v52 }
0x53c7   :  { %v8577_v13 = vpop.eup %8576 }
0x53c8   :  { %v5749_v21 = vmul.f32 %v8577_v13, %v8575_v20  ;;  %v8579_v14 = vpop.eup %8578  ;;  %v5748_v2 = vmul.f32 %v8577_v13, %v5649_v62  ;;  %v10861_v62 = vld [vmem:[#allocation38_spill] sm:$0xff] }
0x53c9   :  { %v5742_v45 = vadd.f32 1.0, %v8579_v14  ;;  %v7910_v5 = vadd.f32 %v10861_v62, %v9745_v18 }
0x53ca   :  { %5751 = vrot.lane.b32.xlu1 %v5749_v21, %s8692_s8 }
0x53cb   :  { %8580 = vrcp.f32 %v5742_v45 }
0x53d5   :  { %v8581_v50 = vpop.eup %8580 }
0x543c   :  { %v5752_v15 = vpop.permute.xlu1 %5751 }
0x543d   :  { %v5754_v4 = vadd.f32 %v5752_v15, %v5748_v2 }
0x543f   :  { %8582 = vtanh.f32 %v5754_v4 }
0x5449   :  { %v8583_v34 = vpop.eup %8582 }
0x544a   :  { %v5756_v29 = vmul.f32 %v8583_v34, %v8581_v50  ;;  %v10864_v34 = vld [vmem:[#allocation41_spill] sm:$0xff] }
0x544c   :  { %5763 = vrot.lane.b32.xlu0 %v5756_v29, %s8692_s8  ;;  %v7916_v29 = vadd.f32 %v10864_v34, %v9771_v30 }
0x54be   :  { %v5764_v36 = vpop.permute.xlu0 %5763 }
0x54bf   :  { %6779 = vmatmul.mubr.msk.f32.vlgmr.msra.gmra.mrb[66].mxu0 %vm1244_vm1, %v5764_v36 }
0x54c0   :  { %7653 = vmatpush1.bf16.msra.mxu0 %v9684_v61  ;;  %5936 = vmatprep.mubr.f32.mxu0 %v10829_v60 }
0x54c1   :  { %7655 = vmatprep.subr.bf16.mxu0 %v9756_v22 }
0x54c4   :  { %7657 = vmatpush1.bf16.msra.mxu0 %v9761_v25 }
0x54c5   :  { %7659 = vmatprep.subr.bf16.mxu0 %v9790_v43 }
0x54c8   :  { %7661 = vmatpush1.bf16.msra.mxu0 %v9804_v48 }
0x54c9   :  { %7663 = vmatprep.subr.bf16.mxu0 %v9837_v0 }
0x54cc   :  { %7665 = vmatpush1.bf16.msra.mxu0 %v9844_v3 }
0x54cd   :  { %7667 = vmatprep.subr.bf16.mxu0 %v9672_v57 }
0x5592   :  { %v5833_v7 = vpop.f32.mrb[66].mxu0 }
0x5593   :  { %v7907_v32 = vadd.f32 %v7906_v31, %v5833_v7  ;;  %v5835_v58 = vpop.f32.mrb[67].mxu0 }
0x5594   :  { %v7909_v8 = vadd.f32 %v7908_v28, %v5835_v58 }
0x5595   :  { %v6780_v35 = vmul.f32 -1.442695, %v7907_v32 }
0x5596   :  { %v6781_v37 = vmul.f32 -1.442695, %v7909_v8 }
0x5597   :  { %8584 = vpow2.f32 %v6780_v35 }
0x5598   :  { %8586 = vtanh.f32 %v7909_v8 }
0x55a1   :  { %v8585_v59 = vpop.eup %8584 }
0x55a2   :  { %v5846_v41 = vadd.f32 1.0, %v8585_v59  ;;  %v8587_v23 = vpop.eup %8586 }
0x55a4   :  { %8588 = vrcp.f32 %v5846_v41 }
0x55a5   :  { %8590 = vpow2.f32 %v6781_v37 }
0x55ae   :  { %v8589_v11 = vpop.eup %8588 }
0x55af   :  { %v5854_v24 = vmul.f32 %v8589_v11, %v8587_v23  ;;  %v8591_v17 = vpop.eup %8590  ;;  %v5853_v19 = vmul.f32 %v8589_v11, %v5754_v4  ;;  %v10863_v4 = vld [vmem:[#allocation40_spill] sm:$0xff] }
0x55b0   :  { %v5847_v12 = vadd.f32 1.0, %v8591_v17  ;;  %v7914_v50 = vadd.f32 %v10863_v4, %v9745_v18 }
0x55b1   :  { %5856 = vrot.lane.b32.xlu1 %v5854_v24, %s8692_s8 }
0x55b2   :  { %8592 = vrcp.f32 %v5847_v12 }
0x55bc   :  { %v8593_v38 = vpop.eup %8592 }
0x5623   :  { %v5857_v42 = vpop.permute.xlu1 %5856 }
0x5624   :  { %v5859_v46 = vadd.f32 %v5857_v42, %v5853_v19 }
0x5626   :  { %8594 = vtanh.f32 %v5859_v46 }
0x5630   :  { %v8595_v55 = vpop.eup %8594 }
0x5631   :  { %v5861_v39 = vmul.f32 %v8595_v55, %v8593_v38  ;;  %v10866_v55 = vld [vmem:[#allocation43_spill] sm:$0xff] }
0x5633   :  { %5868 = vrot.lane.b32.xlu0 %v5861_v39, %s8692_s8  ;;  %v7920_v39 = vadd.f32 %v10866_v55, %v9771_v30 }
0x56a5   :  { %v5869_v56 = vpop.permute.xlu0 %5868 }
0x56a6   :  { %6782 = vmatmul.mubr.msk.f32.vlgmr.msra.gmra.mrb[68].mxu0 %vm1244_vm1, %v5869_v56 }
0x56a7   :  { %7669 = vmatpush1.bf16.msra.mxu0 %v9684_v61  ;;  %6041 = vmatprep.mubr.f32.mxu0 %v10829_v60 }
0x56a8   :  { %7671 = vmatprep.subr.bf16.mxu0 %v9756_v22 }
0x56ab   :  { %7673 = vmatpush1.bf16.msra.mxu0 %v9761_v25 }
0x56ac   :  { %7675 = vmatprep.subr.bf16.mxu0 %v9790_v43 }
0x56af   :  { %7677 = vmatpush1.bf16.msra.mxu0 %v9804_v48 }
0x56b0   :  { %7679 = vmatprep.subr.bf16.mxu0 %v9837_v0 }
0x56b3   :  { %7681 = vmatpush1.bf16.msra.mxu0 %v9844_v3 }
0x56b4   :  { %7683 = vmatprep.subr.bf16.mxu0 %v9672_v57 }
0x5779   :  { %v5938_v6 = vpop.f32.mrb[68].mxu0 }
0x577a   :  { %v7911_v16 = vadd.f32 %v7910_v5, %v5938_v6  ;;  %v5940_v53 = vpop.f32.mrb[69].mxu0 }
0x577b   :  { %v7913_v44 = vadd.f32 %v7912_v40, %v5940_v53 }
0x577c   :  { %v6783_v54 = vmul.f32 -1.442695, %v7911_v16 }
0x577d   :  { %v6784_v10 = vmul.f32 -1.442695, %v7913_v44 }
0x577e   :  { %8596 = vpow2.f32 %v6783_v54 }
0x577f   :  { %8598 = vtanh.f32 %v7913_v44 }
0x5788   :  { %v8597_v47 = vpop.eup %8596 }
0x5789   :  { %v5951_v26 = vadd.f32 1.0, %v8597_v47  ;;  %v8599_v9 = vpop.eup %8598 }
0x578b   :  { %8600 = vrcp.f32 %v5951_v26 }
0x578c   :  { %8602 = vpow2.f32 %v6784_v10 }
0x5795   :  { %v8601_v27 = vpop.eup %8600 }
0x5796   :  { %v5959_v51 = vmul.f32 %v8601_v27, %v8599_v9  ;;  %v8603_v49 = vpop.eup %8602  ;;  %v5958_v13 = vmul.f32 %v8601_v27, %v5859_v46  ;;  %v10865_v46 = vld [vmem:[#allocation42_spill] sm:$0xff] }
0x5797   :  { %v5952_v20 = vadd.f32 1.0, %v8603_v49  ;;  %v7918_v38 = vadd.f32 %v10865_v46, %v9745_v18 }
0x5798   :  { %5961 = vrot.lane.b32.xlu1 %v5959_v51, %s8692_s8 }
0x5799   :  { %8604 = vrcp.f32 %v5952_v20 }
0x57a3   :  { %v8605_v14 = vpop.eup %8604 }
0x580a   :  { %v5962_v21 = vpop.permute.xlu1 %5961 }
0x580b   :  { %v5964_v52 = vadd.f32 %v5962_v21, %v5958_v13  ;;  %v10867_v21 = vld [vmem:[#allocation44_spill] sm:$0xff] }
0x580d   :  { %8606 = vtanh.f32 %v5964_v52 }
0x5817   :  { %v8607_v45 = vpop.eup %8606 }
0x5818   :  { %v5966_v2 = vmul.f32 %v8607_v45, %v8605_v14  ;;  %v10868_v14 = vld [vmem:[#allocation45_spill] sm:$0xff] }
0x581a   :  { %5973 = vrot.lane.b32.xlu0 %v5966_v2, %s8692_s8 }
0x588c   :  { %v5974_v15 = vpop.permute.xlu0 %5973 }
0x588d   :  { %6785 = vmatmul.mubr.msk.f32.vlgmr.msra.gmra.mrb[70].mxu0 %vm1244_vm1, %v5974_v15 }
0x588e   :  { %7685 = vmatpush1.bf16.msra.mxu0 %v9684_v61  ;;  %6146 = vmatprep.mubr.f32.mxu0 %v10829_v60 }
0x588f   :  { %7687 = vmatprep.subr.bf16.mxu0 %v9756_v22 }
0x5892   :  { %7689 = vmatpush1.bf16.msra.mxu0 %v9761_v25 }
0x5893   :  { %7691 = vmatprep.subr.bf16.mxu0 %v9790_v43 }
0x5896   :  { %7693 = vmatpush1.bf16.msra.mxu0 %v9804_v48 }
0x5897   :  { %7695 = vmatprep.subr.bf16.mxu0 %v9837_v0 }
0x589a   :  { %7697 = vmatpush1.bf16.msra.mxu0 %v9844_v3 }
0x589b   :  { %7699 = vmatprep.subr.bf16.mxu0 %v9672_v57 }
0x5960   :  { %v6043_v36 = vpop.f32.mrb[70].mxu0 }
0x5961   :  { %v7915_v63 = vadd.f32 %v7914_v50, %v6043_v36  ;;  %v6045_v31 = vpop.f32.mrb[71].mxu0 }
0x5962   :  { %v7917_v1 = vadd.f32 %v7916_v29, %v6045_v31 }
0x5963   :  { %v6786_v28 = vmul.f32 -1.442695, %v7915_v63 }
0x5964   :  { %v6787_v59 = vmul.f32 -1.442695, %v7917_v1 }
0x5965   :  { %8608 = vpow2.f32 %v6786_v28 }
0x5966   :  { %8610 = vtanh.f32 %v7917_v1 }
0x596f   :  { %v8609_v7 = vpop.eup %8608 }
0x5970   :  { %v6056_v32 = vadd.f32 1.0, %v8609_v7  ;;  %v8611_v58 = vpop.eup %8610 }
0x5972   :  { %8612 = vrcp.f32 %v6056_v32 }
0x5973   :  { %8614 = vpow2.f32 %v6787_v59 }
0x597c   :  { %v8613_v8 = vpop.eup %8612 }
0x597d   :  { %v6064_v35 = vmul.f32 %v8613_v8, %v8611_v58  ;;  %v8615_v41 = vpop.eup %8614  ;;  %v6063_v11 = vmul.f32 %v8613_v8, %v5964_v52  ;;  %v7922_v52 = vadd.f32 %v10867_v21, %v9745_v18  ;;  %v10869_v58 = vld [vmem:[#allocation46_spill] sm:$0xff] }
0x597e   :  { %v6057_v23 = vadd.f32 1.0, %v8615_v41  ;;  %v7926_v8 = vadd.f32 %v10869_v58, %v9745_v18 }
0x597f   :  { %6066 = vrot.lane.b32.xlu1 %v6064_v35, %s8692_s8  ;;  %v10870_v35 = vld [vmem:[#allocation47_spill] sm:$0xff] }
0x5980   :  { %8616 = vrcp.f32 %v6057_v23  ;;  %v7928_v59 = vadd.f32 %v10870_v35, %v9771_v30 }
0x598a   :  { %v8617_v17 = vpop.eup %8616 }
0x59f1   :  { %v6067_v24 = vpop.permute.xlu1 %6066 }
0x59f2   :  { %v6069_v37 = vadd.f32 %v6067_v24, %v6063_v11 }
0x59f4   :  { %8618 = vtanh.f32 %v6069_v37 }
0x59fe   :  { %v8619_v12 = vpop.eup %8618 }
0x59ff   :  { %v6071_v19 = vmul.f32 %v8619_v12, %v8617_v17 }
0x5a01   :  { %6078 = vrot.lane.b32.xlu0 %v6071_v19, %s8692_s8 }
0x5a73   :  { %v6079_v42 = vpop.permute.xlu0 %6078 }
0x5a74   :  { %6788 = vmatmul.mubr.msk.f32.vlgmr.msra.gmra.mrb[72].mxu0 %vm1244_vm1, %v6079_v42 }
0x5a75   :  { %7701 = vmatpush1.bf16.msra.mxu0 %v9684_v61  ;;  %6251 = vmatprep.mubr.f32.mxu0 %v10829_v60 }
0x5a76   :  { %7703 = vmatprep.subr.bf16.mxu0 %v9756_v22 }
0x5a79   :  { %7705 = vmatpush1.bf16.msra.mxu0 %v9761_v25 }
0x5a7a   :  { %7707 = vmatprep.subr.bf16.mxu0 %v9790_v43 }
0x5a7d   :  { %7709 = vmatpush1.bf16.msra.mxu0 %v9804_v48 }
0x5a7e   :  { %7711 = vmatprep.subr.bf16.mxu0 %v9837_v0 }
0x5a81   :  { %7713 = vmatpush1.bf16.msra.mxu0 %v9844_v3 }
0x5a82   :  { %7715 = vmatprep.subr.bf16.mxu0 %v9672_v57 }
0x5b47   :  { %v6148_v56 = vpop.f32.mrb[72].mxu0 }
0x5b48   :  { %v7919_v62 = vadd.f32 %v7918_v38, %v6148_v56  ;;  %v6150_v5 = vpop.f32.mrb[73].mxu0 }
0x5b49   :  { %v7921_v33 = vadd.f32 %v7920_v39, %v6150_v5 }
0x5b4a   :  { %v6789_v40 = vmul.f32 -1.442695, %v7919_v62 }
0x5b4b   :  { %v6790_v57 = vmul.f32 -1.442695, %v7921_v33 }
0x5b4c   :  { %8620 = vpow2.f32 %v6789_v40 }
0x5b4d   :  { %8622 = vtanh.f32 %v7921_v33 }
0x5b56   :  { %v8621_v6 = vpop.eup %8620 }
0x5b57   :  { %v6161_v16 = vadd.f32 1.0, %v8621_v6  ;;  %v8623_v53 = vpop.eup %8622  ;;  %v6387_v6 = vld [vmem:[%s10777_s3] sm:$0x3] }
0x5b59   :  { %8624 = vrcp.f32 %v6161_v16  ;;  %v10871_v16 = vld [vmem:[#allocation6_spill] sm:$0xff] }
0x5b5a   :  { %8626 = vpow2.f32 %v6790_v57 }
0x5b63   :  { %v8625_v44 = vpop.eup %8624 }
0x5b64   :  { %v6169_v54 = vmul.f32 %v8625_v44, %v8623_v53  ;;  %v8627_v47 = vpop.eup %8626  ;;  %v6168_v9 = vmul.f32 %v8625_v44, %v6069_v37  ;;  %v10872_v53 = vsub.s32 0, %v10871_v16 }
0x5b65   :  { %v6162_v26 = vadd.f32 1.0, %v8627_v47 }
0x5b66   :  { %6171 = vrot.lane.b32.xlu1 %v6169_v54, %s8692_s8  ;;  %v6392_v44 = vrot.slane %v6387_v6, %v10872_v53 }
0x5b67   :  { %8628 = vrcp.f32 %v6162_v26 }
0x5b71   :  { %v8629_v10 = vpop.eup %8628 }
0x5bd8   :  { %v6172_v27 = vpop.permute.xlu1 %6171 }
0x5bd9   :  { %v6174_v51 = vadd.f32 %v6172_v27, %v6168_v9  ;;  %v10873_v9 = vsub.s32 1, %v10871_v16 }
0x5bdb   :  { %8630 = vtanh.f32 %v6174_v51  ;;  %v6396_v27 = vrot.slane %v6387_v6, %v10873_v9 }
0x5be5   :  { %v8631_v49 = vpop.eup %8630 }
0x5be6   :  { %v6176_v20 = vmul.f32 %v8631_v49, %v8629_v10 }
0x5be8   :  { %6183 = vrot.lane.b32.xlu0 %v6176_v20, %s8692_s8 }
0x5c5a   :  { %v6184_v13 = vpop.permute.xlu0 %6183 }
0x5c5b   :  { %6791 = vmatmul.mubr.msk.f32.vlgmr.msra.gmra.mrb[74].mxu0 %vm1244_vm1, %v6184_v13 }
0x5c5c   :  { %7717 = vmatpush1.bf16.msra.mxu0 %v9684_v61  ;;  %6356 = vmatprep.mubr.f32.mxu0 %v10829_v60  ;;  %v7924_v61 = vadd.f32 %v10868_v14, %v9771_v30  ;;  %v6498_v14 = vld [vmem:[%s10778_s4 + $0x8] sm:$0xff] }
0x5c5d   :  { %7719 = vmatprep.subr.bf16.mxu0 %v9756_v22 }
0x5c60   :  { %7721 = vmatpush1.bf16.msra.mxu0 %v9761_v25 }
0x5c61   :  { %7723 = vmatprep.subr.bf16.mxu0 %v9790_v43 }
0x5c64   :  { %7725 = vmatpush1.bf16.msra.mxu0 %v9804_v48 }
0x5c65   :  { %7727 = vmatprep.subr.bf16.mxu0 %v9837_v0 }
0x5c68   :  { %7729 = vmatpush1.bf16.msra.mxu0 %v9844_v3 }
0x5d2e   :  { %v6253_v45 = vpop.f32.mrb[74].mxu0 }
0x5d2f   :  { %v7923_v2 = vadd.f32 %v7922_v52, %v6253_v45  ;;  %v6255_v15 = vpop.f32.mrb[75].mxu0  ;;  %v6497_v52 = vld [vmem:[%s10778_s4] sm:$0xff]  ;;  %v8694_v45 = vmov 0.0|0.0  }
0x5d30   :  { %v7925_v22 = vadd.f32 %v7924_v61, %v6255_v15  ;;  %v6499_v61 = vld [vmem:[%s10778_s4 + $0x10] sm:$0xff]  ;;  %7746 = vmatprep.subr.bf16.mxu1 %v8694_v45  ;;  %v6500_v15 = vld [vmem:[%s10778_s4 + $0x18] sm:$0xff]  ;;  %s8696_s4 = smov 32  }
0x5d31   :  { %v6792_v4 = vmul.f32 -1.442695, %v7923_v2  ;;  %v7747_v2 = vpack.c.bf16 %v6498_v14, %v6497_v52 }
0x5d32   :  { %v6793_v3 = vmul.f32 -1.442695, %v7925_v22 }
0x5d33   :  { %8632 = vpow2.f32 %v6792_v4 }
0x5d34   :  { %8634 = vtanh.f32 %v7925_v22  ;;  %v7750_v22 = vpack.c.bf16 %v6500_v15, %v6499_v61 }
0x5d3d   :  { %v8633_v25 = vpop.eup %8632 }
0x5d3e   :  { %v6266_v43 = vadd.f32 1.0, %v8633_v25  ;;  %v8635_v48 = vpop.eup %8634 }
0x5d40   :  { %8636 = vrcp.f32 %v6266_v43 }
0x5d41   :  { %8638 = vpow2.f32 %v6793_v3 }
0x5d4a   :  { %v8637_v0 = vpop.eup %8636 }
0x5d4b   :  { %v6274_v50 = vmul.f32 %v8637_v0, %v8635_v48  ;;  %v8639_v34 = vpop.eup %8638  ;;  %v6273_v36 = vmul.f32 %v8637_v0, %v6174_v51 }
0x5d4c   :  { %v6267_v29 = vadd.f32 1.0, %v8639_v34 }
0x5d4d   :  { %6276 = vrot.lane.b32.xlu1 %v6274_v50, %s8692_s8 }
0x5d4e   :  { %8640 = vrcp.f32 %v6267_v29 }
0x5d58   :  { %v8641_v1 = vpop.eup %8640 }
0x5dbf   :  { %v6277_v63 = vpop.permute.xlu1 %6276 }
0x5dc0   :  { %v6279_v31 = vadd.f32 %v6277_v63, %v6273_v36 }
0x5dc2   :  { %8642 = vtanh.f32 %v6279_v31 }
0x5dcc   :  { %v8643_v28 = vpop.eup %8642 }
0x5dcd   :  { %v6281_v7 = vmul.f32 %v8643_v28, %v8641_v1 }
0x5dcf   :  { %6288 = vrot.lane.b32.xlu0 %v6281_v7, %s8692_s8 }
0x5e41   :  { %v6289_v32 = vpop.permute.xlu0 %6288 }
0x5e42   :  { %6794 = vmatmul.mubr.msk.f32.vlgmr.msra.gmra.mrb[76].mxu0 %vm1244_vm1, %v6289_v32 }
0x5f15   :  { %v6358_v41 = vpop.f32.mrb[76].mxu0 }
0x5f16   :  { %v7927_v23 = vadd.f32 %v7926_v8, %v6358_v41  ;;  %v6360_v11 = vpop.f32.mrb[77].mxu0 }
0x5f17   :  { %v7929_v24 = vadd.f32 %v7928_v59, %v6360_v11 }
0x5f18   :  { %v6795_v37 = vmul.f32 -1.442695, %v7927_v23 }
0x5f19   :  { %v6796_v38 = vmul.f32 -1.442695, %v7929_v24 }
0x5f1a   :  { %8644 = vpow2.f32 %v6795_v37 }
0x5f1b   :  { %8646 = vtanh.f32 %v7929_v24 }
0x5f24   :  { %v8645_v17 = vpop.eup %8644 }
0x5f25   :  { %v6371_v12 = vadd.f32 1.0, %v8645_v17  ;;  %v8647_v19 = vpop.eup %8646 }
0x5f27   :  { %8648 = vrcp.f32 %v6371_v12 }
0x5f28   :  { %8650 = vpow2.f32 %v6796_v38 }
0x5f31   :  { %v8649_v42 = vpop.eup %8648 }
0x5f32   :  { %v6379_v46 = vmul.f32 %v8649_v42, %v8647_v19  ;;  %v8651_v18 = vpop.eup %8650  ;;  %v6378_v30 = vmul.f32 %v8649_v42, %v6279_v31 }
0x5f33   :  { %v6372_v55 = vadd.f32 1.0, %v8651_v18 }
0x5f34   :  { %6381 = vrot.lane.b32.xlu1 %v6379_v46, %s8692_s8 }
0x5f35   :  { %8652 = vrcp.f32 %v6372_v55 }
0x5f3f   :  { %v8653_v62 = vpop.eup %8652 }
0x5fa6   :  { %v6382_v39 = vpop.permute.xlu1 %6381 }
0x5fa7   :  { %v6384_v56 = vadd.f32 %v6382_v39, %v6378_v30 }
0x5fa9   :  { %8654 = vtanh.f32 %v6384_v56 }
0x5fb3   :  { %v8655_v5 = vpop.eup %8654 }
0x5fb4   :  { %v6386_v33 = vmul.f32 %v8655_v5, %v8653_v62 }
0x5fb6   :  { %6400 = vrot.lane.b32.xlu0 %v6386_v33, %s8692_s8 }
0x6028   :  { %v6401_v40 = vpop.permute.xlu0 %6400 }
0x6029   :  { %6797 = vmatmul.mubr.msk.f32.vlgmr.msra.gmra.mrb[100].mxu1 %vm1244_vm1, %v6401_v40 }
0x602a   :  { %6815 = vmatprep.mubr.msk.f32.mxu1 %vm8695_vm2, %v10829_v60  ;;  %7748 = vmatpush3.bf16.msra.mxu1 %v7747_v2  ;;  %v6800_v60 = vld [vmem:[%s10779_s5] ss:$0 sm:$0xff] }
0x602b   :  { %7749 = vmatprep.subr.bf16.mxu1 %v8694_v45 }
0x602e   :  { %7751 = vmatpush3.bf16.msra.mxu1 %v7750_v22 }
0x60fc   :  { %v6470_v54 = vpop.f32.mrb[100].mxu1 }
0x60fd   :  { %v6471_v57 = vadd.f32 %v6470_v54, %v6392_v44  ;;  %v6472_v47 = vpop.f32.mrb[101].mxu1 }
0x60fe   :  { %v6473_v51 = vadd.f32 %v6472_v47, %v6396_v27 }
0x60ff   :  { %v6798_v26 = vmul.f32 -1.442695, %v6471_v57 }
0x6100   :  { %v6799_v4 = vmul.f32 -1.442695, %v6473_v51 }
0x6101   :  { %8656 = vpow2.f32 %v6798_v26 }
0x6102   :  { %8658 = vtanh.f32 %v6473_v51 }
0x610b   :  { %v8657_v10 = vpop.eup %8656 }
0x610c   :  { %v6478_v49 = vadd.f32 1.0, %v8657_v10  ;;  %v8659_v20 = vpop.eup %8658 }
0x610e   :  { %8660 = vrcp.f32 %v6478_v49 }
0x610f   :  { %8662 = vpow2.f32 %v6799_v4 }
0x6118   :  { %v8661_v13 = vpop.eup %8660 }
0x6119   :  { %v6483_v21 = vmul.f32 %v8661_v13, %v8659_v20  ;;  %v8663_v25 = vpop.eup %8662  ;;  %v6481_v48 = vmul.f32 %v8661_v13, %v6384_v56 }
0x611a   :  { %v6492_v43 = vadd.f32 1.0, %v8663_v25 }
0x611b   :  { %6485 = vrot.lane.b32.xlu1 %v6483_v21, %s8692_s8 }
0x611c   :  { %8664 = vrcp.f32 %v6492_v43 }
0x6126   :  { %v8665_v3 = vpop.eup %8664 }
0x618d   :  { %v6486_v0 = vpop.permute.xlu1 %6485 }
0x618e   :  { %v6488_v50 = vadd.f32 %v6486_v0, %v6481_v48 }
0x6190   :  { %8666 = vtanh.f32 %v6488_v50 }
0x619a   :  { %v8667_v34 = vpop.eup %8666 }
0x619b   :  { %v6496_v29 = vmul.f32 %v8667_v34, %v8665_v3 }
0x619d   :  { %6509 = vrot.lane.b32.xlu0 %v6496_v29, %s8696_s4 }
0x620f   :  { %v6510_v36 = vpop.permute.xlu0 %6509 }
0x6210   :  { %6816 = vmatmul.mubr.msk.f32.vlgmr.msra.gmra.mrb[102].mxu1 %vm1220_vm0, %v6510_v36 }
0x62e3   :  { %v6579_v63 = vpop.f32.mrb[102].mxu1 }
0x62e4   :  { %v6580_v31 = vadd.f32 %v6800_v60, %v6579_v63  ;;  %v6817_v1 = vpop.f32.mrb[103].mxu1 }
0x62e6   :  { %6584 = vst.msk [vmem:[#allocation3] sm:$0x3] %vm6583_vm3, %v6580_v31 }
0x62e7   :  { %8679 = shalt.err (!%p8676_p4)
}
0x62e8   :  { %s8680_s14 = scalar_lea.hbm %s10780_s6, 32 }
0x62e9   :  { %p8681_p5 = scmp.ne.s32.totalorder %s10780_s6, %s8680_s14  ;;  %p8684_p6 = scmp.lt.u32.totalorder %s8680_s14, %s10780_s6 }
0x62eb   :  { %p8686_p7 = pnand %p8684_p6, %p8681_p5 }
0x62ed   :  { %8689 = shalt.err (!%p8686_p7)
}
0x62ee   :  { %6594 = dma.vmem_to_hbm [thread:$0]  %s6592_s10, 32, %s10780_s6, [#allocation4]  }
0x62ef   :  { %8690 = dma.done.wait [#allocation4], 32  }
0x62f0   :  { %8691 = vsyncadd [#allocation4], 4294967264 }
0x62f1   :  { %6598 = vsyncpa [#allocation4], 1 }

</bundles_post_ra>
